<compile_context>
chip_gen: v5e
topology: v5e:2x2
jax: 0.10.0
libtpu: 0.0.40
codegen_flags: <defaults>
</compile_context>

<pallas_src>
import functools

import jax
import jax.numpy as jnp
from jax import lax
from jax.experimental import pallas as pl
from jax.experimental.pallas import tpu as pltpu


def _round_up(v, m):
    return ((v + m - 1) // m) * m


def _gru_encoder_kernel(num_layers, T, TB, Hp, gate_bf16, *args):
    # args = (x_ref,
    #         [w_ih_T, w_hh_T, b_proj, b_hh_n] * num_layers,
    #         lin_w_T, lin_b, out_ref, gi_scratch[, hseq_scratch])
    x_ref = args[0]
    n_param = 4 * num_layers
    layer_refs = args[1:1 + n_param]
    lin_w_ref = args[1 + n_param]
    lin_b_ref = args[2 + n_param]
    out_ref = args[3 + n_param]
    gi_ref = args[4 + n_param]                                  # (T*TB, 3*Hp) bf16
    hseq_ref = args[5 + n_param] if num_layers > 1 else None    # (T*TB, Hp)   bf16

    unroll = True if T <= 8 else 2
    gdt = jnp.bfloat16 if gate_bf16 else jnp.float32

    h_last = None
    for l in range(num_layers):
        w_ih_ref = layer_refs[4 * l]            # (in_dim_pad, 3*Hp) bf16
        w_hh_ref = layer_refs[4 * l + 1]        # (Hp, 3*Hp)         bf16
        b_proj = layer_refs[4 * l + 2][...]     # (1, 3*Hp) f32: b_ih (+ b_hh for r,z)
        b_hh_n = layer_refs[4 * l + 3][...]     # (1, Hp)   f32: n-gate b_hh only

        # ---- hoisted input projection: one large MXU matmul per layer ----
        if l == 0:
            in2d = x_ref[0]                                     # (T*TB, Ip) bf16
        else:
            in2d = hseq_ref[...]                                # (T*TB, Hp) bf16
        gi_ref[...] = (jnp.dot(in2d, w_ih_ref[...],
                               preferred_element_type=jnp.float32)
                       + b_proj).astype(jnp.bfloat16)

        # Hoist the (1, Hp) -> (TB, Hp) n-gate bias broadcast out of the
        # serial loop (JAX does not CSE broadcast_in_dim).
        b_hh_n_b = jnp.broadcast_to(b_hh_n, (TB, Hp))
        is_last = l == num_layers - 1

        def step(t, h, w_hh_ref=w_hh_ref, b_hh_n_b=b_hh_n_b, is_last=is_last):
            row = pl.multiple_of(t * TB, TB)
            gi = gi_ref[pl.ds(row, TB), :]                      # (TB, 3*Hp) bf16
            gh = jnp.dot(h.astype(jnp.bfloat16), w_hh_ref[...],
                         preferred_element_type=jnp.float32)    # (TB, 3*Hp) f32
            r = jax.nn.sigmoid((gi[:, :Hp] + gh[:, :Hp]).astype(gdt))
            z = jax.nn.sigmoid((gi[:, Hp:2 * Hp] + gh[:, Hp:2 * Hp]).astype(gdt))
            gh_n = gh[:, 2 * Hp:] + b_hh_n_b                    # (TB, Hp) f32
            n = jnp.tanh(
                (gi[:, 2 * Hp:] + r.astype(jnp.float32) * gh_n).astype(gdt))
            # Keep the recurrent accumulation in f32.
            h_new = ((1.0 - z) * n).astype(jnp.float32) + z.astype(jnp.float32) * h
            if not is_last:
                # Only intermediate layers need their full hidden sequence.
                hseq_ref[pl.ds(row, TB), :] = h_new.astype(jnp.bfloat16)
            return h_new

        h_last = lax.fori_loop(0, T, step,
                               jnp.zeros((TB, Hp), jnp.float32),
                               unroll=unroll)

    # final Linear on the last-timestep hidden state of the top layer
    z_out = jnp.dot(h_last.astype(jnp.bfloat16), lin_w_ref[...],
                    preferred_element_type=jnp.float32) + lin_b_ref[...]
    out_ref[...] = z_out.astype(out_ref.dtype)


def gru_encoder_forward(x, params, *, hidden_size, latent_dim, num_layers):
    """x: (B, T, input_size) float32, batch_first like the PyTorch module."""
    B, T, input_size = x.shape
    H = hidden_size
    Hp = _round_up(H, 128)              # lane-aligned hidden size
    Ip = _round_up(input_size, 128)     # lane-aligned input features
    Lp = _round_up(latent_dim, 128)     # lane-aligned output features
    # Large batch tile so the recurrence feeds the MXU a tall M; 16-row
    # alignment keeps bf16 sublane tiles dense for gi/hseq row slices.
    # (On v7x prefer configs with Bp/TB >= 2 so "parallel" shards both TCs.)
    TB = min(128, _round_up(B, 16))
    Bp = _round_up(B, TB)
    num_bt = Bp // TB

    # bf16 gate nonlinearities only on generations with bf16 VALU/EUP.
    try:
        kind = jax.devices()[0].device_kind.lower()
    except Exception:
        kind = ""
    gate_bf16 = not any(s in kind for s in ("v2", "v3", "v4", "v5"))

    # Batch/feature pad, then rearrange into per-batch-tile time-major 2-D
    # slabs (num_bt, T*TB, Ip): row index inside a tile is t*TB + j.
    x_p = jnp.pad(x.astype(jnp.float32),
                  ((0, Bp - B), (0, 0), (0, Ip - input_size)))
    x_tiles = (x_p.reshape(num_bt, TB, T, Ip)
                  .transpose(0, 2, 1, 3)
                  .reshape(num_bt, T * TB, Ip)
                  .astype(jnp.bfloat16))

    def pad_gate_cols(w_t, rows):
        # w_t: (in_dim, 3H) -> (rows, 3*Hp); gate blocks land at lane offsets
        # 0 / Hp / 2*Hp so gate slices fall on 128-lane vreg boundaries.
        in_dim = w_t.shape[0]
        out = jnp.zeros((rows, 3 * Hp), jnp.float32)
        for g in range(3):
            out = out.at[:in_dim, g * Hp:g * Hp + H].set(
                w_t[:, g * H:(g + 1) * H])
        return out

    def pad_gate_bias(b):
        out = jnp.zeros((1, 3 * Hp), jnp.float32)
        for g in range(3):
            out = out.at[0, g * Hp:g * Hp + H].set(b[g * H:(g + 1) * H])
        return out

    flat_inputs = [x_tiles]
    for l in range(num_layers):
        w_ih, w_hh, b_ih, b_hh = params["layers"][l]
        b_ih = b_ih.astype(jnp.float32)
        b_hh = b_hh.astype(jnp.float32)
        # Fold the r/z-gate b_hh into the hoisted projection bias; the n-gate
        # b_hh must stay inside the per-step r*(h@W_hh_n + b_hh_n) term.
        b_proj = jnp.concatenate([b_ih[:2 * H] + b_hh[:2 * H], b_ih[2 * H:]])
        b_hh_n = jnp.zeros((1, Hp), jnp.float32).at[0, :H].set(b_hh[2 * H:])
        rows = Ip if l == 0 else Hp
        flat_inputs += [
            pad_gate_cols(w_ih.T.astype(jnp.float32), rows).astype(jnp.bfloat16),
            pad_gate_cols(w_hh.T.astype(jnp.float32), Hp).astype(jnp.bfloat16),
            pad_gate_bias(b_proj),
            b_hh_n,
        ]
    lin_w_t = jnp.zeros((Hp, Lp), jnp.float32)
    lin_w_t = lin_w_t.at[:H, :latent_dim].set(params["lin_w"].T.astype(jnp.float32))
    lin_b = jnp.zeros((1, Lp), jnp.float32).at[0, :latent_dim].set(
        params["lin_b"].astype(jnp.float32))
    flat_inputs += [lin_w_t.astype(jnp.bfloat16), lin_b]

    kernel = functools.partial(_gru_encoder_kernel,
                               num_layers, T, TB, Hp, gate_bf16)

    # Weights / biases: whole array, VMEM-resident, single-buffered
    # (no 2-deep pipeline buffers for data with a constant index map).
    resident_spec = pl.BlockSpec(memory_space=pltpu.MemorySpace.VMEM)
    in_specs = [pl.BlockSpec((1, T * TB, Ip), lambda b: (b, 0, 0))]
    in_specs += [resident_spec for _ in flat_inputs[1:]]

    scratch_shapes = [pltpu.VMEM((T * TB, 3 * Hp), jnp.bfloat16)]
    if num_layers > 1:
        scratch_shapes.append(pltpu.VMEM((T * TB, Hp), jnp.bfloat16))

    # Explicit scoped-VMEM limit from the resident working set (v5e defaults
    # to 16 MiB which is too small beyond toy sizes).
    weight_bytes = sum(int(a.size) * a.dtype.itemsize for a in flat_inputs[1:])
    x_tile_bytes = 2 * T * TB * Ip * 2                 # double-buffered bf16 block
    scratch_bytes = T * TB * 3 * Hp * 2
    if num_layers > 1:
        scratch_bytes += T * TB * Hp * 2
    out_bytes = 2 * TB * Lp * 4
    vmem_needed = weight_bytes + x_tile_bytes + scratch_bytes + out_bytes
    vmem_limit = min(max(32 << 20, (vmem_needed * 3) // 2 + (4 << 20)), 100 << 20)

    out = pl.pallas_call(
        kernel,
        out_shape=jax.ShapeDtypeStruct((Bp, Lp), jnp.float32),
        grid=(num_bt,),
        in_specs=in_specs,
        out_specs=pl.BlockSpec((TB, Lp), lambda b: (b, 0)),
        scratch_shapes=scratch_shapes,
        compiler_params=pltpu.CompilerParams(
            dimension_semantics=("parallel",),
            vmem_limit_bytes=int(vmem_limit)),
    )(*flat_inputs)
    return out[:B, :latent_dim]


def init_params(key, input_size, hidden_size, latent_dim, num_layers):
    """Deterministic synthetic params, PyTorch-shaped: weight_ih (3H, in),
    weight_hh (3H, H), biases (3H,); linear (latent, H), (latent,)."""
    bound = 1.0 / float(hidden_size) ** 0.5
    keys = jax.random.split(key, num_layers * 4 + 2)
    idx = 0
    layers = []
    for l in range(num_layers):
        in_dim = input_size if l == 0 else hidden_size
        w_ih = jax.random.uniform(keys[idx], (3 * hidden_size, in_dim),
                                  minval=-bound, maxval=bound); idx += 1
        w_hh = jax.random.uniform(keys[idx], (3 * hidden_size, hidden_size),
                                  minval=-bound, maxval=bound); idx += 1
        b_ih = jax.random.uniform(keys[idx], (3 * hidden_size,),
                                  minval=-bound, maxval=bound); idx += 1
        b_hh = jax.random.uniform(keys[idx], (3 * hidden_size,),
                                  minval=-bound, maxval=bound); idx += 1
        layers.append((w_ih, w_hh, b_ih, b_hh))
    lin_w = jax.random.uniform(keys[idx], (latent_dim, hidden_size),
                               minval=-bound, maxval=bound); idx += 1
    lin_b = jax.random.uniform(keys[idx], (latent_dim,),
                               minval=-bound, maxval=bound)
    return {"layers": layers, "lin_w": lin_w, "lin_b": lin_b}


def reference_forward(x, params, *, hidden_size, num_layers):
    """Pure-JAX f32 reference replicating torch.nn.GRU (batch_first) + Linear."""
    B, T, _ = x.shape
    seq = x
    for l in range(num_layers):
        w_ih, w_hh, b_ih, b_hh = params["layers"][l]
        h = jnp.zeros((B, hidden_size), jnp.float32)
        outs = []
        for t in range(T):
            x_t = seq[:, t, :]
            gi = x_t @ w_ih.T + b_ih
            gh = h @ w_hh.T + b_hh
            i_r, i_z, i_n = jnp.split(gi, 3, axis=-1)
            h_r, h_z, h_n = jnp.split(gh, 3, axis=-1)
            r = jax.nn.sigmoid(i_r + h_r)
            z = jax.nn.sigmoid(i_z + h_z)
            n = jnp.tanh(i_n + r * h_n)
            h = (1.0 - z) * n + z * h
            outs.append(h)
        seq = jnp.stack(outs, axis=1)
    return seq[:, -1, :] @ params["lin_w"].T + params["lin_b"]


if __name__ == "__main__":
    B, T = 2, 8
    input_size, hidden_size, latent_dim, num_layers = 16, 32, 8, 2

    key = jax.random.PRNGKey(0)
    kx, kp = jax.random.split(key)
    x = jax.random.normal(kx, (B, T, input_size), jnp.float32)
    params = init_params(kp, input_size, hidden_size, latent_dim, num_layers)

    z = gru_encoder_forward(x, params, hidden_size=hidden_size,
                            latent_dim=latent_dim, num_layers=num_layers)
    z = jax.block_until_ready(z)

    z_ref = reference_forward(x, params, hidden_size=hidden_size,
                              num_layers=num_layers)
    assert z.shape == (B, latent_dim)
    max_err = jnp.max(jnp.abs(z - z_ref))
    # bf16 matmul operands / bf16 gi,hseq scratch (f32 accumulation) -> looser
    # tolerance vs the pure-f32 reference.
    assert jnp.allclose(z, z_ref, atol=5e-2, rtol=5e-2), (
        f"max abs err {max_err}")

    print("KERNEL_OK")
</pallas_src>

<mosaic_0001>
module attributes {stable_mosaic.version = 11 : i64} {
  func.func @_gru_encoder_kernel(%arg0: i32, %arg1: memref<1x128x128xbf16, #tpu.memory_space<vmem>>, %arg2: memref<128x384xbf16, #tpu.memory_space<vmem>>, %arg3: memref<128x384xbf16, #tpu.memory_space<vmem>>, %arg4: memref<1x384xf32, #tpu.memory_space<vmem>>, %arg5: memref<1x128xf32, #tpu.memory_space<vmem>>, %arg6: memref<128x384xbf16, #tpu.memory_space<vmem>>, %arg7: memref<128x384xbf16, #tpu.memory_space<vmem>>, %arg8: memref<1x384xf32, #tpu.memory_space<vmem>>, %arg9: memref<1x128xf32, #tpu.memory_space<vmem>>, %arg10: memref<128x128xbf16, #tpu.memory_space<vmem>>, %arg11: memref<1x128xf32, #tpu.memory_space<vmem>>, %arg12: memref<16x128xf32, #tpu.memory_space<vmem>>, %arg13: memref<128x384xbf16, #tpu.memory_space<vmem>>, %arg14: memref<128x128xbf16, #tpu.memory_space<vmem>>) attributes {dimension_semantics = [#tpu.dimension_semantics<parallel>], iteration_bounds = array<i64: 1>, scalar_prefetch = 0 : i64, scratch_operands = 2 : i64, tpu.core_type = #tpu.core_type<tc>, window_params = [{transform_indices = @transform_0, window_bounds = array<i64: 1, 128, 128>}, {pipeline_mode = #tpu.pipeline_mode<synchronous>, transform_indices = @transform_1, window_bounds = array<i64: 128, 384>}, {pipeline_mode = #tpu.pipeline_mode<synchronous>, transform_indices = @transform_2, window_bounds = array<i64: 128, 384>}, {pipeline_mode = #tpu.pipeline_mode<synchronous>, transform_indices = @transform_3, window_bounds = array<i64: 1, 384>}, {pipeline_mode = #tpu.pipeline_mode<synchronous>, transform_indices = @transform_4, window_bounds = array<i64: 1, 128>}, {pipeline_mode = #tpu.pipeline_mode<synchronous>, transform_indices = @transform_5, window_bounds = array<i64: 128, 384>}, {pipeline_mode = #tpu.pipeline_mode<synchronous>, transform_indices = @transform_6, window_bounds = array<i64: 128, 384>}, {pipeline_mode = #tpu.pipeline_mode<synchronous>, transform_indices = @transform_7, window_bounds = array<i64: 1, 384>}, {pipeline_mode = #tpu.pipeline_mode<synchronous>, transform_indices = @transform_8, window_bounds = array<i64: 1, 128>}, {pipeline_mode = #tpu.pipeline_mode<synchronous>, transform_indices = @transform_9, window_bounds = array<i64: 128, 128>}, {pipeline_mode = #tpu.pipeline_mode<synchronous>, transform_indices = @transform_10, window_bounds = array<i64: 1, 128>}, {transform_indices = @transform_11, window_bounds = array<i64: 16, 128>}]} {
    %c0 = arith.constant 0 : index
    %c0_0 = arith.constant 0 : index
    %0 = vector.load %arg4[%c0, %c0_0] : memref<1x384xf32, #tpu.memory_space<vmem>>, vector<1x384xf32>
    %c0_1 = arith.constant 0 : index
    %c0_2 = arith.constant 0 : index
    %1 = vector.load %arg5[%c0_1, %c0_2] : memref<1x128xf32, #tpu.memory_space<vmem>>, vector<1x128xf32>
    %c0_3 = arith.constant 0 : index
    %c0_4 = arith.constant 0 : index
    %c0_5 = arith.constant 0 : index
    %2 = vector.load %arg1[%c0_3, %c0_4, %c0_5] : memref<1x128x128xbf16, #tpu.memory_space<vmem>>, vector<1x128x128xbf16>
    %3 = vector.shape_cast %2 : vector<1x128x128xbf16> to vector<128x128xbf16>
    %c0_6 = arith.constant 0 : index
    %c0_7 = arith.constant 0 : index
    %4 = vector.load %arg2[%c0_6, %c0_7] : memref<128x384xbf16, #tpu.memory_space<vmem>>, vector<128x384xbf16>
    %cst = arith.constant dense<0.000000e+00> : vector<128x384xf32>
    %5 = tpu.matmul %3, %4, %cst {dimension_numbers = #tpu.dot_dimension_numbers<[1], [0], [0], [1], [0, 0, 1, 1], [], []>} : vector<128x128xbf16>, vector<128x384xbf16>, vector<128x384xf32> -> vector<128x384xf32>
    %6 = vector.broadcast %0 : vector<1x384xf32> to vector<128x384xf32>
    %7 = arith.addf %5, %6 : vector<128x384xf32>
    %8 = arith.truncf %7 : vector<128x384xf32> to vector<128x384xbf16>
    %c0_8 = arith.constant 0 : index
    %c0_9 = arith.constant 0 : index
    %9 = vector.load %arg13[%c0_8, %c0_9] : memref<128x384xbf16, #tpu.memory_space<vmem>>, vector<128x384xbf16>
    tpu.vector_store %arg13[%c0_8, %c0_9], %8 {strides = array<i32>} : memref<128x384xbf16, #tpu.memory_space<vmem>>, vector<128x384xbf16>,
    %10 = vector.shape_cast %1 : vector<1x128xf32> to vector<1x128xf32>
    %11 = vector.broadcast %10 : vector<1x128xf32> to vector<16x128xf32>
    %cst_10 = arith.constant 0.000000e+00 : f32
    %12 = vector.broadcast %cst_10 : f32 to vector<16x128xf32>
    %c0_i32 = arith.constant 0 : i32
    %c16_i32 = arith.constant 16 : i32
    %13 = arith.muli %c0_i32, %c16_i32 : i32
    %14 = tpu.assume_multiple %13, 16 : i32
    %15 = arith.index_cast %14 : i32 to index
    %c0_11 = arith.constant 0 : index
    %16 = vector.load %arg13[%15, %c0_11] : memref<128x384xbf16, #tpu.memory_space<vmem>>, vector<16x384xbf16>
    %17 = arith.truncf %12 : vector<16x128xf32> to vector<16x128xbf16>
    %c0_12 = arith.constant 0 : index
    %c0_13 = arith.constant 0 : index
    %18 = vector.load %arg3[%c0_12, %c0_13] : memref<128x384xbf16, #tpu.memory_space<vmem>>, vector<128x384xbf16>
    %cst_14 = arith.constant dense<0.000000e+00> : vector<16x384xf32>
    %19 = tpu.matmul %17, %18, %cst_14 {dimension_numbers = #tpu.dot_dimension_numbers<[1], [0], [0], [1], [0, 0, 1, 1], [], []>} : vector<16x128xbf16>, vector<128x384xbf16>, vector<16x384xf32> -> vector<16x384xf32>
    %20 = vector.extract_strided_slice %16 {offsets = [0, 0], sizes = [16, 128], strides = [1, 1]} : vector<16x384xbf16> to vector<16x128xbf16>
    %21 = vector.extract_strided_slice %19 {offsets = [0, 0], sizes = [16, 128], strides = [1, 1]} : vector<16x384xf32> to vector<16x128xf32>
    %22 = arith.extf %20 : vector<16x128xbf16> to vector<16x128xf32>
    %23 = arith.addf %22, %21 : vector<16x128xf32>
    %24 = arith.truncf %23 : vector<16x128xf32> to vector<16x128xbf16>
    %25 = arith.negf %24 : vector<16x128xbf16>
    %26 = math.exp %25 : vector<16x128xbf16>
    %cst_15 = arith.constant 1.000000e+00 : bf16
    %27 = vector.broadcast %cst_15 : bf16 to vector<16x128xbf16>
    %28 = arith.addf %27, %26 : vector<16x128xbf16>
    %29 = arith.divf %27, %28 : vector<16x128xbf16>
    %30 = vector.extract_strided_slice %16 {offsets = [0, 128], sizes = [16, 128], strides = [1, 1]} : vector<16x384xbf16> to vector<16x128xbf16>
    %31 = vector.extract_strided_slice %19 {offsets = [0, 128], sizes = [16, 128], strides = [1, 1]} : vector<16x384xf32> to vector<16x128xf32>
    %32 = arith.extf %30 : vector<16x128xbf16> to vector<16x128xf32>
    %33 = arith.addf %32, %31 : vector<16x128xf32>
    %34 = arith.truncf %33 : vector<16x128xf32> to vector<16x128xbf16>
    %35 = arith.negf %34 : vector<16x128xbf16>
    %36 = math.exp %35 : vector<16x128xbf16>
    %cst_16 = arith.constant 1.000000e+00 : bf16
    %37 = vector.broadcast %cst_16 : bf16 to vector<16x128xbf16>
    %38 = arith.addf %37, %36 : vector<16x128xbf16>
    %39 = arith.divf %37, %38 : vector<16x128xbf16>
    %40 = vector.extract_strided_slice %19 {offsets = [0, 256], sizes = [16, 128], strides = [1, 1]} : vector<16x384xf32> to vector<16x128xf32>
    %41 = arith.addf %40, %11 : vector<16x128xf32>
    %42 = vector.extract_strided_slice %16 {offsets = [0, 256], sizes = [16, 128], strides = [1, 1]} : vector<16x384xbf16> to vector<16x128xbf16>
    %43 = arith.extf %29 : vector<16x128xbf16> to vector<16x128xf32>
    %44 = arith.mulf %43, %41 : vector<16x128xf32>
    %45 = arith.extf %42 : vector<16x128xbf16> to vector<16x128xf32>
    %46 = arith.addf %45, %44 : vector<16x128xf32>
    %47 = arith.truncf %46 : vector<16x128xf32> to vector<16x128xbf16>
    %48 = math.tanh %47 : vector<16x128xbf16>
    %cst_17 = arith.constant 1.000000e+00 : bf16
    %49 = vector.broadcast %cst_17 : bf16 to vector<16x128xbf16>
    %50 = arith.subf %49, %39 : vector<16x128xbf16>
    %51 = arith.mulf %50, %48 : vector<16x128xbf16>
    %52 = arith.extf %51 : vector<16x128xbf16> to vector<16x128xf32>
    %53 = arith.extf %39 : vector<16x128xbf16> to vector<16x128xf32>
    %54 = arith.mulf %53, %12 : vector<16x128xf32>
    %55 = arith.addf %52, %54 : vector<16x128xf32>
    %56 = arith.truncf %55 : vector<16x128xf32> to vector<16x128xbf16>
    %57 = arith.index_cast %14 : i32 to index
    %c0_18 = arith.constant 0 : index
    %58 = vector.load %arg14[%57, %c0_18] : memref<128x128xbf16, #tpu.memory_space<vmem>>, vector<16x128xbf16>
    tpu.vector_store %arg14[%57, %c0_18], %56 {strides = array<i32>} : memref<128x128xbf16, #tpu.memory_space<vmem>>, vector<16x128xbf16>,
    %c1_i32 = arith.constant 1 : i32
    %c16_i32_19 = arith.constant 16 : i32
    %59 = arith.muli %c1_i32, %c16_i32_19 : i32
    %60 = tpu.assume_multiple %59, 16 : i32
    %61 = arith.index_cast %60 : i32 to index
    %c0_20 = arith.constant 0 : index
    %62 = vector.load %arg13[%61, %c0_20] : memref<128x384xbf16, #tpu.memory_space<vmem>>, vector<16x384xbf16>
    %63 = arith.truncf %55 : vector<16x128xf32> to vector<16x128xbf16>
    %c0_21 = arith.constant 0 : index
    %c0_22 = arith.constant 0 : index
    %64 = vector.load %arg3[%c0_21, %c0_22] : memref<128x384xbf16, #tpu.memory_space<vmem>>, vector<128x384xbf16>
    %cst_23 = arith.constant dense<0.000000e+00> : vector<16x384xf32>
    %65 = tpu.matmul %63, %64, %cst_23 {dimension_numbers = #tpu.dot_dimension_numbers<[1], [0], [0], [1], [0, 0, 1, 1], [], []>} : vector<16x128xbf16>, vector<128x384xbf16>, vector<16x384xf32> -> vector<16x384xf32>
    %66 = vector.extract_strided_slice %62 {offsets = [0, 0], sizes = [16, 128], strides = [1, 1]} : vector<16x384xbf16> to vector<16x128xbf16>
    %67 = vector.extract_strided_slice %65 {offsets = [0, 0], sizes = [16, 128], strides = [1, 1]} : vector<16x384xf32> to vector<16x128xf32>
    %68 = arith.extf %66 : vector<16x128xbf16> to vector<16x128xf32>
    %69 = arith.addf %68, %67 : vector<16x128xf32>
    %70 = arith.truncf %69 : vector<16x128xf32> to vector<16x128xbf16>
    %71 = arith.negf %70 : vector<16x128xbf16>
    %72 = math.exp %71 : vector<16x128xbf16>
    %cst_24 = arith.constant 1.000000e+00 : bf16
    %73 = vector.broadcast %cst_24 : bf16 to vector<16x128xbf16>
    %74 = arith.addf %73, %72 : vector<16x128xbf16>
    %75 = arith.divf %73, %74 : vector<16x128xbf16>
    %76 = vector.extract_strided_slice %62 {offsets = [0, 128], sizes = [16, 128], strides = [1, 1]} : vector<16x384xbf16> to vector<16x128xbf16>
    %77 = vector.extract_strided_slice %65 {offsets = [0, 128], sizes = [16, 128], strides = [1, 1]} : vector<16x384xf32> to vector<16x128xf32>
    %78 = arith.extf %76 : vector<16x128xbf16> to vector<16x128xf32>
    %79 = arith.addf %78, %77 : vector<16x128xf32>
    %80 = arith.truncf %79 : vector<16x128xf32> to vector<16x128xbf16>
    %81 = arith.negf %80 : vector<16x128xbf16>
    %82 = math.exp %81 : vector<16x128xbf16>
    %cst_25 = arith.constant 1.000000e+00 : bf16
    %83 = vector.broadcast %cst_25 : bf16 to vector<16x128xbf16>
    %84 = arith.addf %83, %82 : vector<16x128xbf16>
    %85 = arith.divf %83, %84 : vector<16x128xbf16>
    %86 = vector.extract_strided_slice %65 {offsets = [0, 256], sizes = [16, 128], strides = [1, 1]} : vector<16x384xf32> to vector<16x128xf32>
    %87 = arith.addf %86, %11 : vector<16x128xf32>
    %88 = vector.extract_strided_slice %62 {offsets = [0, 256], sizes = [16, 128], strides = [1, 1]} : vector<16x384xbf16> to vector<16x128xbf16>
    %89 = arith.extf %75 : vector<16x128xbf16> to vector<16x128xf32>
    %90 = arith.mulf %89, %87 : vector<16x128xf32>
    %91 = arith.extf %88 : vector<16x128xbf16> to vector<16x128xf32>
    %92 = arith.addf %91, %90 : vector<16x128xf32>
    %93 = arith.truncf %92 : vector<16x128xf32> to vector<16x128xbf16>
    %94 = math.tanh %93 : vector<16x128xbf16>
    %cst_26 = arith.constant 1.000000e+00 : bf16
    %95 = vector.broadcast %cst_26 : bf16 to vector<16x128xbf16>
    %96 = arith.subf %95, %85 : vector<16x128xbf16>
    %97 = arith.mulf %96, %94 : vector<16x128xbf16>
    %98 = arith.extf %97 : vector<16x128xbf16> to vector<16x128xf32>
    %99 = arith.extf %85 : vector<16x128xbf16> to vector<16x128xf32>
    %100 = arith.mulf %99, %55 : vector<16x128xf32>
    %101 = arith.addf %98, %100 : vector<16x128xf32>
    %102 = arith.truncf %101 : vector<16x128xf32> to vector<16x128xbf16>
    %103 = arith.index_cast %60 : i32 to index
    %c0_27 = arith.constant 0 : index
    %104 = vector.load %arg14[%103, %c0_27] : memref<128x128xbf16, #tpu.memory_space<vmem>>, vector<16x128xbf16>
    tpu.vector_store %arg14[%103, %c0_27], %102 {strides = array<i32>} : memref<128x128xbf16, #tpu.memory_space<vmem>>, vector<16x128xbf16>,
    %c2_i32 = arith.constant 2 : i32
    %c16_i32_28 = arith.constant 16 : i32
    %105 = arith.muli %c2_i32, %c16_i32_28 : i32
    %106 = tpu.assume_multiple %105, 16 : i32
    %107 = arith.index_cast %106 : i32 to index
    %c0_29 = arith.constant 0 : index
    %108 = vector.load %arg13[%107, %c0_29] : memref<128x384xbf16, #tpu.memory_space<vmem>>, vector<16x384xbf16>
    %109 = arith.truncf %101 : vector<16x128xf32> to vector<16x128xbf16>
    %c0_30 = arith.constant 0 : index
    %c0_31 = arith.constant 0 : index
    %110 = vector.load %arg3[%c0_30, %c0_31] : memref<128x384xbf16, #tpu.memory_space<vmem>>, vector<128x384xbf16>
    %cst_32 = arith.constant dense<0.000000e+00> : vector<16x384xf32>
    %111 = tpu.matmul %109, %110, %cst_32 {dimension_numbers = #tpu.dot_dimension_numbers<[1], [0], [0], [1], [0, 0, 1, 1], [], []>} : vector<16x128xbf16>, vector<128x384xbf16>, vector<16x384xf32> -> vector<16x384xf32>
    %112 = vector.extract_strided_slice %108 {offsets = [0, 0], sizes = [16, 128], strides = [1, 1]} : vector<16x384xbf16> to vector<16x128xbf16>
    %113 = vector.extract_strided_slice %111 {offsets = [0, 0], sizes = [16, 128], strides = [1, 1]} : vector<16x384xf32> to vector<16x128xf32>
    %114 = arith.extf %112 : vector<16x128xbf16> to vector<16x128xf32>
    %115 = arith.addf %114, %113 : vector<16x128xf32>
    %116 = arith.truncf %115 : vector<16x128xf32> to vector<16x128xbf16>
    %117 = arith.negf %116 : vector<16x128xbf16>
    %118 = math.exp %117 : vector<16x128xbf16>
    %cst_33 = arith.constant 1.000000e+00 : bf16
    %119 = vector.broadcast %cst_33 : bf16 to vector<16x128xbf16>
    %120 = arith.addf %119, %118 : vector<16x128xbf16>
    %121 = arith.divf %119, %120 : vector<16x128xbf16>
    %122 = vector.extract_strided_slice %108 {offsets = [0, 128], sizes = [16, 128], strides = [1, 1]} : vector<16x384xbf16> to vector<16x128xbf16>
    %123 = vector.extract_strided_slice %111 {offsets = [0, 128], sizes = [16, 128], strides = [1, 1]} : vector<16x384xf32> to vector<16x128xf32>
    %124 = arith.extf %122 : vector<16x128xbf16> to vector<16x128xf32>
    %125 = arith.addf %124, %123 : vector<16x128xf32>
    %126 = arith.truncf %125 : vector<16x128xf32> to vector<16x128xbf16>
    %127 = arith.negf %126 : vector<16x128xbf16>
    %128 = math.exp %127 : vector<16x128xbf16>
    %cst_34 = arith.constant 1.000000e+00 : bf16
    %129 = vector.broadcast %cst_34 : bf16 to vector<16x128xbf16>
    %130 = arith.addf %129, %128 : vector<16x128xbf16>
    %131 = arith.divf %129, %130 : vector<16x128xbf16>
    %132 = vector.extract_strided_slice %111 {offsets = [0, 256], sizes = [16, 128], strides = [1, 1]} : vector<16x384xf32> to vector<16x128xf32>
    %133 = arith.addf %132, %11 : vector<16x128xf32>
    %134 = vector.extract_strided_slice %108 {offsets = [0, 256], sizes = [16, 128], strides = [1, 1]} : vector<16x384xbf16> to vector<16x128xbf16>
    %135 = arith.extf %121 : vector<16x128xbf16> to vector<16x128xf32>
    %136 = arith.mulf %135, %133 : vector<16x128xf32>
    %137 = arith.extf %134 : vector<16x128xbf16> to vector<16x128xf32>
    %138 = arith.addf %137, %136 : vector<16x128xf32>
    %139 = arith.truncf %138 : vector<16x128xf32> to vector<16x128xbf16>
    %140 = math.tanh %139 : vector<16x128xbf16>
    %cst_35 = arith.constant 1.000000e+00 : bf16
    %141 = vector.broadcast %cst_35 : bf16 to vector<16x128xbf16>
    %142 = arith.subf %141, %131 : vector<16x128xbf16>
    %143 = arith.mulf %142, %140 : vector<16x128xbf16>
    %144 = arith.extf %143 : vector<16x128xbf16> to vector<16x128xf32>
    %145 = arith.extf %131 : vector<16x128xbf16> to vector<16x128xf32>
    %146 = arith.mulf %145, %101 : vector<16x128xf32>
    %147 = arith.addf %144, %146 : vector<16x128xf32>
    %148 = arith.truncf %147 : vector<16x128xf32> to vector<16x128xbf16>
    %149 = arith.index_cast %106 : i32 to index
    %c0_36 = arith.constant 0 : index
    %150 = vector.load %arg14[%149, %c0_36] : memref<128x128xbf16, #tpu.memory_space<vmem>>, vector<16x128xbf16>
    tpu.vector_store %arg14[%149, %c0_36], %148 {strides = array<i32>} : memref<128x128xbf16, #tpu.memory_space<vmem>>, vector<16x128xbf16>,
    %c3_i32 = arith.constant 3 : i32
    %c16_i32_37 = arith.constant 16 : i32
    %151 = arith.muli %c3_i32, %c16_i32_37 : i32
    %152 = tpu.assume_multiple %151, 16 : i32
    %153 = arith.index_cast %152 : i32 to index
    %c0_38 = arith.constant 0 : index
    %154 = vector.load %arg13[%153, %c0_38] : memref<128x384xbf16, #tpu.memory_space<vmem>>, vector<16x384xbf16>
    %155 = arith.truncf %147 : vector<16x128xf32> to vector<16x128xbf16>
    %c0_39 = arith.constant 0 : index
    %c0_40 = arith.constant 0 : index
    %156 = vector.load %arg3[%c0_39, %c0_40] : memref<128x384xbf16, #tpu.memory_space<vmem>>, vector<128x384xbf16>
    %cst_41 = arith.constant dense<0.000000e+00> : vector<16x384xf32>
    %157 = tpu.matmul %155, %156, %cst_41 {dimension_numbers = #tpu.dot_dimension_numbers<[1], [0], [0], [1], [0, 0, 1, 1], [], []>} : vector<16x128xbf16>, vector<128x384xbf16>, vector<16x384xf32> -> vector<16x384xf32>
    %158 = vector.extract_strided_slice %154 {offsets = [0, 0], sizes = [16, 128], strides = [1, 1]} : vector<16x384xbf16> to vector<16x128xbf16>
    %159 = vector.extract_strided_slice %157 {offsets = [0, 0], sizes = [16, 128], strides = [1, 1]} : vector<16x384xf32> to vector<16x128xf32>
    %160 = arith.extf %158 : vector<16x128xbf16> to vector<16x128xf32>
    %161 = arith.addf %160, %159 : vector<16x128xf32>
    %162 = arith.truncf %161 : vector<16x128xf32> to vector<16x128xbf16>
    %163 = arith.negf %162 : vector<16x128xbf16>
    %164 = math.exp %163 : vector<16x128xbf16>
    %cst_42 = arith.constant 1.000000e+00 : bf16
    %165 = vector.broadcast %cst_42 : bf16 to vector<16x128xbf16>
    %166 = arith.addf %165, %164 : vector<16x128xbf16>
    %167 = arith.divf %165, %166 : vector<16x128xbf16>
    %168 = vector.extract_strided_slice %154 {offsets = [0, 128], sizes = [16, 128], strides = [1, 1]} : vector<16x384xbf16> to vector<16x128xbf16>
    %169 = vector.extract_strided_slice %157 {offsets = [0, 128], sizes = [16, 128], strides = [1, 1]} : vector<16x384xf32> to vector<16x128xf32>
    %170 = arith.extf %168 : vector<16x128xbf16> to vector<16x128xf32>
    %171 = arith.addf %170, %169 : vector<16x128xf32>
    %172 = arith.truncf %171 : vector<16x128xf32> to vector<16x128xbf16>
    %173 = arith.negf %172 : vector<16x128xbf16>
    %174 = math.exp %173 : vector<16x128xbf16>
    %cst_43 = arith.constant 1.000000e+00 : bf16
    %175 = vector.broadcast %cst_43 : bf16 to vector<16x128xbf16>
    %176 = arith.addf %175, %174 : vector<16x128xbf16>
    %177 = arith.divf %175, %176 : vector<16x128xbf16>
    %178 = vector.extract_strided_slice %157 {offsets = [0, 256], sizes = [16, 128], strides = [1, 1]} : vector<16x384xf32> to vector<16x128xf32>
    %179 = arith.addf %178, %11 : vector<16x128xf32>
    %180 = vector.extract_strided_slice %154 {offsets = [0, 256], sizes = [16, 128], strides = [1, 1]} : vector<16x384xbf16> to vector<16x128xbf16>
    %181 = arith.extf %167 : vector<16x128xbf16> to vector<16x128xf32>
    %182 = arith.mulf %181, %179 : vector<16x128xf32>
    %183 = arith.extf %180 : vector<16x128xbf16> to vector<16x128xf32>
    %184 = arith.addf %183, %182 : vector<16x128xf32>
    %185 = arith.truncf %184 : vector<16x128xf32> to vector<16x128xbf16>
    %186 = math.tanh %185 : vector<16x128xbf16>
    %cst_44 = arith.constant 1.000000e+00 : bf16
    %187 = vector.broadcast %cst_44 : bf16 to vector<16x128xbf16>
    %188 = arith.subf %187, %177 : vector<16x128xbf16>
    %189 = arith.mulf %188, %186 : vector<16x128xbf16>
    %190 = arith.extf %189 : vector<16x128xbf16> to vector<16x128xf32>
    %191 = arith.extf %177 : vector<16x128xbf16> to vector<16x128xf32>
    %192 = arith.mulf %191, %147 : vector<16x128xf32>
    %193 = arith.addf %190, %192 : vector<16x128xf32>
    %194 = arith.truncf %193 : vector<16x128xf32> to vector<16x128xbf16>
    %195 = arith.index_cast %152 : i32 to index
    %c0_45 = arith.constant 0 : index
    %196 = vector.load %arg14[%195, %c0_45] : memref<128x128xbf16, #tpu.memory_space<vmem>>, vector<16x128xbf16>
    tpu.vector_store %arg14[%195, %c0_45], %194 {strides = array<i32>} : memref<128x128xbf16, #tpu.memory_space<vmem>>, vector<16x128xbf16>,
    %c4_i32 = arith.constant 4 : i32
    %c16_i32_46 = arith.constant 16 : i32
    %197 = arith.muli %c4_i32, %c16_i32_46 : i32
    %198 = tpu.assume_multiple %197, 16 : i32
    %199 = arith.index_cast %198 : i32 to index
    %c0_47 = arith.constant 0 : index
    %200 = vector.load %arg13[%199, %c0_47] : memref<128x384xbf16, #tpu.memory_space<vmem>>, vector<16x384xbf16>
    %201 = arith.truncf %193 : vector<16x128xf32> to vector<16x128xbf16>
    %c0_48 = arith.constant 0 : index
    %c0_49 = arith.constant 0 : index
    %202 = vector.load %arg3[%c0_48, %c0_49] : memref<128x384xbf16, #tpu.memory_space<vmem>>, vector<128x384xbf16>
    %cst_50 = arith.constant dense<0.000000e+00> : vector<16x384xf32>
    %203 = tpu.matmul %201, %202, %cst_50 {dimension_numbers = #tpu.dot_dimension_numbers<[1], [0], [0], [1], [0, 0, 1, 1], [], []>} : vector<16x128xbf16>, vector<128x384xbf16>, vector<16x384xf32> -> vector<16x384xf32>
    %204 = vector.extract_strided_slice %200 {offsets = [0, 0], sizes = [16, 128], strides = [1, 1]} : vector<16x384xbf16> to vector<16x128xbf16>
    %205 = vector.extract_strided_slice %203 {offsets = [0, 0], sizes = [16, 128], strides = [1, 1]} : vector<16x384xf32> to vector<16x128xf32>
    %206 = arith.extf %204 : vector<16x128xbf16> to vector<16x128xf32>
    %207 = arith.addf %206, %205 : vector<16x128xf32>
    %208 = arith.truncf %207 : vector<16x128xf32> to vector<16x128xbf16>
    %209 = arith.negf %208 : vector<16x128xbf16>
    %210 = math.exp %209 : vector<16x128xbf16>
    %cst_51 = arith.constant 1.000000e+00 : bf16
    %211 = vector.broadcast %cst_51 : bf16 to vector<16x128xbf16>
    %212 = arith.addf %211, %210 : vector<16x128xbf16>
    %213 = arith.divf %211, %212 : vector<16x128xbf16>
    %214 = vector.extract_strided_slice %200 {offsets = [0, 128], sizes = [16, 128], strides = [1, 1]} : vector<16x384xbf16> to vector<16x128xbf16>
    %215 = vector.extract_strided_slice %203 {offsets = [0, 128], sizes = [16, 128], strides = [1, 1]} : vector<16x384xf32> to vector<16x128xf32>
    %216 = arith.extf %214 : vector<16x128xbf16> to vector<16x128xf32>
    %217 = arith.addf %216, %215 : vector<16x128xf32>
    %218 = arith.truncf %217 : vector<16x128xf32> to vector<16x128xbf16>
    %219 = arith.negf %218 : vector<16x128xbf16>
    %220 = math.exp %219 : vector<16x128xbf16>
    %cst_52 = arith.constant 1.000000e+00 : bf16
    %221 = vector.broadcast %cst_52 : bf16 to vector<16x128xbf16>
    %222 = arith.addf %221, %220 : vector<16x128xbf16>
    %223 = arith.divf %221, %222 : vector<16x128xbf16>
    %224 = vector.extract_strided_slice %203 {offsets = [0, 256], sizes = [16, 128], strides = [1, 1]} : vector<16x384xf32> to vector<16x128xf32>
    %225 = arith.addf %224, %11 : vector<16x128xf32>
    %226 = vector.extract_strided_slice %200 {offsets = [0, 256], sizes = [16, 128], strides = [1, 1]} : vector<16x384xbf16> to vector<16x128xbf16>
    %227 = arith.extf %213 : vector<16x128xbf16> to vector<16x128xf32>
    %228 = arith.mulf %227, %225 : vector<16x128xf32>
    %229 = arith.extf %226 : vector<16x128xbf16> to vector<16x128xf32>
    %230 = arith.addf %229, %228 : vector<16x128xf32>
    %231 = arith.truncf %230 : vector<16x128xf32> to vector<16x128xbf16>
    %232 = math.tanh %231 : vector<16x128xbf16>
    %cst_53 = arith.constant 1.000000e+00 : bf16
    %233 = vector.broadcast %cst_53 : bf16 to vector<16x128xbf16>
    %234 = arith.subf %233, %223 : vector<16x128xbf16>
    %235 = arith.mulf %234, %232 : vector<16x128xbf16>
    %236 = arith.extf %235 : vector<16x128xbf16> to vector<16x128xf32>
    %237 = arith.extf %223 : vector<16x128xbf16> to vector<16x128xf32>
    %238 = arith.mulf %237, %193 : vector<16x128xf32>
    %239 = arith.addf %236, %238 : vector<16x128xf32>
    %240 = arith.truncf %239 : vector<16x128xf32> to vector<16x128xbf16>
    %241 = arith.index_cast %198 : i32 to index
    %c0_54 = arith.constant 0 : index
    %242 = vector.load %arg14[%241, %c0_54] : memref<128x128xbf16, #tpu.memory_space<vmem>>, vector<16x128xbf16>
    tpu.vector_store %arg14[%241, %c0_54], %240 {strides = array<i32>} : memref<128x128xbf16, #tpu.memory_space<vmem>>, vector<16x128xbf16>,
    %c5_i32 = arith.constant 5 : i32
    %c16_i32_55 = arith.constant 16 : i32
    %243 = arith.muli %c5_i32, %c16_i32_55 : i32
    %244 = tpu.assume_multiple %243, 16 : i32
    %245 = arith.index_cast %244 : i32 to index
    %c0_56 = arith.constant 0 : index
    %246 = vector.load %arg13[%245, %c0_56] : memref<128x384xbf16, #tpu.memory_space<vmem>>, vector<16x384xbf16>
    %247 = arith.truncf %239 : vector<16x128xf32> to vector<16x128xbf16>
    %c0_57 = arith.constant 0 : index
    %c0_58 = arith.constant 0 : index
    %248 = vector.load %arg3[%c0_57, %c0_58] : memref<128x384xbf16, #tpu.memory_space<vmem>>, vector<128x384xbf16>
    %cst_59 = arith.constant dense<0.000000e+00> : vector<16x384xf32>
    %249 = tpu.matmul %247, %248, %cst_59 {dimension_numbers = #tpu.dot_dimension_numbers<[1], [0], [0], [1], [0, 0, 1, 1], [], []>} : vector<16x128xbf16>, vector<128x384xbf16>, vector<16x384xf32> -> vector<16x384xf32>
    %250 = vector.extract_strided_slice %246 {offsets = [0, 0], sizes = [16, 128], strides = [1, 1]} : vector<16x384xbf16> to vector<16x128xbf16>
    %251 = vector.extract_strided_slice %249 {offsets = [0, 0], sizes = [16, 128], strides = [1, 1]} : vector<16x384xf32> to vector<16x128xf32>
    %252 = arith.extf %250 : vector<16x128xbf16> to vector<16x128xf32>
    %253 = arith.addf %252, %251 : vector<16x128xf32>
    %254 = arith.truncf %253 : vector<16x128xf32> to vector<16x128xbf16>
    %255 = arith.negf %254 : vector<16x128xbf16>
    %256 = math.exp %255 : vector<16x128xbf16>
    %cst_60 = arith.constant 1.000000e+00 : bf16
    %257 = vector.broadcast %cst_60 : bf16 to vector<16x128xbf16>
    %258 = arith.addf %257, %256 : vector<16x128xbf16>
    %259 = arith.divf %257, %258 : vector<16x128xbf16>
    %260 = vector.extract_strided_slice %246 {offsets = [0, 128], sizes = [16, 128], strides = [1, 1]} : vector<16x384xbf16> to vector<16x128xbf16>
    %261 = vector.extract_strided_slice %249 {offsets = [0, 128], sizes = [16, 128], strides = [1, 1]} : vector<16x384xf32> to vector<16x128xf32>
    %262 = arith.extf %260 : vector<16x128xbf16> to vector<16x128xf32>
    %263 = arith.addf %262, %261 : vector<16x128xf32>
    %264 = arith.truncf %263 : vector<16x128xf32> to vector<16x128xbf16>
    %265 = arith.negf %264 : vector<16x128xbf16>
    %266 = math.exp %265 : vector<16x128xbf16>
    %cst_61 = arith.constant 1.000000e+00 : bf16
    %267 = vector.broadcast %cst_61 : bf16 to vector<16x128xbf16>
    %268 = arith.addf %267, %266 : vector<16x128xbf16>
    %269 = arith.divf %267, %268 : vector<16x128xbf16>
    %270 = vector.extract_strided_slice %249 {offsets = [0, 256], sizes = [16, 128], strides = [1, 1]} : vector<16x384xf32> to vector<16x128xf32>
    %271 = arith.addf %270, %11 : vector<16x128xf32>
    %272 = vector.extract_strided_slice %246 {offsets = [0, 256], sizes = [16, 128], strides = [1, 1]} : vector<16x384xbf16> to vector<16x128xbf16>
    %273 = arith.extf %259 : vector<16x128xbf16> to vector<16x128xf32>
    %274 = arith.mulf %273, %271 : vector<16x128xf32>
    %275 = arith.extf %272 : vector<16x128xbf16> to vector<16x128xf32>
    %276 = arith.addf %275, %274 : vector<16x128xf32>
    %277 = arith.truncf %276 : vector<16x128xf32> to vector<16x128xbf16>
    %278 = math.tanh %277 : vector<16x128xbf16>
    %cst_62 = arith.constant 1.000000e+00 : bf16
    %279 = vector.broadcast %cst_62 : bf16 to vector<16x128xbf16>
    %280 = arith.subf %279, %269 : vector<16x128xbf16>
    %281 = arith.mulf %280, %278 : vector<16x128xbf16>
    %282 = arith.extf %281 : vector<16x128xbf16> to vector<16x128xf32>
    %283 = arith.extf %269 : vector<16x128xbf16> to vector<16x128xf32>
    %284 = arith.mulf %283, %239 : vector<16x128xf32>
    %285 = arith.addf %282, %284 : vector<16x128xf32>
    %286 = arith.truncf %285 : vector<16x128xf32> to vector<16x128xbf16>
    %287 = arith.index_cast %244 : i32 to index
    %c0_63 = arith.constant 0 : index
    %288 = vector.load %arg14[%287, %c0_63] : memref<128x128xbf16, #tpu.memory_space<vmem>>, vector<16x128xbf16>
    tpu.vector_store %arg14[%287, %c0_63], %286 {strides = array<i32>} : memref<128x128xbf16, #tpu.memory_space<vmem>>, vector<16x128xbf16>,
    %c6_i32 = arith.constant 6 : i32
    %c16_i32_64 = arith.constant 16 : i32
    %289 = arith.muli %c6_i32, %c16_i32_64 : i32
    %290 = tpu.assume_multiple %289, 16 : i32
    %291 = arith.index_cast %290 : i32 to index
    %c0_65 = arith.constant 0 : index
    %292 = vector.load %arg13[%291, %c0_65] : memref<128x384xbf16, #tpu.memory_space<vmem>>, vector<16x384xbf16>
    %293 = arith.truncf %285 : vector<16x128xf32> to vector<16x128xbf16>
    %c0_66 = arith.constant 0 : index
    %c0_67 = arith.constant 0 : index
    %294 = vector.load %arg3[%c0_66, %c0_67] : memref<128x384xbf16, #tpu.memory_space<vmem>>, vector<128x384xbf16>
    %cst_68 = arith.constant dense<0.000000e+00> : vector<16x384xf32>
    %295 = tpu.matmul %293, %294, %cst_68 {dimension_numbers = #tpu.dot_dimension_numbers<[1], [0], [0], [1], [0, 0, 1, 1], [], []>} : vector<16x128xbf16>, vector<128x384xbf16>, vector<16x384xf32> -> vector<16x384xf32>
    %296 = vector.extract_strided_slice %292 {offsets = [0, 0], sizes = [16, 128], strides = [1, 1]} : vector<16x384xbf16> to vector<16x128xbf16>
    %297 = vector.extract_strided_slice %295 {offsets = [0, 0], sizes = [16, 128], strides = [1, 1]} : vector<16x384xf32> to vector<16x128xf32>
    %298 = arith.extf %296 : vector<16x128xbf16> to vector<16x128xf32>
    %299 = arith.addf %298, %297 : vector<16x128xf32>
    %300 = arith.truncf %299 : vector<16x128xf32> to vector<16x128xbf16>
    %301 = arith.negf %300 : vector<16x128xbf16>
    %302 = math.exp %301 : vector<16x128xbf16>
    %cst_69 = arith.constant 1.000000e+00 : bf16
    %303 = vector.broadcast %cst_69 : bf16 to vector<16x128xbf16>
    %304 = arith.addf %303, %302 : vector<16x128xbf16>
    %305 = arith.divf %303, %304 : vector<16x128xbf16>
    %306 = vector.extract_strided_slice %292 {offsets = [0, 128], sizes = [16, 128], strides = [1, 1]} : vector<16x384xbf16> to vector<16x128xbf16>
    %307 = vector.extract_strided_slice %295 {offsets = [0, 128], sizes = [16, 128], strides = [1, 1]} : vector<16x384xf32> to vector<16x128xf32>
    %308 = arith.extf %306 : vector<16x128xbf16> to vector<16x128xf32>
    %309 = arith.addf %308, %307 : vector<16x128xf32>
    %310 = arith.truncf %309 : vector<16x128xf32> to vector<16x128xbf16>
    %311 = arith.negf %310 : vector<16x128xbf16>
    %312 = math.exp %311 : vector<16x128xbf16>
    %cst_70 = arith.constant 1.000000e+00 : bf16
    %313 = vector.broadcast %cst_70 : bf16 to vector<16x128xbf16>
    %314 = arith.addf %313, %312 : vector<16x128xbf16>
    %315 = arith.divf %313, %314 : vector<16x128xbf16>
    %316 = vector.extract_strided_slice %295 {offsets = [0, 256], sizes = [16, 128], strides = [1, 1]} : vector<16x384xf32> to vector<16x128xf32>
    %317 = arith.addf %316, %11 : vector<16x128xf32>
    %318 = vector.extract_strided_slice %292 {offsets = [0, 256], sizes = [16, 128], strides = [1, 1]} : vector<16x384xbf16> to vector<16x128xbf16>
    %319 = arith.extf %305 : vector<16x128xbf16> to vector<16x128xf32>
    %320 = arith.mulf %319, %317 : vector<16x128xf32>
    %321 = arith.extf %318 : vector<16x128xbf16> to vector<16x128xf32>
    %322 = arith.addf %321, %320 : vector<16x128xf32>
    %323 = arith.truncf %322 : vector<16x128xf32> to vector<16x128xbf16>
    %324 = math.tanh %323 : vector<16x128xbf16>
    %cst_71 = arith.constant 1.000000e+00 : bf16
    %325 = vector.broadcast %cst_71 : bf16 to vector<16x128xbf16>
    %326 = arith.subf %325, %315 : vector<16x128xbf16>
    %327 = arith.mulf %326, %324 : vector<16x128xbf16>
    %328 = arith.extf %327 : vector<16x128xbf16> to vector<16x128xf32>
    %329 = arith.extf %315 : vector<16x128xbf16> to vector<16x128xf32>
    %330 = arith.mulf %329, %285 : vector<16x128xf32>
    %331 = arith.addf %328, %330 : vector<16x128xf32>
    %332 = arith.truncf %331 : vector<16x128xf32> to vector<16x128xbf16>
    %333 = arith.index_cast %290 : i32 to index
    %c0_72 = arith.constant 0 : index
    %334 = vector.load %arg14[%333, %c0_72] : memref<128x128xbf16, #tpu.memory_space<vmem>>, vector<16x128xbf16>
    tpu.vector_store %arg14[%333, %c0_72], %332 {strides = array<i32>} : memref<128x128xbf16, #tpu.memory_space<vmem>>, vector<16x128xbf16>,
    %c7_i32 = arith.constant 7 : i32
    %c16_i32_73 = arith.constant 16 : i32
    %335 = arith.muli %c7_i32, %c16_i32_73 : i32
    %336 = tpu.assume_multiple %335, 16 : i32
    %337 = arith.index_cast %336 : i32 to index
    %c0_74 = arith.constant 0 : index
    %338 = vector.load %arg13[%337, %c0_74] : memref<128x384xbf16, #tpu.memory_space<vmem>>, vector<16x384xbf16>
    %339 = arith.truncf %331 : vector<16x128xf32> to vector<16x128xbf16>
    %c0_75 = arith.constant 0 : index
    %c0_76 = arith.constant 0 : index
    %340 = vector.load %arg3[%c0_75, %c0_76] : memref<128x384xbf16, #tpu.memory_space<vmem>>, vector<128x384xbf16>
    %cst_77 = arith.constant dense<0.000000e+00> : vector<16x384xf32>
    %341 = tpu.matmul %339, %340, %cst_77 {dimension_numbers = #tpu.dot_dimension_numbers<[1], [0], [0], [1], [0, 0, 1, 1], [], []>} : vector<16x128xbf16>, vector<128x384xbf16>, vector<16x384xf32> -> vector<16x384xf32>
    %342 = vector.extract_strided_slice %338 {offsets = [0, 0], sizes = [16, 128], strides = [1, 1]} : vector<16x384xbf16> to vector<16x128xbf16>
    %343 = vector.extract_strided_slice %341 {offsets = [0, 0], sizes = [16, 128], strides = [1, 1]} : vector<16x384xf32> to vector<16x128xf32>
    %344 = arith.extf %342 : vector<16x128xbf16> to vector<16x128xf32>
    %345 = arith.addf %344, %343 : vector<16x128xf32>
    %346 = arith.truncf %345 : vector<16x128xf32> to vector<16x128xbf16>
    %347 = arith.negf %346 : vector<16x128xbf16>
    %348 = math.exp %347 : vector<16x128xbf16>
    %cst_78 = arith.constant 1.000000e+00 : bf16
    %349 = vector.broadcast %cst_78 : bf16 to vector<16x128xbf16>
    %350 = arith.addf %349, %348 : vector<16x128xbf16>
    %351 = arith.divf %349, %350 : vector<16x128xbf16>
    %352 = vector.extract_strided_slice %338 {offsets = [0, 128], sizes = [16, 128], strides = [1, 1]} : vector<16x384xbf16> to vector<16x128xbf16>
    %353 = vector.extract_strided_slice %341 {offsets = [0, 128], sizes = [16, 128], strides = [1, 1]} : vector<16x384xf32> to vector<16x128xf32>
    %354 = arith.extf %352 : vector<16x128xbf16> to vector<16x128xf32>
    %355 = arith.addf %354, %353 : vector<16x128xf32>
    %356 = arith.truncf %355 : vector<16x128xf32> to vector<16x128xbf16>
    %357 = arith.negf %356 : vector<16x128xbf16>
    %358 = math.exp %357 : vector<16x128xbf16>
    %cst_79 = arith.constant 1.000000e+00 : bf16
    %359 = vector.broadcast %cst_79 : bf16 to vector<16x128xbf16>
    %360 = arith.addf %359, %358 : vector<16x128xbf16>
    %361 = arith.divf %359, %360 : vector<16x128xbf16>
    %362 = vector.extract_strided_slice %341 {offsets = [0, 256], sizes = [16, 128], strides = [1, 1]} : vector<16x384xf32> to vector<16x128xf32>
    %363 = arith.addf %362, %11 : vector<16x128xf32>
    %364 = vector.extract_strided_slice %338 {offsets = [0, 256], sizes = [16, 128], strides = [1, 1]} : vector<16x384xbf16> to vector<16x128xbf16>
    %365 = arith.extf %351 : vector<16x128xbf16> to vector<16x128xf32>
    %366 = arith.mulf %365, %363 : vector<16x128xf32>
    %367 = arith.extf %364 : vector<16x128xbf16> to vector<16x128xf32>
    %368 = arith.addf %367, %366 : vector<16x128xf32>
    %369 = arith.truncf %368 : vector<16x128xf32> to vector<16x128xbf16>
    %370 = math.tanh %369 : vector<16x128xbf16>
    %cst_80 = arith.constant 1.000000e+00 : bf16
    %371 = vector.broadcast %cst_80 : bf16 to vector<16x128xbf16>
    %372 = arith.subf %371, %361 : vector<16x128xbf16>
    %373 = arith.mulf %372, %370 : vector<16x128xbf16>
    %374 = arith.extf %373 : vector<16x128xbf16> to vector<16x128xf32>
    %375 = arith.extf %361 : vector<16x128xbf16> to vector<16x128xf32>
    %376 = arith.mulf %375, %331 : vector<16x128xf32>
    %377 = arith.addf %374, %376 : vector<16x128xf32>
    %378 = arith.truncf %377 : vector<16x128xf32> to vector<16x128xbf16>
    %379 = arith.index_cast %336 : i32 to index
    %c0_81 = arith.constant 0 : index
    %380 = vector.load %arg14[%379, %c0_81] : memref<128x128xbf16, #tpu.memory_space<vmem>>, vector<16x128xbf16>
    tpu.vector_store %arg14[%379, %c0_81], %378 {strides = array<i32>} : memref<128x128xbf16, #tpu.memory_space<vmem>>, vector<16x128xbf16>,
    %c8_i32 = arith.constant 8 : i32
    %c0_82 = arith.constant 0 : index
    %c0_83 = arith.constant 0 : index
    %381 = vector.load %arg8[%c0_82, %c0_83] : memref<1x384xf32, #tpu.memory_space<vmem>>, vector<1x384xf32>
    %c0_84 = arith.constant 0 : index
    %c0_85 = arith.constant 0 : index
    %382 = vector.load %arg9[%c0_84, %c0_85] : memref<1x128xf32, #tpu.memory_space<vmem>>, vector<1x128xf32>
    %c0_86 = arith.constant 0 : index
    %c0_87 = arith.constant 0 : index
    %383 = vector.load %arg14[%c0_86, %c0_87] : memref<128x128xbf16, #tpu.memory_space<vmem>>, vector<128x128xbf16>
    %c0_88 = arith.constant 0 : index
    %c0_89 = arith.constant 0 : index
    %384 = vector.load %arg6[%c0_88, %c0_89] : memref<128x384xbf16, #tpu.memory_space<vmem>>, vector<128x384xbf16>
    %cst_90 = arith.constant dense<0.000000e+00> : vector<128x384xf32>
    %385 = tpu.matmul %383, %384, %cst_90 {dimension_numbers = #tpu.dot_dimension_numbers<[1], [0], [0], [1], [0, 0, 1, 1], [], []>} : vector<128x128xbf16>, vector<128x384xbf16>, vector<128x384xf32> -> vector<128x384xf32>
    %386 = vector.broadcast %381 : vector<1x384xf32> to vector<128x384xf32>
    %387 = arith.addf %385, %386 : vector<128x384xf32>
    %388 = arith.truncf %387 : vector<128x384xf32> to vector<128x384xbf16>
    %c0_91 = arith.constant 0 : index
    %c0_92 = arith.constant 0 : index
    %389 = vector.load %arg13[%c0_91, %c0_92] : memref<128x384xbf16, #tpu.memory_space<vmem>>, vector<128x384xbf16>
    tpu.vector_store %arg13[%c0_91, %c0_92], %388 {strides = array<i32>} : memref<128x384xbf16, #tpu.memory_space<vmem>>, vector<128x384xbf16>,
    %390 = vector.shape_cast %382 : vector<1x128xf32> to vector<1x128xf32>
    %391 = vector.broadcast %390 : vector<1x128xf32> to vector<16x128xf32>
    %cst_93 = arith.constant 0.000000e+00 : f32
    %392 = vector.broadcast %cst_93 : f32 to vector<16x128xf32>
    %c0_i32_94 = arith.constant 0 : i32
    %c16_i32_95 = arith.constant 16 : i32
    %393 = arith.muli %c0_i32_94, %c16_i32_95 : i32
    %394 = tpu.assume_multiple %393, 16 : i32
    %395 = arith.index_cast %394 : i32 to index
    %c0_96 = arith.constant 0 : index
    %396 = vector.load %arg13[%395, %c0_96] : memref<128x384xbf16, #tpu.memory_space<vmem>>, vector<16x384xbf16>
    %397 = arith.truncf %392 : vector<16x128xf32> to vector<16x128xbf16>
    %c0_97 = arith.constant 0 : index
    %c0_98 = arith.constant 0 : index
    %398 = vector.load %arg7[%c0_97, %c0_98] : memref<128x384xbf16, #tpu.memory_space<vmem>>, vector<128x384xbf16>
    %cst_99 = arith.constant dense<0.000000e+00> : vector<16x384xf32>
    %399 = tpu.matmul %397, %398, %cst_99 {dimension_numbers = #tpu.dot_dimension_numbers<[1], [0], [0], [1], [0, 0, 1, 1], [], []>} : vector<16x128xbf16>, vector<128x384xbf16>, vector<16x384xf32> -> vector<16x384xf32>
    %400 = vector.extract_strided_slice %396 {offsets = [0, 0], sizes = [16, 128], strides = [1, 1]} : vector<16x384xbf16> to vector<16x128xbf16>
    %401 = vector.extract_strided_slice %399 {offsets = [0, 0], sizes = [16, 128], strides = [1, 1]} : vector<16x384xf32> to vector<16x128xf32>
    %402 = arith.extf %400 : vector<16x128xbf16> to vector<16x128xf32>
    %403 = arith.addf %402, %401 : vector<16x128xf32>
    %404 = arith.truncf %403 : vector<16x128xf32> to vector<16x128xbf16>
    %405 = arith.negf %404 : vector<16x128xbf16>
    %406 = math.exp %405 : vector<16x128xbf16>
    %cst_100 = arith.constant 1.000000e+00 : bf16
    %407 = vector.broadcast %cst_100 : bf16 to vector<16x128xbf16>
    %408 = arith.addf %407, %406 : vector<16x128xbf16>
    %409 = arith.divf %407, %408 : vector<16x128xbf16>
    %410 = vector.extract_strided_slice %396 {offsets = [0, 128], sizes = [16, 128], strides = [1, 1]} : vector<16x384xbf16> to vector<16x128xbf16>
    %411 = vector.extract_strided_slice %399 {offsets = [0, 128], sizes = [16, 128], strides = [1, 1]} : vector<16x384xf32> to vector<16x128xf32>
    %412 = arith.extf %410 : vector<16x128xbf16> to vector<16x128xf32>
    %413 = arith.addf %412, %411 : vector<16x128xf32>
    %414 = arith.truncf %413 : vector<16x128xf32> to vector<16x128xbf16>
    %415 = arith.negf %414 : vector<16x128xbf16>
    %416 = math.exp %415 : vector<16x128xbf16>
    %cst_101 = arith.constant 1.000000e+00 : bf16
    %417 = vector.broadcast %cst_101 : bf16 to vector<16x128xbf16>
    %418 = arith.addf %417, %416 : vector<16x128xbf16>
    %419 = arith.divf %417, %418 : vector<16x128xbf16>
    %420 = vector.extract_strided_slice %399 {offsets = [0, 256], sizes = [16, 128], strides = [1, 1]} : vector<16x384xf32> to vector<16x128xf32>
    %421 = arith.addf %420, %391 : vector<16x128xf32>
    %422 = vector.extract_strided_slice %396 {offsets = [0, 256], sizes = [16, 128], strides = [1, 1]} : vector<16x384xbf16> to vector<16x128xbf16>
    %423 = arith.extf %409 : vector<16x128xbf16> to vector<16x128xf32>
    %424 = arith.mulf %423, %421 : vector<16x128xf32>
    %425 = arith.extf %422 : vector<16x128xbf16> to vector<16x128xf32>
    %426 = arith.addf %425, %424 : vector<16x128xf32>
    %427 = arith.truncf %426 : vector<16x128xf32> to vector<16x128xbf16>
    %428 = math.tanh %427 : vector<16x128xbf16>
    %cst_102 = arith.constant 1.000000e+00 : bf16
    %429 = vector.broadcast %cst_102 : bf16 to vector<16x128xbf16>
    %430 = arith.subf %429, %419 : vector<16x128xbf16>
    %431 = arith.mulf %430, %428 : vector<16x128xbf16>
    %432 = arith.extf %431 : vector<16x128xbf16> to vector<16x128xf32>
    %433 = arith.extf %419 : vector<16x128xbf16> to vector<16x128xf32>
    %434 = arith.mulf %433, %392 : vector<16x128xf32>
    %435 = arith.addf %432, %434 : vector<16x128xf32>
    %c1_i32_103 = arith.constant 1 : i32
    %c16_i32_104 = arith.constant 16 : i32
    %436 = arith.muli %c1_i32_103, %c16_i32_104 : i32
    %437 = tpu.assume_multiple %436, 16 : i32
    %438 = arith.index_cast %437 : i32 to index
    %c0_105 = arith.constant 0 : index
    %439 = vector.load %arg13[%438, %c0_105] : memref<128x384xbf16, #tpu.memory_space<vmem>>, vector<16x384xbf16>
    %440 = arith.truncf %435 : vector<16x128xf32> to vector<16x128xbf16>
    %c0_106 = arith.constant 0 : index
    %c0_107 = arith.constant 0 : index
    %441 = vector.load %arg7[%c0_106, %c0_107] : memref<128x384xbf16, #tpu.memory_space<vmem>>, vector<128x384xbf16>
    %cst_108 = arith.constant dense<0.000000e+00> : vector<16x384xf32>
    %442 = tpu.matmul %440, %441, %cst_108 {dimension_numbers = #tpu.dot_dimension_numbers<[1], [0], [0], [1], [0, 0, 1, 1], [], []>} : vector<16x128xbf16>, vector<128x384xbf16>, vector<16x384xf32> -> vector<16x384xf32>
    %443 = vector.extract_strided_slice %439 {offsets = [0, 0], sizes = [16, 128], strides = [1, 1]} : vector<16x384xbf16> to vector<16x128xbf16>
    %444 = vector.extract_strided_slice %442 {offsets = [0, 0], sizes = [16, 128], strides = [1, 1]} : vector<16x384xf32> to vector<16x128xf32>
    %445 = arith.extf %443 : vector<16x128xbf16> to vector<16x128xf32>
    %446 = arith.addf %445, %444 : vector<16x128xf32>
    %447 = arith.truncf %446 : vector<16x128xf32> to vector<16x128xbf16>
    %448 = arith.negf %447 : vector<16x128xbf16>
    %449 = math.exp %448 : vector<16x128xbf16>
    %cst_109 = arith.constant 1.000000e+00 : bf16
    %450 = vector.broadcast %cst_109 : bf16 to vector<16x128xbf16>
    %451 = arith.addf %450, %449 : vector<16x128xbf16>
    %452 = arith.divf %450, %451 : vector<16x128xbf16>
    %453 = vector.extract_strided_slice %439 {offsets = [0, 128], sizes = [16, 128], strides = [1, 1]} : vector<16x384xbf16> to vector<16x128xbf16>
    %454 = vector.extract_strided_slice %442 {offsets = [0, 128], sizes = [16, 128], strides = [1, 1]} : vector<16x384xf32> to vector<16x128xf32>
    %455 = arith.extf %453 : vector<16x128xbf16> to vector<16x128xf32>
    %456 = arith.addf %455, %454 : vector<16x128xf32>
    %457 = arith.truncf %456 : vector<16x128xf32> to vector<16x128xbf16>
    %458 = arith.negf %457 : vector<16x128xbf16>
    %459 = math.exp %458 : vector<16x128xbf16>
    %cst_110 = arith.constant 1.000000e+00 : bf16
    %460 = vector.broadcast %cst_110 : bf16 to vector<16x128xbf16>
    %461 = arith.addf %460, %459 : vector<16x128xbf16>
    %462 = arith.divf %460, %461 : vector<16x128xbf16>
    %463 = vector.extract_strided_slice %442 {offsets = [0, 256], sizes = [16, 128], strides = [1, 1]} : vector<16x384xf32> to vector<16x128xf32>
    %464 = arith.addf %463, %391 : vector<16x128xf32>
    %465 = vector.extract_strided_slice %439 {offsets = [0, 256], sizes = [16, 128], strides = [1, 1]} : vector<16x384xbf16> to vector<16x128xbf16>
    %466 = arith.extf %452 : vector<16x128xbf16> to vector<16x128xf32>
    %467 = arith.mulf %466, %464 : vector<16x128xf32>
    %468 = arith.extf %465 : vector<16x128xbf16> to vector<16x128xf32>
    %469 = arith.addf %468, %467 : vector<16x128xf32>
    %470 = arith.truncf %469 : vector<16x128xf32> to vector<16x128xbf16>
    %471 = math.tanh %470 : vector<16x128xbf16>
    %cst_111 = arith.constant 1.000000e+00 : bf16
    %472 = vector.broadcast %cst_111 : bf16 to vector<16x128xbf16>
    %473 = arith.subf %472, %462 : vector<16x128xbf16>
    %474 = arith.mulf %473, %471 : vector<16x128xbf16>
    %475 = arith.extf %474 : vector<16x128xbf16> to vector<16x128xf32>
    %476 = arith.extf %462 : vector<16x128xbf16> to vector<16x128xf32>
    %477 = arith.mulf %476, %435 : vector<16x128xf32>
    %478 = arith.addf %475, %477 : vector<16x128xf32>
    %c2_i32_112 = arith.constant 2 : i32
    %c16_i32_113 = arith.constant 16 : i32
    %479 = arith.muli %c2_i32_112, %c16_i32_113 : i32
    %480 = tpu.assume_multiple %479, 16 : i32
    %481 = arith.index_cast %480 : i32 to index
    %c0_114 = arith.constant 0 : index
    %482 = vector.load %arg13[%481, %c0_114] : memref<128x384xbf16, #tpu.memory_space<vmem>>, vector<16x384xbf16>
    %483 = arith.truncf %478 : vector<16x128xf32> to vector<16x128xbf16>
    %c0_115 = arith.constant 0 : index
    %c0_116 = arith.constant 0 : index
    %484 = vector.load %arg7[%c0_115, %c0_116] : memref<128x384xbf16, #tpu.memory_space<vmem>>, vector<128x384xbf16>
    %cst_117 = arith.constant dense<0.000000e+00> : vector<16x384xf32>
    %485 = tpu.matmul %483, %484, %cst_117 {dimension_numbers = #tpu.dot_dimension_numbers<[1], [0], [0], [1], [0, 0, 1, 1], [], []>} : vector<16x128xbf16>, vector<128x384xbf16>, vector<16x384xf32> -> vector<16x384xf32>
    %486 = vector.extract_strided_slice %482 {offsets = [0, 0], sizes = [16, 128], strides = [1, 1]} : vector<16x384xbf16> to vector<16x128xbf16>
    %487 = vector.extract_strided_slice %485 {offsets = [0, 0], sizes = [16, 128], strides = [1, 1]} : vector<16x384xf32> to vector<16x128xf32>
    %488 = arith.extf %486 : vector<16x128xbf16> to vector<16x128xf32>
    %489 = arith.addf %488, %487 : vector<16x128xf32>
    %490 = arith.truncf %489 : vector<16x128xf32> to vector<16x128xbf16>
    %491 = arith.negf %490 : vector<16x128xbf16>
    %492 = math.exp %491 : vector<16x128xbf16>
    %cst_118 = arith.constant 1.000000e+00 : bf16
    %493 = vector.broadcast %cst_118 : bf16 to vector<16x128xbf16>
    %494 = arith.addf %493, %492 : vector<16x128xbf16>
    %495 = arith.divf %493, %494 : vector<16x128xbf16>
    %496 = vector.extract_strided_slice %482 {offsets = [0, 128], sizes = [16, 128], strides = [1, 1]} : vector<16x384xbf16> to vector<16x128xbf16>
    %497 = vector.extract_strided_slice %485 {offsets = [0, 128], sizes = [16, 128], strides = [1, 1]} : vector<16x384xf32> to vector<16x128xf32>
    %498 = arith.extf %496 : vector<16x128xbf16> to vector<16x128xf32>
    %499 = arith.addf %498, %497 : vector<16x128xf32>
    %500 = arith.truncf %499 : vector<16x128xf32> to vector<16x128xbf16>
    %501 = arith.negf %500 : vector<16x128xbf16>
    %502 = math.exp %501 : vector<16x128xbf16>
    %cst_119 = arith.constant 1.000000e+00 : bf16
    %503 = vector.broadcast %cst_119 : bf16 to vector<16x128xbf16>
    %504 = arith.addf %503, %502 : vector<16x128xbf16>
    %505 = arith.divf %503, %504 : vector<16x128xbf16>
    %506 = vector.extract_strided_slice %485 {offsets = [0, 256], sizes = [16, 128], strides = [1, 1]} : vector<16x384xf32> to vector<16x128xf32>
    %507 = arith.addf %506, %391 : vector<16x128xf32>
    %508 = vector.extract_strided_slice %482 {offsets = [0, 256], sizes = [16, 128], strides = [1, 1]} : vector<16x384xbf16> to vector<16x128xbf16>
    %509 = arith.extf %495 : vector<16x128xbf16> to vector<16x128xf32>
    %510 = arith.mulf %509, %507 : vector<16x128xf32>
    %511 = arith.extf %508 : vector<16x128xbf16> to vector<16x128xf32>
    %512 = arith.addf %511, %510 : vector<16x128xf32>
    %513 = arith.truncf %512 : vector<16x128xf32> to vector<16x128xbf16>
    %514 = math.tanh %513 : vector<16x128xbf16>
    %cst_120 = arith.constant 1.000000e+00 : bf16
    %515 = vector.broadcast %cst_120 : bf16 to vector<16x128xbf16>
    %516 = arith.subf %515, %505 : vector<16x128xbf16>
    %517 = arith.mulf %516, %514 : vector<16x128xbf16>
    %518 = arith.extf %517 : vector<16x128xbf16> to vector<16x128xf32>
    %519 = arith.extf %505 : vector<16x128xbf16> to vector<16x128xf32>
    %520 = arith.mulf %519, %478 : vector<16x128xf32>
    %521 = arith.addf %518, %520 : vector<16x128xf32>
    %c3_i32_121 = arith.constant 3 : i32
    %c16_i32_122 = arith.constant 16 : i32
    %522 = arith.muli %c3_i32_121, %c16_i32_122 : i32
    %523 = tpu.assume_multiple %522, 16 : i32
    %524 = arith.index_cast %523 : i32 to index
    %c0_123 = arith.constant 0 : index
    %525 = vector.load %arg13[%524, %c0_123] : memref<128x384xbf16, #tpu.memory_space<vmem>>, vector<16x384xbf16>
    %526 = arith.truncf %521 : vector<16x128xf32> to vector<16x128xbf16>
    %c0_124 = arith.constant 0 : index
    %c0_125 = arith.constant 0 : index
    %527 = vector.load %arg7[%c0_124, %c0_125] : memref<128x384xbf16, #tpu.memory_space<vmem>>, vector<128x384xbf16>
    %cst_126 = arith.constant dense<0.000000e+00> : vector<16x384xf32>
    %528 = tpu.matmul %526, %527, %cst_126 {dimension_numbers = #tpu.dot_dimension_numbers<[1], [0], [0], [1], [0, 0, 1, 1], [], []>} : vector<16x128xbf16>, vector<128x384xbf16>, vector<16x384xf32> -> vector<16x384xf32>
    %529 = vector.extract_strided_slice %525 {offsets = [0, 0], sizes = [16, 128], strides = [1, 1]} : vector<16x384xbf16> to vector<16x128xbf16>
    %530 = vector.extract_strided_slice %528 {offsets = [0, 0], sizes = [16, 128], strides = [1, 1]} : vector<16x384xf32> to vector<16x128xf32>
    %531 = arith.extf %529 : vector<16x128xbf16> to vector<16x128xf32>
    %532 = arith.addf %531, %530 : vector<16x128xf32>
    %533 = arith.truncf %532 : vector<16x128xf32> to vector<16x128xbf16>
    %534 = arith.negf %533 : vector<16x128xbf16>
    %535 = math.exp %534 : vector<16x128xbf16>
    %cst_127 = arith.constant 1.000000e+00 : bf16
    %536 = vector.broadcast %cst_127 : bf16 to vector<16x128xbf16>
    %537 = arith.addf %536, %535 : vector<16x128xbf16>
    %538 = arith.divf %536, %537 : vector<16x128xbf16>
    %539 = vector.extract_strided_slice %525 {offsets = [0, 128], sizes = [16, 128], strides = [1, 1]} : vector<16x384xbf16> to vector<16x128xbf16>
    %540 = vector.extract_strided_slice %528 {offsets = [0, 128], sizes = [16, 128], strides = [1, 1]} : vector<16x384xf32> to vector<16x128xf32>
    %541 = arith.extf %539 : vector<16x128xbf16> to vector<16x128xf32>
    %542 = arith.addf %541, %540 : vector<16x128xf32>
    %543 = arith.truncf %542 : vector<16x128xf32> to vector<16x128xbf16>
    %544 = arith.negf %543 : vector<16x128xbf16>
    %545 = math.exp %544 : vector<16x128xbf16>
    %cst_128 = arith.constant 1.000000e+00 : bf16
    %546 = vector.broadcast %cst_128 : bf16 to vector<16x128xbf16>
    %547 = arith.addf %546, %545 : vector<16x128xbf16>
    %548 = arith.divf %546, %547 : vector<16x128xbf16>
    %549 = vector.extract_strided_slice %528 {offsets = [0, 256], sizes = [16, 128], strides = [1, 1]} : vector<16x384xf32> to vector<16x128xf32>
    %550 = arith.addf %549, %391 : vector<16x128xf32>
    %551 = vector.extract_strided_slice %525 {offsets = [0, 256], sizes = [16, 128], strides = [1, 1]} : vector<16x384xbf16> to vector<16x128xbf16>
    %552 = arith.extf %538 : vector<16x128xbf16> to vector<16x128xf32>
    %553 = arith.mulf %552, %550 : vector<16x128xf32>
    %554 = arith.extf %551 : vector<16x128xbf16> to vector<16x128xf32>
    %555 = arith.addf %554, %553 : vector<16x128xf32>
    %556 = arith.truncf %555 : vector<16x128xf32> to vector<16x128xbf16>
    %557 = math.tanh %556 : vector<16x128xbf16>
    %cst_129 = arith.constant 1.000000e+00 : bf16
    %558 = vector.broadcast %cst_129 : bf16 to vector<16x128xbf16>
    %559 = arith.subf %558, %548 : vector<16x128xbf16>
    %560 = arith.mulf %559, %557 : vector<16x128xbf16>
    %561 = arith.extf %560 : vector<16x128xbf16> to vector<16x128xf32>
    %562 = arith.extf %548 : vector<16x128xbf16> to vector<16x128xf32>
    %563 = arith.mulf %562, %521 : vector<16x128xf32>
    %564 = arith.addf %561, %563 : vector<16x128xf32>
    %c4_i32_130 = arith.constant 4 : i32
    %c16_i32_131 = arith.constant 16 : i32
    %565 = arith.muli %c4_i32_130, %c16_i32_131 : i32
    %566 = tpu.assume_multiple %565, 16 : i32
    %567 = arith.index_cast %566 : i32 to index
    %c0_132 = arith.constant 0 : index
    %568 = vector.load %arg13[%567, %c0_132] : memref<128x384xbf16, #tpu.memory_space<vmem>>, vector<16x384xbf16>
    %569 = arith.truncf %564 : vector<16x128xf32> to vector<16x128xbf16>
    %c0_133 = arith.constant 0 : index
    %c0_134 = arith.constant 0 : index
    %570 = vector.load %arg7[%c0_133, %c0_134] : memref<128x384xbf16, #tpu.memory_space<vmem>>, vector<128x384xbf16>
    %cst_135 = arith.constant dense<0.000000e+00> : vector<16x384xf32>
    %571 = tpu.matmul %569, %570, %cst_135 {dimension_numbers = #tpu.dot_dimension_numbers<[1], [0], [0], [1], [0, 0, 1, 1], [], []>} : vector<16x128xbf16>, vector<128x384xbf16>, vector<16x384xf32> -> vector<16x384xf32>
    %572 = vector.extract_strided_slice %568 {offsets = [0, 0], sizes = [16, 128], strides = [1, 1]} : vector<16x384xbf16> to vector<16x128xbf16>
    %573 = vector.extract_strided_slice %571 {offsets = [0, 0], sizes = [16, 128], strides = [1, 1]} : vector<16x384xf32> to vector<16x128xf32>
    %574 = arith.extf %572 : vector<16x128xbf16> to vector<16x128xf32>
    %575 = arith.addf %574, %573 : vector<16x128xf32>
    %576 = arith.truncf %575 : vector<16x128xf32> to vector<16x128xbf16>
    %577 = arith.negf %576 : vector<16x128xbf16>
    %578 = math.exp %577 : vector<16x128xbf16>
    %cst_136 = arith.constant 1.000000e+00 : bf16
    %579 = vector.broadcast %cst_136 : bf16 to vector<16x128xbf16>
    %580 = arith.addf %579, %578 : vector<16x128xbf16>
    %581 = arith.divf %579, %580 : vector<16x128xbf16>
    %582 = vector.extract_strided_slice %568 {offsets = [0, 128], sizes = [16, 128], strides = [1, 1]} : vector<16x384xbf16> to vector<16x128xbf16>
    %583 = vector.extract_strided_slice %571 {offsets = [0, 128], sizes = [16, 128], strides = [1, 1]} : vector<16x384xf32> to vector<16x128xf32>
    %584 = arith.extf %582 : vector<16x128xbf16> to vector<16x128xf32>
    %585 = arith.addf %584, %583 : vector<16x128xf32>
    %586 = arith.truncf %585 : vector<16x128xf32> to vector<16x128xbf16>
    %587 = arith.negf %586 : vector<16x128xbf16>
    %588 = math.exp %587 : vector<16x128xbf16>
    %cst_137 = arith.constant 1.000000e+00 : bf16
    %589 = vector.broadcast %cst_137 : bf16 to vector<16x128xbf16>
    %590 = arith.addf %589, %588 : vector<16x128xbf16>
    %591 = arith.divf %589, %590 : vector<16x128xbf16>
    %592 = vector.extract_strided_slice %571 {offsets = [0, 256], sizes = [16, 128], strides = [1, 1]} : vector<16x384xf32> to vector<16x128xf32>
    %593 = arith.addf %592, %391 : vector<16x128xf32>
    %594 = vector.extract_strided_slice %568 {offsets = [0, 256], sizes = [16, 128], strides = [1, 1]} : vector<16x384xbf16> to vector<16x128xbf16>
    %595 = arith.extf %581 : vector<16x128xbf16> to vector<16x128xf32>
    %596 = arith.mulf %595, %593 : vector<16x128xf32>
    %597 = arith.extf %594 : vector<16x128xbf16> to vector<16x128xf32>
    %598 = arith.addf %597, %596 : vector<16x128xf32>
    %599 = arith.truncf %598 : vector<16x128xf32> to vector<16x128xbf16>
    %600 = math.tanh %599 : vector<16x128xbf16>
    %cst_138 = arith.constant 1.000000e+00 : bf16
    %601 = vector.broadcast %cst_138 : bf16 to vector<16x128xbf16>
    %602 = arith.subf %601, %591 : vector<16x128xbf16>
    %603 = arith.mulf %602, %600 : vector<16x128xbf16>
    %604 = arith.extf %603 : vector<16x128xbf16> to vector<16x128xf32>
    %605 = arith.extf %591 : vector<16x128xbf16> to vector<16x128xf32>
    %606 = arith.mulf %605, %564 : vector<16x128xf32>
    %607 = arith.addf %604, %606 : vector<16x128xf32>
    %c5_i32_139 = arith.constant 5 : i32
    %c16_i32_140 = arith.constant 16 : i32
    %608 = arith.muli %c5_i32_139, %c16_i32_140 : i32
    %609 = tpu.assume_multiple %608, 16 : i32
    %610 = arith.index_cast %609 : i32 to index
    %c0_141 = arith.constant 0 : index
    %611 = vector.load %arg13[%610, %c0_141] : memref<128x384xbf16, #tpu.memory_space<vmem>>, vector<16x384xbf16>
    %612 = arith.truncf %607 : vector<16x128xf32> to vector<16x128xbf16>
    %c0_142 = arith.constant 0 : index
    %c0_143 = arith.constant 0 : index
    %613 = vector.load %arg7[%c0_142, %c0_143] : memref<128x384xbf16, #tpu.memory_space<vmem>>, vector<128x384xbf16>
    %cst_144 = arith.constant dense<0.000000e+00> : vector<16x384xf32>
    %614 = tpu.matmul %612, %613, %cst_144 {dimension_numbers = #tpu.dot_dimension_numbers<[1], [0], [0], [1], [0, 0, 1, 1], [], []>} : vector<16x128xbf16>, vector<128x384xbf16>, vector<16x384xf32> -> vector<16x384xf32>
    %615 = vector.extract_strided_slice %611 {offsets = [0, 0], sizes = [16, 128], strides = [1, 1]} : vector<16x384xbf16> to vector<16x128xbf16>
    %616 = vector.extract_strided_slice %614 {offsets = [0, 0], sizes = [16, 128], strides = [1, 1]} : vector<16x384xf32> to vector<16x128xf32>
    %617 = arith.extf %615 : vector<16x128xbf16> to vector<16x128xf32>
    %618 = arith.addf %617, %616 : vector<16x128xf32>
    %619 = arith.truncf %618 : vector<16x128xf32> to vector<16x128xbf16>
    %620 = arith.negf %619 : vector<16x128xbf16>
    %621 = math.exp %620 : vector<16x128xbf16>
    %cst_145 = arith.constant 1.000000e+00 : bf16
    %622 = vector.broadcast %cst_145 : bf16 to vector<16x128xbf16>
    %623 = arith.addf %622, %621 : vector<16x128xbf16>
    %624 = arith.divf %622, %623 : vector<16x128xbf16>
    %625 = vector.extract_strided_slice %611 {offsets = [0, 128], sizes = [16, 128], strides = [1, 1]} : vector<16x384xbf16> to vector<16x128xbf16>
    %626 = vector.extract_strided_slice %614 {offsets = [0, 128], sizes = [16, 128], strides = [1, 1]} : vector<16x384xf32> to vector<16x128xf32>
    %627 = arith.extf %625 : vector<16x128xbf16> to vector<16x128xf32>
    %628 = arith.addf %627, %626 : vector<16x128xf32>
    %629 = arith.truncf %628 : vector<16x128xf32> to vector<16x128xbf16>
    %630 = arith.negf %629 : vector<16x128xbf16>
    %631 = math.exp %630 : vector<16x128xbf16>
    %cst_146 = arith.constant 1.000000e+00 : bf16
    %632 = vector.broadcast %cst_146 : bf16 to vector<16x128xbf16>
    %633 = arith.addf %632, %631 : vector<16x128xbf16>
    %634 = arith.divf %632, %633 : vector<16x128xbf16>
    %635 = vector.extract_strided_slice %614 {offsets = [0, 256], sizes = [16, 128], strides = [1, 1]} : vector<16x384xf32> to vector<16x128xf32>
    %636 = arith.addf %635, %391 : vector<16x128xf32>
    %637 = vector.extract_strided_slice %611 {offsets = [0, 256], sizes = [16, 128], strides = [1, 1]} : vector<16x384xbf16> to vector<16x128xbf16>
    %638 = arith.extf %624 : vector<16x128xbf16> to vector<16x128xf32>
    %639 = arith.mulf %638, %636 : vector<16x128xf32>
    %640 = arith.extf %637 : vector<16x128xbf16> to vector<16x128xf32>
    %641 = arith.addf %640, %639 : vector<16x128xf32>
    %642 = arith.truncf %641 : vector<16x128xf32> to vector<16x128xbf16>
    %643 = math.tanh %642 : vector<16x128xbf16>
    %cst_147 = arith.constant 1.000000e+00 : bf16
    %644 = vector.broadcast %cst_147 : bf16 to vector<16x128xbf16>
    %645 = arith.subf %644, %634 : vector<16x128xbf16>
    %646 = arith.mulf %645, %643 : vector<16x128xbf16>
    %647 = arith.extf %646 : vector<16x128xbf16> to vector<16x128xf32>
    %648 = arith.extf %634 : vector<16x128xbf16> to vector<16x128xf32>
    %649 = arith.mulf %648, %607 : vector<16x128xf32>
    %650 = arith.addf %647, %649 : vector<16x128xf32>
    %c6_i32_148 = arith.constant 6 : i32
    %c16_i32_149 = arith.constant 16 : i32
    %651 = arith.muli %c6_i32_148, %c16_i32_149 : i32
    %652 = tpu.assume_multiple %651, 16 : i32
    %653 = arith.index_cast %652 : i32 to index
    %c0_150 = arith.constant 0 : index
    %654 = vector.load %arg13[%653, %c0_150] : memref<128x384xbf16, #tpu.memory_space<vmem>>, vector<16x384xbf16>
    %655 = arith.truncf %650 : vector<16x128xf32> to vector<16x128xbf16>
    %c0_151 = arith.constant 0 : index
    %c0_152 = arith.constant 0 : index
    %656 = vector.load %arg7[%c0_151, %c0_152] : memref<128x384xbf16, #tpu.memory_space<vmem>>, vector<128x384xbf16>
    %cst_153 = arith.constant dense<0.000000e+00> : vector<16x384xf32>
    %657 = tpu.matmul %655, %656, %cst_153 {dimension_numbers = #tpu.dot_dimension_numbers<[1], [0], [0], [1], [0, 0, 1, 1], [], []>} : vector<16x128xbf16>, vector<128x384xbf16>, vector<16x384xf32> -> vector<16x384xf32>
    %658 = vector.extract_strided_slice %654 {offsets = [0, 0], sizes = [16, 128], strides = [1, 1]} : vector<16x384xbf16> to vector<16x128xbf16>
    %659 = vector.extract_strided_slice %657 {offsets = [0, 0], sizes = [16, 128], strides = [1, 1]} : vector<16x384xf32> to vector<16x128xf32>
    %660 = arith.extf %658 : vector<16x128xbf16> to vector<16x128xf32>
    %661 = arith.addf %660, %659 : vector<16x128xf32>
    %662 = arith.truncf %661 : vector<16x128xf32> to vector<16x128xbf16>
    %663 = arith.negf %662 : vector<16x128xbf16>
    %664 = math.exp %663 : vector<16x128xbf16>
    %cst_154 = arith.constant 1.000000e+00 : bf16
    %665 = vector.broadcast %cst_154 : bf16 to vector<16x128xbf16>
    %666 = arith.addf %665, %664 : vector<16x128xbf16>
    %667 = arith.divf %665, %666 : vector<16x128xbf16>
    %668 = vector.extract_strided_slice %654 {offsets = [0, 128], sizes = [16, 128], strides = [1, 1]} : vector<16x384xbf16> to vector<16x128xbf16>
    %669 = vector.extract_strided_slice %657 {offsets = [0, 128], sizes = [16, 128], strides = [1, 1]} : vector<16x384xf32> to vector<16x128xf32>
    %670 = arith.extf %668 : vector<16x128xbf16> to vector<16x128xf32>
    %671 = arith.addf %670, %669 : vector<16x128xf32>
    %672 = arith.truncf %671 : vector<16x128xf32> to vector<16x128xbf16>
    %673 = arith.negf %672 : vector<16x128xbf16>
    %674 = math.exp %673 : vector<16x128xbf16>
    %cst_155 = arith.constant 1.000000e+00 : bf16
    %675 = vector.broadcast %cst_155 : bf16 to vector<16x128xbf16>
    %676 = arith.addf %675, %674 : vector<16x128xbf16>
    %677 = arith.divf %675, %676 : vector<16x128xbf16>
    %678 = vector.extract_strided_slice %657 {offsets = [0, 256], sizes = [16, 128], strides = [1, 1]} : vector<16x384xf32> to vector<16x128xf32>
    %679 = arith.addf %678, %391 : vector<16x128xf32>
    %680 = vector.extract_strided_slice %654 {offsets = [0, 256], sizes = [16, 128], strides = [1, 1]} : vector<16x384xbf16> to vector<16x128xbf16>
    %681 = arith.extf %667 : vector<16x128xbf16> to vector<16x128xf32>
    %682 = arith.mulf %681, %679 : vector<16x128xf32>
    %683 = arith.extf %680 : vector<16x128xbf16> to vector<16x128xf32>
    %684 = arith.addf %683, %682 : vector<16x128xf32>
    %685 = arith.truncf %684 : vector<16x128xf32> to vector<16x128xbf16>
    %686 = math.tanh %685 : vector<16x128xbf16>
    %cst_156 = arith.constant 1.000000e+00 : bf16
    %687 = vector.broadcast %cst_156 : bf16 to vector<16x128xbf16>
    %688 = arith.subf %687, %677 : vector<16x128xbf16>
    %689 = arith.mulf %688, %686 : vector<16x128xbf16>
    %690 = arith.extf %689 : vector<16x128xbf16> to vector<16x128xf32>
    %691 = arith.extf %677 : vector<16x128xbf16> to vector<16x128xf32>
    %692 = arith.mulf %691, %650 : vector<16x128xf32>
    %693 = arith.addf %690, %692 : vector<16x128xf32>
    %c7_i32_157 = arith.constant 7 : i32
    %c16_i32_158 = arith.constant 16 : i32
    %694 = arith.muli %c7_i32_157, %c16_i32_158 : i32
    %695 = tpu.assume_multiple %694, 16 : i32
    %696 = arith.index_cast %695 : i32 to index
    %c0_159 = arith.constant 0 : index
    %697 = vector.load %arg13[%696, %c0_159] : memref<128x384xbf16, #tpu.memory_space<vmem>>, vector<16x384xbf16>
    %698 = arith.truncf %693 : vector<16x128xf32> to vector<16x128xbf16>
    %c0_160 = arith.constant 0 : index
    %c0_161 = arith.constant 0 : index
    %699 = vector.load %arg7[%c0_160, %c0_161] : memref<128x384xbf16, #tpu.memory_space<vmem>>, vector<128x384xbf16>
    %cst_162 = arith.constant dense<0.000000e+00> : vector<16x384xf32>
    %700 = tpu.matmul %698, %699, %cst_162 {dimension_numbers = #tpu.dot_dimension_numbers<[1], [0], [0], [1], [0, 0, 1, 1], [], []>} : vector<16x128xbf16>, vector<128x384xbf16>, vector<16x384xf32> -> vector<16x384xf32>
    %701 = vector.extract_strided_slice %697 {offsets = [0, 0], sizes = [16, 128], strides = [1, 1]} : vector<16x384xbf16> to vector<16x128xbf16>
    %702 = vector.extract_strided_slice %700 {offsets = [0, 0], sizes = [16, 128], strides = [1, 1]} : vector<16x384xf32> to vector<16x128xf32>
    %703 = arith.extf %701 : vector<16x128xbf16> to vector<16x128xf32>
    %704 = arith.addf %703, %702 : vector<16x128xf32>
    %705 = arith.truncf %704 : vector<16x128xf32> to vector<16x128xbf16>
    %706 = arith.negf %705 : vector<16x128xbf16>
    %707 = math.exp %706 : vector<16x128xbf16>
    %cst_163 = arith.constant 1.000000e+00 : bf16
    %708 = vector.broadcast %cst_163 : bf16 to vector<16x128xbf16>
    %709 = arith.addf %708, %707 : vector<16x128xbf16>
    %710 = arith.divf %708, %709 : vector<16x128xbf16>
    %711 = vector.extract_strided_slice %697 {offsets = [0, 128], sizes = [16, 128], strides = [1, 1]} : vector<16x384xbf16> to vector<16x128xbf16>
    %712 = vector.extract_strided_slice %700 {offsets = [0, 128], sizes = [16, 128], strides = [1, 1]} : vector<16x384xf32> to vector<16x128xf32>
    %713 = arith.extf %711 : vector<16x128xbf16> to vector<16x128xf32>
    %714 = arith.addf %713, %712 : vector<16x128xf32>
    %715 = arith.truncf %714 : vector<16x128xf32> to vector<16x128xbf16>
    %716 = arith.negf %715 : vector<16x128xbf16>
    %717 = math.exp %716 : vector<16x128xbf16>
    %cst_164 = arith.constant 1.000000e+00 : bf16
    %718 = vector.broadcast %cst_164 : bf16 to vector<16x128xbf16>
    %719 = arith.addf %718, %717 : vector<16x128xbf16>
    %720 = arith.divf %718, %719 : vector<16x128xbf16>
    %721 = vector.extract_strided_slice %700 {offsets = [0, 256], sizes = [16, 128], strides = [1, 1]} : vector<16x384xf32> to vector<16x128xf32>
    %722 = arith.addf %721, %391 : vector<16x128xf32>
    %723 = vector.extract_strided_slice %697 {offsets = [0, 256], sizes = [16, 128], strides = [1, 1]} : vector<16x384xbf16> to vector<16x128xbf16>
    %724 = arith.extf %710 : vector<16x128xbf16> to vector<16x128xf32>
    %725 = arith.mulf %724, %722 : vector<16x128xf32>
    %726 = arith.extf %723 : vector<16x128xbf16> to vector<16x128xf32>
    %727 = arith.addf %726, %725 : vector<16x128xf32>
    %728 = arith.truncf %727 : vector<16x128xf32> to vector<16x128xbf16>
    %729 = math.tanh %728 : vector<16x128xbf16>
    %cst_165 = arith.constant 1.000000e+00 : bf16
    %730 = vector.broadcast %cst_165 : bf16 to vector<16x128xbf16>
    %731 = arith.subf %730, %720 : vector<16x128xbf16>
    %732 = arith.mulf %731, %729 : vector<16x128xbf16>
    %733 = arith.extf %732 : vector<16x128xbf16> to vector<16x128xf32>
    %734 = arith.extf %720 : vector<16x128xbf16> to vector<16x128xf32>
    %735 = arith.mulf %734, %693 : vector<16x128xf32>
    %736 = arith.addf %733, %735 : vector<16x128xf32>
    %c8_i32_166 = arith.constant 8 : i32
    %737 = arith.truncf %736 : vector<16x128xf32> to vector<16x128xbf16>
    %c0_167 = arith.constant 0 : index
    %c0_168 = arith.constant 0 : index
    %738 = vector.load %arg10[%c0_167, %c0_168] : memref<128x128xbf16, #tpu.memory_space<vmem>>, vector<128x128xbf16>
    %cst_169 = arith.constant dense<0.000000e+00> : vector<16x128xf32>
    %739 = tpu.matmul %737, %738, %cst_169 {dimension_numbers = #tpu.dot_dimension_numbers<[1], [0], [0], [1], [0, 0, 1, 1], [], []>} : vector<16x128xbf16>, vector<128x128xbf16>, vector<16x128xf32> -> vector<16x128xf32>
    %c0_170 = arith.constant 0 : index
    %c0_171 = arith.constant 0 : index
    %740 = vector.load %arg11[%c0_170, %c0_171] : memref<1x128xf32, #tpu.memory_space<vmem>>, vector<1x128xf32>
    %741 = vector.broadcast %740 : vector<1x128xf32> to vector<16x128xf32>
    %742 = arith.addf %739, %741 : vector<16x128xf32>
    %c0_172 = arith.constant 0 : index
    %c0_173 = arith.constant 0 : index
    %743 = vector.load %arg12[%c0_172, %c0_173] : memref<16x128xf32, #tpu.memory_space<vmem>>, vector<16x128xf32>
    tpu.vector_store %arg12[%c0_172, %c0_173], %742 {strides = array<i32>} : memref<16x128xf32, #tpu.memory_space<vmem>>, vector<16x128xf32>,
    return
  }
  func.func @transform_0(%arg0: i32) -> (i32, i32, i32) {
    %c0_i32 = arith.constant 0 : i32
    %c0_i32_0 = arith.constant 0 : i32
    %c0_i32_1 = arith.constant 0 : i32
    return %arg0, %c0_i32, %c0_i32_0 : i32, i32, i32
  }
  func.func @transform_1(%arg0: i32) -> (i32, i32) {
    %c0_i32 = arith.constant 0 : i32
    %c0_i32_0 = arith.constant 0 : i32
    %c0_i32_1 = arith.constant 0 : i32
    return %c0_i32, %c0_i32_0 : i32, i32
  }
  func.func @transform_2(%arg0: i32) -> (i32, i32) {
    %c0_i32 = arith.constant 0 : i32
    %c0_i32_0 = arith.constant 0 : i32
    %c0_i32_1 = arith.constant 0 : i32
    return %c0_i32, %c0_i32_0 : i32, i32
  }
  func.func @transform_3(%arg0: i32) -> (i32, i32) {
    %c0_i32 = arith.constant 0 : i32
    %c0_i32_0 = arith.constant 0 : i32
    %c0_i32_1 = arith.constant 0 : i32
    return %c0_i32, %c0_i32_0 : i32, i32
  }
  func.func @transform_4(%arg0: i32) -> (i32, i32) {
    %c0_i32 = arith.constant 0 : i32
    %c0_i32_0 = arith.constant 0 : i32
    %c0_i32_1 = arith.constant 0 : i32
    return %c0_i32, %c0_i32_0 : i32, i32
  }
  func.func @transform_5(%arg0: i32) -> (i32, i32) {
    %c0_i32 = arith.constant 0 : i32
    %c0_i32_0 = arith.constant 0 : i32
    %c0_i32_1 = arith.constant 0 : i32
    return %c0_i32, %c0_i32_0 : i32, i32
  }
  func.func @transform_6(%arg0: i32) -> (i32, i32) {
    %c0_i32 = arith.constant 0 : i32
    %c0_i32_0 = arith.constant 0 : i32
    %c0_i32_1 = arith.constant 0 : i32
    return %c0_i32, %c0_i32_0 : i32, i32
  }
  func.func @transform_7(%arg0: i32) -> (i32, i32) {
    %c0_i32 = arith.constant 0 : i32
    %c0_i32_0 = arith.constant 0 : i32
    %c0_i32_1 = arith.constant 0 : i32
    return %c0_i32, %c0_i32_0 : i32, i32
  }
  func.func @transform_8(%arg0: i32) -> (i32, i32) {
    %c0_i32 = arith.constant 0 : i32
    %c0_i32_0 = arith.constant 0 : i32
    %c0_i32_1 = arith.constant 0 : i32
    return %c0_i32, %c0_i32_0 : i32, i32
  }
  func.func @transform_9(%arg0: i32) -> (i32, i32) {
    %c0_i32 = arith.constant 0 : i32
    %c0_i32_0 = arith.constant 0 : i32
    %c0_i32_1 = arith.constant 0 : i32
    return %c0_i32, %c0_i32_0 : i32, i32
  }
  func.func @transform_10(%arg0: i32) -> (i32, i32) {
    %c0_i32 = arith.constant 0 : i32
    %c0_i32_0 = arith.constant 0 : i32
    %c0_i32_1 = arith.constant 0 : i32
    return %c0_i32, %c0_i32_0 : i32, i32
  }
  func.func @transform_11(%arg0: i32) -> (i32, i32) {
    %c0_i32 = arith.constant 0 : i32
    %c0_i32_0 = arith.constant 0 : i32
    return %arg0, %c0_i32 : i32, i32
  }
}

</mosaic_0001>

<bundles_post_ra>
// kernel: tpu_custom_call.1
= control target key start
LH: loop header
LB: loop body
LE: loop exit
PB: predicated region body
PF: predicated region fallthrough
CT: control target
= control target key end

     0   :  { %16 = vsyncpa [#allocation5], 0  ;;  %s8385_s0 = inlined_call_operand.hbm [shape: bf16[1,128,128], index: 0, kind: input, shape index: {}]   ;;  %s8386_s1 = inlined_call_operand.hbm [shape: bf16[128,384], index: 1, kind: input, shape index: {}]   ;;  %s8387_s2 = inlined_call_operand.hbm [shape: bf16[128,384], index: 2, kind: input, shape index: {}]   ;;  %s8388_s3 = inlined_call_operand.hbm [shape: f32[1,384], index: 3, kind: input, shape index: {}]   ;;  %s8389_s4 = inlined_call_operand.vmem [shape: f32[1,128], index: 4, kind: input, shape index: {}]   ;;  %s8390_s5 = inlined_call_operand.hbm [shape: bf16[128,384], index: 5, kind: input, shape index: {}]   ;;  %s8391_s6 = inlined_call_operand.hbm [shape: bf16[128,384], index: 6, kind: input, shape index: {}]   ;;  %s8392_s7 = inlined_call_operand.vmem [shape: f32[1,384], index: 7, kind: input, shape index: {}]   ;;  %s8393_s8 = inlined_call_operand.vmem [shape: f32[1,128], index: 8, kind: input, shape index: {}]   ;;  %s8394_s9 = inlined_call_operand.hbm [shape: bf16[128,128], index: 9, kind: input, shape index: {}]   ;;  %s8395_s10 = inlined_call_operand.vmem [shape: f32[1,128], index: 10, kind: input, shape index: {}]   ;;  %s8396_s11 = inlined_call_operand.hbm [shape: f32[16,128], index: 11, kind: output, shape index: {}]  }
   0x1   :  { %17 = vsyncpa [#allocation8], 0 }
   0x2   :  { %18 = vsyncpa [#allocation11], 0 }
   0x3   :  { %19 = vsyncpa [#allocation14], 0  ;;  %s38_s19 = sshll.u32 %s8386_s1, 4  ;;  %s39_s19 = int_to_ptr.hbm [resolvable:$true] %s38_s19 }
   0x4   :  { %20 = vsyncpa [#allocation6], 0  ;;  %s7457_s20 = smov [#allocation7]   ;;  %s65_s24 = sshll.u32 %s8388_s3, 4  ;;  %s66_s24 = int_to_ptr.hbm [resolvable:$true] %s65_s24 }
   0x5   :  { %s40_s21 = sshll.u32 %s7457_s20, 4  ;;  %s7458_s25 = smov 192   ;;  %s41_s21 = int_to_ptr.vmem [resolvable:$true] %s40_s21 }
   0x6   :  { %s7459_s26 = smov 12   ;;  %s7460_s27 = smov [#allocation10]  }
   0x7   :  { %46 = dma.hbm_to_vmem [thread:$0]  %s39_s19, 3072, %s41_s21, [#allocation8], %s7458_s25, %s7458_s25, %s7459_s26  }
   0x8   :  { %s67_s28 = sshll.u32 %s7460_s27, 4  ;;  %s90_s30 = sshll.u32 %s8391_s6, 4  ;;  %s68_s28 = int_to_ptr.vmem [resolvable:$true] %s67_s28  ;;  %s91_s30 = int_to_ptr.hbm [resolvable:$true] %s90_s30 }
   0x9   :  { %70 = dma.hbm_to_vmem [thread:$0]  %s66_s24, 48, %s68_s28, [#allocation11]  }
   0xa   :  { %s25_s3 = sshll.u32 %s8385_s0, 4  ;;  %s7461_s14 = smov [#allocation13]   ;;  %s26_s3 = int_to_ptr.hbm [resolvable:$true] %s25_s3 }
   0xb   :  { %s92_s15 = sshll.u32 %s7461_s14, 4  ;;  %s7462_s16 = smov [#allocation4]   ;;  %s93_s15 = int_to_ptr.vmem [resolvable:$true] %s92_s15 }
   0xc   :  { %98 = dma.hbm_to_vmem [thread:$0]  %s91_s30, 3072, %s93_s15, [#allocation14], %s7458_s25, %s7458_s25, %s7459_s26  }
   0xd   :  { %s27_s17 = sshll.u32 %s7462_s16, 4  ;;  %s7463_s18 = smov 64   ;;  %s28_s17 = int_to_ptr.vmem [resolvable:$true] %s27_s17 }
   0xe   :  { %s7464_s6 = smov 4   ;;  %s51_s21 = sshll.u32 %s8387_s2, 4  ;;  %s52_s21 = int_to_ptr.hbm [resolvable:$true] %s51_s21 }
   0xf   :  { %33 = dma.hbm_to_vmem [thread:$0]  %s26_s3, 1024, %s28_s17, [#allocation5], %s7463_s18, %s7463_s18, %s7464_s6  }
  0x10   :  { %s7465_s0 = smov [#allocation9]   ;;  %s77_s27 = sshll.u32 %s8390_s5, 4  ;;  %s78_s27 = int_to_ptr.hbm [resolvable:$true] %s77_s27 }
  0x11   :  { %s53_s22 = sshll.u32 %s7465_s0, 4  ;;  %s7466_s28 = smov [#allocation12]   ;;  %s54_s22 = int_to_ptr.vmem [resolvable:$true] %s53_s22 }
  0x12   :  { %59 = dma.hbm_to_vmem [thread:$0]  %s52_s21, 3072, %s54_s22, [#allocation8], %s7458_s25, %s7458_s25, %s7459_s26  }
  0x13   :  { %s79_s29 = sshll.u32 %s7466_s28, 4  ;;  %s107_s12 = sshll.u32 %s8394_s9, 4  ;;  %s80_s29 = int_to_ptr.vmem [resolvable:$true] %s79_s29  ;;  %s108_s12 = int_to_ptr.hbm [resolvable:$true] %s107_s12 }
  0x14   :  { %85 = dma.hbm_to_vmem [thread:$0]  %s78_s27, 3072, %s80_s29, [#allocation11], %s7458_s25, %s7458_s25, %s7459_s26  }
  0x15   :  { %s7467_s2 = smov [#allocation15]  }
  0x16   :  { %s109_s13 = sshll.u32 %s7467_s2, 4  ;;  %s110_s13 = int_to_ptr.vmem [resolvable:$true] %s109_s13 }
  0x17   :  { %115 = dma.hbm_to_vmem [thread:$0]  %s108_s12, 1024, %s110_s13, [#allocation14], %s7463_s18, %s7463_s18, %s7464_s6  }
  0x18   :  { %7447 = dma.done.wait [#allocation5], 1024  }
  0x19   :  { %7448 = vsyncadd [#allocation5], 4294966272 }
  0x1a   :  { %7449 = dma.done.wait [#allocation8], 6144  }
  0x1b   :  { %7450 = vsyncadd [#allocation8], 4294961152 }
  0x1c   :  { %7451 = dma.done.wait [#allocation11], 3120  }
  0x1d   :  { %7452 = vsyncadd [#allocation11], 4294964176 }
  0x1e   :  { %7453 = dma.done.wait [#allocation14], 4096  }
  0x1f   :  { %7454 = vsyncadd [#allocation14], 4294963200  ;;  %v5516_v0 = vld [vmem:[#allocation9 + $0xa8] sm:$0xf]  ;;  %v6508_v1 = vld [vmem:[#allocation9 + $0xb0] sm:$0xf0] }
  0x20   :  { %v5420_v2 = vld [vmem:[#allocation7 + $0xa8] sm:$0xf]  ;;  %v5517_v3 = vor.u32 %v6508_v1, %v5516_v0  ;;  %v6484_v4 = vld [vmem:[#allocation7 + $0xb0] sm:$0xf0]  ;;  %v6483_v5 = vld [vmem:[#allocation7 + $0xac] sm:$0xf] }
  0x21   :  { %v5422_v6 = vld [vmem:[#allocation7 + $0xb4] sm:$0xf0]  ;;  %v5421_v7 = vor.u32 %v6484_v4, %v5420_v2  ;;  %v5504_v9 = vld [vmem:[#allocation9 + $0x90] sm:$0xf]  ;;  %v6505_v10 = vld [vmem:[#allocation9 + $0x98] sm:$0xf0] }
  0x22   :  { %v5425_v8 = vor.u32 %v6483_v5, %v5422_v6  ;;  %v5408_v11 = vld [vmem:[#allocation7 + $0x90] sm:$0xf]  ;;  %762 = vmatpush.bf16.msra.mxu3 %v5517_v3  ;;  %v5505_v12 = vor.u32 %v6505_v10, %v5504_v9  ;;  %v6481_v13 = vld [vmem:[#allocation7 + $0x98] sm:$0xf0]  ;;  %v6480_v14 = vld [vmem:[#allocation7 + $0x94] sm:$0xf] }
  0x23   :  { %v5410_v15 = vld [vmem:[#allocation7 + $0x9c] sm:$0xf0]  ;;  %381 = vmatpush.bf16.msra.mxu0 %v5421_v7  ;;  %v5409_v16 = vor.u32 %v6481_v13, %v5408_v11  ;;  %v5492_v18 = vld [vmem:[#allocation9 + $0x78] sm:$0xf]  ;;  %v6502_v19 = vld [vmem:[#allocation9 + $0x80] sm:$0xf0] }
  0x24   :  { %430 = vmatpush.bf16.msra.mxu1 %v5425_v8  ;;  %v5413_v17 = vor.u32 %v6480_v14, %v5410_v15  ;;  %v5396_v20 = vld [vmem:[#allocation7 + $0x78] sm:$0xf]  ;;  %v6478_v21 = vld [vmem:[#allocation7 + $0x80] sm:$0xf0]  ;;  %v6477_v22 = vld [vmem:[#allocation7 + $0x7c] sm:$0xf]  ;;  %v5493_v24 = vor.u32 %v6502_v19, %v5492_v18 }
  0x25   :  { %v5398_v23 = vld [vmem:[#allocation7 + $0x84] sm:$0xf0]  ;;  %v5397_v25 = vor.u32 %v6478_v21, %v5396_v20  ;;  %v5480_v27 = vld [vmem:[#allocation9 + $0x60] sm:$0xf]  ;;  %v6499_v28 = vld [vmem:[#allocation9 + $0x68] sm:$0xf0] }
  0x26   :  { %763 = vmatpush.bf16.msra.mxu3 %v5505_v12  ;;  %v5401_v26 = vor.u32 %v6477_v22, %v5398_v23  ;;  %v5384_v29 = vld [vmem:[#allocation7 + $0x60] sm:$0xf]  ;;  %v6475_v30 = vld [vmem:[#allocation7 + $0x68] sm:$0xf0]  ;;  %v6474_v31 = vld [vmem:[#allocation7 + $0x64] sm:$0xf]  ;;  %v5481_v33 = vor.u32 %v6499_v28, %v5480_v27 }
  0x27   :  { %382 = vmatpush.bf16.msra.mxu0 %v5409_v16  ;;  %v5386_v32 = vld [vmem:[#allocation7 + $0x6c] sm:$0xf0]  ;;  %v5385_v34 = vor.u32 %v6475_v30, %v5384_v29  ;;  %v5468_v36 = vld [vmem:[#allocation9 + $0x48] sm:$0xf]  ;;  %v6496_v37 = vld [vmem:[#allocation9 + $0x50] sm:$0xf0] }
  0x28   :  { %431 = vmatpush.bf16.msra.mxu1 %v5413_v17  ;;  %v5389_v35 = vor.u32 %v6474_v31, %v5386_v32  ;;  %v5372_v38 = vld [vmem:[#allocation7 + $0x48] sm:$0xf]  ;;  %v6472_v39 = vld [vmem:[#allocation7 + $0x50] sm:$0xf0]  ;;  %v6471_v40 = vld [vmem:[#allocation7 + $0x4c] sm:$0xf]  ;;  %v5469_v42 = vor.u32 %v6496_v37, %v5468_v36 }
  0x29   :  { %v5374_v41 = vld [vmem:[#allocation7 + $0x54] sm:$0xf0]  ;;  %v5373_v43 = vor.u32 %v6472_v39, %v5372_v38  ;;  %v5456_v45 = vld [vmem:[#allocation9 + $0x30] sm:$0xf]  ;;  %v6493_v46 = vld [vmem:[#allocation9 + $0x38] sm:$0xf0] }
  0x2a   :  { %764 = vmatpush.bf16.msra.mxu3 %v5493_v24  ;;  %v5377_v44 = vor.u32 %v6471_v40, %v5374_v41  ;;  %v5360_v47 = vld [vmem:[#allocation7 + $0x30] sm:$0xf]  ;;  %v6469_v48 = vld [vmem:[#allocation7 + $0x38] sm:$0xf0]  ;;  %v6468_v49 = vld [vmem:[#allocation7 + $0x34] sm:$0xf]  ;;  %v5457_v53 = vor.u32 %v6493_v46, %v5456_v45 }
  0x2b   :  { %383 = vmatpush.bf16.msra.mxu0 %v5397_v25  ;;  %v5362_v50 = vld [vmem:[#allocation7 + $0x3c] sm:$0xf0]  ;;  %v5428_v51 = vld [vmem:[#allocation7 + $0xb0] sm:$0xf]  ;;  %v6485_v52 = vld [vmem:[#allocation7 + $0xb8] sm:$0xf0]  ;;  %v5361_v57 = vor.u32 %v6469_v48, %v5360_v47 }
  0x2c   :  { %432 = vmatpush.bf16.msra.mxu1 %v5401_v26  ;;  %v5444_v54 = vld [vmem:[#allocation9 + $0x18] sm:$0xf]  ;;  %v5429_v55 = vor.u32 %v6485_v52, %v5428_v51  ;;  %v5365_v58 = vor.u32 %v6468_v49, %v5362_v50  ;;  %v6490_v59 = vld [vmem:[#allocation9 + $0x20] sm:$0xf0]  ;;  %v6465_v63 = vld [vmem:[#allocation7 + $0x1c] sm:$0xf] }
  0x2d   :  { %v5416_v56 = vld [vmem:[#allocation7 + $0x98] sm:$0xf]  ;;  %v6482_v61 = vld [vmem:[#allocation7 + $0xa0] sm:$0xf0]  ;;  %v5350_v0 = vld [vmem:[#allocation7 + $0x24] sm:$0xf0]  ;;  %v5445_v5 = vor.u32 %v6490_v59, %v5444_v54 }
  0x2e   :  { %765 = vmatpush.bf16.msra.mxu3 %v5481_v33  ;;  %v5348_v60 = vld [vmem:[#allocation7 + $0x18] sm:$0xf]  ;;  %v6466_v62 = vld [vmem:[#allocation7 + $0x20] sm:$0xf0]  ;;  %479 = vmatpush.bf16.msra.mxu2 %v5429_v55  ;;  %v5417_v1 = vor.u32 %v6482_v61, %v5416_v56  ;;  %v5432_v2 = vld [vmem:[#allocation9] sm:$0xf]  ;;  %v5353_v9 = vor.u32 %v6465_v63, %v5350_v0 }
  0x2f   :  { %384 = vmatpush.bf16.msra.mxu0 %v5385_v34  ;;  %v5404_v3 = vld [vmem:[#allocation7 + $0x80] sm:$0xf]  ;;  %v6479_v4 = vld [vmem:[#allocation7 + $0x88] sm:$0xf0]  ;;  %v5349_v8 = vor.u32 %v6466_v62, %v5348_v60  ;;  %v6462_v11 = vld [vmem:[#allocation7 + $0x4] sm:$0xf] }
  0x30   :  { %433 = vmatpush.bf16.msra.mxu1 %v5389_v35  ;;  %v6487_v6 = vld [vmem:[#allocation9 + $0x8] sm:$0xf0]  ;;  %v5336_v7 = vld [vmem:[#allocation7] sm:$0xf]  ;;  %v5338_v12 = vld [vmem:[#allocation7 + $0xc] sm:$0xf0]  ;;  %v5405_v14 = vor.u32 %v6479_v4, %v5404_v3 }
  0x31   :  { %v6463_v10 = vld [vmem:[#allocation7 + $0x8] sm:$0xf0]  ;;  %v5518_v15 = vld [vmem:[#allocation9 + $0xb4] sm:$0xf0]  ;;  %v5392_v16 = vld [vmem:[#allocation7 + $0x68] sm:$0xf]  ;;  %v5433_v18 = vor.u32 %v6487_v6, %v5432_v2  ;;  %v5341_v20 = vor.u32 %v6462_v11, %v5338_v12 }
  0x32   :  { %766 = vmatpush.bf16.msra.mxu3 %v5469_v42  ;;  %v6507_v13 = vld [vmem:[#allocation9 + $0xac] sm:$0xf]  ;;  %480 = vmatpush.bf16.msra.mxu2 %v5417_v1  ;;  %v6476_v17 = vld [vmem:[#allocation7 + $0x70] sm:$0xf0]  ;;  %v5337_v19 = vor.u32 %v6463_v10, %v5336_v7  ;;  %v5506_v24 = vld [vmem:[#allocation9 + $0x9c] sm:$0xf0] }
  0x33   :  { %385 = vmatpush.bf16.msra.mxu0 %v5373_v43  ;;  %v5521_v21 = vor.u32 %v6507_v13, %v5518_v15  ;;  %v6504_v22 = vld [vmem:[#allocation9 + $0x94] sm:$0xf]  ;;  %v5393_v23 = vor.u32 %v6476_v17, %v5392_v16  ;;  %v5380_v25 = vld [vmem:[#allocation7 + $0x50] sm:$0xf]  ;;  %v6473_v26 = vld [vmem:[#allocation7 + $0x58] sm:$0xf0] }
  0x34   :  { %434 = vmatpush.bf16.msra.mxu1 %v5377_v44  ;;  %v6454_v27 = vld [vmem:[#allocation4] sm:$0xff]  ;;  %v5509_v28 = vor.u32 %v6504_v22, %v5506_v24  ;;  %v6501_v29 = vld [vmem:[#allocation9 + $0x7c] sm:$0xf]  ;;  %v5381_v30 = vor.u32 %v6473_v26, %v5380_v25  ;;  %v5494_v31 = vld [vmem:[#allocation9 + $0x84] sm:$0xf0]  ;;  %v7468_v32 = vmov 0  }
  0x35   :  { %v5368_v33 = vld [vmem:[#allocation7 + $0x38] sm:$0xf]  ;;  %v6470_v34 = vld [vmem:[#allocation7 + $0x40] sm:$0xf0]  ;;  %v5497_v35 = vor.u32 %v6501_v29, %v5494_v31  ;;  %v5482_v38 = vld [vmem:[#allocation9 + $0x6c] sm:$0xf0] }
  0x36   :  { %767 = vmatpush.bf16.msra.mxu3 %v5457_v53  ;;  %481 = vmatpush.bf16.msra.mxu2 %v5405_v14  ;;  %v6498_v36 = vld [vmem:[#allocation9 + $0x64] sm:$0xf]  ;;  %v5369_v37 = vor.u32 %v6470_v34, %v5368_v33  ;;  %v5356_v39 = vld [vmem:[#allocation7 + $0x20] sm:$0xf]  ;;  %v6467_v40 = vld [vmem:[#allocation7 + $0x28] sm:$0xf0] }
  0x37   :  { %386 = vmatpush.bf16.msra.mxu0 %v5361_v57  ;;  %v5485_v41 = vor.u32 %v6498_v36, %v5482_v38  ;;  %v6495_v42 = vld [vmem:[#allocation9 + $0x4c] sm:$0xf]  ;;  %v5357_v43 = vor.u32 %v6467_v40, %v5356_v39  ;;  %v5470_v44 = vld [vmem:[#allocation9 + $0x54] sm:$0xf0]  ;;  %v5344_v45 = vld [vmem:[#allocation7 + $0x8] sm:$0xf] }
  0x38   :  { %435 = vmatpush.bf16.msra.mxu1 %v5365_v58  ;;  %v6464_v46 = vld [vmem:[#allocation7 + $0x10] sm:$0xf0]  ;;  %v5473_v47 = vor.u32 %v6495_v42, %v5470_v44  ;;  %v5458_v50 = vld [vmem:[#allocation9 + $0x3c] sm:$0xf0]  ;;  %v6489_v52 = vld [vmem:[#allocation9 + $0x1c] sm:$0xf] }
  0x39   :  { %v5345_v48 = vor.u32 %v6464_v46, %v5344_v45  ;;  %v6492_v49 = vld [vmem:[#allocation9 + $0x34] sm:$0xf]  ;;  %v5446_v53 = vld [vmem:[#allocation9 + $0x24] sm:$0xf0]  ;;  %v6486_v55 = vld [vmem:[#allocation9 + $0x4] sm:$0xf] }
  0x3a   :  { %768 = vmatpush.bf16.msra.mxu3 %v5445_v5  ;;  %482 = vmatpush.bf16.msra.mxu2 %v5393_v23  ;;  %v5461_v51 = vor.u32 %v6492_v49, %v5458_v50  ;;  %v5449_v54 = vor.u32 %v6489_v52, %v5446_v53  ;;  %v5434_v56 = vld [vmem:[#allocation9 + $0xc] sm:$0xf0]  ;;  %v6509_v58 = vld [vmem:[#allocation9 + $0xb8] sm:$0xf0]  ;;  %v5512_v61 = vld [vmem:[#allocation9 + $0x98] sm:$0xf] }
  0x3b   :  { %387 = vmatpush.bf16.msra.mxu0 %v5349_v8  ;;  %v5524_v57 = vld [vmem:[#allocation9 + $0xb0] sm:$0xf]  ;;  %v5437_v59 = vor.u32 %v6486_v55, %v5434_v56  ;;  %v6506_v62 = vld [vmem:[#allocation9 + $0xa0] sm:$0xf0]  ;;  %v6455_v63 = vld [vmem:[#allocation4 + $0x8] sm:$0xff]  ;;  %s7470_s22 = smov [#allocation16]  }
  0x3c   :  { %436 = vmatpush.bf16.msra.mxu1 %v5353_v9  ;;  %v5525_v60 = vor.u32 %v6509_v58, %v5524_v57  ;;  %v6531_v0 = vld [vmem:[#allocation9 + $0xac] sm:$0xf]  ;;  %v5614_v1 = vld [vmem:[#allocation9 + $0xb4] sm:$0xf0]  ;;  %v5513_v2 = vor.u32 %v6506_v62, %v5512_v61  ;;  %v5500_v4 = vld [vmem:[#allocation9 + $0x80] sm:$0xf] }
  0x3d   :  { %v5617_v3 = vor.u32 %v6531_v0, %v5614_v1  ;;  %v6503_v5 = vld [vmem:[#allocation9 + $0x88] sm:$0xf0]  ;;  %v5488_v7 = vld [vmem:[#allocation9 + $0x68] sm:$0xf]  ;;  %v6500_v8 = vld [vmem:[#allocation9 + $0x70] sm:$0xf0] }
  0x3e   :  { %769 = vmatpush.bf16.msra.mxu3 %v5433_v18  ;;  %483 = vmatpush.bf16.msra.mxu2 %v5381_v30  ;;  %v5501_v6 = vor.u32 %v6503_v5, %v5500_v4  ;;  %v5489_v9 = vor.u32 %v6500_v8, %v5488_v7  ;;  %v5476_v10 = vld [vmem:[#allocation9 + $0x50] sm:$0xf]  ;;  %v6497_v11 = vld [vmem:[#allocation9 + $0x58] sm:$0xf0]  ;;  %v5464_v13 = vld [vmem:[#allocation9 + $0x38] sm:$0xf] }
  0x3f   :  { %388 = vmatpush.bf16.msra.mxu0 %v5337_v19  ;;  %v5477_v12 = vor.u32 %v6497_v11, %v5476_v10  ;;  %v6494_v14 = vld [vmem:[#allocation9 + $0x40] sm:$0xf0]  ;;  %v5452_v16 = vld [vmem:[#allocation9 + $0x20] sm:$0xf]  ;;  %v6491_v17 = vld [vmem:[#allocation9 + $0x28] sm:$0xf0] }
  0x40   :  { %437 = vmatpush.bf16.msra.mxu1 %v5341_v20  ;;  %v5465_v15 = vor.u32 %v6494_v14, %v5464_v13  ;;  %v5453_v18 = vor.u32 %v6491_v17, %v5452_v16  ;;  %v5440_v19 = vld [vmem:[#allocation9 + $0x8] sm:$0xf]  ;;  %v6488_v20 = vld [vmem:[#allocation9 + $0x10] sm:$0xf0]  ;;  %v148_v23 = vld [vmem:[#allocation10] sm:$0x7] }
  0x41   :  { %770 = vmatmul.bf16.vlgmr.msra.gmra.mxu3 %v7468_v32  ;;  %v6456_v22 = vld [vmem:[#allocation4 + $0x10] sm:$0xff]  ;;  %v6457_v24 = vld [vmem:[#allocation4 + $0x18] sm:$0xff]  ;;  %v7569_v25 = vperm.slane %v148_v23, 0  ;;  %v7571_v26 = vperm.slane %v148_v23, 1  ;;  %v5602_v34 = vld [vmem:[#allocation9 + $0x9c] sm:$0xf0] }
  0x42   :  { %776 = vmatpush.bf16.msrb.mxu3 %v5521_v21  ;;  %389 = vmatmul.bf16.vlgmr.msra.gmra.mxu0 %v6454_v27  ;;  %v5441_v21 = vor.u32 %v6488_v20, %v5440_v19  ;;  %v6528_v33 = vld [vmem:[#allocation9 + $0x94] sm:$0xf]  ;;  %v5620_v46 = vld [vmem:[#allocation9 + $0xb0] sm:$0xf]  ;;  %v6525_v50 = vld [vmem:[#allocation9 + $0x7c] sm:$0xf] }
  0x43   :  { %438 = vmatmul.bf16.vlgmr.msra.gmra.mxu1 %v6454_v27  ;;  %484 = vmatpush.bf16.msra.mxu2 %v5369_v37  ;;  %v7577_v61 = vperm.slane %v148_v23, 2  ;;  %v6459_v4 = vld [vmem:[#allocation4 + $0x28] sm:$0xff]  ;;  %v5608_v20 = vld [vmem:[#allocation9 + $0x98] sm:$0xf]  ;;  %s5277_s23 = sshll.u32 %s7470_s22, 4  ;;  %s5279_s28 = sshll.u32 %s8396_s11, 4  ;;  %s5278_s23 = int_to_ptr.vmem [resolvable:$true] %s5277_s23  ;;  %s5280_s28 = int_to_ptr.hbm [resolvable:$true] %s5279_s28 }
  0x44   :  { %1113 = vmatpush.bf16.msrb.mxu0 %v5617_v3  ;;  %s7471_s29 = smov 128   ;;  %s7472_s1 = smov 8  }
  0x46   :  { %777 = vmatpush.bf16.msrb.mxu3 %v5509_v28 }
  0x47   :  { %485 = vmatpush.bf16.msra.mxu2 %v5357_v43 }
  0x4a   :  { %778 = vmatpush.bf16.msrb.mxu3 %v5497_v35  ;;  %v5605_v35 = vor.u32 %v6528_v33, %v5602_v34  ;;  %v6460_v33 = vld [vmem:[#allocation4 + $0x30] sm:$0xff]  ;;  %v5612_v34 = vld [vmem:[#allocation9 + $0xa8] sm:$0xf] }
  0x4b   :  { %486 = vmatpush.bf16.msra.mxu2 %v5345_v48  ;;  %v6458_v48 = vld [vmem:[#allocation4 + $0x20] sm:$0xff] }
  0x4c   :  { %1114 = vmatpush.bf16.msrb.mxu0 %v5605_v35 }
  0x4e   :  { %779 = vmatpush.bf16.msrb.mxu3 %v5485_v41  ;;  %487 = vmatmul.bf16.vlgmr.msra.gmra.mxu2 %v6454_v27 }
  0x52   :  { %780 = vmatpush.bf16.msrb.mxu3 %v5473_v47  ;;  %394 = vmatmul.bf16.gmra.mxu0 %v6455_v63  ;;  %v6533_v47 = vld [vmem:[#allocation9 + $0xb8] sm:$0xf0] }
  0x53   :  { %443 = vmatmul.bf16.gmra.mxu1 %v6455_v63  ;;  %v5621_v49 = vor.u32 %v6533_v47, %v5620_v46  ;;  %v6527_v46 = vld [vmem:[#allocation9 + $0x88] sm:$0xf0] }
  0x54   :  { %v6519_v47 = vld [vmem:[#allocation9 + $0x4c] sm:$0xf] }
  0x55   :  { %1127 = vmatpush.bf16.msrb.mxu1 %v5621_v49 }
  0x56   :  { %781 = vmatpush.bf16.msrb.mxu3 %v5461_v51  ;;  %v5590_v51 = vld [vmem:[#allocation9 + $0x84] sm:$0xf0] }
  0x57   :  { %v5593_v55 = vor.u32 %v6525_v50, %v5590_v51  ;;  %v5566_v50 = vld [vmem:[#allocation9 + $0x54] sm:$0xf0]  ;;  %v5600_v51 = vld [vmem:[#allocation9 + $0x90] sm:$0xf] }
  0x59   :  { %1115 = vmatpush.bf16.msrb.mxu0 %v5593_v55  ;;  %v5569_v55 = vor.u32 %v6519_v47, %v5566_v50  ;;  %v6518_v47 = vld [vmem:[#allocation9 + $0x40] sm:$0xf0] }
  0x5a   :  { %782 = vmatpush.bf16.msrb.mxu3 %v5449_v54 }
  0x5e   :  { %783 = vmatpush.bf16.msrb.mxu3 %v5437_v59  ;;  %492 = vmatmul.bf16.gmra.mxu2 %v6455_v63 }
  0x61   :  { %784 = vmatmul.bf16.vlgmr.msrb.gmra.mxu3 %v7468_v32 }
  0x62   :  { %790 = vmatpush.bf16.msra.mxu3 %v5525_v60  ;;  %399 = vmatmul.bf16.gmra.mxu0 %v6456_v22 }
  0x63   :  { %448 = vmatmul.bf16.gmra.mxu1 %v6456_v22 }
  0x66   :  { %791 = vmatpush.bf16.msra.mxu3 %v5513_v2 }
  0x6a   :  { %792 = vmatpush.bf16.msra.mxu3 %v5501_v6 }
  0x6e   :  { %793 = vmatpush.bf16.msra.mxu3 %v5489_v9  ;;  %497 = vmatmul.bf16.gmra.mxu2 %v6456_v22 }
  0x72   :  { %794 = vmatpush.bf16.msra.mxu3 %v5477_v12  ;;  %404 = vmatmul.bf16.gmra.mxu0 %v6457_v24 }
  0x73   :  { %453 = vmatmul.bf16.gmra.mxu1 %v6457_v24 }
  0x76   :  { %795 = vmatpush.bf16.msra.mxu3 %v5465_v15 }
  0x7a   :  { %796 = vmatpush.bf16.msra.mxu3 %v5453_v18 }
  0x7e   :  { %797 = vmatpush.bf16.msra.mxu3 %v5441_v21  ;;  %502 = vmatmul.bf16.gmra.mxu2 %v6457_v24  ;;  %v6530_v21 = vld [vmem:[#allocation9 + $0xa0] sm:$0xf0] }
  0x7f   :  { %v5609_v24 = vor.u32 %v6530_v21, %v5608_v20  ;;  %v6461_v20 = vld [vmem:[#allocation4 + $0x38] sm:$0xff] }
  0x81   :  { %798 = vmatmul.bf16.vlgmr.msra.gmra.mxu3 %v7468_v32  ;;  %1128 = vmatpush.bf16.msrb.mxu1 %v5609_v24  ;;  %v5564_v24 = vld [vmem:[#allocation9 + $0x48] sm:$0xf] }
  0x82   :  { %409 = vmatmul.bf16.gmra.mxu0 %v6458_v48 }
  0x83   :  { %458 = vmatmul.bf16.gmra.mxu1 %v6458_v48 }
  0x8e   :  { %507 = vmatmul.bf16.gmra.mxu2 %v6458_v48 }
  0x92   :  { %414 = vmatmul.bf16.gmra.mxu0 %v6459_v4 }
  0x93   :  { %463 = vmatmul.bf16.gmra.mxu1 %v6459_v4 }
  0x9e   :  { %512 = vmatmul.bf16.gmra.mxu2 %v6459_v4 }
  0xa2   :  { %419 = vmatmul.bf16.gmra.mxu0 %v6460_v33 }
  0xa3   :  { %468 = vmatmul.bf16.gmra.mxu1 %v6460_v33 }
  0xae   :  { %517 = vmatmul.bf16.gmra.mxu2 %v6460_v33  ;;  %v7590_v33 = vld [vmem:[%s8389_s4] ss:$0 sm:$0xff] }
  0xb2   :  { %424 = vmatmul.bf16.gmra.mxu0 %v6461_v20 }
  0xb3   :  { %473 = vmatmul.bf16.gmra.mxu1 %v6461_v20 }
  0xbe   :  { %522 = vmatmul.bf16.gmra.mxu2 %v6461_v20 }
  0xbf   :  { %v390_v27 = vpop.f32.mrf.mxu0 }
  0xc0   :  { %v439_v28 = vpop.f32.mrf.mxu1  ;;  %v391_v29 = vadd.f32 %v390_v27, %v7569_v25 }
  0xc1   :  { %v440_v30 = vadd.f32 %v439_v28, %v7571_v26 }
  0xc3   :  { %v528_v31 = vpack.c.bf16 %v440_v30, %v391_v29 }
  0xc4   :  { %v771_v36 = vpop.f32.mrf.mxu3 }
  0xc5   :  { %v804_v37 = vunpack.c.l.bf16 %v528_v31  ;;  %v844_v6 = vrot.slane %v528_v31, 4 }
  0xc7   :  { %v806_v38 = vadd.f32 %v804_v37, %v771_v36  ;;  %v392_v39 = vpop.f32.mrf.mxu0  ;;  %v848_v12 = vunpack.c.l.bf16 %v844_v6  ;;  %v6532_v37 = vld [vmem:[#allocation9 + $0xb0] sm:$0xf0] }
  0xc8   :  { %v441_v40 = vpop.f32.mrf.mxu1  ;;  %v393_v41 = vadd.f32 %v392_v39, %v7569_v25  ;;  %v5613_v39 = vor.u32 %v6532_v37, %v5612_v34 }
  0xc9   :  { %v442_v42 = vadd.f32 %v441_v40, %v7571_v26  ;;  %v808_v43 = vpack.c.bf16 %v806_v38, %v806_v38 }
  0xca   :  { %1099 = vmatpush.bf16.msrb.mxu3 %v5613_v39  ;;  %v5554_v39 = vld [vmem:[#allocation9 + $0x3c] sm:$0xf0] }
  0xcb   :  { %v530_v44 = vpack.c.bf16 %v442_v42, %v393_v41  ;;  %v810_v45 = vxor.u32 2147516416, %v808_v43  ;;  %v6522_v41 = vld [vmem:[#allocation9 + $0x64] sm:$0xf]  ;;  %v5578_v42 = vld [vmem:[#allocation9 + $0x6c] sm:$0xf0] }
  0xcc   :  { %v773_v53 = vpop.f32.mrf.mxu3  ;;  %v5596_v43 = vld [vmem:[#allocation9 + $0x80] sm:$0xf] }
  0xcd   :  { %v812_v52 = vunpack.c.l.bf16 %v810_v45  ;;  %v805_v54 = vunpack.c.l.bf16 %v530_v44  ;;  %v845_v19 = vrot.slane %v530_v44, 4  ;;  %v5581_v45 = vor.u32 %v6522_v41, %v5578_v42 }
  0xce   :  { %v5597_v49 = vor.u32 %v6527_v46, %v5596_v43  ;;  %v5560_v46 = vld [vmem:[#allocation9 + $0x38] sm:$0xf] }
  0xcf   :  { %v814_v56 = vmul.f32 1.442695, %v812_v52  ;;  %v807_v57 = vadd.f32 %v805_v54, %v773_v53  ;;  %v849_v30 = vunpack.c.l.bf16 %v845_v19  ;;  %v6529_v52 = vld [vmem:[#allocation9 + $0x98] sm:$0xf0]  ;;  %1116 = vmatpush.bf16.msrb.mxu0 %v5581_v45 }
  0xd0   :  { %1129 = vmatpush.bf16.msrb.mxu1 %v5597_v49  ;;  %v6521_v19 = vld [vmem:[#allocation9 + $0x58] sm:$0xf0] }
  0xd1   :  { %6801 = vpow2.f32 %v814_v56  ;;  %v809_v58 = vpack.c.bf16 %v807_v57, %v807_v57  ;;  %v488_v0 = vpop.f32.mrf.mxu2  ;;  %v5601_v56 = vor.u32 %v6529_v52, %v5600_v51  ;;  %v6517_v45 = vld [vmem:[#allocation9 + $0x38] sm:$0xf0]  ;;  %v5561_v51 = vor.u32 %v6518_v47, %v5560_v46 }
  0xd2   :  { %v489_v2 = vadd.f32 %v488_v0, %v7577_v61  ;;  %v6526_v0 = vld [vmem:[#allocation9 + $0x80] sm:$0xf0]  ;;  %v6513_v52 = vld [vmem:[#allocation9 + $0x1c] sm:$0xf] }
  0xd3   :  { %v811_v59 = vxor.u32 2147516416, %v809_v58  ;;  %1100 = vmatpush.bf16.msrb.mxu3 %v5601_v56  ;;  %1117 = vmatpush.bf16.msrb.mxu0 %v5569_v55 }
  0xd4   :  { %v529_v3 = vpack.c.bf16 %v489_v2, %v489_v2 }
  0xd5   :  { %v813_v60 = vunpack.c.l.bf16 %v811_v59  ;;  %v7469_v59 = vmov 1065369472  }
  0xd6   :  { %561 = vst [vmem:[#allocation2 + $0x8] sm:$0xf] %v529_v3 }
  0xd7   :  { %v6802_v62 = vpop.eup %6801  ;;  %v816_v63 = vmul.f32 1.442695, %v813_v60  ;;  %v7581_v60 = vunpack.c.h.bf16 %v7469_v59 }
  0xd8   :  { %v818_v1 = vpack.c.bf16 %v6802_v62, %v6802_v62  ;;  %v7583_v62 = vunpack.c.l.bf16 %v7469_v59  ;;  %v5548_v59 = vld [vmem:[#allocation9 + $0x20] sm:$0xf] }
  0xd9   :  { %6803 = vpow2.f32 %v816_v63  ;;  %v490_v8 = vpop.f32.mrf.mxu2  ;;  %v5588_v63 = vld [vmem:[#allocation9 + $0x78] sm:$0xf] }
  0xda   :  { %v820_v5 = vunpack.c.l.bf16 %v818_v1  ;;  %v491_v10 = vadd.f32 %v490_v8, %v7577_v61  ;;  %v5589_v3 = vor.u32 %v6526_v0, %v5588_v63  ;;  %v5584_v8 = vld [vmem:[#allocation9 + $0x68] sm:$0xf]  ;;  %v6515_v63 = vld [vmem:[#allocation9 + $0x28] sm:$0xf0] }
  0xdc   :  { %v822_v9 = vadd.f32 1.0, %v820_v5  ;;  %v531_v13 = vpack.c.bf16 %v491_v10, %v491_v10  ;;  %v5576_v10 = vld [vmem:[#allocation9 + $0x60] sm:$0xf]  ;;  %1101 = vmatpush.bf16.msrb.mxu3 %v5589_v3  ;;  %v6511_v3 = vld [vmem:[#allocation9 + $0x8] sm:$0xf0] }
  0xde   :  { %v824_v15 = vpack.c.bf16 %v822_v9, %v822_v9  ;;  %563 = vst [vmem:[#allocation2 + $0x14] sm:$0xf] %v531_v13  ;;  %v6524_v9 = vld [vmem:[#allocation9 + $0x70] sm:$0xf0] }
  0xdf   :  { %v6804_v7 = vpop.eup %6803 }
  0xe0   :  { %v819_v11 = vpack.c.bf16 %v6804_v7, %v6804_v7  ;;  %v828_v22 = vunpack.c.h.bf16 %v824_v15  ;;  %v829_v27 = vunpack.c.l.bf16 %v824_v15 }
  0xe2   :  { %v821_v17 = vunpack.c.l.bf16 %v819_v11  ;;  %6805 = vrcp.f32 %v828_v22  ;;  %v5585_v11 = vor.u32 %v6524_v9, %v5584_v8  ;;  %v599_v22 = vld [vmem:[#allocation2 + $0x8] sm:$0xf] }
  0xe3   :  { %6807 = vrcp.f32 %v829_v27  ;;  %v6520_v27 = vld [vmem:[#allocation9 + $0x50] sm:$0xf0]  ;;  %v890_v37 = vunpack.c.l.bf16 %v599_v22 }
  0xe4   :  { %v785_v14 = vpop.f32.mrf.mxu3  ;;  %v823_v28 = vadd.f32 1.0, %v821_v17  ;;  %1130 = vmatpush.bf16.msrb.mxu1 %v5585_v11  ;;  %v5565_v34 = vor.u32 %v6520_v27, %v5564_v24  ;;  %v5536_v11 = vld [vmem:[#allocation9 + $0x8] sm:$0xf] }
  0xe5   :  { %v850_v16 = vadd.f32 %v848_v12, %v785_v14  ;;  %v6523_v12 = vld [vmem:[#allocation9 + $0x68] sm:$0xf0] }
  0xe6   :  { %v825_v38 = vpack.c.bf16 %v823_v28, %v823_v28  ;;  %v5577_v14 = vor.u32 %v6523_v12, %v5576_v10  ;;  %v5530_v10 = vld [vmem:[#allocation9 + $0xc] sm:$0xf0]  ;;  %v6512_v12 = vld [vmem:[#allocation9 + $0x10] sm:$0xf0] }
  0xe7   :  { %v852_v18 = vpack.c.bf16 %v850_v16, %v850_v16 }
  0xe8   :  { %v835_v48 = vunpack.c.h.bf16 %v825_v38  ;;  %v6806_v53 = vpop.eup %6805  ;;  %v836_v58 = vunpack.c.l.bf16 %v825_v38  ;;  %1102 = vmatpush.bf16.msrb.mxu3 %v5577_v14  ;;  %v6516_v38 = vld [vmem:[#allocation9 + $0x34] sm:$0xf] }
  0xe9   :  { %v854_v23 = vxor.u32 2147516416, %v852_v18  ;;  %v6808_v57 = vpop.eup %6807  ;;  %v831_v6 = vmul.f32 %v6806_v53, %v7581_v60  ;;  %v5572_v18 = vld [vmem:[#allocation9 + $0x50] sm:$0xf]  ;;  %v5542_v53 = vld [vmem:[#allocation9 + $0x24] sm:$0xf0] }
  0xea   :  { %v833_v7 = vmul.f32 %v6808_v57, %v7583_v62  ;;  %v5545_v57 = vor.u32 %v6513_v52, %v5542_v53 }
  0xeb   :  { %v856_v29 = vunpack.c.l.bf16 %v854_v23  ;;  %v5573_v23 = vor.u32 %v6521_v19, %v5572_v18  ;;  %v5537_v18 = vor.u32 %v6512_v12, %v5536_v11  ;;  %v601_v19 = vld [vmem:[#allocation2 + $0x14] sm:$0xf] }
  0xec   :  { %v787_v31 = vpop.f32.mrf.mxu3  ;;  %v834_v17 = vpack.c.bf16 %v831_v6, %v833_v7  ;;  %1103 = vmatpush.bf16.msrb.mxu3 %v5565_v34 }
  0xed   :  { %v858_v35 = vmul.f32 1.442695, %v856_v29  ;;  %v851_v36 = vadd.f32 %v849_v30, %v787_v31  ;;  %1131 = vmatpush.bf16.msrb.mxu1 %v5573_v23 }
  0xef   :  { %6809 = vpow2.f32 %v858_v35  ;;  %v853_v40 = vpack.c.bf16 %v851_v36, %v851_v36  ;;  %v886_v36 = vunpack.c.l.bf16 %v834_v17 }
  0xf0   :  { %6811 = vrcp.f32 %v835_v48 }
  0xf1   :  { %v855_v44 = vxor.u32 2147516416, %v853_v40  ;;  %v5552_v40 = vld [vmem:[#allocation9 + $0x30] sm:$0xf]  ;;  %1132 = vmatpush.bf16.msrb.mxu1 %v5561_v51 }
  0xf2   :  { %v5553_v50 = vor.u32 %v6517_v45, %v5552_v40 }
  0xf3   :  { %v857_v54 = vunpack.c.l.bf16 %v855_v44  ;;  %v5557_v44 = vor.u32 %v6516_v38, %v5554_v39 }
  0xf4   :  { %1104 = vmatpush.bf16.msrb.mxu3 %v5553_v50 }
  0xf5   :  { %v6810_v1 = vpop.eup %6809  ;;  %v860_v2 = vmul.f32 1.442695, %v857_v54  ;;  %1118 = vmatpush.bf16.msrb.mxu0 %v5557_v44  ;;  %v5540_v54 = vld [vmem:[#allocation9 + $0x18] sm:$0xf] }
  0xf6   :  { %v862_v4 = vpack.c.bf16 %v6810_v1, %v6810_v1  ;;  %v6812_v15 = vpop.eup %6811  ;;  %v5549_v1 = vor.u32 %v6515_v63, %v5548_v59 }
  0xf7   :  { %6813 = vpow2.f32 %v860_v2  ;;  %v838_v42 = vmul.f32 %v6812_v15, %v7581_v60  ;;  %v5528_v2 = vld [vmem:[#allocation9] sm:$0xf] }
  0xf8   :  { %6815 = vrcp.f32 %v836_v58  ;;  %v864_v5 = vunpack.c.l.bf16 %v862_v4  ;;  %v6514_v58 = vld [vmem:[#allocation9 + $0x20] sm:$0xf0]  ;;  %1133 = vmatpush.bf16.msrb.mxu1 %v5549_v1 }
  0xf9   :  { %v5541_v0 = vor.u32 %v6514_v58, %v5540_v54  ;;  %v6510_v4 = vld [vmem:[#allocation9 + $0x4] sm:$0xf]  ;;  %1119 = vmatpush.bf16.msrb.mxu0 %v5545_v57 }
  0xfa   :  { %v866_v13 = vadd.f32 1.0, %v864_v5  ;;  %v5533_v15 = vor.u32 %v6510_v4, %v5530_v10 }
  0xfb   :  { %1105 = vmatpush.bf16.msrb.mxu3 %v5541_v0 }
  0xfc   :  { %v868_v16 = vpack.c.bf16 %v866_v13, %v866_v13  ;;  %1134 = vmatpush.bf16.msrb.mxu1 %v5537_v18 }
  0xfd   :  { %v6814_v21 = vpop.eup %6813  ;;  %1120 = vmatpush.bf16.msrb.mxu0 %v5533_v15 }
  0xfe   :  { %v6816_v28 = vpop.eup %6815  ;;  %v870_v29 = vunpack.c.h.bf16 %v868_v16  ;;  %v871_v30 = vunpack.c.l.bf16 %v868_v16  ;;  %v863_v31 = vpack.c.bf16 %v6814_v21, %v6814_v21  ;;  %v5529_v21 = vor.u32 %v6511_v3, %v5528_v2 }
  0xff   :  { %v840_v43 = vmul.f32 %v6816_v28, %v7583_v62 }
 0x100   :  { %6817 = vrcp.f32 %v870_v29  ;;  %v865_v35 = vunpack.c.l.bf16 %v863_v31  ;;  %1106 = vmatpush.bf16.msrb.mxu3 %v5529_v21 }
 0x101   :  { %6819 = vrcp.f32 %v871_v30  ;;  %v841_v9 = vpack.c.bf16 %v838_v42, %v840_v43  ;;  %v891_v30 = vunpack.c.l.bf16 %v601_v19 }
 0x102   :  { %v867_v48 = vadd.f32 1.0, %v865_v35 }
 0x103   :  { %v887_v27 = vunpack.c.l.bf16 %v841_v9 }
 0x104   :  { %v799_v41 = vpop.f32.mrf.mxu3  ;;  %v869_v55 = vpack.c.bf16 %v867_v48, %v867_v48 }
 0x105   :  { %v884_v49 = vadd.f32 %v7590_v33, %v799_v41 }
 0x106   :  { %v6818_v5 = vpop.eup %6817  ;;  %v877_v6 = vunpack.c.h.bf16 %v869_v55  ;;  %v878_v7 = vunpack.c.l.bf16 %v869_v55 }
 0x107   :  { %v888_v56 = vmul.f32 %v886_v36, %v884_v49  ;;  %v6820_v13 = vpop.eup %6819  ;;  %v873_v14 = vmul.f32 %v6818_v5, %v7581_v60  ;;  %v395_v36 = vpop.f32.mrf.mxu0 }
 0x108   :  { %v875_v16 = vmul.f32 %v6820_v13, %v7583_v62  ;;  %6821 = vrcp.f32 %v877_v6  ;;  %v396_v40 = vadd.f32 %v395_v36, %v7569_v25 }
 0x109   :  { %v892_v8 = vadd.f32 %v890_v37, %v888_v56  ;;  %6823 = vrcp.f32 %v878_v7  ;;  %v444_v37 = vpop.f32.mrf.mxu1 }
 0x10a   :  { %v876_v22 = vpack.c.bf16 %v873_v14, %v875_v16  ;;  %v445_v41 = vadd.f32 %v444_v37, %v7571_v26  ;;  %v5708_v37 = vld [vmem:[#allocation9 + $0xa8] sm:$0xf] }
 0x10b   :  { %v894_v17 = vpack.c.bf16 %v892_v8, %v892_v8 }
 0x10c   :  { %v801_v20 = vpop.f32.mrf.mxu3  ;;  %v902_v28 = vunpack.c.l.bf16 %v876_v22  ;;  %v7602_v45 = vpack.c.bf16 %v445_v41, %v396_v40 }
 0x10d   :  { %v896_v23 = vunpack.c.l.bf16 %v894_v17  ;;  %v885_v24 = vadd.f32 %v7590_v33, %v801_v20 }
 0x10e   :  { %v6822_v31 = vpop.eup %6821  ;;  %v904_v34 = vsub.f32 1.0, %v902_v28  ;;  %v918_v1 = vmul.f32 0.0, %v902_v28 }
 0x10f   :  { %6825 = vtanh.f32 %v896_v23  ;;  %v889_v29 = vmul.f32 %v887_v27, %v885_v24  ;;  %v6824_v38 = vpop.eup %6823  ;;  %v880_v39 = vmul.f32 %v6822_v31, %v7581_v60  ;;  %v7604_v3 = vpop.f32.mrf.mxu0 }
 0x110   :  { %v882_v42 = vmul.f32 %v6824_v38, %v7583_v62  ;;  %v906_v44 = vpack.c.bf16 %v904_v34, %v904_v34  ;;  %v6556_v38 = vld [vmem:[#allocation9 + $0xb0] sm:$0xf0] }
 0x111   :  { %v893_v35 = vadd.f32 %v891_v30, %v889_v29  ;;  %v7606_v4 = vpop.f32.mrf.mxu1 }
 0x112   :  { %v883_v47 = vpack.c.bf16 %v880_v39, %v882_v42  ;;  %v908_v51 = vunpack.c.l.bf16 %v906_v44  ;;  %v5709_v39 = vor.u32 %v6556_v38, %v5708_v37  ;;  %v398_v37 = vadd.f32 %v7604_v3, %v7569_v25 }
 0x113   :  { %v895_v43 = vpack.c.bf16 %v893_v35, %v893_v35  ;;  %v447_v38 = vadd.f32 %v7606_v4, %v7571_v26  ;;  %v1141_v3 = vunpack.c.l.bf16 %v7602_v45 }
 0x114   :  { %v903_v50 = vunpack.c.l.bf16 %v883_v47  ;;  %1435 = vmatpush.bf16.msrb.mxu2 %v5709_v39  ;;  %v1179_v39 = vrot.slane %v7602_v45, 4 }
 0x115   :  { %v6826_v46 = vpop.eup %6825  ;;  %v897_v48 = vunpack.c.l.bf16 %v895_v43 }
 0x116   :  { %v900_v49 = vpack.c.bf16 %v6826_v46, %v6826_v46  ;;  %v905_v53 = vsub.f32 1.0, %v903_v50  ;;  %v919_v8 = vmul.f32 0.0, %v903_v50 }
 0x117   :  { %6827 = vtanh.f32 %v897_v48  ;;  %v400_v15 = vpop.f32.mrf.mxu0 }
 0x118   :  { %v910_v52 = vunpack.c.l.bf16 %v900_v49  ;;  %v907_v56 = vpack.c.bf16 %v905_v53, %v905_v53  ;;  %v401_v18 = vadd.f32 %v400_v15, %v7569_v25 }
 0x119   :  { %v449_v16 = vpop.f32.mrf.mxu1 }
 0x11a   :  { %v912_v54 = vmul.f32 %v910_v52, %v908_v51  ;;  %v909_v63 = vunpack.c.l.bf16 %v907_v56  ;;  %v450_v19 = vadd.f32 %v449_v16, %v7571_v26  ;;  %v5696_v51 = vld [vmem:[#allocation9 + $0x90] sm:$0xf]  ;;  %v6553_v52 = vld [vmem:[#allocation9 + $0x98] sm:$0xf0] }
 0x11b   :  { %v5697_v53 = vor.u32 %v6553_v52, %v5696_v51 }
 0x11c   :  { %v914_v55 = vpack.c.bf16 %v912_v54, %v912_v54  ;;  %v7620_v20 = vpack.c.bf16 %v450_v19, %v401_v18 }
 0x11d   :  { %v6828_v57 = vpop.eup %6827  ;;  %1436 = vmatpush.bf16.msrb.mxu2 %v5697_v53 }
 0x11e   :  { %v901_v58 = vpack.c.bf16 %v6828_v57, %v6828_v57  ;;  %v916_v59 = vunpack.c.l.bf16 %v914_v55 }
 0x11f   :  { %v7622_v21 = vpop.f32.mrf.mxu0 }
 0x120   :  { %v911_v0 = vunpack.c.l.bf16 %v901_v58  ;;  %v7608_v5 = vadd.f32 %v918_v1, %v916_v59 }
 0x121   :  { %v7624_v22 = vpop.f32.mrf.mxu1 }
 0x122   :  { %v913_v2 = vmul.f32 %v911_v0, %v909_v63  ;;  %v922_v10 = vpack.c.bf16 %v7608_v5, %v7608_v5 }
 0x124   :  { %v915_v6 = vpack.c.bf16 %v913_v2, %v913_v2  ;;  %v967_v13 = vunpack.c.l.b16 %v922_v10 }
 0x126   :  { %v917_v7 = vunpack.c.l.bf16 %v915_v6  ;;  %v5684_v6 = vld [vmem:[#allocation9 + $0x78] sm:$0xf] }
 0x127   :  { %v405_v23 = vpop.f32.mrf.mxu0 }
 0x128   :  { %v7610_v9 = vadd.f32 %v919_v8, %v917_v7  ;;  %v406_v27 = vadd.f32 %v405_v23, %v7569_v25  ;;  %v6550_v7 = vld [vmem:[#allocation9 + $0x80] sm:$0xf0] }
 0x129   :  { %v454_v24 = vpop.f32.mrf.mxu1  ;;  %v5685_v8 = vor.u32 %v6550_v7, %v5684_v6 }
 0x12a   :  { %v923_v11 = vpack.c.bf16 %v7610_v9, %v7610_v9  ;;  %v6745_v12 = vpack.c.bf16 %v7610_v9, %v7608_v5  ;;  %v455_v28 = vadd.f32 %v454_v24, %v7571_v26 }
 0x12b   :  { %1437 = vmatpush.bf16.msrb.mxu2 %v5685_v8 }
 0x12c   :  { %6746 = vst [vmem:[#allocation3 + $0x30] sm:$0xff] %v6745_v12   ;;  %v968_v14 = vunpack.c.l.b16 %v923_v11  ;;  %v540_v29 = vpack.c.bf16 %v455_v28, %v406_v27 }
 0x12e   :  { %v969_v17 = vpack.c.b16 %v968_v14, %v967_v13  ;;  %572 = vst [vmem:[#allocation2 + $0x48] sm:$0xff] %v540_v29 }
 0x12f   :  { %v407_v30 = vpop.f32.mrf.mxu0 }
 0x130   :  { %1107 = vmatmul.bf16.vlgmr.msrb.gmra.mxu3 %v969_v17  ;;  %1121 = vmatmul.bf16.vlgmr.msrb.gmra.mxu0 %v969_v17  ;;  %v408_v34 = vadd.f32 %v407_v30, %v7569_v25 }
 0x131   :  { %1135 = vmatmul.bf16.vlgmr.msrb.gmra.mxu1 %v969_v17  ;;  %v456_v31 = vpop.f32.mrf.mxu1 }
 0x132   :  { %v457_v35 = vadd.f32 %v456_v31, %v7571_v26 }
 0x134   :  { %v542_v36 = vpack.c.bf16 %v457_v35, %v408_v34 }
 0x136   :  { %574 = vst [vmem:[#allocation2 + $0x54] sm:$0xff] %v542_v36 }
 0x137   :  { %v410_v40 = vpop.f32.mrf.mxu0 }
 0x138   :  { %v411_v42 = vadd.f32 %v410_v40, %v7569_v25  ;;  %v493_v40 = vpop.f32.mrf.mxu2 }
 0x139   :  { %v459_v41 = vpop.f32.mrf.mxu1 }
 0x13a   :  { %v460_v43 = vadd.f32 %v459_v41, %v7571_v26  ;;  %v534_v41 = vpack.c.bf16 %v447_v38, %v398_v37  ;;  %v5648_v37 = vld [vmem:[#allocation9 + $0x30] sm:$0xf] }
 0x13c   :  { %v544_v44 = vpack.c.bf16 %v460_v43, %v411_v42  ;;  %v1183_v42 = vunpack.c.l.bf16 %v1179_v39  ;;  %v1142_v7 = vunpack.c.l.bf16 %v534_v41 }
 0x13e   :  { %576 = vst [vmem:[#allocation2 + $0x60] sm:$0xff] %v544_v44 }
 0x13f   :  { %v412_v46 = vpop.f32.mrf.mxu0 }
 0x140   :  { %v413_v48 = vadd.f32 %v412_v46, %v7569_v25 }
 0x141   :  { %v461_v47 = vpop.f32.mrf.mxu1 }
 0x142   :  { %v462_v49 = vadd.f32 %v461_v47, %v7571_v26  ;;  %v1180_v47 = vrot.slane %v534_v41, 4 }
 0x144   :  { %v546_v50 = vpack.c.bf16 %v462_v49, %v413_v48  ;;  %v495_v48 = vpop.f32.mrf.mxu2  ;;  %v494_v49 = vadd.f32 %v493_v40, %v7577_v61 }
 0x146   :  { %578 = vst [vmem:[#allocation2 + $0x6c] sm:$0xff] %v546_v50  ;;  %v496_v50 = vadd.f32 %v495_v48, %v7577_v61  ;;  %v533_v53 = vpack.c.bf16 %v494_v49, %v494_v49  ;;  %v5716_v48 = vld [vmem:[#allocation9 + $0xb0] sm:$0xf]  ;;  %v6557_v49 = vld [vmem:[#allocation9 + $0xb8] sm:$0xf0] }
 0x147   :  { %v415_v54 = vpop.f32.mrf.mxu0 }
 0x148   :  { %v416_v56 = vadd.f32 %v415_v54, %v7569_v25  ;;  %v535_v4 = vpack.c.bf16 %v496_v50, %v496_v50  ;;  %565 = vst [vmem:[#allocation2 + $0x20] sm:$0xf] %v533_v53  ;;  %v6552_v50 = vld [vmem:[#allocation9 + $0x94] sm:$0xf]  ;;  %v5704_v53 = vld [vmem:[#allocation9 + $0x98] sm:$0xf] }
 0x149   :  { %v464_v55 = vpop.f32.mrf.mxu1 }
 0x14a   :  { %v465_v57 = vadd.f32 %v464_v55, %v7571_v26  ;;  %567 = vst [vmem:[#allocation2 + $0x2c] sm:$0xf] %v535_v4  ;;  %v6554_v4 = vld [vmem:[#allocation9 + $0xa0] sm:$0xf0] }
 0x14c   :  { %v548_v58 = vpack.c.bf16 %v465_v57, %v416_v56  ;;  %v1184_v56 = vunpack.c.l.bf16 %v1180_v47  ;;  %v6538_v47 = vld [vmem:[#allocation9 + $0x20] sm:$0xf0] }
 0x14e   :  { %580 = vst [vmem:[#allocation2 + $0x78] sm:$0xff] %v548_v58 }
 0x14f   :  { %v417_v59 = vpop.f32.mrf.mxu0 }
 0x150   :  { %v418_v0 = vadd.f32 %v417_v59, %v7569_v25 }
 0x151   :  { %v466_v63 = vpop.f32.mrf.mxu1 }
 0x152   :  { %v467_v1 = vadd.f32 %v466_v63, %v7571_v26 }
 0x154   :  { %v550_v2 = vpack.c.bf16 %v467_v1, %v418_v0 }
 0x156   :  { %582 = vst [vmem:[#allocation2 + $0x84] sm:$0xff] %v550_v2 }
 0x157   :  { %v420_v10 = vpop.f32.mrf.mxu0 }
 0x158   :  { %v421_v12 = vadd.f32 %v420_v10, %v7569_v25 }
 0x159   :  { %v469_v11 = vpop.f32.mrf.mxu1 }
 0x15a   :  { %v470_v13 = vadd.f32 %v469_v11, %v7571_v26 }
 0x15c   :  { %v552_v14 = vpack.c.bf16 %v470_v13, %v421_v12  ;;  %v5672_v12 = vld [vmem:[#allocation9 + $0x60] sm:$0xf]  ;;  %v6547_v13 = vld [vmem:[#allocation9 + $0x68] sm:$0xf0] }
 0x15e   :  { %584 = vst [vmem:[#allocation2 + $0x90] sm:$0xff] %v552_v14 }
 0x15f   :  { %v422_v15 = vpop.f32.mrf.mxu0 }
 0x160   :  { %v423_v17 = vadd.f32 %v422_v15, %v7569_v25 }
 0x161   :  { %v471_v16 = vpop.f32.mrf.mxu1 }
 0x162   :  { %v472_v18 = vadd.f32 %v471_v16, %v7571_v26  ;;  %v5673_v16 = vor.u32 %v6547_v13, %v5672_v12 }
 0x164   :  { %v554_v19 = vpack.c.bf16 %v472_v18, %v423_v17  ;;  %1438 = vmatpush.bf16.msrb.mxu2 %v5673_v16  ;;  %v5624_v16 = vld [vmem:[#allocation9] sm:$0xf] }
 0x166   :  { %586 = vst [vmem:[#allocation2 + $0x9c] sm:$0xff] %v554_v19 }
 0x167   :  { %v425_v23 = vpop.f32.mrf.mxu0 }
 0x168   :  { %v426_v27 = vadd.f32 %v425_v23, %v7569_v25 }
 0x169   :  { %v474_v24 = vpop.f32.mrf.mxu1 }
 0x16a   :  { %v475_v28 = vadd.f32 %v474_v24, %v7571_v26 }
 0x16c   :  { %v556_v29 = vpack.c.bf16 %v475_v28, %v426_v27 }
 0x16e   :  { %588 = vst [vmem:[#allocation2 + $0xa8] sm:$0xff] %v556_v29 }
 0x16f   :  { %v427_v30 = vpop.f32.mrf.mxu0 }
 0x170   :  { %v428_v34 = vadd.f32 %v427_v30, %v7569_v25  ;;  %v6555_v30 = vld [vmem:[#allocation9 + $0xac] sm:$0xf] }
 0x171   :  { %v476_v31 = vpop.f32.mrf.mxu1 }
 0x172   :  { %v477_v35 = vadd.f32 %v476_v31, %v7571_v26  ;;  %v5710_v31 = vld [vmem:[#allocation9 + $0xb4] sm:$0xf0] }
 0x173   :  { %v5713_v38 = vor.u32 %v6555_v30, %v5710_v31  ;;  %v6543_v30 = vld [vmem:[#allocation9 + $0x4c] sm:$0xf]  ;;  %v5662_v31 = vld [vmem:[#allocation9 + $0x54] sm:$0xf0] }
 0x174   :  { %v558_v36 = vpack.c.bf16 %v477_v35, %v428_v34  ;;  %v5660_v35 = vld [vmem:[#allocation9 + $0x48] sm:$0xf] }
 0x175   :  { %1449 = vmatpush.bf16.msra.mxu3 %v5713_v38  ;;  %v5665_v38 = vor.u32 %v6543_v30, %v5662_v31 }
 0x176   :  { %590 = vst [vmem:[#allocation2 + $0xb4] sm:$0xff] %v558_v36  ;;  %v6544_v36 = vld [vmem:[#allocation9 + $0x50] sm:$0xf0] }
 0x177   :  { %v5661_v41 = vor.u32 %v6544_v36, %v5660_v35 }
 0x179   :  { %1439 = vmatpush.bf16.msrb.mxu2 %v5661_v41 }
 0x1ad   :  { %v1122_v43 = vpop.f32.mrf.mxu0 }
 0x1ae   :  { %v1185_v44 = vadd.f32 %v1183_v42, %v1122_v43  ;;  %v6541_v42 = vld [vmem:[#allocation9 + $0x38] sm:$0xf0] }
 0x1b0   :  { %v1187_v46 = vpack.c.bf16 %v1185_v44, %v1185_v44 }
 0x1b2   :  { %v1189_v51 = vxor.u32 2147516416, %v1187_v46  ;;  %v5636_v46 = vld [vmem:[#allocation9 + $0x18] sm:$0xf] }
 0x1b3   :  { %v1108_v52 = vpop.f32.mrf.mxu3 }
 0x1b4   :  { %v1191_v54 = vunpack.c.l.bf16 %v1189_v51  ;;  %v1143_v55 = vadd.f32 %v1141_v3, %v1108_v52  ;;  %v5649_v51 = vor.u32 %v6541_v42, %v5648_v37  ;;  %v5717_v3 = vor.u32 %v6557_v49, %v5716_v48  ;;  %v5698_v52 = vld [vmem:[#allocation9 + $0x9c] sm:$0xf0]  ;;  %v6540_v42 = vld [vmem:[#allocation9 + $0x34] sm:$0xf] }
 0x1b5   :  { %v1124_v57 = vpop.f32.mrf.mxu0 }
 0x1b6   :  { %v1193_v58 = vmul.f32 1.442695, %v1191_v54  ;;  %v1145_v59 = vpack.c.bf16 %v1143_v55, %v1143_v55  ;;  %v1186_v63 = vadd.f32 %v1184_v56, %v1124_v57  ;;  %v5701_v56 = vor.u32 %v6552_v50, %v5698_v52  ;;  %v6549_v57 = vld [vmem:[#allocation9 + $0x7c] sm:$0xf]  ;;  %1463 = vmatpush.bf16.msra.mxu0 %v5717_v3  ;;  %1440 = vmatpush.bf16.msrb.mxu2 %v5649_v51  ;;  %v1136_v50 = vpop.f32.mrf.mxu1 }
 0x1b8   :  { %6829 = vpow2.f32 %v1193_v58  ;;  %v1147_v0 = vxor.u32 2147516416, %v1145_v59  ;;  %v1188_v1 = vpack.c.bf16 %v1186_v63, %v1186_v63  ;;  %v5686_v58 = vld [vmem:[#allocation9 + $0x84] sm:$0xf0]  ;;  %v5705_v63 = vor.u32 %v6554_v4, %v5704_v53  ;;  %1450 = vmatpush.bf16.msra.mxu3 %v5701_v56  ;;  %v6537_v56 = vld [vmem:[#allocation9 + $0x1c] sm:$0xf] }
 0x1ba   :  { %v1149_v2 = vunpack.c.l.bf16 %v1147_v0  ;;  %v1190_v6 = vxor.u32 2147516416, %v1188_v1  ;;  %1464 = vmatpush.bf16.msra.mxu0 %v5705_v63 }
 0x1bb   :  { %v1110_v8 = vpop.f32.mrf.mxu3 }
 0x1bc   :  { %v1151_v45 = vmul.f32 1.442695, %v1149_v2  ;;  %v1192_v10 = vunpack.c.l.bf16 %v1190_v6  ;;  %v1144_v11 = vadd.f32 %v1142_v7, %v1110_v8  ;;  %v5689_v2 = vor.u32 %v6549_v57, %v5686_v58  ;;  %v5692_v6 = vld [vmem:[#allocation9 + $0x80] sm:$0xf]  ;;  %v6551_v7 = vld [vmem:[#allocation9 + $0x88] sm:$0xf0] }
 0x1bd   :  { %v5638_v57 = vld [vmem:[#allocation9 + $0x24] sm:$0xf0]  ;;  %v930_v58 = vld [vmem:[#allocation2 + $0x20] sm:$0xf] }
 0x1be   :  { %v6830_v14 = vpop.eup %6829  ;;  %6831 = vpow2.f32 %v1151_v45  ;;  %v1195_v15 = vmul.f32 1.442695, %v1192_v10  ;;  %v1146_v17 = vpack.c.bf16 %v1144_v11, %v1144_v11  ;;  %v5637_v45 = vor.u32 %v6538_v47, %v5636_v46  ;;  %v6546_v10 = vld [vmem:[#allocation9 + $0x64] sm:$0xf]  ;;  %v5674_v11 = vld [vmem:[#allocation9 + $0x6c] sm:$0xf0]  ;;  %1451 = vmatpush.bf16.msra.mxu3 %v5689_v2  ;;  %v1138_v31 = vpop.f32.mrf.mxu1 }
 0x1bf   :  { %v1197_v18 = vpack.c.bf16 %v6830_v14, %v6830_v14  ;;  %v1219_v2 = vadd.f32 %v7590_v33, %v1136_v50  ;;  %v498_v50 = vpop.f32.mrf.mxu2 }
 0x1c0   :  { %6833 = vpow2.f32 %v1195_v15  ;;  %v1148_v19 = vxor.u32 2147516416, %v1146_v17  ;;  %v6535_v17 = vld [vmem:[#allocation9 + $0x8] sm:$0xf0]  ;;  %1441 = vmatpush.bf16.msrb.mxu2 %v5637_v45 }
 0x1c1   :  { %v1199_v23 = vunpack.c.l.bf16 %v1197_v18  ;;  %v6539_v45 = vld [vmem:[#allocation9 + $0x28] sm:$0xf0] }
 0x1c2   :  { %v1150_v24 = vunpack.c.l.bf16 %v1148_v19  ;;  %v5693_v19 = vor.u32 %v6551_v7, %v5692_v6  ;;  %v5641_v7 = vor.u32 %v6537_v56, %v5638_v57 }
 0x1c3   :  { %v1201_v27 = vadd.f32 1.0, %v1199_v23 }
 0x1c4   :  { %v6832_v28 = vpop.eup %6831  ;;  %v1153_v29 = vmul.f32 1.442695, %v1150_v24  ;;  %v5677_v24 = vor.u32 %v6546_v10, %v5674_v11  ;;  %1465 = vmatpush.bf16.msra.mxu0 %v5693_v19  ;;  %v1225_v10 = vunpack.c.l.bf16 %v930_v58 }
 0x1c5   :  { %v1155_v34 = vpack.c.bf16 %v6832_v28, %v6832_v28  ;;  %v1203_v40 = vpack.c.bf16 %v1201_v27, %v1201_v27  ;;  %v5680_v27 = vld [vmem:[#allocation9 + $0x68] sm:$0xf]  ;;  %v6548_v28 = vld [vmem:[#allocation9 + $0x70] sm:$0xf0] }
 0x1c6   :  { %v6834_v39 = vpop.eup %6833  ;;  %6835 = vpow2.f32 %v1153_v29  ;;  %v5625_v29 = vor.u32 %v6535_v17, %v5624_v16  ;;  %v5681_v36 = vor.u32 %v6548_v28, %v5680_v27  ;;  %1452 = vmatpush.bf16.msra.mxu3 %v5677_v24  ;;  %v5632_v28 = vld [vmem:[#allocation9 + $0x8] sm:$0xf] }
 0x1c7   :  { %v1157_v43 = vunpack.c.l.bf16 %v1155_v34  ;;  %v1198_v44 = vpack.c.bf16 %v6834_v39, %v6834_v39  ;;  %v1205_v59 = vunpack.c.h.bf16 %v1203_v40  ;;  %v1206_v12 = vunpack.c.l.bf16 %v1203_v40  ;;  %v5668_v39 = vld [vmem:[#allocation9 + $0x50] sm:$0xf]  ;;  %v6545_v40 = vld [vmem:[#allocation9 + $0x58] sm:$0xf0] }
 0x1c8   :  { %1442 = vmatpush.bf16.msrb.mxu2 %v5625_v29  ;;  %1466 = vmatpush.bf16.msra.mxu0 %v5681_v36  ;;  %v5669_v3 = vor.u32 %v6545_v40, %v5668_v39  ;;  %v6536_v29 = vld [vmem:[#allocation9 + $0x10] sm:$0xf0]  ;;  %v932_v39 = vld [vmem:[#allocation2 + $0x2c] sm:$0xf] }
 0x1c9   :  { %v1159_v54 = vadd.f32 1.0, %v1157_v43  ;;  %v1200_v55 = vunpack.c.l.bf16 %v1198_v44  ;;  %6837 = vrcp.f32 %v1205_v59  ;;  %v5650_v43 = vld [vmem:[#allocation9 + $0x3c] sm:$0xf0] }
 0x1ca   :  { %1453 = vmatpush.bf16.msra.mxu3 %v5665_v38  ;;  %v5653_v4 = vor.u32 %v6540_v42, %v5650_v43  ;;  %v5633_v38 = vor.u32 %v6536_v29, %v5632_v28 }
 0x1cb   :  { %v1161_v0 = vpack.c.bf16 %v1159_v54, %v1159_v54  ;;  %v1202_v1 = vadd.f32 1.0, %v1200_v55  ;;  %v5656_v54 = vld [vmem:[#allocation9 + $0x38] sm:$0xf]  ;;  %v6542_v55 = vld [vmem:[#allocation9 + $0x40] sm:$0xf0] }
 0x1cc   :  { %v6836_v8 = vpop.eup %6835  ;;  %1467 = vmatpush.bf16.msra.mxu0 %v5669_v3 }
 0x1cd   :  { %v1163_v13 = vunpack.c.h.bf16 %v1161_v0  ;;  %v1164_v14 = vunpack.c.l.bf16 %v1161_v0  ;;  %v1156_v15 = vpack.c.bf16 %v6836_v8, %v6836_v8  ;;  %v1204_v18 = vpack.c.bf16 %v1202_v1, %v1202_v1  ;;  %v5644_v8 = vld [vmem:[#allocation9 + $0x20] sm:$0xf] }
 0x1ce   :  { %v5657_v1 = vor.u32 %v6542_v55, %v5656_v54  ;;  %1454 = vmatpush.bf16.msra.mxu3 %v5653_v4 }
 0x1cf   :  { %6839 = vrcp.f32 %v1163_v13  ;;  %v1158_v23 = vunpack.c.l.bf16 %v1156_v15  ;;  %v1212_v35 = vunpack.c.h.bf16 %v1204_v18  ;;  %v6838_v41 = vpop.eup %6837  ;;  %v1213_v46 = vunpack.c.l.bf16 %v1204_v18  ;;  %v5626_v13 = vld [vmem:[#allocation9 + $0xc] sm:$0xf0] }
 0x1d0   :  { %6841 = vrcp.f32 %v1164_v14  ;;  %v1208_v63 = vmul.f32 %v6838_v41, %v7581_v60  ;;  %1468 = vmatpush.bf16.msra.mxu0 %v5657_v1  ;;  %v5645_v18 = vor.u32 %v6539_v45, %v5644_v8  ;;  %v1220_v41 = vadd.f32 %v7590_v33, %v1138_v31 }
 0x1d1   :  { %6843 = vrcp.f32 %v1206_v12  ;;  %v1160_v34 = vadd.f32 1.0, %v1158_v23  ;;  %v6534_v12 = vld [vmem:[#allocation9 + $0x4] sm:$0xf] }
 0x1d2   :  { %6845 = vrcp.f32 %v1212_v35  ;;  %1455 = vmatpush.bf16.msra.mxu3 %v5641_v7  ;;  %v5629_v27 = vor.u32 %v6534_v12, %v5626_v13 }
 0x1d3   :  { %v1162_v37 = vpack.c.bf16 %v1160_v34, %v1160_v34 }
 0x1d4   :  { %1469 = vmatpush.bf16.msra.mxu0 %v5645_v18 }
 0x1d5   :  { %v6840_v44 = vpop.eup %6839  ;;  %v1170_v47 = vunpack.c.h.bf16 %v1162_v37  ;;  %v1171_v48 = vunpack.c.l.bf16 %v1162_v37 }
 0x1d6   :  { %v6842_v49 = vpop.eup %6841  ;;  %v1166_v51 = vmul.f32 %v6840_v44, %v7581_v60  ;;  %1456 = vmatpush.bf16.msra.mxu3 %v5629_v27 }
 0x1d7   :  { %v6844_v52 = vpop.eup %6843  ;;  %v1168_v53 = vmul.f32 %v6842_v49, %v7583_v62  ;;  %6847 = vrcp.f32 %v1170_v47 }
 0x1d8   :  { %6849 = vrcp.f32 %v1171_v48  ;;  %v1210_v0 = vmul.f32 %v6844_v52, %v7583_v62  ;;  %v6846_v11 = vpop.eup %6845  ;;  %1470 = vmatpush.bf16.msra.mxu0 %v5633_v38 }
 0x1d9   :  { %v1169_v59 = vpack.c.bf16 %v1166_v51, %v1168_v53  ;;  %6851 = vrcp.f32 %v1213_v46  ;;  %v1215_v36 = vmul.f32 %v6846_v11, %v7581_v60  ;;  %v1226_v46 = vunpack.c.l.bf16 %v932_v39 }
 0x1da   :  { %v1211_v19 = vpack.c.bf16 %v1208_v63, %v1210_v0  ;;  %v499_v51 = vadd.f32 %v498_v50, %v7577_v61 }
 0x1db   :  { %v1221_v6 = vunpack.c.l.bf16 %v1169_v59  ;;  %v500_v59 = vpop.f32.mrf.mxu2 }
 0x1dc   :  { %v1237_v40 = vunpack.c.l.bf16 %v1211_v19  ;;  %v537_v4 = vpack.c.bf16 %v499_v51, %v499_v51  ;;  %v501_v0 = vadd.f32 %v500_v59, %v7577_v61  ;;  %v452_v59 = vadd.f32 %v7624_v22, %v7571_v26 }
 0x1dd   :  { %v6848_v14 = vpop.eup %6847  ;;  %v1223_v15 = vmul.f32 %v1221_v6, %v1219_v2 }
 0x1de   :  { %v6850_v16 = vpop.eup %6849  ;;  %v1173_v17 = vmul.f32 %v6848_v14, %v7581_v60  ;;  %v1239_v48 = vsub.f32 1.0, %v1237_v40  ;;  %569 = vst [vmem:[#allocation2 + $0x38] sm:$0xf] %v537_v4  ;;  %v539_v6 = vpack.c.bf16 %v501_v0, %v501_v0  ;;  %v1253_v14 = vmul.f32 %v1237_v40, %v7608_v5 }
 0x1df   :  { %v6852_v23 = vpop.eup %6851  ;;  %v1175_v24 = vmul.f32 %v6850_v16, %v7583_v62  ;;  %v1227_v30 = vadd.f32 %v1225_v10, %v1223_v15 }
 0x1e0   :  { %v1217_v37 = vmul.f32 %v6852_v23, %v7583_v62  ;;  %v1241_v53 = vpack.c.bf16 %v1239_v48, %v1239_v48  ;;  %571 = vst [vmem:[#allocation2 + $0x44] sm:$0xf] %v539_v6 }
 0x1e1   :  { %v1176_v34 = vpack.c.bf16 %v1173_v17, %v1175_v24  ;;  %v1229_v35 = vpack.c.bf16 %v1227_v30, %v1227_v30 }
 0x1e2   :  { %v1218_v47 = vpack.c.bf16 %v1215_v36, %v1217_v37  ;;  %v1243_v57 = vunpack.c.l.bf16 %v1241_v53 }
 0x1e3   :  { %v1222_v42 = vunpack.c.l.bf16 %v1176_v34  ;;  %v1231_v43 = vunpack.c.l.bf16 %v1229_v35  ;;  %v503_v12 = vpop.f32.mrf.mxu2 }
 0x1e4   :  { %v1238_v52 = vunpack.c.l.bf16 %v1218_v47  ;;  %v504_v15 = vadd.f32 %v503_v12, %v7577_v61 }
 0x1e5   :  { %v1224_v44 = vmul.f32 %v1222_v42, %v1220_v41  ;;  %6853 = vtanh.f32 %v1231_v43 }
 0x1e6   :  { %v1240_v56 = vsub.f32 1.0, %v1238_v52  ;;  %v541_v18 = vpack.c.bf16 %v504_v15, %v504_v15  ;;  %v1254_v23 = vmul.f32 %v1238_v52, %v7610_v9 }
 0x1e7   :  { %v1228_v49 = vadd.f32 %v1226_v46, %v1224_v44 }
 0x1e8   :  { %v1242_v1 = vpack.c.bf16 %v1240_v56, %v1240_v56  ;;  %573 = vst [vmem:[#allocation2 + $0x50] sm:$0xf] %v541_v18 }
 0x1e9   :  { %v1230_v3 = vpack.c.bf16 %v1228_v49, %v1228_v49 }
 0x1ea   :  { %v1244_v45 = vunpack.c.l.bf16 %v1242_v1  ;;  %v1477_v1 = vunpack.c.l.bf16 %v7620_v20 }
 0x1eb   :  { %v6854_v54 = vpop.eup %6853  ;;  %v1232_v55 = vunpack.c.l.bf16 %v1230_v3  ;;  %v505_v28 = vpop.f32.mrf.mxu2 }
 0x1ec   :  { %v1235_v33 = vpack.c.bf16 %v6854_v54, %v6854_v54  ;;  %v506_v30 = vadd.f32 %v505_v28, %v7577_v61 }
 0x1ed   :  { %6855 = vtanh.f32 %v1232_v55 }
 0x1ee   :  { %v1245_v58 = vunpack.c.l.bf16 %v1235_v33  ;;  %v543_v35 = vpack.c.bf16 %v506_v30, %v506_v30 }
 0x1f0   :  { %v1247_v63 = vmul.f32 %v1245_v58, %v1243_v57  ;;  %575 = vst [vmem:[#allocation2 + $0x5c] sm:$0xf] %v543_v35  ;;  %v403_v58 = vadd.f32 %v7622_v21, %v7569_v25 }
 0x1f2   :  { %v1249_v2 = vpack.c.bf16 %v1247_v63, %v1247_v63  ;;  %v1515_v63 = vrot.slane %v7620_v20, 4  ;;  %v538_v0 = vpack.c.bf16 %v452_v59, %v403_v58  ;;  %v6574_v58 = vld [vmem:[#allocation9 + $0x80] sm:$0xf0] }
 0x1f3   :  { %v6856_v7 = vpop.eup %6855  ;;  %v508_v36 = vpop.f32.mrf.mxu2 }
 0x1f4   :  { %v1236_v8 = vpack.c.bf16 %v6856_v7, %v6856_v7  ;;  %v1251_v11 = vunpack.c.l.bf16 %v1249_v2  ;;  %v509_v37 = vadd.f32 %v508_v36, %v7577_v61  ;;  %v1519_v2 = vunpack.c.l.bf16 %v1515_v63  ;;  %v6573_v63 = vld [vmem:[#allocation9 + $0x7c] sm:$0xf] }
 0x1f5   :  { %v1478_v21 = vunpack.c.l.bf16 %v538_v0 }
 0x1f6   :  { %v1246_v10 = vunpack.c.l.bf16 %v1236_v8  ;;  %v7668_v17 = vadd.f32 %v1253_v14, %v1251_v11  ;;  %v545_v38 = vpack.c.bf16 %v509_v37, %v509_v37  ;;  %v1516_v11 = vrot.slane %v538_v0, 4  ;;  %v5804_v37 = vld [vmem:[#allocation9 + $0xa8] sm:$0xf] }
 0x1f7   :  { %v5782_v0 = vld [vmem:[#allocation9 + $0x84] sm:$0xf0] }
 0x1f8   :  { %v1248_v13 = vmul.f32 %v1246_v10, %v1244_v45  ;;  %v1257_v27 = vpack.c.bf16 %v7668_v17, %v7668_v17  ;;  %577 = vst [vmem:[#allocation2 + $0x68] sm:$0xf] %v545_v38  ;;  %v1520_v15 = vunpack.c.l.bf16 %v1516_v11  ;;  %v6580_v38 = vld [vmem:[#allocation9 + $0xb0] sm:$0xf0] }
 0x1fa   :  { %v1250_v16 = vpack.c.bf16 %v1248_v13, %v1248_v13  ;;  %v1303_v31 = vunpack.c.l.b16 %v1257_v27 }
 0x1fb   :  { %v510_v39 = vpop.f32.mrf.mxu2 }
 0x1fc   :  { %v1252_v19 = vunpack.c.l.bf16 %v1250_v16  ;;  %v511_v40 = vadd.f32 %v510_v39, %v7577_v61  ;;  %v6579_v39 = vld [vmem:[#allocation9 + $0xac] sm:$0xf] }
 0x1fe   :  { %v7671_v24 = vadd.f32 %v1254_v23, %v1252_v19  ;;  %v547_v41 = vpack.c.bf16 %v511_v40, %v511_v40 }
 0x200   :  { %v1258_v29 = vpack.c.bf16 %v7671_v24, %v7671_v24  ;;  %v6750_v5 = vpack.c.bf16 %v7671_v24, %v7668_v17  ;;  %579 = vst [vmem:[#allocation2 + $0x74] sm:$0xf] %v547_v41  ;;  %v5805_v41 = vor.u32 %v6580_v38, %v5804_v37  ;;  %v5764_v37 = vld [vmem:[#allocation9 + $0x50] sm:$0xf]  ;;  %v6569_v38 = vld [vmem:[#allocation9 + $0x58] sm:$0xf0] }
 0x202   :  { %6751 = vst [vmem:[#allocation3] sm:$0xff] %v6750_v5   ;;  %v1304_v34 = vunpack.c.l.b16 %v1258_v29  ;;  %1771 = vmatpush.bf16.msra.mxu1 %v5805_v41 }
 0x203   :  { %v513_v42 = vpop.f32.mrf.mxu2 }
 0x204   :  { %v1305_v9 = vpack.c.b16 %v1304_v34, %v1303_v31  ;;  %v514_v43 = vadd.f32 %v513_v42, %v7577_v61  ;;  %v5806_v42 = vld [vmem:[#allocation9 + $0xb4] sm:$0xf0] }
 0x206   :  { %1443 = vmatmul.bf16.vlgmr.msrb.gmra.mxu2 %v1305_v9  ;;  %1457 = vmatmul.bf16.vlgmr.msra.gmra.mxu3 %v1305_v9  ;;  %v549_v44 = vpack.c.bf16 %v514_v43, %v514_v43  ;;  %v5812_v43 = vld [vmem:[#allocation9 + $0xb0] sm:$0xf] }
 0x207   :  { %1471 = vmatmul.bf16.vlgmr.msra.gmra.mxu0 %v1305_v9 }
 0x208   :  { %581 = vst [vmem:[#allocation2 + $0x80] sm:$0xf] %v549_v44  ;;  %v6581_v44 = vld [vmem:[#allocation9 + $0xb8] sm:$0xf0] }
 0x20b   :  { %v515_v46 = vpop.f32.mrf.mxu2 }
 0x20c   :  { %v516_v47 = vadd.f32 %v515_v46, %v7577_v61 }
 0x20e   :  { %v551_v48 = vpack.c.bf16 %v516_v47, %v516_v47  ;;  %v5809_v47 = vor.u32 %v6579_v39, %v5806_v42 }
 0x210   :  { %583 = vst [vmem:[#allocation2 + $0x8c] sm:$0xf] %v551_v48  ;;  %v5813_v48 = vor.u32 %v6581_v44, %v5812_v43  ;;  %1785 = vmatpush.bf16.msra.mxu2 %v5809_v47  ;;  %v5765_v47 = vor.u32 %v6569_v38, %v5764_v37 }
 0x212   :  { %1799 = vmatpush.bf16.msrb.mxu3 %v5813_v48  ;;  %v5744_v48 = vld [vmem:[#allocation9 + $0x30] sm:$0xf] }
 0x213   :  { %v518_v49 = vpop.f32.mrf.mxu2 }
 0x214   :  { %v519_v50 = vadd.f32 %v518_v49, %v7577_v61  ;;  %v5792_v49 = vld [vmem:[#allocation9 + $0x90] sm:$0xf] }
 0x216   :  { %v553_v51 = vpack.c.bf16 %v519_v50, %v519_v50  ;;  %v6577_v50 = vld [vmem:[#allocation9 + $0x98] sm:$0xf0] }
 0x218   :  { %585 = vst [vmem:[#allocation2 + $0x98] sm:$0xf] %v553_v51  ;;  %v6576_v51 = vld [vmem:[#allocation9 + $0x94] sm:$0xf] }
 0x21b   :  { %v520_v3 = vpop.f32.mrf.mxu2 }
 0x21c   :  { %v521_v52 = vadd.f32 %v520_v3, %v7577_v61 }
 0x21e   :  { %v555_v53 = vpack.c.bf16 %v521_v52, %v521_v52  ;;  %v5793_v52 = vor.u32 %v6577_v50, %v5792_v49  ;;  %v6565_v49 = vld [vmem:[#allocation9 + $0x38] sm:$0xf0]  ;;  %v6564_v50 = vld [vmem:[#allocation9 + $0x34] sm:$0xf] }
 0x220   :  { %587 = vst [vmem:[#allocation2 + $0xa4] sm:$0xf] %v555_v53  ;;  %v5794_v53 = vld [vmem:[#allocation9 + $0x9c] sm:$0xf0]  ;;  %1772 = vmatpush.bf16.msra.mxu1 %v5793_v52 }
 0x223   :  { %v523_v4 = vpop.f32.mrf.mxu2 }
 0x224   :  { %v524_v54 = vadd.f32 %v523_v4, %v7577_v61  ;;  %v5800_v4 = vld [vmem:[#allocation9 + $0x98] sm:$0xf] }
 0x226   :  { %v557_v55 = vpack.c.bf16 %v524_v54, %v524_v54  ;;  %v6578_v54 = vld [vmem:[#allocation9 + $0xa0] sm:$0xf0] }
 0x228   :  { %589 = vst [vmem:[#allocation2 + $0xb0] sm:$0xf] %v557_v55 }
 0x22b   :  { %v525_v33 = vpop.f32.mrf.mxu2 }
 0x22c   :  { %v526_v56 = vadd.f32 %v525_v33, %v7577_v61  ;;  %v5797_v33 = vor.u32 %v6576_v51, %v5794_v53 }
 0x22e   :  { %v559_v57 = vpack.c.bf16 %v526_v56, %v526_v56  ;;  %v5801_v56 = vor.u32 %v6578_v54, %v5800_v4  ;;  %1786 = vmatpush.bf16.msra.mxu2 %v5797_v33  ;;  %v5746_v54 = vld [vmem:[#allocation9 + $0x3c] sm:$0xf0]  ;;  %v6566_v33 = vld [vmem:[#allocation9 + $0x40] sm:$0xf0] }
 0x230   :  { %591 = vst [vmem:[#allocation2 + $0xbc] sm:$0xf] %v559_v57  ;;  %v5780_v57 = vld [vmem:[#allocation9 + $0x78] sm:$0xf]  ;;  %1800 = vmatpush.bf16.msrb.mxu3 %v5801_v56 }
 0x289   :  { %v1444_v6 = vpop.f32.mrf.mxu2  ;;  %v1458_v7 = vpop.f32.mrf.mxu3 }
 0x28a   :  { %v1479_v8 = vadd.f32 %v1477_v1, %v1444_v6  ;;  %v1521_v45 = vadd.f32 %v1519_v2, %v1458_v7  ;;  %v5788_v2 = vld [vmem:[#allocation9 + $0x80] sm:$0xf]  ;;  %v6575_v6 = vld [vmem:[#allocation9 + $0x88] sm:$0xf0] }
 0x28c   :  { %v1481_v10 = vpack.c.bf16 %v1479_v8, %v1479_v8  ;;  %v1523_v61 = vpack.c.bf16 %v1521_v45, %v1521_v45  ;;  %v5781_v45 = vor.u32 %v6574_v58, %v5780_v57 }
 0x28e   :  { %v1483_v12 = vxor.u32 2147516416, %v1481_v10  ;;  %v1525_v13 = vxor.u32 2147516416, %v1523_v61  ;;  %v5785_v10 = vor.u32 %v6573_v63, %v5782_v0  ;;  %1773 = vmatpush.bf16.msra.mxu1 %v5781_v45  ;;  %v5745_v63 = vor.u32 %v6565_v49, %v5744_v48 }
 0x290   :  { %v1485_v14 = vunpack.c.l.bf16 %v1483_v12  ;;  %v1527_v25 = vunpack.c.l.bf16 %v1525_v13  ;;  %1787 = vmatpush.bf16.msra.mxu2 %v5785_v10 }
 0x291   :  { %v1446_v26 = vpop.f32.mrf.mxu2  ;;  %v1460_v22 = vpop.f32.mrf.mxu3 }
 0x292   :  { %v1487_v16 = vmul.f32 1.442695, %v1485_v14  ;;  %v1529_v18 = vmul.f32 1.442695, %v1527_v25  ;;  %v1480_v19 = vadd.f32 %v1478_v21, %v1446_v26  ;;  %v1522_v20 = vadd.f32 %v1520_v15, %v1460_v22  ;;  %v5768_v25 = vld [vmem:[#allocation9 + $0x60] sm:$0xf] }
 0x293   :  { %v5789_v14 = vor.u32 %v6575_v6, %v5788_v2  ;;  %v6571_v21 = vld [vmem:[#allocation9 + $0x68] sm:$0xf0]  ;;  %v6570_v15 = vld [vmem:[#allocation9 + $0x64] sm:$0xf]  ;;  %v5732_v6 = vld [vmem:[#allocation9 + $0x18] sm:$0xf] }
 0x294   :  { %6857 = vpow2.f32 %v1487_v16  ;;  %v1482_v23 = vpack.c.bf16 %v1480_v19, %v1480_v19  ;;  %v1524_v27 = vpack.c.bf16 %v1522_v20, %v1522_v20  ;;  %v5776_v19 = vld [vmem:[#allocation9 + $0x68] sm:$0xf]  ;;  %v6572_v20 = vld [vmem:[#allocation9 + $0x70] sm:$0xf0] }
 0x295   :  { %6859 = vpow2.f32 %v1529_v18  ;;  %v5770_v18 = vld [vmem:[#allocation9 + $0x6c] sm:$0xf0]  ;;  %1801 = vmatpush.bf16.msrb.mxu3 %v5789_v14 }
 0x296   :  { %v1484_v28 = vxor.u32 2147516416, %v1482_v23  ;;  %v1526_v29 = vxor.u32 2147516416, %v1524_v27 }
 0x298   :  { %v1486_v5 = vunpack.c.l.bf16 %v1484_v28  ;;  %v1528_v30 = vunpack.c.l.bf16 %v1526_v29  ;;  %v5769_v28 = vor.u32 %v6571_v21, %v5768_v25  ;;  %v5756_v29 = vld [vmem:[#allocation9 + $0x48] sm:$0xf] }
 0x29a   :  { %v6858_v31 = vpop.eup %6857  ;;  %v1489_v34 = vmul.f32 1.442695, %v1486_v5  ;;  %v1531_v35 = vmul.f32 1.442695, %v1528_v30  ;;  %v6568_v5 = vld [vmem:[#allocation9 + $0x50] sm:$0xf0]  ;;  %1774 = vmatpush.bf16.msra.mxu1 %v5769_v28 }
 0x29b   :  { %v6860_v9 = vpop.eup %6859  ;;  %v1491_v36 = vpack.c.bf16 %v6858_v31, %v6858_v31  ;;  %v5773_v31 = vor.u32 %v6570_v15, %v5770_v18  ;;  %v5757_v41 = vor.u32 %v6568_v5, %v5756_v29  ;;  %v5720_v15 = vld [vmem:[#allocation9] sm:$0xf] }
 0x29c   :  { %v1533_v40 = vpack.c.bf16 %v6860_v9, %v6860_v9  ;;  %6861 = vpow2.f32 %v1489_v34  ;;  %v5777_v34 = vor.u32 %v6572_v20, %v5776_v19  ;;  %v5758_v9 = vld [vmem:[#allocation9 + $0x54] sm:$0xf0]  ;;  %v6559_v20 = vld [vmem:[#allocation9 + $0x8] sm:$0xf0] }
 0x29d   :  { %v1493_v46 = vunpack.c.l.bf16 %v1491_v36  ;;  %6863 = vpow2.f32 %v1531_v35  ;;  %v6567_v35 = vld [vmem:[#allocation9 + $0x4c] sm:$0xf]  ;;  %1788 = vmatpush.bf16.msra.mxu2 %v5773_v31  ;;  %v6560_v31 = vld [vmem:[#allocation9 + $0x10] sm:$0xf0]  ;;  %v5721_v38 = vor.u32 %v6559_v20, %v5720_v15 }
 0x29e   :  { %v1535_v3 = vunpack.c.l.bf16 %v1533_v40  ;;  %1802 = vmatpush.bf16.msrb.mxu3 %v5777_v34  ;;  %1775 = vmatpush.bf16.msra.mxu1 %v5757_v41 }
 0x29f   :  { %v1495_v55 = vadd.f32 1.0, %v1493_v46  ;;  %v5761_v46 = vor.u32 %v6567_v35, %v5758_v9 }
 0x2a0   :  { %v1537_v59 = vadd.f32 1.0, %v1535_v3  ;;  %v1472_v3 = vpop.f32.mrf.mxu0 }
 0x2a1   :  { %v1497_v1 = vpack.c.bf16 %v1495_v55, %v1495_v55  ;;  %v5752_v55 = vld [vmem:[#allocation9 + $0x38] sm:$0xf]  ;;  %1789 = vmatpush.bf16.msra.mxu2 %v5761_v46 }
 0x2a2   :  { %v6862_v7 = vpop.eup %6861  ;;  %v1539_v8 = vpack.c.bf16 %v1537_v59, %v1537_v59  ;;  %v1266_v59 = vld [vmem:[#allocation2 + $0x38] sm:$0xf]  ;;  %1803 = vmatpush.bf16.msrb.mxu3 %v5765_v47  ;;  %v5753_v2 = vor.u32 %v6566_v33, %v5752_v55  ;;  %1776 = vmatpush.bf16.msra.mxu1 %v5745_v63  ;;  %v1268_v47 = vld [vmem:[#allocation2 + $0x44] sm:$0xf] }
 0x2a3   :  { %v6864_v61 = vpop.eup %6863  ;;  %v1499_v11 = vunpack.c.h.bf16 %v1497_v1  ;;  %v1500_v12 = vunpack.c.l.bf16 %v1497_v1  ;;  %v1492_v13 = vpack.c.bf16 %v6862_v7, %v6862_v7  ;;  %v5749_v1 = vor.u32 %v6564_v50, %v5746_v54  ;;  %v6562_v7 = vld [vmem:[#allocation9 + $0x20] sm:$0xf0] }
 0x2a4   :  { %v1541_v26 = vunpack.c.h.bf16 %v1539_v8  ;;  %v1542_v22 = vunpack.c.l.bf16 %v1539_v8  ;;  %v1534_v16 = vpack.c.bf16 %v6864_v61, %v6864_v61  ;;  %v6561_v8 = vld [vmem:[#allocation9 + $0x1c] sm:$0xf]  ;;  %v5734_v61 = vld [vmem:[#allocation9 + $0x24] sm:$0xf0]  ;;  %v5733_v21 = vor.u32 %v6562_v7, %v5732_v6 }
 0x2a5   :  { %6865 = vrcp.f32 %v1499_v11  ;;  %v1494_v23 = vunpack.c.l.bf16 %v1492_v13  ;;  %v5740_v11 = vld [vmem:[#allocation9 + $0x20] sm:$0xf]  ;;  %1790 = vmatpush.bf16.msra.mxu2 %v5749_v1  ;;  %v5737_v18 = vor.u32 %v6561_v8, %v5734_v61 }
 0x2a6   :  { %6867 = vrcp.f32 %v1500_v12  ;;  %v1536_v27 = vunpack.c.l.bf16 %v1534_v16  ;;  %v6563_v12 = vld [vmem:[#allocation9 + $0x28] sm:$0xf0]  ;;  %v7701_v13 = vld [vmem:[%s8389_s4] ss:$0 sm:$0xff]  ;;  %v1561_v16 = vunpack.c.l.bf16 %v1266_v59  ;;  %1804 = vmatpush.bf16.msrb.mxu3 %v5753_v2  ;;  %1777 = vmatpush.bf16.msra.mxu1 %v5733_v21 }
 0x2a7   :  { %6869 = vrcp.f32 %v1541_v26  ;;  %v1496_v30 = vadd.f32 1.0, %v1494_v23  ;;  %v1555_v14 = vadd.f32 %v7701_v13, %v1472_v3  ;;  %v5741_v19 = vor.u32 %v6563_v12, %v5740_v11  ;;  %v6558_v23 = vld [vmem:[#allocation9 + $0x4] sm:$0xf] }
 0x2a8   :  { %6871 = vrcp.f32 %v1542_v22  ;;  %v1538_v36 = vadd.f32 1.0, %v1536_v27  ;;  %v5722_v27 = vld [vmem:[#allocation9 + $0xc] sm:$0xf0]  ;;  %v1474_v37 = vpop.f32.mrf.mxu0  ;;  %v1562_v3 = vunpack.c.l.bf16 %v1268_v47 }
 0x2a9   :  { %v1498_v39 = vpack.c.bf16 %v1496_v30, %v1496_v30  ;;  %v5728_v30 = vld [vmem:[#allocation9 + $0x8] sm:$0xf]  ;;  %1791 = vmatpush.bf16.msra.mxu2 %v5737_v18  ;;  %v1556_v48 = vadd.f32 %v7701_v13, %v1474_v37 }
 0x2aa   :  { %v1540_v40 = vpack.c.bf16 %v1538_v36, %v1538_v36  ;;  %1805 = vmatpush.bf16.msrb.mxu3 %v5741_v19  ;;  %v5729_v41 = vor.u32 %v6560_v31, %v5728_v30  ;;  %1778 = vmatpush.bf16.msra.mxu1 %v5721_v38  ;;  %v1603_v30 = vld [vmem:[#allocation2 + $0x54] sm:$0xff] }
 0x2ab   :  { %v6866_v42 = vpop.eup %6865  ;;  %v1506_v43 = vunpack.c.h.bf16 %v1498_v39  ;;  %v1507_v44 = vunpack.c.l.bf16 %v1498_v39  ;;  %v5725_v39 = vor.u32 %v6558_v23, %v5722_v27  ;;  %v1601_v23 = vld [vmem:[#allocation2 + $0x48] sm:$0xff]  ;;  %v1814_v37 = vunpack.c.l.bf16 %v1603_v30 }
 0x2ac   :  { %v6868_v51 = vpop.eup %6867  ;;  %v1502_v52 = vmul.f32 %v6866_v42, %v7581_v60  ;;  %v1548_v53 = vunpack.c.h.bf16 %v1540_v40  ;;  %v1549_v4 = vunpack.c.l.bf16 %v1540_v40 }
 0x2ad   :  { %v6870_v56 = vpop.eup %6869  ;;  %v1504_v57 = vmul.f32 %v6868_v51, %v7583_v62  ;;  %6873 = vrcp.f32 %v1506_v43  ;;  %1792 = vmatpush.bf16.msra.mxu2 %v5725_v39 }
 0x2ae   :  { %v6872_v58 = vpop.eup %6871  ;;  %6875 = vrcp.f32 %v1507_v44  ;;  %v1544_v45 = vmul.f32 %v6870_v56, %v7581_v60  ;;  %1806 = vmatpush.bf16.msrb.mxu3 %v5729_v41 }
 0x2af   :  { %v1505_v0 = vpack.c.bf16 %v1502_v52, %v1504_v57  ;;  %6877 = vrcp.f32 %v1548_v53  ;;  %v1546_v10 = vmul.f32 %v6872_v58, %v7583_v62 }
 0x2b0   :  { %6879 = vrcp.f32 %v1549_v4 }
 0x2b1   :  { %v1557_v25 = vunpack.c.l.bf16 %v1505_v0  ;;  %v1547_v29 = vpack.c.bf16 %v1544_v45, %v1546_v10 }
 0x2b3   :  { %v6874_v26 = vpop.eup %6873  ;;  %v1559_v22 = vmul.f32 %v1557_v25, %v1555_v14  ;;  %v1573_v43 = vunpack.c.l.bf16 %v1547_v29  ;;  %v1851_v29 = vrot.slane %v1601_v23, 4 }
 0x2b4   :  { %v6876_v28 = vpop.eup %6875  ;;  %v1509_v5 = vmul.f32 %v6874_v26, %v7581_v60 }
 0x2b5   :  { %v6878_v34 = vpop.eup %6877  ;;  %v1563_v35 = vadd.f32 %v1561_v16, %v1559_v22  ;;  %v1511_v9 = vmul.f32 %v6876_v28, %v7583_v62  ;;  %v1575_v52 = vsub.f32 1.0, %v1573_v43  ;;  %v1589_v12 = vmul.f32 %v1573_v43, %v7668_v17 }
 0x2b6   :  { %v6880_v36 = vpop.eup %6879  ;;  %v1551_v44 = vmul.f32 %v6878_v34, %v7581_v60  ;;  %v1855_v34 = vunpack.c.l.bf16 %v1851_v29  ;;  %v5876_v29 = vld [vmem:[#allocation9 + $0x78] sm:$0xf] }
 0x2b7   :  { %v1512_v40 = vpack.c.bf16 %v1509_v5, %v1511_v9  ;;  %v1565_v42 = vpack.c.bf16 %v1563_v35, %v1563_v35  ;;  %v1553_v46 = vmul.f32 %v6880_v36, %v7583_v62  ;;  %v1577_v33 = vpack.c.bf16 %v1575_v52, %v1575_v52 }
 0x2b9   :  { %v1558_v49 = vunpack.c.l.bf16 %v1512_v40  ;;  %v1567_v50 = vunpack.c.l.bf16 %v1565_v42  ;;  %v1554_v53 = vpack.c.bf16 %v1551_v44, %v1553_v46  ;;  %v1579_v63 = vunpack.c.l.bf16 %v1577_v33  ;;  %v5900_v33 = vld [vmem:[#allocation9 + $0xa8] sm:$0xf] }
 0x2ba   :  { %v1852_v42 = vrot.slane %v1603_v30, 4  ;;  %v6597_v30 = vld [vmem:[#allocation9 + $0x7c] sm:$0xf] }
 0x2bb   :  { %v1560_v51 = vmul.f32 %v1558_v49, %v1556_v48  ;;  %6881 = vtanh.f32 %v1567_v50  ;;  %v1574_v55 = vunpack.c.l.bf16 %v1554_v53 }
 0x2bc   :  { %v1856_v48 = vunpack.c.l.bf16 %v1852_v42 }
 0x2bd   :  { %v1564_v4 = vadd.f32 %v1562_v3, %v1560_v51  ;;  %v1576_v59 = vsub.f32 1.0, %v1574_v55  ;;  %v1590_v15 = vmul.f32 %v1574_v55, %v7671_v24  ;;  %v1813_v24 = vunpack.c.l.bf16 %v1601_v23 }
 0x2bf   :  { %v1566_v54 = vpack.c.bf16 %v1564_v4, %v1564_v4  ;;  %v1578_v2 = vpack.c.bf16 %v1576_v59, %v1576_v59  ;;  %v6603_v59 = vld [vmem:[#allocation9 + $0xac] sm:$0xf] }
 0x2c1   :  { %v6882_v56 = vpop.eup %6881  ;;  %v1568_v57 = vunpack.c.l.bf16 %v1566_v54  ;;  %v1580_v45 = vunpack.c.l.bf16 %v1578_v2 }
 0x2c2   :  { %v1571_v58 = vpack.c.bf16 %v6882_v56, %v6882_v56  ;;  %v6604_v56 = vld [vmem:[#allocation9 + $0xb0] sm:$0xf0] }
 0x2c3   :  { %6883 = vtanh.f32 %v1568_v57 }
 0x2c4   :  { %v1581_v0 = vunpack.c.l.bf16 %v1571_v58  ;;  %v5901_v58 = vor.u32 %v6604_v56, %v5900_v33 }
 0x2c6   :  { %v1583_v1 = vmul.f32 %v1581_v0, %v1579_v63  ;;  %v5902_v63 = vld [vmem:[#allocation9 + $0xb4] sm:$0xf0]  ;;  %v5908_v0 = vld [vmem:[#allocation9 + $0xb0] sm:$0xf]  ;;  %2107 = vmatpush.bf16.msrb.mxu0 %v5901_v58 }
 0x2c7   :  { %v5905_v2 = vor.u32 %v6603_v59, %v5902_v63 }
 0x2c8   :  { %v1585_v6 = vpack.c.bf16 %v1583_v1, %v1583_v1 }
 0x2c9   :  { %v6884_v7 = vpop.eup %6883  ;;  %2121 = vmatpush.bf16.msrb.mxu1 %v5905_v2  ;;  %v6591_v2 = vld [vmem:[#allocation9 + $0x4c] sm:$0xf] }
 0x2ca   :  { %v1572_v8 = vpack.c.bf16 %v6884_v7, %v6884_v7  ;;  %v1587_v61 = vunpack.c.l.bf16 %v1585_v6  ;;  %v6605_v6 = vld [vmem:[#allocation9 + $0xb8] sm:$0xf0] }
 0x2cc   :  { %v1582_v10 = vunpack.c.l.bf16 %v1572_v8  ;;  %v7710_v25 = vadd.f32 %v1589_v12, %v1587_v61  ;;  %v5909_v8 = vor.u32 %v6605_v6, %v5908_v0  ;;  %v5888_v61 = vld [vmem:[#allocation9 + $0x90] sm:$0xf]  ;;  %v5852_v0 = vld [vmem:[#allocation9 + $0x48] sm:$0xf] }
 0x2ce   :  { %v1584_v11 = vmul.f32 %v1582_v10, %v1580_v45  ;;  %v1593_v22 = vpack.c.bf16 %v7710_v25, %v7710_v25  ;;  %2135 = vmatpush.bf16.msrb.mxu2 %v5909_v8 }
 0x2d0   :  { %v1586_v14 = vpack.c.bf16 %v1584_v11, %v1584_v11  ;;  %v1639_v19 = vunpack.c.l.b16 %v1593_v22  ;;  %v6601_v11 = vld [vmem:[#allocation9 + $0x98] sm:$0xf0]  ;;  %v5890_v22 = vld [vmem:[#allocation9 + $0x9c] sm:$0xf0] }
 0x2d2   :  { %v1588_v21 = vunpack.c.l.bf16 %v1586_v14 }
 0x2d4   :  { %v7713_v26 = vadd.f32 %v1590_v15, %v1588_v21  ;;  %v5889_v21 = vor.u32 %v6601_v11, %v5888_v61  ;;  %v6600_v15 = vld [vmem:[#allocation9 + $0x94] sm:$0xf]  ;;  %v6593_v11 = vld [vmem:[#allocation9 + $0x58] sm:$0xf0] }
 0x2d6   :  { %v1594_v16 = vpack.c.bf16 %v7713_v26, %v7713_v26  ;;  %v6755_v18 = vpack.c.bf16 %v7713_v26, %v7710_v25  ;;  %2108 = vmatpush.bf16.msrb.mxu0 %v5889_v21 }
 0x2d8   :  { %6756 = vst [vmem:[#allocation3 + $0x18] sm:$0xff] %v6755_v18   ;;  %v1640_v17 = vunpack.c.l.b16 %v1594_v16  ;;  %v5896_v16 = vld [vmem:[#allocation9 + $0x98] sm:$0xf] }
 0x2da   :  { %v1641_v20 = vpack.c.b16 %v1640_v17, %v1639_v19  ;;  %v5893_v19 = vor.u32 %v6600_v15, %v5890_v22  ;;  %v6602_v17 = vld [vmem:[#allocation9 + $0xa0] sm:$0xf0] }
 0x2dc   :  { %1779 = vmatmul.bf16.vlgmr.msra.gmra.mxu1 %v1641_v20  ;;  %1793 = vmatmul.bf16.vlgmr.msra.gmra.mxu2 %v1641_v20 }
 0x2dd   :  { %1807 = vmatmul.bf16.vlgmr.msrb.gmra.mxu3 %v1641_v20  ;;  %2122 = vmatpush.bf16.msrb.mxu1 %v5893_v19  ;;  %v6588_v19 = vld [vmem:[#allocation9 + $0x34] sm:$0xf] }
 0x359   :  { %v1780_v27 = vpop.f32.mrf.mxu1 }
 0x35a   :  { %v1815_v28 = vadd.f32 %v1813_v24, %v1780_v27 }
 0x35c   :  { %v1817_v5 = vpack.c.bf16 %v1815_v28, %v1815_v28  ;;  %v5897_v28 = vor.u32 %v6602_v17, %v5896_v16  ;;  %v5840_v16 = vld [vmem:[#allocation9 + $0x30] sm:$0xf] }
 0x35e   :  { %v1819_v31 = vxor.u32 2147516416, %v1817_v5  ;;  %v6598_v5 = vld [vmem:[#allocation9 + $0x80] sm:$0xf0]  ;;  %2136 = vmatpush.bf16.msrb.mxu2 %v5897_v28  ;;  %v5842_v28 = vld [vmem:[#allocation9 + $0x3c] sm:$0xf0] }
 0x35f   :  { %v1794_v35 = vpop.f32.mrf.mxu2 }
 0x360   :  { %v1821_v9 = vunpack.c.l.bf16 %v1819_v31  ;;  %v1857_v36 = vadd.f32 %v1855_v34, %v1794_v35  ;;  %v5877_v35 = vor.u32 %v6598_v5, %v5876_v29  ;;  %v1808_v59 = vpop.f32.mrf.mxu3  ;;  %v5848_v29 = vld [vmem:[#allocation9 + $0x38] sm:$0xf]  ;;  %v6590_v5 = vld [vmem:[#allocation9 + $0x40] sm:$0xf0] }
 0x361   :  { %v1782_v38 = vpop.f32.mrf.mxu1  ;;  %v1891_v22 = vadd.f32 %v7701_v13, %v1808_v59  ;;  %v6584_v59 = vld [vmem:[#allocation9 + $0x10] sm:$0xf0] }
 0x362   :  { %v1823_v39 = vmul.f32 1.442695, %v1821_v9  ;;  %v1859_v40 = vpack.c.bf16 %v1857_v36, %v1857_v36  ;;  %v1816_v41 = vadd.f32 %v1814_v37, %v1782_v38  ;;  %v5878_v9 = vld [vmem:[#allocation9 + $0x84] sm:$0xf0]  ;;  %v5884_v36 = vld [vmem:[#allocation9 + $0x80] sm:$0xf]  ;;  %2109 = vmatpush.bf16.msrb.mxu0 %v5877_v35  ;;  %v5849_v35 = vor.u32 %v6590_v5, %v5848_v29 }
 0x363   :  { %v5881_v37 = vor.u32 %v6597_v30, %v5878_v9  ;;  %v6599_v38 = vld [vmem:[#allocation9 + $0x88] sm:$0xf0]  ;;  %v5828_v9 = vld [vmem:[#allocation9 + $0x18] sm:$0xf] }
 0x364   :  { %6885 = vpow2.f32 %v1823_v39  ;;  %v1861_v43 = vxor.u32 2147516416, %v1859_v40  ;;  %v1818_v44 = vpack.c.bf16 %v1816_v41, %v1816_v41  ;;  %v5885_v41 = vor.u32 %v6599_v38, %v5884_v36  ;;  %v6586_v36 = vld [vmem:[#allocation9 + $0x20] sm:$0xf0] }
 0x365   :  { %2123 = vmatpush.bf16.msrb.mxu1 %v5881_v37  ;;  %v6585_v37 = vld [vmem:[#allocation9 + $0x1c] sm:$0xf] }
 0x366   :  { %v1863_v46 = vunpack.c.l.bf16 %v1861_v43  ;;  %v1820_v47 = vxor.u32 2147516416, %v1818_v44  ;;  %v5864_v43 = vld [vmem:[#allocation9 + $0x60] sm:$0xf]  ;;  %v6595_v44 = vld [vmem:[#allocation9 + $0x68] sm:$0xf0]  ;;  %2137 = vmatpush.bf16.msrb.mxu2 %v5885_v41 }
 0x367   :  { %v1796_v49 = vpop.f32.mrf.mxu2 }
 0x368   :  { %v1865_v50 = vmul.f32 1.442695, %v1863_v46  ;;  %v1822_v51 = vunpack.c.l.bf16 %v1820_v47  ;;  %v1858_v3 = vadd.f32 %v1856_v48, %v1796_v49  ;;  %v6594_v46 = vld [vmem:[#allocation9 + $0x64] sm:$0xf] }
 0x36a   :  { %v6886_v52 = vpop.eup %6885  ;;  %6887 = vpow2.f32 %v1865_v50  ;;  %v1825_v53 = vmul.f32 1.442695, %v1822_v51  ;;  %v1860_v4 = vpack.c.bf16 %v1858_v3, %v1858_v3  ;;  %v5866_v51 = vld [vmem:[#allocation9 + $0x6c] sm:$0xf0]  ;;  %v5872_v3 = vld [vmem:[#allocation9 + $0x68] sm:$0xf] }
 0x36b   :  { %v1827_v54 = vpack.c.bf16 %v6886_v52, %v6886_v52  ;;  %v6596_v52 = vld [vmem:[#allocation9 + $0x70] sm:$0xf0] }
 0x36c   :  { %6889 = vpow2.f32 %v1825_v53  ;;  %v1862_v55 = vxor.u32 2147516416, %v1860_v4  ;;  %v5865_v53 = vor.u32 %v6595_v44, %v5864_v43  ;;  %v5869_v4 = vor.u32 %v6594_v46, %v5866_v51  ;;  %v5836_v43 = vld [vmem:[#allocation9 + $0x20] sm:$0xf]  ;;  %v6587_v44 = vld [vmem:[#allocation9 + $0x28] sm:$0xf0] }
 0x36d   :  { %v1829_v57 = vunpack.c.l.bf16 %v1827_v54  ;;  %v5873_v54 = vor.u32 %v6596_v52, %v5872_v3 }
 0x36e   :  { %v1864_v1 = vunpack.c.l.bf16 %v1862_v55  ;;  %2110 = vmatpush.bf16.msrb.mxu0 %v5865_v53  ;;  %2124 = vmatpush.bf16.msrb.mxu1 %v5869_v4  ;;  %v6583_v53 = vld [vmem:[#allocation9 + $0x8] sm:$0xf0]  ;;  %v6582_v4 = vld [vmem:[#allocation9 + $0x4] sm:$0xf] }
 0x36f   :  { %v1831_v7 = vadd.f32 1.0, %v1829_v57  ;;  %2138 = vmatpush.bf16.msrb.mxu2 %v5873_v54  ;;  %v5818_v54 = vld [vmem:[#allocation9 + $0xc] sm:$0xf0] }
 0x370   :  { %v6888_v45 = vpop.eup %6887  ;;  %v1867_v10 = vmul.f32 1.442695, %v1864_v1  ;;  %v6592_v1 = vld [vmem:[#allocation9 + $0x50] sm:$0xf0] }
 0x371   :  { %v1833_v12 = vpack.c.bf16 %v1831_v7, %v1831_v7  ;;  %v1869_v14 = vpack.c.bf16 %v6888_v45, %v6888_v45  ;;  %v5853_v8 = vor.u32 %v6592_v1, %v5852_v0  ;;  %v5854_v45 = vld [vmem:[#allocation9 + $0x54] sm:$0xf0]  ;;  %v1604_v0 = vld [vmem:[#allocation2 + $0x5c] sm:$0xf] }
 0x372   :  { %v6890_v18 = vpop.eup %6889  ;;  %6891 = vpow2.f32 %v1867_v10  ;;  %v5860_v10 = vld [vmem:[#allocation9 + $0x50] sm:$0xf]  ;;  %v5857_v61 = vor.u32 %v6591_v2, %v5854_v45  ;;  %v5821_v2 = vor.u32 %v6582_v4, %v5818_v54 }
 0x373   :  { %v1835_v20 = vunpack.c.h.bf16 %v1833_v12  ;;  %v1836_v23 = vunpack.c.l.bf16 %v1833_v12  ;;  %v1871_v24 = vunpack.c.l.bf16 %v1869_v14  ;;  %v1828_v27 = vpack.c.bf16 %v6890_v18, %v6890_v18  ;;  %v1602_v12 = vld [vmem:[#allocation2 + $0x50] sm:$0xf]  ;;  %2111 = vmatpush.bf16.msrb.mxu0 %v5853_v8  ;;  %v6589_v18 = vld [vmem:[#allocation9 + $0x38] sm:$0xf0] }
 0x374   :  { %v5861_v15 = vor.u32 %v6593_v11, %v5860_v10  ;;  %2125 = vmatpush.bf16.msrb.mxu1 %v5857_v61  ;;  %v1897_v41 = vunpack.c.l.bf16 %v1602_v12  ;;  %v1939_v54 = vld [vmem:[#allocation2 + $0x6c] sm:$0xff] }
 0x375   :  { %6893 = vrcp.f32 %v1835_v20  ;;  %v1873_v31 = vadd.f32 1.0, %v1871_v24  ;;  %v1830_v34 = vunpack.c.l.bf16 %v1828_v27  ;;  %v5841_v27 = vor.u32 %v6589_v18, %v5840_v16 }
 0x376   :  { %6895 = vrcp.f32 %v1836_v23  ;;  %2139 = vmatpush.bf16.msrb.mxu2 %v5861_v15 }
 0x377   :  { %v1875_v39 = vpack.c.bf16 %v1873_v31, %v1873_v31  ;;  %v1832_v40 = vadd.f32 1.0, %v1830_v34  ;;  %v5845_v34 = vor.u32 %v6588_v19, %v5842_v28  ;;  %2112 = vmatpush.bf16.msrb.mxu0 %v5841_v27 }
 0x378   :  { %v6892_v42 = vpop.eup %6891 }
 0x379   :  { %v1877_v47 = vunpack.c.h.bf16 %v1875_v39  ;;  %v1878_v48 = vunpack.c.l.bf16 %v1875_v39  ;;  %v1834_v49 = vpack.c.bf16 %v1832_v40, %v1832_v40  ;;  %v1870_v50 = vpack.c.bf16 %v6892_v42, %v6892_v42  ;;  %v5830_v42 = vld [vmem:[#allocation9 + $0x24] sm:$0xf0]  ;;  %2126 = vmatpush.bf16.msrb.mxu1 %v5845_v34 }
 0x37a   :  { %2140 = vmatpush.bf16.msrb.mxu2 %v5849_v35 }
 0x37b   :  { %v6894_v55 = vpop.eup %6893  ;;  %6897 = vrcp.f32 %v1877_v47  ;;  %v1842_v33 = vunpack.c.h.bf16 %v1834_v49  ;;  %v1843_v56 = vunpack.c.l.bf16 %v1834_v49  ;;  %v1872_v57 = vunpack.c.l.bf16 %v1870_v50  ;;  %v5816_v50 = vld [vmem:[#allocation9] sm:$0xf] }
 0x37c   :  { %v6896_v58 = vpop.eup %6895  ;;  %6899 = vrcp.f32 %v1878_v48  ;;  %v1838_v63 = vmul.f32 %v6894_v55, %v7581_v60  ;;  %v5829_v48 = vor.u32 %v6586_v36, %v5828_v9  ;;  %v5833_v49 = vor.u32 %v6585_v37, %v5830_v42  ;;  %v1810_v55 = vpop.f32.mrf.mxu3 }
 0x37d   :  { %v1840_v6 = vmul.f32 %v6896_v58, %v7583_v62  ;;  %6901 = vrcp.f32 %v1842_v33  ;;  %v1874_v7 = vadd.f32 1.0, %v1872_v57  ;;  %v5837_v33 = vor.u32 %v6587_v44, %v5836_v43  ;;  %v5824_v58 = vld [vmem:[#allocation9 + $0x8] sm:$0xf] }
 0x37e   :  { %6903 = vrcp.f32 %v1843_v56  ;;  %2113 = vmatpush.bf16.msrb.mxu0 %v5829_v48  ;;  %2127 = vmatpush.bf16.msrb.mxu1 %v5833_v49  ;;  %v5817_v1 = vor.u32 %v6583_v53, %v5816_v50  ;;  %v1892_v8 = vadd.f32 %v7701_v13, %v1810_v55  ;;  %v5825_v11 = vor.u32 %v6584_v59, %v5824_v58 }
 0x37f   :  { %v1841_v14 = vpack.c.bf16 %v1838_v63, %v1840_v6  ;;  %v1876_v21 = vpack.c.bf16 %v1874_v7, %v1874_v7  ;;  %2141 = vmatpush.bf16.msrb.mxu2 %v5837_v33  ;;  %v2188_v58 = vrot.slane %v1939_v54, 4 }
 0x381   :  { %v6898_v17 = vpop.eup %6897  ;;  %v1893_v20 = vunpack.c.l.bf16 %v1841_v14  ;;  %v1884_v23 = vunpack.c.h.bf16 %v1876_v21  ;;  %v1885_v24 = vunpack.c.l.bf16 %v1876_v21  ;;  %v1898_v21 = vunpack.c.l.bf16 %v1604_v0 }
 0x382   :  { %v6900_v30 = vpop.eup %6899  ;;  %v1880_v31 = vmul.f32 %v6898_v17, %v7581_v60  ;;  %2114 = vmatpush.bf16.msrb.mxu0 %v5817_v1  ;;  %2128 = vmatpush.bf16.msrb.mxu1 %v5821_v2  ;;  %v2150_v2 = vunpack.c.l.bf16 %v1939_v54 }
 0x383   :  { %v6902_v38 = vpop.eup %6901  ;;  %v1882_v39 = vmul.f32 %v6900_v30, %v7583_v62  ;;  %v1895_v40 = vmul.f32 %v1893_v20, %v1891_v22  ;;  %6905 = vrcp.f32 %v1884_v23  ;;  %2142 = vmatpush.bf16.msrb.mxu2 %v5825_v11 }
 0x384   :  { %v6904_v46 = vpop.eup %6903  ;;  %6907 = vrcp.f32 %v1885_v24  ;;  %v1845_v47 = vmul.f32 %v6902_v38, %v7581_v60 }
 0x385   :  { %v1883_v51 = vpack.c.bf16 %v1880_v31, %v1882_v39  ;;  %v1899_v3 = vadd.f32 %v1897_v41, %v1895_v40  ;;  %v1847_v52 = vmul.f32 %v6904_v46, %v7583_v62 }
 0x387   :  { %v1901_v56 = vpack.c.bf16 %v1899_v3, %v1899_v3  ;;  %v1848_v57 = vpack.c.bf16 %v1845_v47, %v1847_v52  ;;  %v1909_v63 = vunpack.c.l.bf16 %v1883_v51  ;;  %v1937_v51 = vld [vmem:[#allocation2 + $0x60] sm:$0xff] }
 0x388   :  { %v2149_v3 = vunpack.c.l.bf16 %v1937_v51 }
 0x389   :  { %v6906_v6 = vpop.eup %6905  ;;  %v1903_v7 = vunpack.c.l.bf16 %v1901_v56  ;;  %v1894_v45 = vunpack.c.l.bf16 %v1848_v57  ;;  %v1911_v15 = vsub.f32 1.0, %v1909_v63  ;;  %v1925_v38 = vmul.f32 %v1909_v63, %v7710_v25 }
 0x38a   :  { %v6908_v10 = vpop.eup %6907  ;;  %v1887_v61 = vmul.f32 %v6906_v6, %v7581_v60  ;;  %v2192_v6 = vunpack.c.l.bf16 %v2188_v58  ;;  %v6622_v58 = vld [vmem:[#allocation9 + $0x80] sm:$0xf0] }
 0x38b   :  { %6909 = vtanh.f32 %v1903_v7  ;;  %v1889_v12 = vmul.f32 %v6908_v10, %v7583_v62  ;;  %v1896_v14 = vmul.f32 %v1894_v45, %v1892_v8  ;;  %v1913_v19 = vpack.c.bf16 %v1911_v15, %v1911_v15 }
 0x38d   :  { %v1890_v22 = vpack.c.bf16 %v1887_v61, %v1889_v12  ;;  %v1900_v16 = vadd.f32 %v1898_v21, %v1896_v14  ;;  %v1915_v27 = vunpack.c.l.bf16 %v1913_v19 }
 0x38f   :  { %v1902_v18 = vpack.c.bf16 %v1900_v16, %v1900_v16  ;;  %v1910_v17 = vunpack.c.l.bf16 %v1890_v22 }
 0x391   :  { %v6910_v20 = vpop.eup %6909  ;;  %v1904_v23 = vunpack.c.l.bf16 %v1902_v18  ;;  %v1912_v29 = vsub.f32 1.0, %v1910_v17  ;;  %v1926_v43 = vmul.f32 %v1910_v17, %v7713_v26  ;;  %v2187_v26 = vrot.slane %v1937_v51, 4 }
 0x392   :  { %v1907_v24 = vpack.c.bf16 %v6910_v20, %v6910_v20 }
 0x393   :  { %6911 = vtanh.f32 %v1904_v23  ;;  %v1914_v31 = vpack.c.bf16 %v1912_v29, %v1912_v29  ;;  %v2191_v52 = vunpack.c.l.bf16 %v2187_v26  ;;  %v6627_v29 = vld [vmem:[#allocation9 + $0xac] sm:$0xf]  ;;  %v6626_v26 = vld [vmem:[#allocation9 + $0xa0] sm:$0xf0] }
 0x394   :  { %v1917_v28 = vunpack.c.l.bf16 %v1907_v24 }
 0x395   :  { %v1916_v36 = vunpack.c.l.bf16 %v1914_v31  ;;  %v5998_v31 = vld [vmem:[#allocation9 + $0xb4] sm:$0xf0] }
 0x396   :  { %v1919_v5 = vmul.f32 %v1917_v28, %v1915_v27  ;;  %v5996_v27 = vld [vmem:[#allocation9 + $0xa8] sm:$0xf]  ;;  %v6628_v28 = vld [vmem:[#allocation9 + $0xb0] sm:$0xf0] }
 0x398   :  { %v1921_v30 = vpack.c.bf16 %v1919_v5, %v1919_v5 }
 0x399   :  { %v6912_v34 = vpop.eup %6911 }
 0x39a   :  { %v1908_v35 = vpack.c.bf16 %v6912_v34, %v6912_v34  ;;  %v1923_v9 = vunpack.c.l.bf16 %v1921_v30  ;;  %v5997_v30 = vor.u32 %v6628_v28, %v5996_v27  ;;  %v6004_v34 = vld [vmem:[#allocation9 + $0xb0] sm:$0xf] }
 0x39c   :  { %v1918_v37 = vunpack.c.l.bf16 %v1908_v35  ;;  %v7732_v40 = vadd.f32 %v1925_v38, %v1923_v9  ;;  %v6629_v35 = vld [vmem:[#allocation9 + $0xb8] sm:$0xf0]  ;;  %2443 = vmatpush.bf16.msra.mxu3 %v5997_v30 }
 0x39e   :  { %v1920_v39 = vmul.f32 %v1918_v37, %v1916_v36  ;;  %v1929_v46 = vpack.c.bf16 %v7732_v40, %v7732_v40  ;;  %v6001_v36 = vor.u32 %v6627_v29, %v5998_v31  ;;  %v6005_v37 = vor.u32 %v6629_v35, %v6004_v34  ;;  %v5948_v34 = vld [vmem:[#allocation9 + $0x48] sm:$0xf]  ;;  %v6616_v35 = vld [vmem:[#allocation9 + $0x50] sm:$0xf0] }
 0x3a0   :  { %v1922_v41 = vpack.c.bf16 %v1920_v39, %v1920_v39  ;;  %v1975_v25 = vunpack.c.l.b16 %v1929_v46  ;;  %2457 = vmatpush.bf16.msra.mxu0 %v6001_v36  ;;  %2471 = vmatpush.bf16.msra.mxu1 %v6005_v37 }
 0x3a2   :  { %v1924_v42 = vunpack.c.l.bf16 %v1922_v41  ;;  %v5984_v41 = vld [vmem:[#allocation9 + $0x90] sm:$0xf] }
 0x3a4   :  { %v7735_v44 = vadd.f32 %v1926_v43, %v1924_v42  ;;  %v6625_v42 = vld [vmem:[#allocation9 + $0x98] sm:$0xf0] }
 0x3a5   :  { %v5985_v46 = vor.u32 %v6625_v42, %v5984_v41  ;;  %v5956_v41 = vld [vmem:[#allocation9 + $0x50] sm:$0xf]  ;;  %v6617_v42 = vld [vmem:[#allocation9 + $0x58] sm:$0xf0] }
 0x3a6   :  { %v1930_v47 = vpack.c.bf16 %v7735_v44, %v7735_v44  ;;  %v6760_v48 = vpack.c.bf16 %v7735_v44, %v7732_v40 }
 0x3a7   :  { %2444 = vmatpush.bf16.msra.mxu3 %v5985_v46 }
 0x3a8   :  { %6761 = vst [vmem:[#allocation3 + $0x10] sm:$0xff] %v6760_v48   ;;  %v1976_v49 = vunpack.c.l.b16 %v1930_v47  ;;  %v6624_v47 = vld [vmem:[#allocation9 + $0x94] sm:$0xf]  ;;  %v5986_v48 = vld [vmem:[#allocation9 + $0x9c] sm:$0xf0] }
 0x3a9   :  { %v5989_v51 = vor.u32 %v6624_v47, %v5986_v48  ;;  %v5957_v47 = vor.u32 %v6617_v42, %v5956_v41  ;;  %v1938_v48 = vld [vmem:[#allocation2 + $0x68] sm:$0xf] }
 0x3aa   :  { %v1977_v50 = vpack.c.b16 %v1976_v49, %v1975_v25  ;;  %v5992_v25 = vld [vmem:[#allocation9 + $0x98] sm:$0xf] }
 0x3ab   :  { %v5993_v54 = vor.u32 %v6626_v26, %v5992_v25  ;;  %2458 = vmatpush.bf16.msra.mxu0 %v5989_v51  ;;  %v5936_v51 = vld [vmem:[#allocation9 + $0x30] sm:$0xf]  ;;  %v6613_v26 = vld [vmem:[#allocation9 + $0x38] sm:$0xf0] }
 0x3ac   :  { %2115 = vmatmul.bf16.vlgmr.msrb.gmra.mxu0 %v1977_v50  ;;  %2129 = vmatmul.bf16.vlgmr.msrb.gmra.mxu1 %v1977_v50 }
 0x3ad   :  { %2143 = vmatmul.bf16.vlgmr.msrb.gmra.mxu2 %v1977_v50  ;;  %2472 = vmatpush.bf16.msra.mxu1 %v5993_v54  ;;  %v5938_v54 = vld [vmem:[#allocation9 + $0x3c] sm:$0xf0] }
 0x429   :  { %v2116_v53 = vpop.f32.mrf.mxu0  ;;  %v2130_v4 = vpop.f32.mrf.mxu1 }
 0x42a   :  { %v2151_v55 = vadd.f32 %v2149_v3, %v2116_v53  ;;  %v2193_v33 = vadd.f32 %v2191_v52, %v2130_v4 }
 0x42c   :  { %v2153_v56 = vpack.c.bf16 %v2151_v55, %v2151_v55  ;;  %v2195_v57 = vpack.c.bf16 %v2193_v33, %v2193_v33 }
 0x42e   :  { %v2155_v59 = vxor.u32 2147516416, %v2153_v56  ;;  %v2197_v63 = vxor.u32 2147516416, %v2195_v57  ;;  %v5972_v57 = vld [vmem:[#allocation9 + $0x78] sm:$0xf] }
 0x430   :  { %v2157_v0 = vunpack.c.l.bf16 %v2155_v59  ;;  %v2199_v1 = vunpack.c.l.bf16 %v2197_v63  ;;  %v6621_v59 = vld [vmem:[#allocation9 + $0x7c] sm:$0xf]  ;;  %v2144_v29 = vpop.f32.mrf.mxu2 }
 0x431   :  { %v2118_v7 = vpop.f32.mrf.mxu0  ;;  %v2132_v8 = vpop.f32.mrf.mxu1 }
 0x432   :  { %v2159_v45 = vmul.f32 1.442695, %v2157_v0  ;;  %v2201_v10 = vmul.f32 1.442695, %v2199_v1  ;;  %v2152_v61 = vadd.f32 %v2150_v2, %v2118_v7  ;;  %v2194_v11 = vadd.f32 %v2192_v6, %v2132_v8  ;;  %v5974_v1 = vld [vmem:[#allocation9 + $0x84] sm:$0xf0] }
 0x433   :  { %v5973_v0 = vor.u32 %v6622_v58, %v5972_v57  ;;  %v5980_v2 = vld [vmem:[#allocation9 + $0x80] sm:$0xf]  ;;  %v6623_v6 = vld [vmem:[#allocation9 + $0x88] sm:$0xf0]  ;;  %v5977_v8 = vor.u32 %v6621_v59, %v5974_v1  ;;  %v5924_v58 = vld [vmem:[#allocation9 + $0x18] sm:$0xf] }
 0x434   :  { %6913 = vpow2.f32 %v2159_v45  ;;  %v2154_v12 = vpack.c.bf16 %v2152_v61, %v2152_v61  ;;  %v2196_v14 = vpack.c.bf16 %v2194_v11, %v2194_v11  ;;  %v5981_v45 = vor.u32 %v6623_v6, %v5980_v2  ;;  %v5960_v11 = vld [vmem:[#allocation9 + $0x60] sm:$0xf]  ;;  %v6610_v59 = vld [vmem:[#allocation9 + $0x20] sm:$0xf0] }
 0x435   :  { %6915 = vpow2.f32 %v2201_v10  ;;  %2445 = vmatpush.bf16.msra.mxu3 %v5973_v0  ;;  %2459 = vmatpush.bf16.msra.mxu0 %v5977_v8  ;;  %v2233_v2 = vunpack.c.l.bf16 %v1938_v48  ;;  %v5925_v6 = vor.u32 %v6610_v59, %v5924_v58  ;;  %v5932_v8 = vld [vmem:[#allocation9 + $0x20] sm:$0xf] }
 0x436   :  { %v2156_v21 = vxor.u32 2147516416, %v2154_v12  ;;  %v2198_v15 = vxor.u32 2147516416, %v2196_v14  ;;  %v6619_v12 = vld [vmem:[#allocation9 + $0x68] sm:$0xf0]  ;;  %2473 = vmatpush.bf16.msra.mxu1 %v5981_v45 }
 0x437   :  { %v6611_v45 = vld [vmem:[#allocation9 + $0x28] sm:$0xf0] }
 0x438   :  { %v2158_v22 = vunpack.c.l.bf16 %v2156_v21  ;;  %v2200_v16 = vunpack.c.l.bf16 %v2198_v15  ;;  %v5961_v21 = vor.u32 %v6619_v12, %v5960_v11  ;;  %v6618_v15 = vld [vmem:[#allocation9 + $0x64] sm:$0xf]  ;;  %v5912_v12 = vld [vmem:[#allocation9] sm:$0xf] }
 0x43a   :  { %v6914_v18 = vpop.eup %6913  ;;  %v2161_v19 = vmul.f32 1.442695, %v2158_v22  ;;  %v2203_v17 = vmul.f32 1.442695, %v2200_v16  ;;  %v5962_v22 = vld [vmem:[#allocation9 + $0x6c] sm:$0xf0]  ;;  %2446 = vmatpush.bf16.msra.mxu3 %v5961_v21 }
 0x43b   :  { %v6916_v20 = vpop.eup %6915  ;;  %v2163_v23 = vpack.c.bf16 %v6914_v18, %v6914_v18  ;;  %v5968_v16 = vld [vmem:[#allocation9 + $0x68] sm:$0xf] }
 0x43c   :  { %v2205_v24 = vpack.c.bf16 %v6916_v20, %v6916_v20  ;;  %6917 = vpow2.f32 %v2161_v19  ;;  %v5965_v19 = vor.u32 %v6618_v15, %v5962_v22 }
 0x43d   :  { %v2165_v5 = vunpack.c.l.bf16 %v2163_v23  ;;  %6919 = vpow2.f32 %v2203_v17  ;;  %v6620_v17 = vld [vmem:[#allocation9 + $0x70] sm:$0xf0] }
 0x43e   :  { %v2207_v9 = vunpack.c.l.bf16 %v2205_v24  ;;  %v5969_v27 = vor.u32 %v6620_v17, %v5968_v16  ;;  %2460 = vmatpush.bf16.msra.mxu0 %v5965_v19  ;;  %v5933_v16 = vor.u32 %v6611_v45, %v5932_v8  ;;  %v5914_v19 = vld [vmem:[#allocation9 + $0xc] sm:$0xf0] }
 0x43f   :  { %v2167_v38 = vadd.f32 1.0, %v2165_v5 }
 0x440   :  { %v2209_v39 = vadd.f32 1.0, %v2207_v9  ;;  %v6615_v9 = vld [vmem:[#allocation9 + $0x4c] sm:$0xf]  ;;  %2474 = vmatpush.bf16.msra.mxu1 %v5969_v27 }
 0x441   :  { %v2169_v43 = vpack.c.bf16 %v2167_v38, %v2167_v38  ;;  %v5949_v38 = vor.u32 %v6616_v35, %v5948_v34  ;;  %v1940_v34 = vld [vmem:[#allocation2 + $0x74] sm:$0xf] }
 0x442   :  { %v6918_v49 = vpop.eup %6917  ;;  %v2211_v50 = vpack.c.bf16 %v2209_v39, %v2209_v39  ;;  %v5950_v39 = vld [vmem:[#allocation9 + $0x54] sm:$0xf0]  ;;  %v2234_v42 = vunpack.c.l.bf16 %v1940_v34 }
 0x443   :  { %v6920_v3 = vpop.eup %6919  ;;  %v2171_v52 = vunpack.c.h.bf16 %v2169_v43  ;;  %v2172_v53 = vunpack.c.l.bf16 %v2169_v43  ;;  %v2164_v4 = vpack.c.bf16 %v6918_v49, %v6918_v49  ;;  %v5953_v46 = vor.u32 %v6615_v9, %v5950_v39  ;;  %2447 = vmatpush.bf16.msra.mxu3 %v5949_v38 }
 0x444   :  { %v2213_v55 = vunpack.c.h.bf16 %v2211_v50  ;;  %v2214_v33 = vunpack.c.l.bf16 %v2211_v50  ;;  %v2206_v56 = vpack.c.bf16 %v6920_v3, %v6920_v3  ;;  %v6612_v3 = vld [vmem:[#allocation9 + $0x34] sm:$0xf]  ;;  %2475 = vmatpush.bf16.msra.mxu1 %v5957_v47 }
 0x445   :  { %6921 = vrcp.f32 %v2171_v52  ;;  %v2166_v63 = vunpack.c.l.bf16 %v2164_v4  ;;  %2461 = vmatpush.bf16.msra.mxu0 %v5953_v46  ;;  %v2227_v52 = vadd.f32 %v7701_v13, %v2144_v29  ;;  %v5937_v4 = vor.u32 %v6613_v26, %v5936_v51 }
 0x446   :  { %6923 = vrcp.f32 %v2172_v53  ;;  %v2208_v7 = vunpack.c.l.bf16 %v2206_v56  ;;  %v5941_v56 = vor.u32 %v6612_v3, %v5938_v54 }
 0x447   :  { %6925 = vrcp.f32 %v2213_v55  ;;  %v2168_v10 = vadd.f32 1.0, %v2166_v63  ;;  %v5944_v55 = vld [vmem:[#allocation9 + $0x38] sm:$0xf]  ;;  %v6609_v63 = vld [vmem:[#allocation9 + $0x1c] sm:$0xf]  ;;  %2448 = vmatpush.bf16.msra.mxu3 %v5937_v4 }
 0x448   :  { %6927 = vrcp.f32 %v2214_v33  ;;  %v2210_v61 = vadd.f32 1.0, %v2208_v7  ;;  %v6614_v33 = vld [vmem:[#allocation9 + $0x40] sm:$0xf0]  ;;  %v5926_v7 = vld [vmem:[#allocation9 + $0x24] sm:$0xf0] }
 0x449   :  { %v2170_v14 = vpack.c.bf16 %v2168_v10, %v2168_v10  ;;  %v5945_v57 = vor.u32 %v6614_v33, %v5944_v55  ;;  %2462 = vmatpush.bf16.msra.mxu0 %v5941_v56  ;;  %v5929_v11 = vor.u32 %v6609_v63, %v5926_v7 }
 0x44a   :  { %v2212_v18 = vpack.c.bf16 %v2210_v61, %v2210_v61 }
 0x44b   :  { %v6922_v20 = vpop.eup %6921  ;;  %v2178_v23 = vunpack.c.h.bf16 %v2170_v14  ;;  %v2179_v24 = vunpack.c.l.bf16 %v2170_v14  ;;  %v6607_v14 = vld [vmem:[#allocation9 + $0x8] sm:$0xf0]  ;;  %2476 = vmatpush.bf16.msra.mxu1 %v5945_v57  ;;  %2449 = vmatpush.bf16.msra.mxu3 %v5925_v6 }
 0x44c   :  { %v6924_v28 = vpop.eup %6923  ;;  %v2174_v5 = vmul.f32 %v6922_v20, %v7581_v60  ;;  %v2220_v30 = vunpack.c.h.bf16 %v2212_v18  ;;  %v2221_v31 = vunpack.c.l.bf16 %v2212_v18  ;;  %v6606_v18 = vld [vmem:[#allocation9 + $0x4] sm:$0xf]  ;;  %v2146_v20 = vpop.f32.mrf.mxu2  ;;  %v5913_v29 = vor.u32 %v6607_v14, %v5912_v12  ;;  %v2273_v12 = vld [vmem:[#allocation2 + $0x78] sm:$0xff] }
 0x44d   :  { %v6926_v36 = vpop.eup %6925  ;;  %v2176_v37 = vmul.f32 %v6924_v28, %v7583_v62  ;;  %6929 = vrcp.f32 %v2178_v23  ;;  %v5920_v23 = vld [vmem:[#allocation9 + $0x8] sm:$0xf]  ;;  %2463 = vmatpush.bf16.msra.mxu0 %v5929_v11  ;;  %v5917_v35 = vor.u32 %v6606_v18, %v5914_v19 }
 0x44e   :  { %v6928_v43 = vpop.eup %6927  ;;  %6931 = vrcp.f32 %v2179_v24  ;;  %v2216_v49 = vmul.f32 %v6926_v36, %v7581_v60  ;;  %v6608_v24 = vld [vmem:[#allocation9 + $0x10] sm:$0xf0]  ;;  %v7755_v36 = vld [vmem:[%s8389_s4] ss:$0 sm:$0xff] }
 0x44f   :  { %v2177_v25 = vpack.c.bf16 %v2174_v5, %v2176_v37  ;;  %6933 = vrcp.f32 %v2220_v30  ;;  %v2218_v50 = vmul.f32 %v6928_v43, %v7583_v62  ;;  %v2228_v37 = vadd.f32 %v7755_v36, %v2146_v20  ;;  %2477 = vmatpush.bf16.msra.mxu1 %v5933_v16  ;;  %2450 = vmatpush.bf16.msra.mxu3 %v5913_v29 }
 0x450   :  { %6935 = vrcp.f32 %v2221_v31  ;;  %v5921_v39 = vor.u32 %v6608_v24, %v5920_v23 }
 0x451   :  { %v2229_v53 = vunpack.c.l.bf16 %v2177_v25  ;;  %v2219_v10 = vpack.c.bf16 %v2216_v49, %v2218_v50  ;;  %2464 = vmatpush.bf16.msra.mxu0 %v5917_v35  ;;  %v6100_v35 = vld [vmem:[#allocation9 + $0xb0] sm:$0xf] }
 0x453   :  { %v6930_v0 = vpop.eup %6929  ;;  %v2231_v1 = vmul.f32 %v2229_v53, %v2227_v52  ;;  %v2245_v5 = vunpack.c.l.bf16 %v2219_v10  ;;  %2478 = vmatpush.bf16.msra.mxu1 %v5921_v39 }
 0x454   :  { %v6932_v13 = vpop.eup %6931  ;;  %v2181_v61 = vmul.f32 %v6930_v0, %v7581_v60 }
 0x455   :  { %v6934_v21 = vpop.eup %6933  ;;  %v2235_v15 = vadd.f32 %v2233_v2, %v2231_v1  ;;  %v2183_v22 = vmul.f32 %v6932_v13, %v7583_v62  ;;  %v2247_v43 = vsub.f32 1.0, %v2245_v5  ;;  %v2261_v63 = vmul.f32 %v2245_v5, %v7732_v40 }
 0x456   :  { %v6936_v17 = vpop.eup %6935  ;;  %v2223_v30 = vmul.f32 %v6934_v21, %v7581_v60 }
 0x457   :  { %v2237_v27 = vpack.c.bf16 %v2235_v15, %v2235_v15  ;;  %v2184_v28 = vpack.c.bf16 %v2181_v61, %v2183_v22  ;;  %v2225_v31 = vmul.f32 %v6936_v17, %v7583_v62  ;;  %v2249_v25 = vpack.c.bf16 %v2247_v43, %v2247_v43  ;;  %v2275_v15 = vld [vmem:[#allocation2 + $0x84] sm:$0xff] }
 0x458   :  { %v2524_v18 = vrot.slane %v2275_v15, 4  ;;  %v2485_v17 = vunpack.c.l.bf16 %v2273_v12 }
 0x459   :  { %v2239_v9 = vunpack.c.l.bf16 %v2237_v27  ;;  %v2230_v38 = vunpack.c.l.bf16 %v2184_v28  ;;  %v2226_v46 = vpack.c.bf16 %v2223_v30, %v2225_v31  ;;  %v2251_v3 = vunpack.c.l.bf16 %v2249_v25  ;;  %v6650_v25 = vld [vmem:[#allocation9 + $0xa0] sm:$0xf0] }
 0x45a   :  { %v2528_v27 = vunpack.c.l.bf16 %v2524_v18  ;;  %v6648_v18 = vld [vmem:[#allocation9 + $0x94] sm:$0xf] }
 0x45b   :  { %6937 = vtanh.f32 %v2239_v9  ;;  %v2232_v41 = vmul.f32 %v2230_v38, %v2228_v37  ;;  %v2246_v49 = vunpack.c.l.bf16 %v2226_v46  ;;  %v6653_v9 = vld [vmem:[#allocation9 + $0xb8] sm:$0xf0] }
 0x45c   :  { %v6101_v37 = vor.u32 %v6653_v9, %v6100_v35  ;;  %v6645_v9 = vld [vmem:[#allocation9 + $0x7c] sm:$0xf] }
 0x45d   :  { %v2236_v47 = vadd.f32 %v2234_v42, %v2232_v41  ;;  %v2248_v53 = vsub.f32 1.0, %v2246_v49  ;;  %v2262_v7 = vmul.f32 %v2246_v49, %v7735_v44  ;;  %v2523_v44 = vrot.slane %v2273_v12, 4 }
 0x45e   :  { %v2486_v41 = vunpack.c.l.bf16 %v2275_v15  ;;  %2807 = vmatpush.bf16.msrb.mxu0 %v6101_v37  ;;  %v6070_v37 = vld [vmem:[#allocation9 + $0x84] sm:$0xf0] }
 0x45f   :  { %v2238_v48 = vpack.c.bf16 %v2236_v47, %v2236_v47  ;;  %v2250_v55 = vpack.c.bf16 %v2248_v53, %v2248_v53  ;;  %v2527_v14 = vunpack.c.l.bf16 %v2523_v44  ;;  %v6076_v53 = vld [vmem:[#allocation9 + $0x80] sm:$0xf]  ;;  %v6052_v44 = vld [vmem:[#allocation9 + $0x50] sm:$0xf] }
 0x461   :  { %v6938_v50 = vpop.eup %6937  ;;  %v2240_v51 = vunpack.c.l.bf16 %v2238_v48  ;;  %v2252_v58 = vunpack.c.l.bf16 %v2250_v55  ;;  %v6088_v48 = vld [vmem:[#allocation9 + $0x98] sm:$0xf] }
 0x462   :  { %v2243_v26 = vpack.c.bf16 %v6938_v50, %v6938_v50  ;;  %v6089_v49 = vor.u32 %v6650_v25, %v6088_v48  ;;  %v6056_v25 = vld [vmem:[#allocation9 + $0x60] sm:$0xf] }
 0x463   :  { %6939 = vtanh.f32 %v2240_v51 }
 0x464   :  { %v2253_v52 = vunpack.c.l.bf16 %v2243_v26  ;;  %2808 = vmatpush.bf16.msrb.mxu0 %v6089_v49  ;;  %v6643_v49 = vld [vmem:[#allocation9 + $0x68] sm:$0xf0] }
 0x466   :  { %v2255_v4 = vmul.f32 %v2253_v52, %v2251_v3 }
 0x468   :  { %v2257_v54 = vpack.c.bf16 %v2255_v4, %v2255_v4  ;;  %v6647_v4 = vld [vmem:[#allocation9 + $0x88] sm:$0xf0] }
 0x469   :  { %v6940_v33 = vpop.eup %6939  ;;  %v6077_v55 = vor.u32 %v6647_v4, %v6076_v53  ;;  %v6058_v53 = vld [vmem:[#allocation9 + $0x6c] sm:$0xf0]  ;;  %v6016_v4 = vld [vmem:[#allocation9 + $0x8] sm:$0xf] }
 0x46a   :  { %v2244_v56 = vpack.c.bf16 %v6940_v33, %v6940_v33  ;;  %v2259_v57 = vunpack.c.l.bf16 %v2257_v54 }
 0x46b   :  { %2809 = vmatpush.bf16.msrb.mxu0 %v6077_v55  ;;  %v6632_v55 = vld [vmem:[#allocation9 + $0x10] sm:$0xf0] }
 0x46c   :  { %v2254_v59 = vunpack.c.l.bf16 %v2244_v56  ;;  %v7759_v1 = vadd.f32 %v2261_v63, %v2259_v57  ;;  %v6644_v63 = vld [vmem:[#allocation9 + $0x70] sm:$0xf0] }
 0x46e   :  { %v2256_v0 = vmul.f32 %v2254_v59, %v2252_v58  ;;  %v2265_v45 = vpack.c.bf16 %v7759_v1, %v7759_v1  ;;  %v6064_v59 = vld [vmem:[#allocation9 + $0x68] sm:$0xf] }
 0x470   :  { %v2258_v2 = vpack.c.bf16 %v2256_v0, %v2256_v0  ;;  %v2311_v40 = vunpack.c.l.b16 %v2265_v45  ;;  %v6651_v45 = vld [vmem:[#allocation9 + $0xac] sm:$0xf] }
 0x472   :  { %v2260_v6 = vunpack.c.l.bf16 %v2258_v2  ;;  %v6065_v2 = vor.u32 %v6644_v63, %v6064_v59  ;;  %v6708_v59 = vld [vmem:[#allocation12 + $0xb0] sm:$0xf0] }
 0x474   :  { %v7762_v8 = vadd.f32 %v2262_v7, %v2260_v6  ;;  %v6092_v6 = vld [vmem:[#allocation9 + $0xa8] sm:$0xf]  ;;  %v6652_v7 = vld [vmem:[#allocation9 + $0xb0] sm:$0xf0]  ;;  %2810 = vmatpush.bf16.msrb.mxu0 %v6065_v2 }
 0x476   :  { %v2266_v13 = vpack.c.bf16 %v7762_v8, %v7762_v8  ;;  %v6765_v10 = vpack.c.bf16 %v7762_v8, %v7759_v1 }
 0x478   :  { %6766 = vst [vmem:[#allocation3 + $0x8] sm:$0xff] %v6765_v10   ;;  %v2312_v61 = vunpack.c.l.b16 %v2266_v13 }
 0x47a   :  { %v2313_v11 = vpack.c.b16 %v2312_v61, %v2311_v40  ;;  %v6093_v40 = vor.u32 %v6652_v7, %v6092_v6  ;;  %v6094_v61 = vld [vmem:[#allocation9 + $0xb4] sm:$0xf0]  ;;  %v6017_v6 = vor.u32 %v6632_v55, %v6016_v4  ;;  %v6639_v7 = vld [vmem:[#allocation9 + $0x4c] sm:$0xf] }
 0x47b   :  { %v6097_v15 = vor.u32 %v6651_v45, %v6094_v61  ;;  %v6046_v45 = vld [vmem:[#allocation9 + $0x54] sm:$0xf0]  ;;  %v6032_v61 = vld [vmem:[#allocation9 + $0x30] sm:$0xf] }
 0x47c   :  { %2451 = vmatmul.bf16.vlgmr.msra.gmra.mxu3 %v2313_v11  ;;  %2465 = vmatmul.bf16.vlgmr.msra.gmra.mxu0 %v2313_v11 }
 0x47d   :  { %2479 = vmatmul.bf16.vlgmr.msra.gmra.mxu1 %v2313_v11  ;;  %2779 = vmatpush.bf16.msra.mxu2 %v6093_v40 }
 0x47e   :  { %2793 = vmatpush.bf16.msrb.mxu3 %v6097_v15  ;;  %v6304_v15 = vld [vmem:[#allocation12 + $0x90] sm:$0xf] }
 0x4f9   :  { %v2466_v21 = vpop.f32.mrf.mxu0 }
 0x4fa   :  { %v2529_v22 = vadd.f32 %v2527_v14, %v2466_v21  ;;  %v6641_v14 = vld [vmem:[#allocation9 + $0x58] sm:$0xf0]  ;;  %v6080_v21 = vld [vmem:[#allocation9 + $0x90] sm:$0xf] }
 0x4fc   :  { %v2531_v16 = vpack.c.bf16 %v2529_v22, %v2529_v22  ;;  %v6053_v22 = vor.u32 %v6641_v14, %v6052_v44 }
 0x4fe   :  { %v2533_v19 = vxor.u32 2147516416, %v2531_v16  ;;  %v6649_v16 = vld [vmem:[#allocation9 + $0x98] sm:$0xf0]  ;;  %2811 = vmatpush.bf16.msrb.mxu0 %v6053_v22  ;;  %v6705_v22 = vld [vmem:[#allocation12 + $0x98] sm:$0xf0] }
 0x4ff   :  { %v2452_v20 = vpop.f32.mrf.mxu3 }
 0x500   :  { %v2535_v23 = vunpack.c.l.bf16 %v2533_v19  ;;  %v2487_v24 = vadd.f32 %v2485_v17, %v2452_v20  ;;  %v6082_v19 = vld [vmem:[#allocation9 + $0x9c] sm:$0xf0] }
 0x501   :  { %v2468_v28 = vpop.f32.mrf.mxu0 }
 0x502   :  { %v2537_v29 = vmul.f32 1.442695, %v2535_v23  ;;  %v2489_v5 = vpack.c.bf16 %v2487_v24, %v2487_v24  ;;  %v2530_v30 = vadd.f32 %v2528_v27, %v2468_v28  ;;  %v6081_v23 = vor.u32 %v6649_v16, %v6080_v21  ;;  %v6040_v24 = vld [vmem:[#allocation9 + $0x38] sm:$0xf]  ;;  %v6638_v27 = vld [vmem:[#allocation9 + $0x40] sm:$0xf0] }
 0x503   :  { %v6041_v35 = vor.u32 %v6638_v27, %v6040_v24  ;;  %v6637_v21 = vld [vmem:[#allocation9 + $0x38] sm:$0xf0]  ;;  %v6636_v24 = vld [vmem:[#allocation9 + $0x34] sm:$0xf]  ;;  %v6034_v27 = vld [vmem:[#allocation9 + $0x3c] sm:$0xf0] }
 0x504   :  { %6941 = vpow2.f32 %v2537_v29  ;;  %v2491_v31 = vxor.u32 2147516416, %v2489_v5  ;;  %v2532_v34 = vpack.c.bf16 %v2530_v30, %v2530_v30  ;;  %v6085_v29 = vor.u32 %v6648_v18, %v6082_v19  ;;  %v6068_v5 = vld [vmem:[#allocation9 + $0x78] sm:$0xf]  ;;  %v6646_v30 = vld [vmem:[#allocation9 + $0x80] sm:$0xf0]  ;;  %2780 = vmatpush.bf16.msra.mxu2 %v6081_v23  ;;  %v2480_v18 = vpop.f32.mrf.mxu1 }
 0x505   :  { %2812 = vmatpush.bf16.msrb.mxu0 %v6041_v35  ;;  %v6702_v35 = vld [vmem:[#allocation12 + $0x80] sm:$0xf0] }
 0x506   :  { %v2493_v38 = vunpack.c.l.bf16 %v2491_v31  ;;  %v2534_v39 = vxor.u32 2147516416, %v2532_v34  ;;  %2794 = vmatpush.bf16.msrb.mxu3 %v6085_v29  ;;  %v6305_v29 = vor.u32 %v6705_v22, %v6304_v15  ;;  %v6268_v22 = vld [vmem:[#allocation12 + $0x48] sm:$0xf] }
 0x507   :  { %v2454_v42 = vpop.f32.mrf.mxu3 }
 0x508   :  { %v2495_v43 = vmul.f32 1.442695, %v2493_v38  ;;  %v2536_v46 = vunpack.c.l.bf16 %v2534_v39  ;;  %v2488_v47 = vadd.f32 %v2486_v41, %v2454_v42  ;;  %v6069_v39 = vor.u32 %v6646_v30, %v6068_v5  ;;  %v6028_v41 = vld [vmem:[#allocation9 + $0x20] sm:$0xf]  ;;  %v6635_v42 = vld [vmem:[#allocation9 + $0x28] sm:$0xf0] }
 0x509   :  { %v6020_v5 = vld [vmem:[#allocation9 + $0x18] sm:$0xf] }
 0x50a   :  { %v6942_v50 = vpop.eup %6941  ;;  %6943 = vpow2.f32 %v2495_v43  ;;  %v2539_v51 = vmul.f32 1.442695, %v2536_v46  ;;  %v2490_v26 = vpack.c.bf16 %v2488_v47, %v2488_v47  ;;  %2781 = vmatpush.bf16.msra.mxu2 %v6069_v39  ;;  %v6037_v39 = vor.u32 %v6636_v24, %v6034_v27  ;;  %v6693_v24 = vld [vmem:[#allocation12 + $0x38] sm:$0xf0] }
 0x50b   :  { %v2541_v3 = vpack.c.bf16 %v6942_v50, %v6942_v50 }
 0x50c   :  { %6945 = vpow2.f32 %v2539_v51  ;;  %v2492_v52 = vxor.u32 2147516416, %v2490_v26  ;;  %v6073_v51 = vor.u32 %v6645_v9, %v6070_v37 }
 0x50d   :  { %v2543_v54 = vunpack.c.l.bf16 %v2541_v3  ;;  %v6029_v3 = vor.u32 %v6635_v42, %v6028_v41  ;;  %v2563_v41 = vadd.f32 %v7755_v36, %v2480_v18 }
 0x50e   :  { %v2494_v33 = vunpack.c.l.bf16 %v2492_v52  ;;  %v6642_v52 = vld [vmem:[#allocation9 + $0x64] sm:$0xf]  ;;  %2795 = vmatpush.bf16.msrb.mxu3 %v6073_v51 }
 0x50f   :  { %v2545_v56 = vadd.f32 1.0, %v2543_v54  ;;  %v6057_v54 = vor.u32 %v6643_v49, %v6056_v25  ;;  %2813 = vmatpush.bf16.msrb.mxu0 %v6029_v3  ;;  %v6008_v49 = vld [vmem:[#allocation9] sm:$0xf]  ;;  %v6631_v3 = vld [vmem:[#allocation9 + $0x8] sm:$0xf0] }
 0x510   :  { %v6944_v57 = vpop.eup %6943  ;;  %v2497_v58 = vmul.f32 1.442695, %v2494_v33  ;;  %v6044_v33 = vld [vmem:[#allocation9 + $0x48] sm:$0xf] }
 0x511   :  { %v2499_v0 = vpack.c.bf16 %v6944_v57, %v6944_v57  ;;  %v2547_v10 = vpack.c.bf16 %v2545_v56, %v2545_v56  ;;  %v6640_v56 = vld [vmem:[#allocation9 + $0x50] sm:$0xf0]  ;;  %2782 = vmatpush.bf16.msra.mxu2 %v6057_v54 }
 0x512   :  { %v6946_v13 = vpop.eup %6945  ;;  %6947 = vpow2.f32 %v2497_v58  ;;  %v6316_v58 = vld [vmem:[#allocation12 + $0xa8] sm:$0xf] }
 0x513   :  { %v2501_v11 = vunpack.c.l.bf16 %v2499_v0  ;;  %v2542_v12 = vpack.c.bf16 %v6946_v13, %v6946_v13  ;;  %v2549_v28 = vunpack.c.h.bf16 %v2547_v10  ;;  %v2550_v43 = vunpack.c.l.bf16 %v2547_v10  ;;  %2814 = vmatpush.bf16.msrb.mxu0 %v6017_v6 }
 0x514   :  { %v6061_v0 = vor.u32 %v6642_v52, %v6058_v53  ;;  %v6045_v10 = vor.u32 %v6640_v56, %v6044_v33  ;;  %v6317_v40 = vor.u32 %v6708_v59, %v6316_v58  ;;  %v6280_v52 = vld [vmem:[#allocation12 + $0x60] sm:$0xf]  ;;  %v6699_v53 = vld [vmem:[#allocation12 + $0x68] sm:$0xf0] }
 0x515   :  { %v2503_v17 = vadd.f32 1.0, %v2501_v11  ;;  %v2544_v20 = vunpack.c.l.bf16 %v2542_v12  ;;  %6949 = vrcp.f32 %v2549_v28  ;;  %v6033_v28 = vor.u32 %v6637_v21, %v6032_v61  ;;  %v6630_v59 = vld [vmem:[#allocation9 + $0x4] sm:$0xf]  ;;  %v2276_v61 = vld [vmem:[#allocation2 + $0x8c] sm:$0xf] }
 0x516   :  { %2796 = vmatpush.bf16.msrb.mxu3 %v6061_v0  ;;  %2783 = vmatpush.bf16.msra.mxu2 %v6045_v10  ;;  %v2482_v0 = vpop.f32.mrf.mxu1  ;;  %v6281_v6 = vor.u32 %v6699_v53, %v6280_v52  ;;  %v2570_v15 = vunpack.c.l.bf16 %v2276_v61 }
 0x517   :  { %v2505_v31 = vpack.c.bf16 %v2503_v17, %v2503_v17  ;;  %v2546_v34 = vadd.f32 1.0, %v2544_v20  ;;  %v6049_v17 = vor.u32 %v6639_v7, %v6046_v45  ;;  %3511 = vmatpush.bf16.msra.mxu0 %v6317_v40 }
 0x518   :  { %v6948_v38 = vpop.eup %6947 }
 0x519   :  { %v2507_v46 = vunpack.c.h.bf16 %v2505_v31  ;;  %v2508_v47 = vunpack.c.l.bf16 %v2505_v31  ;;  %v2500_v48 = vpack.c.bf16 %v6948_v38, %v6948_v38  ;;  %v2548_v50 = vpack.c.bf16 %v2546_v34, %v2546_v34  ;;  %v6634_v31 = vld [vmem:[#allocation9 + $0x20] sm:$0xf0]  ;;  %v6292_v34 = vld [vmem:[#allocation12 + $0x78] sm:$0xf]  ;;  %v2274_v38 = vld [vmem:[#allocation2 + $0x80] sm:$0xf] }
 0x51a   :  { %2797 = vmatpush.bf16.msrb.mxu3 %v6049_v17  ;;  %2784 = vmatpush.bf16.msra.mxu2 %v6033_v28  ;;  %v6293_v25 = vor.u32 %v6702_v35, %v6292_v34 }
 0x51b   :  { %6951 = vrcp.f32 %v2507_v46  ;;  %v2502_v26 = vunpack.c.l.bf16 %v2500_v48  ;;  %v2556_v63 = vunpack.c.h.bf16 %v2548_v50  ;;  %v6950_v13 = vpop.eup %6949  ;;  %v2557_v12 = vunpack.c.l.bf16 %v2548_v50  ;;  %v6022_v46 = vld [vmem:[#allocation9 + $0x24] sm:$0xf0]  ;;  %3512 = vmatpush.bf16.msra.mxu0 %v6305_v29 }
 0x51c   :  { %6953 = vrcp.f32 %v2508_v47  ;;  %v2552_v9 = vmul.f32 %v6950_v13, %v7581_v60  ;;  %v6021_v48 = vor.u32 %v6634_v31, %v6020_v5  ;;  %v6690_v29 = vld [vmem:[#allocation12 + $0x20] sm:$0xf0] }
 0x51d   :  { %6955 = vrcp.f32 %v2550_v43  ;;  %v2504_v57 = vadd.f32 1.0, %v2502_v26  ;;  %v6633_v43 = vld [vmem:[#allocation9 + $0x1c] sm:$0xf]  ;;  %v2569_v26 = vunpack.c.l.bf16 %v2274_v38  ;;  %v6687_v38 = vld [vmem:[#allocation12 + $0x8] sm:$0xf0] }
 0x51e   :  { %6957 = vrcp.f32 %v2556_v63  ;;  %2798 = vmatpush.bf16.msrb.mxu3 %v6037_v39  ;;  %v6025_v33 = vor.u32 %v6633_v43, %v6022_v46  ;;  %v6010_v63 = vld [vmem:[#allocation9 + $0xc] sm:$0xf0]  ;;  %2785 = vmatpush.bf16.msra.mxu2 %v6021_v48 }
 0x51f   :  { %v2506_v2 = vpack.c.bf16 %v2504_v57, %v2504_v57  ;;  %3513 = vmatpush.bf16.msra.mxu0 %v6293_v25 }
 0x521   :  { %v6952_v11 = vpop.eup %6951  ;;  %v2514_v44 = vunpack.c.h.bf16 %v2506_v2  ;;  %v2515_v14 = vunpack.c.l.bf16 %v2506_v2  ;;  %v6009_v2 = vor.u32 %v6631_v3, %v6008_v49 }
 0x522   :  { %v6954_v16 = vpop.eup %6953  ;;  %v2510_v19 = vmul.f32 %v6952_v11, %v7581_v60  ;;  %2799 = vmatpush.bf16.msrb.mxu3 %v6025_v33  ;;  %v6013_v11 = vor.u32 %v6630_v59, %v6010_v63 }
 0x523   :  { %v6956_v20 = vpop.eup %6955  ;;  %v2512_v23 = vmul.f32 %v6954_v16, %v7583_v62  ;;  %6959 = vrcp.f32 %v2514_v44  ;;  %2786 = vmatpush.bf16.msra.mxu2 %v6009_v2  ;;  %3514 = vmatpush.bf16.msra.mxu0 %v6281_v6  ;;  %v6696_v16 = vld [vmem:[#allocation12 + $0x50] sm:$0xf0]  ;;  %v7801_v6 = vld [vmem:[#allocation3 + $0x10] sm:$0xff] }
 0x524   :  { %6961 = vrcp.f32 %v2515_v14  ;;  %v2554_v37 = vmul.f32 %v6956_v20, %v7583_v62  ;;  %v6958_v47 = vpop.eup %6957  ;;  %v6269_v17 = vor.u32 %v6696_v16, %v6268_v22  ;;  %v7798_v2 = vld [vmem:[#allocation3 + $0x18] sm:$0xff] }
 0x525   :  { %v2513_v30 = vpack.c.bf16 %v2510_v19, %v2512_v23  ;;  %6963 = vrcp.f32 %v2557_v12  ;;  %v2559_v10 = vmul.f32 %v6958_v47, %v7581_v60  ;;  %v2564_v12 = vadd.f32 %v7755_v36, %v2482_v0  ;;  %v6256_v23 = vld [vmem:[#allocation12 + $0x30] sm:$0xf]  ;;  %v6244_v36 = vld [vmem:[#allocation12 + $0x18] sm:$0xf] }
 0x526   :  { %v2555_v54 = vpack.c.bf16 %v2552_v9, %v2554_v37  ;;  %2800 = vmatpush.bf16.msrb.mxu3 %v6013_v11  ;;  %v6257_v27 = vor.u32 %v6693_v24, %v6256_v23  ;;  %v6245_v9 = vor.u32 %v6690_v29, %v6244_v36  ;;  %v6232_v37 = vld [vmem:[#allocation12] sm:$0xf]  ;;  %v7792_v0 = vld [vmem:[#allocation3 + $0x30] sm:$0xff]  ;;  %v6160_v29 = vld [vmem:[#allocation9 + $0x68] sm:$0xf] }
 0x527   :  { %v2565_v42 = vunpack.c.l.bf16 %v2513_v30  ;;  %3515 = vmatpush.bf16.msra.mxu0 %v6269_v17  ;;  %v6233_v46 = vor.u32 %v6687_v38, %v6232_v37  ;;  %v6671_v17 = vld [vmem:[#allocation9 + $0x88] sm:$0xf0]  ;;  %v6676_v37 = vld [vmem:[#allocation9 + $0xb0] sm:$0xf0] }
 0x528   :  { %v2581_v13 = vunpack.c.l.bf16 %v2555_v54  ;;  %v6675_v38 = vld [vmem:[#allocation9 + $0xac] sm:$0xf] }
 0x529   :  { %v6960_v50 = vpop.eup %6959  ;;  %v2567_v51 = vmul.f32 %v2565_v42, %v2563_v41 }
 0x52a   :  { %v6962_v4 = vpop.eup %6961  ;;  %v2517_v55 = vmul.f32 %v6960_v50, %v7581_v60  ;;  %v2583_v18 = vsub.f32 1.0, %v2581_v13  ;;  %v2597_v52 = vmul.f32 %v2581_v13, %v7759_v1  ;;  %v2609_v13 = vld [vmem:[#allocation2 + $0x90] sm:$0xff] }
 0x52b   :  { %v6964_v56 = vpop.eup %6963  ;;  %v2571_v57 = vadd.f32 %v2569_v26, %v2567_v51  ;;  %v2519_v58 = vmul.f32 %v6962_v4, %v7583_v62  ;;  %3516 = vmatpush.bf16.msra.mxu0 %v6257_v27  ;;  %v2859_v11 = vrot.slane %v2609_v13, 4 }
 0x52c   :  { %v2561_v40 = vmul.f32 %v6964_v56, %v7583_v62  ;;  %v2585_v30 = vpack.c.bf16 %v2583_v18, %v2583_v18  ;;  %v2611_v18 = vld [vmem:[#allocation2 + $0x9c] sm:$0xff] }
 0x52d   :  { %v2520_v7 = vpack.c.bf16 %v2517_v55, %v2519_v58  ;;  %v2573_v45 = vpack.c.bf16 %v2571_v57, %v2571_v57  ;;  %v2860_v36 = vrot.slane %v2611_v18, 4 }
 0x52e   :  { %v2562_v19 = vpack.c.bf16 %v2559_v10, %v2561_v40  ;;  %v2587_v41 = vunpack.c.l.bf16 %v2585_v30  ;;  %v6196_v10 = vld [vmem:[#allocation9 + $0xb0] sm:$0xf]  ;;  %v6677_v40 = vld [vmem:[#allocation9 + $0xb8] sm:$0xf0] }
 0x52f   :  { %v2566_v44 = vunpack.c.l.bf16 %v2520_v7  ;;  %v2575_v14 = vunpack.c.l.bf16 %v2573_v45  ;;  %3517 = vmatpush.bf16.msra.mxu0 %v6245_v9  ;;  %v7804_v7 = vld [vmem:[#allocation3 + $0x8] sm:$0xff]  ;;  %v6197_v61 = vor.u32 %v6677_v40, %v6196_v10  ;;  %v6662_v10 = vld [vmem:[#allocation9 + $0x40] sm:$0xf0] }
 0x530   :  { %v2582_v5 = vunpack.c.l.bf16 %v2562_v19  ;;  %v6172_v19 = vld [vmem:[#allocation9 + $0x80] sm:$0xf]  ;;  %v6188_v9 = vld [vmem:[#allocation9 + $0xa8] sm:$0xf] }
 0x531   :  { %v2568_v21 = vmul.f32 %v2566_v44, %v2564_v12  ;;  %6965 = vtanh.f32 %v2575_v14  ;;  %3143 = vmatpush.bf16.msra.mxu3 %v6197_v61  ;;  %v6184_v12 = vld [vmem:[#allocation9 + $0x98] sm:$0xf]  ;;  %v6674_v44 = vld [vmem:[#allocation9 + $0xa0] sm:$0xf0]  ;;  %v6173_v24 = vor.u32 %v6671_v17, %v6172_v19  ;;  %v6124_v19 = vld [vmem:[#allocation9 + $0x20] sm:$0xf] }
 0x532   :  { %v2584_v39 = vsub.f32 1.0, %v2582_v5  ;;  %v2598_v55 = vmul.f32 %v2582_v5, %v7762_v8  ;;  %v7795_v8 = vld [vmem:[#allocation3] sm:$0xff]  ;;  %v6185_v14 = vor.u32 %v6674_v44, %v6184_v12  ;;  %v6668_v5 = vld [vmem:[#allocation9 + $0x70] sm:$0xf0]  ;;  %v6164_v12 = vld [vmem:[#allocation9 + $0x78] sm:$0xf] }
 0x533   :  { %v2572_v20 = vadd.f32 %v2570_v15, %v2568_v21  ;;  %3518 = vmatpush.bf16.msra.mxu0 %v6233_v46  ;;  %v2821_v21 = vunpack.c.l.bf16 %v2609_v13  ;;  %v2863_v15 = vunpack.c.l.bf16 %v2859_v11  ;;  %v6190_v46 = vld [vmem:[#allocation9 + $0xb4] sm:$0xf0]  ;;  %v6670_v44 = vld [vmem:[#allocation9 + $0x80] sm:$0xf0]  ;;  %v6659_v17 = vld [vmem:[#allocation9 + $0x28] sm:$0xf0] }
 0x534   :  { %v2586_v47 = vpack.c.bf16 %v2584_v39, %v2584_v39  ;;  %v6136_v13 = vld [vmem:[#allocation9 + $0x38] sm:$0xf] }
 0x535   :  { %v2574_v28 = vpack.c.bf16 %v2572_v20, %v2572_v20  ;;  %3144 = vmatpush.bf16.msra.mxu3 %v6185_v14  ;;  %v6137_v11 = vor.u32 %v6662_v10, %v6136_v13  ;;  %v6669_v14 = vld [vmem:[#allocation9 + $0x7c] sm:$0xf]  ;;  %v6128_v10 = vld [vmem:[#allocation9 + $0x30] sm:$0xf] }
 0x536   :  { %v2588_v50 = vunpack.c.l.bf16 %v2586_v47 }
 0x537   :  { %v6966_v31 = vpop.eup %6965  ;;  %v2576_v34 = vunpack.c.l.bf16 %v2574_v28 }
 0x538   :  { %v2579_v35 = vpack.c.bf16 %v6966_v31, %v6966_v31 }
 0x539   :  { %6967 = vtanh.f32 %v2576_v34  ;;  %3145 = vmatpush.bf16.msra.mxu3 %v6173_v24  ;;  %v6161_v34 = vor.u32 %v6668_v5, %v6160_v29  ;;  %v6152_v29 = vld [vmem:[#allocation9 + $0x60] sm:$0xf]  ;;  %v6667_v5 = vld [vmem:[#allocation9 + $0x68] sm:$0xf0] }
 0x53a   :  { %v2589_v42 = vunpack.c.l.bf16 %v2579_v35  ;;  %v2822_v35 = vunpack.c.l.bf16 %v2611_v18 }
 0x53c   :  { %v2591_v43 = vmul.f32 %v2589_v42, %v2587_v41  ;;  %v2864_v42 = vunpack.c.l.bf16 %v2860_v36 }
 0x53d   :  { %3146 = vmatpush.bf16.msra.mxu3 %v6161_v34  ;;  %v6153_v34 = vor.u32 %v6667_v5, %v6152_v29  ;;  %v6376_v5 = vld [vmem:[#allocation13 + $0x60] sm:$0xf] }
 0x53e   :  { %v2593_v48 = vpack.c.bf16 %v2591_v43, %v2591_v43  ;;  %v6189_v43 = vor.u32 %v6676_v37, %v6188_v9 }
 0x53f   :  { %v6968_v25 = vpop.eup %6967 }
 0x540   :  { %v2580_v49 = vpack.c.bf16 %v6968_v25, %v6968_v25  ;;  %v2595_v26 = vunpack.c.l.bf16 %v2593_v48  ;;  %v6193_v25 = vor.u32 %v6675_v38, %v6190_v46  ;;  %3115 = vmatpush.bf16.msrb.mxu1 %v6189_v43  ;;  %v6112_v38 = vld [vmem:[#allocation9 + $0x8] sm:$0xf]  ;;  %v6412_v43 = vld [vmem:[#allocation13 + $0xa8] sm:$0xf]  ;;  %v6732_v46 = vld [vmem:[#allocation13 + $0xb0] sm:$0xf0] }
 0x542   :  { %v2590_v51 = vunpack.c.l.bf16 %v2580_v49  ;;  %v7781_v4 = vadd.f32 %v2597_v52, %v2595_v26  ;;  %v6148_v49 = vld [vmem:[#allocation9 + $0x50] sm:$0xf]  ;;  %3129 = vmatpush.bf16.msrb.mxu2 %v6193_v25  ;;  %v6140_v25 = vld [vmem:[#allocation9 + $0x48] sm:$0xf] }
 0x544   :  { %v2592_v3 = vmul.f32 %v2590_v51, %v2588_v50  ;;  %v2601_v56 = vpack.c.bf16 %v7781_v4, %v7781_v4  ;;  %v6665_v50 = vld [vmem:[#allocation9 + $0x58] sm:$0xf0] }
 0x546   :  { %v2594_v53 = vpack.c.bf16 %v2592_v3, %v2592_v3  ;;  %v2647_v59 = vunpack.c.l.b16 %v2601_v56  ;;  %v6672_v56 = vld [vmem:[#allocation9 + $0x94] sm:$0xf] }
 0x548   :  { %v2596_v54 = vunpack.c.l.bf16 %v2594_v53  ;;  %v6149_v53 = vor.u32 %v6665_v50, %v6148_v49  ;;  %v6664_v49 = vld [vmem:[#allocation9 + $0x50] sm:$0xf0] }
 0x54a   :  { %v7784_v33 = vadd.f32 %v2598_v55, %v2596_v54  ;;  %v6176_v54 = vld [vmem:[#allocation9 + $0x90] sm:$0xf]  ;;  %v6673_v55 = vld [vmem:[#allocation9 + $0x98] sm:$0xf0]  ;;  %3147 = vmatpush.bf16.msra.mxu3 %v6149_v53 }
 0x54c   :  { %v2602_v57 = vpack.c.bf16 %v7784_v33, %v7784_v33  ;;  %v6770_v58 = vpack.c.bf16 %v7784_v33, %v7781_v4 }
 0x54e   :  { %6771 = vst [vmem:[#allocation3 + $0x20] sm:$0xff] %v6770_v58   ;;  %v2648_v1 = vunpack.c.l.b16 %v2602_v57  ;;  %3148 = vmatpush.bf16.msra.mxu3 %v6137_v11 }
 0x550   :  { %v2649_v63 = vpack.c.b16 %v2648_v1, %v2647_v59  ;;  %v6177_v59 = vor.u32 %v6673_v55, %v6176_v54  ;;  %v6178_v1 = vld [vmem:[#allocation9 + $0x9c] sm:$0xf0] }
 0x552   :  { %2787 = vmatmul.bf16.vlgmr.msra.gmra.mxu2 %v2649_v63  ;;  %2801 = vmatmul.bf16.vlgmr.msrb.gmra.mxu3 %v2649_v63 }
 0x553   :  { %2815 = vmatmul.bf16.vlgmr.msrb.gmra.mxu0 %v2649_v63  ;;  %v6181_v63 = vor.u32 %v6672_v56, %v6178_v1  ;;  %3116 = vmatpush.bf16.msrb.mxu1 %v6177_v59  ;;  %v6400_v56 = vld [vmem:[#allocation13 + $0x90] sm:$0xf] }
 0x555   :  { %v7807_v45 = vld [vmem:[#allocation3 + $0x20] sm:$0xff]  ;;  %3130 = vmatpush.bf16.msrb.mxu2 %v6181_v63 }
 0x563   :  { %3519 = vmatmul.bf16.vlgmr.msra.gmra.mxu0 %v7792_v0 }
 0x573   :  { %3524 = vmatmul.bf16.gmra.mxu0 %v7795_v8 }
 0x583   :  { %3529 = vmatmul.bf16.gmra.mxu0 %v7798_v2 }
 0x593   :  { %3534 = vmatmul.bf16.gmra.mxu0 %v7801_v6 }
 0x5a3   :  { %3539 = vmatmul.bf16.gmra.mxu0 %v7804_v7 }
 0x5b3   :  { %3544 = vmatmul.bf16.gmra.mxu0 %v7807_v45 }
 0x5d5   :  { %v2788_v22 = vpop.f32.mrf.mxu2  ;;  %v2802_v16 = vpop.f32.mrf.mxu3 }
 0x5d6   :  { %v2823_v20 = vadd.f32 %v2821_v21, %v2788_v22  ;;  %v2865_v23 = vadd.f32 %v2863_v15, %v2802_v16  ;;  %v6165_v22 = vor.u32 %v6670_v44, %v6164_v12  ;;  %v6166_v16 = vld [vmem:[#allocation9 + $0x84] sm:$0xf0] }
 0x5d7   :  { %v6169_v18 = vor.u32 %v6669_v14, %v6166_v16  ;;  %v6388_v16 = vld [vmem:[#allocation13 + $0x78] sm:$0xf] }
 0x5d8   :  { %v2825_v27 = vpack.c.bf16 %v2823_v20, %v2823_v20  ;;  %v2867_v28 = vpack.c.bf16 %v2865_v23, %v2865_v23  ;;  %3117 = vmatpush.bf16.msrb.mxu1 %v6165_v22 }
 0x5d9   :  { %3131 = vmatpush.bf16.msrb.mxu2 %v6169_v18  ;;  %v6726_v18 = vld [vmem:[#allocation13 + $0x80] sm:$0xf0] }
 0x5da   :  { %v2827_v30 = vxor.u32 2147516416, %v2825_v27  ;;  %v2869_v31 = vxor.u32 2147516416, %v2867_v28  ;;  %v6125_v27 = vor.u32 %v6659_v17, %v6124_v19  ;;  %v6116_v19 = vld [vmem:[#allocation9 + $0x18] sm:$0xf] }
 0x5dc   :  { %v2829_v39 = vunpack.c.l.bf16 %v2827_v30  ;;  %v2871_v41 = vunpack.c.l.bf16 %v2869_v31  ;;  %v6666_v30 = vld [vmem:[#allocation9 + $0x64] sm:$0xf]  ;;  %3149 = vmatpush.bf16.msra.mxu3 %v6125_v27  ;;  %3118 = vmatpush.bf16.msrb.mxu1 %v6153_v34  ;;  %v6118_v27 = vld [vmem:[#allocation9 + $0x24] sm:$0xf0]  ;;  %v6104_v34 = vld [vmem:[#allocation9] sm:$0xf] }
 0x5dd   :  { %v2790_v47 = vpop.f32.mrf.mxu2  ;;  %v2804_v48 = vpop.f32.mrf.mxu3 }
 0x5de   :  { %v2831_v51 = vmul.f32 1.442695, %v2829_v39  ;;  %v2873_v26 = vmul.f32 1.442695, %v2871_v41  ;;  %v2824_v3 = vadd.f32 %v2822_v35, %v2790_v47  ;;  %v2866_v52 = vadd.f32 %v2864_v42, %v2804_v48  ;;  %v6154_v35 = vld [vmem:[#allocation9 + $0x6c] sm:$0xf0] }
 0x5df   :  { %v6157_v37 = vor.u32 %v6666_v30, %v6154_v35  ;;  %v6656_v39 = vld [vmem:[#allocation9 + $0x10] sm:$0xf0]  ;;  %v7810_v48 = vor.u32 %v6732_v46, %v6412_v43  ;;  %v6723_v30 = vld [vmem:[#allocation13 + $0x68] sm:$0xf0]  ;;  %v6655_v35 = vld [vmem:[#allocation9 + $0x8] sm:$0xf0] }
 0x5e0   :  { %6969 = vpow2.f32 %v2831_v51  ;;  %v2826_v57 = vpack.c.bf16 %v2824_v3, %v2824_v3  ;;  %v2868_v58 = vpack.c.bf16 %v2866_v52, %v2866_v52  ;;  %v6113_v42 = vor.u32 %v6656_v39, %v6112_v38  ;;  %v6142_v3 = vld [vmem:[#allocation9 + $0x54] sm:$0xf0]  ;;  %v6106_v38 = vld [vmem:[#allocation9 + $0xc] sm:$0xf0] }
 0x5e1   :  { %6971 = vpow2.f32 %v2873_v26  ;;  %3132 = vmatpush.bf16.msrb.mxu2 %v6157_v37  ;;  %v6141_v51 = vor.u32 %v6664_v49, %v6140_v25  ;;  %v6663_v26 = vld [vmem:[#allocation9 + $0x4c] sm:$0xf]  ;;  %v6654_v37 = vld [vmem:[#allocation9 + $0x4] sm:$0xf] }
 0x5e2   :  { %v2828_v40 = vxor.u32 2147516416, %v2826_v57  ;;  %v2870_v61 = vxor.u32 2147516416, %v2868_v58  ;;  %3150 = vmatpush.bf16.msra.mxu3 %v6113_v42  ;;  %v6145_v53 = vor.u32 %v6663_v26, %v6142_v3  ;;  %v6729_v57 = vld [vmem:[#allocation13 + $0x98] sm:$0xf0]  ;;  %v6105_v42 = vor.u32 %v6655_v35, %v6104_v34 }
 0x5e3   :  { %3119 = vmatpush.bf16.msrb.mxu1 %v6141_v51  ;;  %v7813_v13 = vor.u32 %v6729_v57, %v6400_v56  ;;  %v6109_v25 = vor.u32 %v6654_v37, %v6106_v38  ;;  %v6701_v35 = vld [vmem:[#allocation12 + $0x7c] sm:$0xf]  ;;  %v6300_v37 = vld [vmem:[#allocation12 + $0x80] sm:$0xf] }
 0x5e4   :  { %v2830_v21 = vunpack.c.l.bf16 %v2828_v40  ;;  %v2872_v15 = vunpack.c.l.bf16 %v2870_v61  ;;  %v6661_v40 = vld [vmem:[#allocation9 + $0x38] sm:$0xf0]  ;;  %v6660_v61 = vld [vmem:[#allocation9 + $0x34] sm:$0xf] }
 0x5e5   :  { %3133 = vmatpush.bf16.msrb.mxu2 %v6145_v53  ;;  %v6129_v14 = vor.u32 %v6661_v40, %v6128_v10  ;;  %v6318_v53 = vld [vmem:[#allocation12 + $0xb4] sm:$0xf0] }
 0x5e6   :  { %v6970_v20 = vpop.eup %6969  ;;  %v2833_v23 = vmul.f32 1.442695, %v2830_v21  ;;  %v2875_v24 = vmul.f32 1.442695, %v2872_v15  ;;  %3889 = vmatpush.bf16.msrb.mxu3 %v7810_v48  ;;  %v6130_v21 = vld [vmem:[#allocation9 + $0x3c] sm:$0xf0] }
 0x5e7   :  { %v6972_v28 = vpop.eup %6971  ;;  %v2835_v36 = vpack.c.bf16 %v6970_v20, %v6970_v20  ;;  %v6133_v22 = vor.u32 %v6660_v61, %v6130_v21  ;;  %3120 = vmatpush.bf16.msrb.mxu1 %v6129_v14  ;;  %v7816_v20 = vor.u32 %v6726_v18, %v6388_v16  ;;  %v6352_v16 = vld [vmem:[#allocation13 + $0x30] sm:$0xf]  ;;  %v6717_v18 = vld [vmem:[#allocation13 + $0x38] sm:$0xf0] }
 0x5e8   :  { %v2877_v31 = vpack.c.bf16 %v6972_v28, %v6972_v28  ;;  %6973 = vpow2.f32 %v2833_v23  ;;  %v6658_v23 = vld [vmem:[#allocation9 + $0x20] sm:$0xf0] }
 0x5e9   :  { %v2837_v9 = vunpack.c.l.bf16 %v2835_v36  ;;  %6975 = vpow2.f32 %v2875_v24  ;;  %v6657_v24 = vld [vmem:[#allocation9 + $0x1c] sm:$0xf]  ;;  %3134 = vmatpush.bf16.msrb.mxu2 %v6133_v22  ;;  %v6117_v36 = vor.u32 %v6658_v23, %v6116_v19  ;;  %v6706_v22 = vld [vmem:[#allocation12 + $0xa0] sm:$0xf0]  ;;  %v2610_v19 = vld [vmem:[#allocation2 + $0x98] sm:$0xf] }
 0x5ea   :  { %v2879_v41 = vunpack.c.l.bf16 %v2877_v31  ;;  %3890 = vmatpush.bf16.msrb.mxu3 %v7813_v13  ;;  %v6121_v29 = vor.u32 %v6657_v24, %v6118_v27  ;;  %v7831_v23 = vld [vmem:[%s8389_s4] ss:$0 sm:$0xff] }
 0x5eb   :  { %v2839_v47 = vadd.f32 1.0, %v2837_v9  ;;  %3121 = vmatpush.bf16.msrb.mxu1 %v6117_v36  ;;  %v7835_v36 = vor.u32 %v6717_v18, %v6352_v16 }
 0x5ec   :  { %v2881_v50 = vadd.f32 1.0, %v2879_v41  ;;  %v7819_v41 = vor.u32 %v6723_v30, %v6376_v5  ;;  %v2905_v30 = vunpack.c.l.bf16 %v2610_v19  ;;  %v6731_v19 = vld [vmem:[#allocation13 + $0xac] sm:$0xf] }
 0x5ed   :  { %v2841_v52 = vpack.c.bf16 %v2839_v47, %v2839_v47  ;;  %3135 = vmatpush.bf16.msrb.mxu2 %v6121_v29 }
 0x5ee   :  { %v6974_v54 = vpop.eup %6973  ;;  %v2883_v55 = vpack.c.bf16 %v2881_v50, %v2881_v50  ;;  %3891 = vmatpush.bf16.msrb.mxu3 %v7816_v20  ;;  %v2816_v50 = vpop.f32.mrf.mxu0 }
 0x5ef   :  { %v6976_v58 = vpop.eup %6975  ;;  %v2843_v59 = vunpack.c.h.bf16 %v2841_v52  ;;  %v2844_v1 = vunpack.c.l.bf16 %v2841_v52  ;;  %v2836_v63 = vpack.c.bf16 %v6974_v54, %v6974_v54  ;;  %v6707_v52 = vld [vmem:[#allocation12 + $0xac] sm:$0xf]  ;;  %v6324_v54 = vld [vmem:[#allocation12 + $0xb0] sm:$0xf]  ;;  %3122 = vmatpush.bf16.msrb.mxu1 %v6105_v42  ;;  %v2899_v24 = vadd.f32 %v7831_v23, %v2816_v50  ;;  %v2612_v42 = vld [vmem:[#allocation2 + $0xa4] sm:$0xf] }
 0x5f0   :  { %v2885_v11 = vunpack.c.h.bf16 %v2883_v55  ;;  %v2886_v12 = vunpack.c.l.bf16 %v2883_v55  ;;  %v2878_v44 = vpack.c.bf16 %v6976_v58, %v6976_v58  ;;  %v6321_v57 = vor.u32 %v6707_v52, %v6318_v53  ;;  %v6709_v58 = vld [vmem:[#allocation12 + $0xb8] sm:$0xf0]  ;;  %v6698_v52 = vld [vmem:[#allocation12 + $0x64] sm:$0xf]  ;;  %v6282_v53 = vld [vmem:[#allocation12 + $0x6c] sm:$0xf0] }
 0x5f1   :  { %6977 = vrcp.f32 %v2843_v59  ;;  %v2838_v15 = vunpack.c.l.bf16 %v2836_v63  ;;  %v6364_v59 = vld [vmem:[#allocation13 + $0x48] sm:$0xf]  ;;  %v6325_v40 = vor.u32 %v6709_v58, %v6324_v54  ;;  %3136 = vmatpush.bf16.msrb.mxu2 %v6109_v25 }
 0x5f2   :  { %6979 = vrcp.f32 %v2844_v1  ;;  %v2880_v17 = vunpack.c.l.bf16 %v2878_v44  ;;  %v6720_v1 = vld [vmem:[#allocation13 + $0x50] sm:$0xf0]  ;;  %3892 = vmatpush.bf16.msrb.mxu3 %v7819_v41  ;;  %v6312_v44 = vld [vmem:[#allocation12 + $0x98] sm:$0xf]  ;;  %v6288_v58 = vld [vmem:[#allocation12 + $0x68] sm:$0xf] }
 0x5f3   :  { %6981 = vrcp.f32 %v2885_v11  ;;  %v2840_v28 = vadd.f32 1.0, %v2838_v15  ;;  %v7825_v61 = vor.u32 %v6720_v1, %v6364_v59  ;;  %v6704_v11 = vld [vmem:[#allocation12 + $0x94] sm:$0xf]  ;;  %3560 = vmatpush.bf16.msra.mxu1 %v6321_v57  ;;  %v6328_v1 = vld [vmem:[#allocation13] sm:$0xf] }
 0x5f4   :  { %6983 = vrcp.f32 %v2886_v12  ;;  %v2882_v31 = vadd.f32 1.0, %v2880_v17  ;;  %v6306_v12 = vld [vmem:[#allocation12 + $0x9c] sm:$0xf0]  ;;  %v6313_v17 = vor.u32 %v6706_v22, %v6312_v44  ;;  %v6700_v59 = vld [vmem:[#allocation12 + $0x70] sm:$0xf0] }
 0x5f5   :  { %v2842_v9 = vpack.c.bf16 %v2840_v28, %v2840_v28  ;;  %v6309_v15 = vor.u32 %v6704_v11, %v6306_v12  ;;  %3609 = vmatpush.bf16.msra.mxu2 %v6325_v40  ;;  %v6289_v40 = vor.u32 %v6700_v59, %v6288_v58  ;;  %v6711_v11 = vld [vmem:[#allocation13 + $0x8] sm:$0xf0]  ;;  %v6689_v59 = vld [vmem:[#allocation12 + $0x1c] sm:$0xf] }
 0x5f6   :  { %v2884_v39 = vpack.c.bf16 %v2882_v31, %v2882_v31  ;;  %3893 = vmatpush.bf16.msrb.mxu3 %v7825_v61  ;;  %v2818_v50 = vpop.f32.mrf.mxu0 }
 0x5f7   :  { %v6978_v43 = vpop.eup %6977  ;;  %v2850_v46 = vunpack.c.h.bf16 %v2842_v9  ;;  %v2851_v47 = vunpack.c.l.bf16 %v2842_v9  ;;  %3561 = vmatpush.bf16.msra.mxu1 %v6309_v15  ;;  %v6294_v9 = vld [vmem:[#allocation12 + $0x84] sm:$0xf0]  ;;  %v2900_v44 = vadd.f32 %v7831_v23, %v2818_v50  ;;  %v7848_v15 = vor.u32 %v6711_v11, %v6328_v1  ;;  %v6691_v11 = vld [vmem:[#allocation12 + $0x28] sm:$0xf0] }
 0x5f8   :  { %v6980_v49 = vpop.eup %6979  ;;  %v2846_v51 = vmul.f32 %v6978_v43, %v7581_v60  ;;  %v2892_v26 = vunpack.c.h.bf16 %v2884_v39  ;;  %v2893_v3 = vunpack.c.l.bf16 %v2884_v39  ;;  %v6246_v1 = vld [vmem:[#allocation12 + $0x24] sm:$0xf0] }
 0x5f9   :  { %v6982_v55 = vpop.eup %6981  ;;  %v2848_v56 = vmul.f32 %v6980_v49, %v7583_v62  ;;  %6985 = vrcp.f32 %v2850_v46  ;;  %3610 = vmatpush.bf16.msra.mxu2 %v6313_v17  ;;  %v6703_v46 = vld [vmem:[#allocation12 + $0x88] sm:$0xf0]  ;;  %v6414_v17 = vld [vmem:[#allocation13 + $0xb4] sm:$0xf0] }
 0x5fa   :  { %v6984_v63 = vpop.eup %6983  ;;  %v2888_v10 = vmul.f32 %v6982_v55, %v7581_v60  ;;  %6987 = vrcp.f32 %v2851_v47  ;;  %v6340_v47 = vld [vmem:[#allocation13 + $0x18] sm:$0xf]  ;;  %3894 = vmatpush.bf16.msrb.mxu3 %v7835_v36 }
 0x5fb   :  { %v2849_v14 = vpack.c.bf16 %v2846_v51, %v2848_v56  ;;  %v2890_v21 = vmul.f32 %v6984_v63, %v7583_v62  ;;  %6989 = vrcp.f32 %v2892_v26  ;;  %v6297_v51 = vor.u32 %v6701_v35, %v6294_v9  ;;  %v6728_v35 = vld [vmem:[#allocation13 + $0x94] sm:$0xf]  ;;  %v6402_v9 = vld [vmem:[#allocation13 + $0x9c] sm:$0xf0] }
 0x5fc   :  { %6991 = vrcp.f32 %v2893_v3  ;;  %v6301_v26 = vor.u32 %v6703_v46, %v6300_v37  ;;  %v6714_v3 = vld [vmem:[#allocation13 + $0x20] sm:$0xf0]  ;;  %v6258_v46 = vld [vmem:[#allocation12 + $0x3c] sm:$0xf0] }
 0x5fd   :  { %v2901_v27 = vunpack.c.l.bf16 %v2849_v14  ;;  %v2891_v28 = vpack.c.bf16 %v2888_v10, %v2890_v21  ;;  %3562 = vmatpush.bf16.msra.mxu1 %v6297_v51  ;;  %v7844_v63 = vor.u32 %v6714_v3, %v6340_v47  ;;  %v6285_v10 = vor.u32 %v6698_v52, %v6282_v53  ;;  %v6264_v47 = vld [vmem:[#allocation12 + $0x38] sm:$0xf] }
 0x5fe   :  { %3611 = vmatpush.bf16.msra.mxu2 %v6301_v26  ;;  %v2906_v21 = vunpack.c.l.bf16 %v2612_v42  ;;  %v7857_v42 = vor.u32 %v6728_v35, %v6402_v9  ;;  %v6694_v26 = vld [vmem:[#allocation12 + $0x40] sm:$0xf0]  ;;  %v6366_v35 = vld [vmem:[#allocation13 + $0x54] sm:$0xf0] }
 0x5ff   :  { %v6986_v29 = vpop.eup %6985  ;;  %v2903_v5 = vmul.f32 %v2901_v27, %v2899_v24  ;;  %v7839_v49 = vunpack.c.l.bf16 %v2891_v28  ;;  %3895 = vmatpush.bf16.msrb.mxu3 %v7844_v63  ;;  %v7851_v24 = vor.u32 %v6731_v19, %v6414_v17  ;;  %v6695_v27 = vld [vmem:[#allocation12 + $0x4c] sm:$0xf]  ;;  %v6270_v28 = vld [vmem:[#allocation12 + $0x54] sm:$0xf0]  ;;  %v6265_v52 = vor.u32 %v6694_v26, %v6264_v47  ;;  %v6686_v19 = vld [vmem:[#allocation12 + $0x4] sm:$0xf] }
 0x600   :  { %v6988_v31 = vpop.eup %6987  ;;  %v2853_v34 = vmul.f32 %v6986_v29, %v7581_v60  ;;  %v6276_v29 = vld [vmem:[#allocation12 + $0x50] sm:$0xf] }
 0x601   :  { %v6990_v38 = vpop.eup %6989  ;;  %v2907_v39 = vadd.f32 %v2905_v30, %v2903_v5  ;;  %v2855_v43 = vmul.f32 %v6988_v31, %v7583_v62  ;;  %v2919_v22 = vsub.f32 1.0, %v7839_v49  ;;  %3563 = vmatpush.bf16.msra.mxu1 %v6285_v10  ;;  %v6697_v30 = vld [vmem:[#allocation12 + $0x58] sm:$0xf0]  ;;  %v6273_v31 = vor.u32 %v6695_v27, %v6270_v28  ;;  %4066 = vmatpush.bf16.msrb.mxu0 %v7851_v24  ;;  %v6252_v10 = vld [vmem:[#allocation12 + $0x20] sm:$0xf] }
 0x602   :  { %v6992_v25 = vpop.eup %6991  ;;  %v2895_v56 = vmul.f32 %v6990_v38, %v7581_v60  ;;  %3612 = vmatpush.bf16.msra.mxu2 %v6289_v40  ;;  %v6249_v40 = vor.u32 %v6689_v59, %v6246_v1  ;;  %v6234_v17 = vld [vmem:[#allocation12 + $0xc] sm:$0xf0]  ;;  %v6240_v27 = vld [vmem:[#allocation12 + $0x8] sm:$0xf]  ;;  %v6710_v1 = vld [vmem:[#allocation13 + $0x4] sm:$0xf] }
 0x603   :  { %v2909_v54 = vpack.c.bf16 %v2907_v39, %v2907_v39  ;;  %v2856_v55 = vpack.c.bf16 %v2853_v34, %v2855_v43  ;;  %v2897_v57 = vmul.f32 %v6992_v25, %v7583_v62  ;;  %3896 = vmatpush.bf16.msrb.mxu3 %v7848_v15  ;;  %v6277_v34 = vor.u32 %v6697_v30, %v6276_v29  ;;  %v6692_v43 = vld [vmem:[#allocation12 + $0x34] sm:$0xf] }
 0x604   :  { %v2921_v39 = vpack.c.bf16 %v2919_v22, %v2919_v22  ;;  %v6261_v51 = vor.u32 %v6692_v43, %v6258_v46  ;;  %v6237_v29 = vor.u32 %v6686_v19, %v6234_v17  ;;  %v2933_v46 = vmul.f32 %v7839_v49, %v7781_v4  ;;  %v6396_v17 = vld [vmem:[#allocation13 + $0x80] sm:$0xf] }
 0x605   :  { %v2911_v12 = vunpack.c.l.bf16 %v2909_v54  ;;  %v2902_v14 = vunpack.c.l.bf16 %v2856_v55  ;;  %v2898_v18 = vpack.c.bf16 %v2895_v56, %v2897_v57  ;;  %3564 = vmatpush.bf16.msra.mxu1 %v6273_v31  ;;  %4067 = vmatpush.bf16.msrb.mxu0 %v7857_v42  ;;  %v6725_v54 = vld [vmem:[#allocation13 + $0x7c] sm:$0xf]  ;;  %v6390_v55 = vld [vmem:[#allocation13 + $0x84] sm:$0xf0] }
 0x606   :  { %3613 = vmatpush.bf16.msra.mxu2 %v6277_v34  ;;  %v2923_v56 = vunpack.c.l.bf16 %v2921_v39  ;;  %v7861_v58 = vor.u32 %v6725_v54, %v6390_v55  ;;  %v6719_v34 = vld [vmem:[#allocation13 + $0x4c] sm:$0xf]  ;;  %v6713_v54 = vld [vmem:[#allocation13 + $0x1c] sm:$0xf]  ;;  %v6342_v55 = vld [vmem:[#allocation13 + $0x24] sm:$0xf0] }
 0x607   :  { %6993 = vtanh.f32 %v2911_v12  ;;  %v2904_v16 = vmul.f32 %v2902_v14, %v2900_v44  ;;  %v7855_v38 = vunpack.c.l.bf16 %v2898_v18  ;;  %v6253_v44 = vor.u32 %v6691_v11, %v6252_v10  ;;  %v6722_v14 = vld [vmem:[#allocation13 + $0x64] sm:$0xf]  ;;  %v6420_v11 = vld [vmem:[#allocation13 + $0xb0] sm:$0xf] }
 0x608   :  { %v7867_v43 = vor.u32 %v6719_v34, %v6366_v35  ;;  %v7883_v49 = vor.u32 %v6713_v54, %v6342_v55  ;;  %v6721_v34 = vld [vmem:[#allocation13 + $0x58] sm:$0xf0]  ;;  %v2947_v54 = vld [vmem:[#allocation2 + $0xb4] sm:$0xff] }
 0x609   :  { %v2908_v5 = vadd.f32 %v2906_v21, %v2904_v16  ;;  %v2920_v53 = vsub.f32 1.0, %v7855_v38  ;;  %3565 = vmatpush.bf16.msra.mxu1 %v6261_v51  ;;  %v6378_v21 = vld [vmem:[#allocation13 + $0x6c] sm:$0xf0]  ;;  %4068 = vmatpush.bf16.msrb.mxu0 %v7861_v58 }
 0x60a   :  { %3614 = vmatpush.bf16.msra.mxu2 %v6265_v52  ;;  %v7864_v18 = vor.u32 %v6722_v14, %v6378_v21  ;;  %v2934_v52 = vmul.f32 %v7855_v38, %v7784_v33  ;;  %v6330_v33 = vld [vmem:[#allocation13 + $0xc] sm:$0xf0]  ;;  %v6408_v21 = vld [vmem:[#allocation13 + $0x98] sm:$0xf] }
 0x60b   :  { %v2910_v37 = vpack.c.bf16 %v2908_v5, %v2908_v5  ;;  %v2922_v22 = vpack.c.bf16 %v2920_v53, %v2920_v53  ;;  %v6688_v5 = vld [vmem:[#allocation12 + $0x10] sm:$0xf0] }
 0x60c   :  { %v6241_v31 = vor.u32 %v6688_v5, %v6240_v27  ;;  %v6727_v27 = vld [vmem:[#allocation13 + $0x88] sm:$0xf0]  ;;  %v6724_v5 = vld [vmem:[#allocation13 + $0x70] sm:$0xf0] }
 0x60d   :  { %v6994_v25 = vpop.eup %6993  ;;  %v2912_v50 = vunpack.c.l.bf16 %v2910_v37  ;;  %3566 = vmatpush.bf16.msra.mxu1 %v6249_v40  ;;  %4069 = vmatpush.bf16.msrb.mxu0 %v7864_v18  ;;  %v2924_v9 = vunpack.c.l.bf16 %v2922_v22  ;;  %v7890_v40 = vor.u32 %v6710_v1, %v6330_v33  ;;  %v6730_v22 = vld [vmem:[#allocation13 + $0xa0] sm:$0xf0] }
 0x60e   :  { %v2915_v3 = vpack.c.bf16 %v6994_v25, %v6994_v25  ;;  %3615 = vmatpush.bf16.msra.mxu2 %v6253_v44  ;;  %v6716_v25 = vld [vmem:[#allocation13 + $0x34] sm:$0xf] }
 0x60f   :  { %6995 = vtanh.f32 %v2912_v50  ;;  %v6354_v50 = vld [vmem:[#allocation13 + $0x3c] sm:$0xf0] }
 0x610   :  { %v2925_v57 = vunpack.c.l.bf16 %v2915_v3  ;;  %v7874_v3 = vor.u32 %v6716_v25, %v6354_v50  ;;  %v6712_v50 = vld [vmem:[#allocation13 + $0x10] sm:$0xf0] }
 0x611   :  { %3567 = vmatpush.bf16.msra.mxu1 %v6237_v29  ;;  %4070 = vmatpush.bf16.msrb.mxu0 %v7867_v43  ;;  %v6384_v29 = vld [vmem:[#allocation13 + $0x68] sm:$0xf] }
 0x612   :  { %v2927_v12 = vmul.f32 %v2925_v57, %v2923_v56  ;;  %3616 = vmatpush.bf16.msra.mxu2 %v6241_v31  ;;  %v6372_v31 = vld [vmem:[#allocation13 + $0x50] sm:$0xf] }
 0x613   :  { %v7917_v35 = vor.u32 %v6721_v34, %v6372_v31 }
 0x614   :  { %v2929_v16 = vpack.c.bf16 %v2927_v12, %v2927_v12  ;;  %v6733_v12 = vld [vmem:[#allocation13 + $0xb8] sm:$0xf0] }
 0x615   :  { %v6996_v28 = vpop.eup %6995  ;;  %4071 = vmatpush.bf16.msrb.mxu0 %v7874_v3  ;;  %v7892_v44 = vor.u32 %v6733_v12, %v6420_v11  ;;  %v3278_v11 = vld [vmem:[%s8392_s7] sm:$0x7] }
 0x616   :  { %v2916_v30 = vpack.c.bf16 %v6996_v28, %v6996_v28  ;;  %v2931_v39 = vunpack.c.l.bf16 %v2929_v16  ;;  %v7896_v16 = vor.u32 %v6730_v22, %v6408_v21  ;;  %v7905_v28 = vor.u32 %v6727_v27, %v6396_v17 }
 0x617   :  { %v3196_v22 = vrot.slane %v2947_v54, 4 }
 0x618   :  { %v2926_v37 = vunpack.c.l.bf16 %v2916_v30  ;;  %v7872_v26 = vadd.f32 %v2933_v46, %v2931_v39  ;;  %v7911_v30 = vor.u32 %v6724_v5, %v6384_v29  ;;  %v6348_v46 = vld [vmem:[#allocation13 + $0x20] sm:$0xf]  ;;  %v8008_v29 = vperm.slane %v3278_v11, 0 }
 0x619   :  { %4072 = vmatpush.bf16.msrb.mxu0 %v7883_v49  ;;  %v3200_v34 = vunpack.c.l.bf16 %v3196_v22 }
 0x61a   :  { %v2928_v47 = vmul.f32 %v2926_v37, %v2924_v9  ;;  %v2937_v4 = vpack.c.bf16 %v7872_v26, %v7872_v26  ;;  %v6360_v9 = vld [vmem:[#allocation13 + $0x38] sm:$0xf]  ;;  %v6718_v37 = vld [vmem:[#allocation13 + $0x40] sm:$0xf0] }
 0x61b   :  { %v7926_v39 = vor.u32 %v6718_v37, %v6360_v9  ;;  %v8010_v9 = vperm.slane %v3278_v11, 1 }
 0x61c   :  { %v2930_v51 = vpack.c.bf16 %v2928_v47, %v2928_v47  ;;  %v2983_v38 = vunpack.c.l.b16 %v2937_v4  ;;  %v6715_v47 = vld [vmem:[#allocation13 + $0x28] sm:$0xf0] }
 0x61d   :  { %4073 = vmatpush.bf16.msrb.mxu0 %v7890_v40  ;;  %v7932_v25 = vor.u32 %v6715_v47, %v6348_v46 }
 0x61e   :  { %v2932_v53 = vunpack.c.l.bf16 %v2930_v51 }
 0x620   :  { %v7879_v56 = vadd.f32 %v2934_v52, %v2932_v53 }
 0x621   :  { %4243 = vmatpush.bf16.msra.mxu0 %v7892_v44 }
 0x622   :  { %v2938_v57 = vpack.c.bf16 %v7879_v56, %v7879_v56  ;;  %v6775_v59 = vpack.c.bf16 %v7879_v56, %v7872_v26 }
 0x624   :  { %6776 = vst [vmem:[#allocation3 + $0x28] sm:$0xff] %v6775_v59   ;;  %v2984_v10 = vunpack.c.l.b16 %v2938_v57 }
 0x625   :  { %4244 = vmatpush.bf16.msra.mxu0 %v7896_v16 }
 0x626   :  { %v2985_v14 = vpack.c.b16 %v2984_v10, %v2983_v38  ;;  %v3158_v38 = vunpack.c.l.bf16 %v2947_v54 }
 0x628   :  { %3123 = vmatmul.bf16.vlgmr.msrb.gmra.mxu1 %v2985_v14  ;;  %3137 = vmatmul.bf16.vlgmr.msrb.gmra.mxu2 %v2985_v14 }
 0x629   :  { %3151 = vmatmul.bf16.vlgmr.msra.gmra.mxu3 %v2985_v14  ;;  %4080 = vmatpush.bf16.msrb.mxu1 %v7892_v44 }
 0x62a   :  { %3903 = vmatpush.bf16.msra.mxu3 %v7851_v24  ;;  %4215 = vmatpush.bf16.msrb.mxu2 %v7810_v48 }
 0x62b   :  { %v7901_v19 = vld [vmem:[#allocation3 + $0x28] sm:$0xff]  ;;  %4245 = vmatpush.bf16.msra.mxu0 %v7905_v28 }
 0x62c   :  { %3549 = vmatmul.bf16.gmra.mxu0 %v7901_v19 }
 0x62d   :  { %4081 = vmatpush.bf16.msrb.mxu1 %v7896_v16 }
 0x62e   :  { %3904 = vmatpush.bf16.msra.mxu3 %v7857_v42  ;;  %4216 = vmatpush.bf16.msrb.mxu2 %v7813_v13 }
 0x62f   :  { %4246 = vmatpush.bf16.msra.mxu0 %v7911_v30 }
 0x631   :  { %4082 = vmatpush.bf16.msrb.mxu1 %v7905_v28 }
 0x632   :  { %3905 = vmatpush.bf16.msra.mxu3 %v7861_v58  ;;  %4217 = vmatpush.bf16.msrb.mxu2 %v7816_v20 }
 0x633   :  { %4247 = vmatpush.bf16.msra.mxu0 %v7917_v35 }
 0x635   :  { %4083 = vmatpush.bf16.msrb.mxu1 %v7911_v30 }
 0x636   :  { %3906 = vmatpush.bf16.msra.mxu3 %v7864_v18  ;;  %4218 = vmatpush.bf16.msrb.mxu2 %v7819_v41 }
 0x637   :  { %4248 = vmatpush.bf16.msra.mxu0 %v7926_v39 }
 0x638   :  { %3568 = vmatmul.bf16.vlgmr.msra.gmra.mxu1 %v7792_v0  ;;  %3617 = vmatmul.bf16.vlgmr.msra.gmra.mxu2 %v7792_v0  ;;  %v6336_v0 = vld [vmem:[#allocation13 + $0x8] sm:$0xf] }
 0x639   :  { %3897 = vmatmul.bf16.vlgmr.msrb.gmra.mxu3 %v7468_v32  ;;  %4084 = vmatpush.bf16.msrb.mxu1 %v7917_v35  ;;  %v7938_v51 = vor.u32 %v6712_v50, %v6336_v0 }
 0x63a   :  { %3907 = vmatpush.bf16.msra.mxu3 %v7867_v43  ;;  %4219 = vmatpush.bf16.msrb.mxu2 %v7825_v61 }
 0x63b   :  { %4249 = vmatpush.bf16.msra.mxu0 %v7932_v25 }
 0x63d   :  { %4085 = vmatpush.bf16.msrb.mxu1 %v7926_v39 }
 0x63e   :  { %3908 = vmatpush.bf16.msra.mxu3 %v7874_v3  ;;  %4220 = vmatpush.bf16.msrb.mxu2 %v7835_v36 }
 0x63f   :  { %4250 = vmatpush.bf16.msra.mxu0 %v7938_v51 }
 0x641   :  { %4086 = vmatpush.bf16.msrb.mxu1 %v7932_v25 }
 0x642   :  { %3909 = vmatpush.bf16.msra.mxu3 %v7883_v49  ;;  %4221 = vmatpush.bf16.msrb.mxu2 %v7844_v63 }
 0x645   :  { %4087 = vmatpush.bf16.msrb.mxu1 %v7938_v51 }
 0x646   :  { %3910 = vmatpush.bf16.msra.mxu3 %v7890_v40  ;;  %4222 = vmatpush.bf16.msrb.mxu2 %v7848_v15 }
 0x648   :  { %3573 = vmatmul.bf16.gmra.mxu1 %v7795_v8  ;;  %3622 = vmatmul.bf16.gmra.mxu2 %v7795_v8  ;;  %v2945_v8 = vld [vmem:[#allocation2 + $0xa8] sm:$0xff] }
 0x649   :  { %4378 = vmatpush.bf16.msra.mxu1 %v7810_v48  ;;  %3911 = vmatmul.bf16.vlgmr.msra.gmra.mxu3 %v7468_v32  ;;  %v3195_v52 = vrot.slane %v2945_v8, 4 }
 0x64a   :  { %3917 = vmatpush.bf16.msrb.mxu3 %v7892_v44  ;;  %4392 = vmatpush.bf16.msra.mxu2 %v7851_v24 }
 0x64b   :  { %v3199_v4 = vunpack.c.l.bf16 %v3195_v52 }
 0x64d   :  { %4379 = vmatpush.bf16.msra.mxu1 %v7813_v13 }
 0x64e   :  { %3918 = vmatpush.bf16.msrb.mxu3 %v7896_v16  ;;  %4393 = vmatpush.bf16.msra.mxu2 %v7857_v42 }
 0x651   :  { %4380 = vmatpush.bf16.msra.mxu1 %v7816_v20 }
 0x652   :  { %3919 = vmatpush.bf16.msrb.mxu3 %v7905_v28  ;;  %4394 = vmatpush.bf16.msra.mxu2 %v7861_v58 }
 0x655   :  { %4381 = vmatpush.bf16.msra.mxu1 %v7819_v41 }
 0x656   :  { %3920 = vmatpush.bf16.msrb.mxu3 %v7911_v30  ;;  %4395 = vmatpush.bf16.msra.mxu2 %v7864_v18 }
 0x658   :  { %3578 = vmatmul.bf16.gmra.mxu1 %v7798_v2  ;;  %3627 = vmatmul.bf16.gmra.mxu2 %v7798_v2  ;;  %v3157_v2 = vunpack.c.l.bf16 %v2945_v8 }
 0x659   :  { %4382 = vmatpush.bf16.msra.mxu1 %v7825_v61 }
 0x65a   :  { %3921 = vmatpush.bf16.msrb.mxu3 %v7917_v35  ;;  %4396 = vmatpush.bf16.msra.mxu2 %v7867_v43 }
 0x65d   :  { %4383 = vmatpush.bf16.msra.mxu1 %v7835_v36 }
 0x65e   :  { %3922 = vmatpush.bf16.msrb.mxu3 %v7926_v39  ;;  %4397 = vmatpush.bf16.msra.mxu2 %v7874_v3 }
 0x661   :  { %4384 = vmatpush.bf16.msra.mxu1 %v7844_v63 }
 0x662   :  { %3923 = vmatpush.bf16.msrb.mxu3 %v7932_v25  ;;  %4398 = vmatpush.bf16.msra.mxu2 %v7883_v49 }
 0x665   :  { %4385 = vmatpush.bf16.msra.mxu1 %v7848_v15 }
 0x666   :  { %3924 = vmatpush.bf16.msrb.mxu3 %v7938_v51  ;;  %4399 = vmatpush.bf16.msra.mxu2 %v7890_v40 }
 0x668   :  { %3583 = vmatmul.bf16.gmra.mxu1 %v7801_v6  ;;  %3632 = vmatmul.bf16.gmra.mxu2 %v7801_v6 }
 0x669   :  { %3925 = vmatmul.bf16.vlgmr.msrb.gmra.mxu3 %v7468_v32  ;;  %v3520_v32 = vpop.f32.mrf.mxu0 }
 0x66a   :  { %4052 = vmatpush.bf16.msra.mxu3 %v7810_v48  ;;  %v3521_v8 = vadd.f32 %v3520_v32, %v8008_v29 }
 0x66e   :  { %4053 = vmatpush.bf16.msra.mxu3 %v7813_v13 }
 0x671   :  { %v3522_v6 = vpop.f32.mrf.mxu0 }
 0x672   :  { %4054 = vmatpush.bf16.msra.mxu3 %v7816_v20 }
 0x676   :  { %4055 = vmatpush.bf16.msra.mxu3 %v7819_v41 }
 0x678   :  { %3588 = vmatmul.bf16.gmra.mxu1 %v7804_v7  ;;  %3637 = vmatmul.bf16.gmra.mxu2 %v7804_v7 }
 0x67a   :  { %4056 = vmatpush.bf16.msra.mxu3 %v7825_v61 }
 0x67e   :  { %4057 = vmatpush.bf16.msra.mxu3 %v7835_v36 }
 0x682   :  { %4058 = vmatpush.bf16.msra.mxu3 %v7844_v63 }
 0x686   :  { %4059 = vmatpush.bf16.msra.mxu3 %v7848_v15 }
 0x688   :  { %3593 = vmatmul.bf16.gmra.mxu1 %v7807_v45  ;;  %3642 = vmatmul.bf16.gmra.mxu2 %v7807_v45 }
 0x68a   :  { %4229 = vmatpush.bf16.msrb.mxu3 %v7851_v24 }
 0x68e   :  { %4230 = vmatpush.bf16.msrb.mxu3 %v7857_v42 }
 0x692   :  { %4231 = vmatpush.bf16.msrb.mxu3 %v7861_v58 }
 0x696   :  { %4232 = vmatpush.bf16.msrb.mxu3 %v7864_v18 }
 0x698   :  { %3598 = vmatmul.bf16.gmra.mxu1 %v7901_v19  ;;  %3647 = vmatmul.bf16.gmra.mxu2 %v7901_v19  ;;  %v8006_v19 = vpop.f32.mrf.mxu0 }
 0x69a   :  { %4233 = vmatpush.bf16.msrb.mxu3 %v7867_v43 }
 0x69e   :  { %4234 = vmatpush.bf16.msrb.mxu3 %v7874_v3 }
 0x6a2   :  { %4235 = vmatpush.bf16.msrb.mxu3 %v7883_v49 }
 0x6a5   :  { %v3124_v7 = vpop.f32.mrf.mxu1 }
 0x6a6   :  { %4236 = vmatpush.bf16.msrb.mxu3 %v7890_v40  ;;  %v3159_v45 = vadd.f32 %v3157_v2, %v3124_v7 }
 0x6a8   :  { %v3161_v53 = vpack.c.bf16 %v3159_v45, %v3159_v45 }
 0x6aa   :  { %v3163_v55 = vxor.u32 2147516416, %v3161_v53 }
 0x6ab   :  { %v3138_v57 = vpop.f32.mrf.mxu2 }
 0x6ac   :  { %v3165_v59 = vunpack.c.l.bf16 %v3163_v55  ;;  %v3201_v1 = vadd.f32 %v3199_v4, %v3138_v57  ;;  %v8001_v33 = vpop.f32.mrf.mxu3  ;;  %v8018_v57 = vperm.slane %v3278_v11, 2  ;;  %v3523_v11 = vadd.f32 %v3522_v6, %v8008_v29 }
 0x6ad   :  { %v3126_v10 = vpop.f32.mrf.mxu1 }
 0x6ae   :  { %v3167_v12 = vmul.f32 1.442695, %v3165_v59  ;;  %v3203_v14 = vpack.c.bf16 %v3201_v1, %v3201_v1  ;;  %v3160_v21 = vadd.f32 %v3158_v38, %v3126_v10  ;;  %v8020_v59 = vpop.f32.mrf.mxu0 }
 0x6b0   :  { %6997 = vpow2.f32 %v3167_v12  ;;  %v3205_v17 = vxor.u32 2147516416, %v3203_v14  ;;  %v3162_v27 = vpack.c.bf16 %v3160_v21, %v3160_v21 }
 0x6b2   :  { %v3207_v5 = vunpack.c.l.bf16 %v3205_v17  ;;  %v3164_v31 = vxor.u32 2147516416, %v3162_v27 }
 0x6b3   :  { %v3140_v37 = vpop.f32.mrf.mxu2 }
 0x6b4   :  { %v3209_v46 = vmul.f32 1.442695, %v3207_v5  ;;  %v3166_v47 = vunpack.c.l.bf16 %v3164_v31  ;;  %v3202_v0 = vadd.f32 %v3200_v34, %v3140_v37  ;;  %v8012_v50 = vpop.f32.mrf.mxu3 }
 0x6b5   :  { %v3569_v2 = vpop.f32.mrf.mxu1 }
 0x6b6   :  { %v6998_v7 = vpop.eup %6997  ;;  %6999 = vpow2.f32 %v3209_v46  ;;  %v3169_v45 = vmul.f32 1.442695, %v3166_v47  ;;  %v3204_v52 = vpack.c.bf16 %v3202_v0, %v3202_v0  ;;  %v3570_v53 = vadd.f32 %v3569_v2, %v8010_v9  ;;  %v8029_v6 = vpop.f32.mrf.mxu0 }
 0x6b7   :  { %v3171_v54 = vpack.c.bf16 %v6998_v7, %v6998_v7 }
 0x6b8   :  { %7001 = vpow2.f32 %v3169_v45  ;;  %v3206_v55 = vxor.u32 2147516416, %v3204_v52  ;;  %v8016_v4 = vpack.c.bf16 %v3570_v53, %v3521_v8 }
 0x6b9   :  { %v3173_v1 = vunpack.c.l.bf16 %v3171_v54 }
 0x6ba   :  { %v3208_v38 = vunpack.c.l.bf16 %v3206_v55  ;;  %v3931_v32 = vunpack.c.l.bf16 %v8016_v4 }
 0x6bb   :  { %v3175_v10 = vadd.f32 1.0, %v3173_v1  ;;  %v3618_v12 = vpop.f32.mrf.mxu2 }
 0x6bc   :  { %v7000_v14 = vpop.eup %6999  ;;  %v3211_v21 = vmul.f32 1.442695, %v3208_v38  ;;  %v3619_v22 = vadd.f32 %v3618_v12, %v8018_v57  ;;  %v3898_v17 = vpop.f32.mrf.mxu3 }
 0x6bd   :  { %v3177_v27 = vpack.c.bf16 %v3175_v10, %v3175_v10  ;;  %v3213_v5 = vpack.c.bf16 %v7000_v14, %v7000_v14  ;;  %v3933_v31 = vadd.f32 %v3931_v32, %v3898_v17  ;;  %v3571_v34 = vpop.f32.mrf.mxu1  ;;  %v3526_v14 = vadd.f32 %v8006_v19, %v8008_v29 }
 0x6be   :  { %v7002_v37 = vpop.eup %7001  ;;  %7003 = vpow2.f32 %v3211_v21  ;;  %v3659_v46 = vpack.c.bf16 %v3619_v22, %v3619_v22  ;;  %v3572_v47 = vadd.f32 %v3571_v34, %v8010_v9 }
 0x6bf   :  { %v3179_v0 = vunpack.c.h.bf16 %v3177_v27  ;;  %v3180_v8 = vunpack.c.l.bf16 %v3177_v27  ;;  %v3215_v2 = vunpack.c.l.bf16 %v3213_v5  ;;  %v3172_v7 = vpack.c.bf16 %v7002_v37, %v7002_v37 }
 0x6c0   :  { %3691 = vst [vmem:[#allocation2 + $0x8] sm:$0xf] %v3659_v46  ;;  %v3935_v45 = vpack.c.bf16 %v3933_v31, %v3933_v31  ;;  %v8026_v52 = vpack.c.bf16 %v3572_v47, %v3523_v11  ;;  %v3969_v27 = vrot.slane %v8016_v4, 4 }
 0x6c1   :  { %7005 = vrcp.f32 %v3179_v0  ;;  %v3217_v53 = vadd.f32 1.0, %v3215_v2  ;;  %v3174_v54 = vunpack.c.l.bf16 %v3172_v7  ;;  %v2946_v7 = vld [vmem:[#allocation2 + $0xb0] sm:$0xf] }
 0x6c2   :  { %7007 = vrcp.f32 %v3180_v8  ;;  %v3937_v55 = vxor.u32 2147516416, %v3935_v45  ;;  %v3932_v1 = vunpack.c.l.bf16 %v8026_v52 }
 0x6c3   :  { %v3219_v38 = vpack.c.bf16 %v3217_v53, %v3217_v53  ;;  %v3176_v32 = vadd.f32 1.0, %v3174_v54  ;;  %v3620_v10 = vpop.f32.mrf.mxu2 }
 0x6c4   :  { %v7004_v12 = vpop.eup %7003  ;;  %v3939_v21 = vunpack.c.l.bf16 %v3937_v55  ;;  %v3621_v22 = vadd.f32 %v3620_v10, %v8018_v57  ;;  %v3900_v17 = vpop.f32.mrf.mxu3  ;;  %v3241_v10 = vunpack.c.l.bf16 %v2946_v7 }
 0x6c5   :  { %v3221_v5 = vunpack.c.h.bf16 %v3219_v38  ;;  %v3222_v31 = vunpack.c.l.bf16 %v3219_v38  ;;  %v3178_v34 = vpack.c.bf16 %v3176_v32, %v3176_v32  ;;  %v3214_v37 = vpack.c.bf16 %v7004_v12, %v7004_v12  ;;  %v3574_v11 = vpop.f32.mrf.mxu1 }
 0x6c6   :  { %v3941_v46 = vmul.f32 1.442695, %v3939_v21  ;;  %v3661_v47 = vpack.c.bf16 %v3621_v22, %v3621_v22  ;;  %v3934_v0 = vadd.f32 %v3932_v1, %v3900_v17  ;;  %v3575_v8 = vadd.f32 %v3574_v11, %v8010_v9 }
 0x6c7   :  { %v7006_v2 = vpop.eup %7005  ;;  %7009 = vrcp.f32 %v3221_v5  ;;  %v3186_v19 = vunpack.c.h.bf16 %v3178_v34  ;;  %v3187_v45 = vunpack.c.l.bf16 %v3178_v34  ;;  %v3216_v53 = vunpack.c.l.bf16 %v3214_v37 }
 0x6c8   :  { %v7008_v54 = vpop.eup %7007  ;;  %7011 = vrcp.f32 %v3222_v31  ;;  %v3182_v4 = vmul.f32 %v7006_v2, %v7581_v60  ;;  %3693 = vst [vmem:[#allocation2 + $0x14] sm:$0xf] %v3661_v47  ;;  %v3936_v55 = vpack.c.bf16 %v3934_v0, %v3934_v0  ;;  %v8037_v38 = vpack.c.bf16 %v3575_v8, %v3526_v14  ;;  %v8045_v0 = vpop.f32.mrf.mxu0 }
 0x6c9   :  { %v3184_v32 = vmul.f32 %v7008_v54, %v7583_v62  ;;  %7013 = vrcp.f32 %v3186_v19  ;;  %v3218_v1 = vadd.f32 1.0, %v3216_v53  ;;  %v3973_v5 = vunpack.c.l.bf16 %v3969_v27 }
 0x6ca   :  { %7015 = vrcp.f32 %v3187_v45  ;;  %v3938_v12 = vxor.u32 2147516416, %v3936_v55  ;;  %v3528_v31 = vadd.f32 %v8020_v59, %v8008_v29  ;;  %v3235_v34 = vadd.f32 %v7831_v23, %v8001_v33 }
 0x6cb   :  { %v3185_v21 = vpack.c.bf16 %v3182_v4, %v3184_v32  ;;  %v3220_v22 = vpack.c.bf16 %v3218_v1, %v3218_v1  ;;  %7017 = vpow2.f32 %v3941_v46  ;;  %v3623_v17 = vpop.f32.mrf.mxu2 }
 0x6cc   :  { %v3940_v14 = vunpack.c.l.bf16 %v3938_v12  ;;  %v3624_v37 = vadd.f32 %v3623_v17, %v8018_v57  ;;  %v3912_v11 = vpop.f32.mrf.mxu3  ;;  %v2948_v12 = vld [vmem:[#allocation2 + $0xbc] sm:$0xf]  ;;  %v3970_v17 = vrot.slane %v8026_v52, 4 }
 0x6cd   :  { %v7010_v47 = vpop.eup %7009  ;;  %v3237_v8 = vunpack.c.l.bf16 %v3185_v21  ;;  %v3228_v2 = vunpack.c.h.bf16 %v3220_v22  ;;  %v3229_v7 = vunpack.c.l.bf16 %v3220_v22  ;;  %v3975_v19 = vadd.f32 %v3973_v5, %v3912_v11  ;;  %v3576_v46 = vpop.f32.mrf.mxu1 }
 0x6ce   :  { %v7012_v45 = vpop.eup %7011  ;;  %v3224_v27 = vmul.f32 %v7010_v47, %v7581_v60  ;;  %v3943_v53 = vmul.f32 1.442695, %v3940_v14  ;;  %v3663_v59 = vpack.c.bf16 %v3624_v37, %v3624_v37  ;;  %v3577_v54 = vadd.f32 %v3576_v46, %v8010_v9 }
 0x6cf   :  { %v7014_v33 = vpop.eup %7013  ;;  %v3226_v4 = vmul.f32 %v7012_v45, %v7583_v62  ;;  %v3239_v55 = vmul.f32 %v3237_v8, %v3235_v34  ;;  %7019 = vrcp.f32 %v3228_v2  ;;  %v3977_v32 = vpack.c.bf16 %v3975_v19, %v3975_v19 }
 0x6d0   :  { %v7016_v1 = vpop.eup %7015  ;;  %7021 = vrcp.f32 %v3229_v7  ;;  %v3189_v21 = vmul.f32 %v7014_v33, %v7581_v60  ;;  %3695 = vst [vmem:[#allocation2 + $0x20] sm:$0xf] %v3663_v59  ;;  %v8051_v22 = vpack.c.bf16 %v3577_v54, %v3528_v31  ;;  %v3242_v19 = vunpack.c.l.bf16 %v2948_v12 }
 0x6d1   :  { %v7018_v5 = vpop.eup %7017  ;;  %v3227_v14 = vpack.c.bf16 %v3224_v27, %v3226_v4  ;;  %v3243_v37 = vadd.f32 %v3241_v10, %v3239_v55  ;;  %v3191_v11 = vmul.f32 %v7016_v1, %v7583_v62  ;;  %7023 = vpow2.f32 %v3943_v53 }
 0x6d2   :  { %v3945_v47 = vpack.c.bf16 %v7018_v5, %v7018_v5  ;;  %v3979_v34 = vxor.u32 2147516416, %v3977_v32  ;;  %v3236_v46 = vadd.f32 %v7831_v23, %v8012_v50  ;;  %v3974_v53 = vunpack.c.l.bf16 %v3970_v17  ;;  %v8063_v50 = vpop.f32.mrf.mxu0 }
 0x6d3   :  { %v3245_v8 = vpack.c.bf16 %v3243_v37, %v3243_v37  ;;  %v3192_v2 = vpack.c.bf16 %v3189_v21, %v3191_v11  ;;  %v3625_v7 = vpop.f32.mrf.mxu2  ;;  %v8058_v27 = vunpack.c.l.bf16 %v3227_v14  ;;  %v3531_v23 = vadd.f32 %v8029_v6, %v8008_v29 }
 0x6d4   :  { %v3947_v45 = vunpack.c.l.bf16 %v3945_v47  ;;  %v3981_v31 = vunpack.c.l.bf16 %v3979_v34  ;;  %v3626_v59 = vadd.f32 %v3625_v7, %v8018_v57  ;;  %v3914_v33 = vpop.f32.mrf.mxu3 }
 0x6d5   :  { %v7020_v52 = vpop.eup %7019  ;;  %v3247_v54 = vunpack.c.l.bf16 %v3245_v8  ;;  %v3238_v10 = vunpack.c.l.bf16 %v3192_v2  ;;  %v3579_v4 = vpop.f32.mrf.mxu1  ;;  %v3976_v17 = vadd.f32 %v3974_v53, %v3914_v33  ;;  %v3255_v34 = vsub.f32 1.0, %v8058_v27 }
 0x6d6   :  { %v7022_v55 = vpop.eup %7021  ;;  %v3231_v32 = vmul.f32 %v7020_v52, %v7581_v60  ;;  %v3949_v1 = vadd.f32 1.0, %v3947_v45  ;;  %v3983_v12 = vmul.f32 1.442695, %v3981_v31  ;;  %v3665_v21 = vpack.c.bf16 %v3626_v59, %v3626_v59 }
 0x6d7   :  { %v7024_v5 = vpop.eup %7023  ;;  %7025 = vtanh.f32 %v3247_v54  ;;  %v3233_v14 = vmul.f32 %v7022_v55, %v7583_v62  ;;  %v3240_v37 = vmul.f32 %v3238_v10, %v3236_v46  ;;  %v3580_v7 = vadd.f32 %v3579_v4, %v8010_v9 }
 0x6d8   :  { %v3951_v11 = vpack.c.bf16 %v3949_v1, %v3949_v1  ;;  %v3946_v47 = vpack.c.bf16 %v7024_v5, %v7024_v5  ;;  %7027 = vpow2.f32 %v3983_v12  ;;  %3697 = vst [vmem:[#allocation2 + $0x2c] sm:$0xf] %v3665_v21  ;;  %v3978_v59 = vpack.c.bf16 %v3976_v17, %v3976_v17 }
 0x6d9   :  { %v3234_v8 = vpack.c.bf16 %v3231_v32, %v3233_v14  ;;  %v3244_v2 = vadd.f32 %v3242_v19, %v3240_v37  ;;  %v8070_v55 = vpack.c.bf16 %v3580_v7, %v3531_v23  ;;  %v3533_v19 = vadd.f32 %v8045_v0, %v8008_v29 }
 0x6da   :  { %v3953_v45 = vunpack.c.h.bf16 %v3951_v11  ;;  %v3954_v31 = vunpack.c.l.bf16 %v3951_v11  ;;  %v3948_v6 = vunpack.c.l.bf16 %v3946_v47  ;;  %v3980_v1 = vxor.u32 2147516416, %v3978_v59  ;;  %v3537_v0 = vpop.f32.mrf.mxu0 }
 0x6db   :  { %v3246_v52 = vpack.c.bf16 %v3244_v2, %v3244_v2  ;;  %v8068_v54 = vunpack.c.l.bf16 %v3234_v8  ;;  %v3628_v46 = vpop.f32.mrf.mxu2  ;;  %v3257_v4 = vpack.c.bf16 %v3255_v34, %v3255_v34 }
 0x6dc   :  { %7029 = vrcp.f32 %v3953_v45  ;;  %v3950_v10 = vadd.f32 1.0, %v3948_v6  ;;  %v3629_v33 = vadd.f32 %v3628_v46, %v8018_v57  ;;  %v3982_v37 = vunpack.c.l.bf16 %v3980_v1 }
 0x6dd   :  { %v7026_v53 = vpop.eup %7025  ;;  %v3248_v32 = vunpack.c.l.bf16 %v3246_v52  ;;  %7031 = vrcp.f32 %v3954_v31  ;;  %v3581_v12 = vpop.f32.mrf.mxu1  ;;  %v3256_v11 = vsub.f32 1.0, %v8068_v54  ;;  %v3259_v34 = vunpack.c.l.bf16 %v3257_v4 }
 0x6de   :  { %v7028_v21 = vpop.eup %7027  ;;  %v3251_v5 = vpack.c.bf16 %v7026_v53, %v7026_v53  ;;  %v3952_v14 = vpack.c.bf16 %v3950_v10, %v3950_v10  ;;  %v3667_v23 = vpack.c.bf16 %v3629_v33, %v3629_v33  ;;  %v3582_v17 = vadd.f32 %v3581_v12, %v8010_v9 }
 0x6df   :  { %7033 = vtanh.f32 %v3248_v32  ;;  %v3987_v47 = vpack.c.bf16 %v7028_v21, %v7028_v21  ;;  %v3985_v45 = vmul.f32 1.442695, %v3982_v37  ;;  %v3258_v53 = vpack.c.bf16 %v3256_v11, %v3256_v11 }
 0x6e0   :  { %v3261_v8 = vunpack.c.l.bf16 %v3251_v5  ;;  %v3960_v2 = vunpack.c.h.bf16 %v3952_v14  ;;  %v3961_v7 = vunpack.c.l.bf16 %v3952_v14  ;;  %3699 = vst [vmem:[#allocation2 + $0x38] sm:$0xf] %v3667_v23  ;;  %v8077_v6 = vpack.c.bf16 %v3582_v17, %v3533_v19 }
 0x6e1   :  { %v3989_v31 = vunpack.c.l.bf16 %v3987_v47  ;;  %v3536_v19 = vadd.f32 %v8063_v50, %v8008_v29  ;;  %v8088_v47 = vld [vmem:[%s8393_s8] ss:$0 sm:$0xff]  ;;  %v3726_v50 = vld [vmem:[#allocation2 + $0x8] sm:$0xf] }
 0x6e2   :  { %v7030_v59 = vpop.eup %7029  ;;  %7035 = vrcp.f32 %v3960_v2  ;;  %v3263_v46 = vmul.f32 %v3261_v8, %v3259_v34 }
 0x6e3   :  { %v7032_v52 = vpop.eup %7031  ;;  %7037 = vrcp.f32 %v3961_v7  ;;  %v3991_v10 = vadd.f32 1.0, %v3989_v31  ;;  %v3630_v1 = vpop.f32.mrf.mxu2  ;;  %v3956_v33 = vmul.f32 %v7030_v59, %v7581_v60 }
 0x6e4   :  { %7039 = vpow2.f32 %v3985_v45  ;;  %v3631_v32 = vadd.f32 %v3630_v1, %v8018_v57  ;;  %v3958_v12 = vmul.f32 %v7032_v52, %v7583_v62  ;;  %v3265_v11 = vpack.c.bf16 %v3263_v46, %v3263_v46 }
 0x6e5   :  { %v7034_v21 = vpop.eup %7033  ;;  %v3993_v4 = vpack.c.bf16 %v3991_v10, %v3991_v10  ;;  %v3584_v5 = vpop.f32.mrf.mxu1  ;;  %v3260_v45 = vunpack.c.l.bf16 %v3258_v53  ;;  %v3538_v53 = vadd.f32 %v3537_v0, %v8008_v29 }
 0x6e6   :  { %v3252_v14 = vpack.c.bf16 %v7034_v21, %v7034_v21  ;;  %v3669_v37 = vpack.c.bf16 %v3631_v32, %v3631_v32  ;;  %v3585_v23 = vadd.f32 %v3584_v5, %v8010_v9  ;;  %v3959_v2 = vpack.c.bf16 %v3956_v33, %v3958_v12  ;;  %v3540_v12 = vpop.f32.mrf.mxu0 }
 0x6e7   :  { %v3995_v17 = vunpack.c.h.bf16 %v3993_v4  ;;  %v3996_v8 = vunpack.c.l.bf16 %v3993_v4  ;;  %v3267_v4 = vunpack.c.l.bf16 %v3265_v11 }
 0x6e8   :  { %v7036_v7 = vpop.eup %7035  ;;  %v3262_v34 = vunpack.c.l.bf16 %v3252_v14  ;;  %3701 = vst [vmem:[#allocation2 + $0x44] sm:$0xf] %v3669_v37  ;;  %v3670_v31 = vpack.c.bf16 %v3585_v23, %v3536_v19  ;;  %v4011_v10 = vunpack.c.l.bf16 %v3959_v2  ;;  %v4015_v23 = vunpack.c.l.bf16 %v3726_v50 }
 0x6e9   :  { %v7038_v59 = vpop.eup %7037  ;;  %7041 = vrcp.f32 %v3995_v17  ;;  %v3963_v1 = vmul.f32 %v7036_v7, %v7581_v60  ;;  %v3269_v2 = vmul.f32 %v8058_v27, %v7872_v26 }
 0x6ea   :  { %v7040_v32 = vpop.eup %7039  ;;  %v3264_v21 = vmul.f32 %v3262_v34, %v3260_v45  ;;  %7043 = vrcp.f32 %v3996_v8  ;;  %3702 = vst [vmem:[#allocation2 + $0x48] sm:$0xff] %v3670_v31  ;;  %v3965_v33 = vmul.f32 %v7038_v59, %v7583_v62  ;;  %v3270_v8 = vmul.f32 %v8068_v54, %v7879_v56  ;;  %v3728_v54 = vld [vmem:[#allocation2 + $0x14] sm:$0xf] }
 0x6eb   :  { %v3988_v5 = vpack.c.bf16 %v7040_v32, %v7040_v32  ;;  %v3633_v19 = vpop.f32.mrf.mxu2  ;;  %v3271_v32 = vadd.f32 %v3269_v2, %v3267_v4 }
 0x6ec   :  { %v3926_v52 = vpop.f32.mrf.mxu3  ;;  %v3266_v14 = vpack.c.bf16 %v3264_v21, %v3264_v21  ;;  %v3634_v17 = vadd.f32 %v3633_v19, %v8018_v57  ;;  %v3966_v34 = vpack.c.bf16 %v3963_v1, %v3965_v33 }
 0x6ed   :  { %v4009_v46 = vadd.f32 %v8088_v47, %v3926_v52  ;;  %v3990_v7 = vunpack.c.l.bf16 %v3988_v5  ;;  %v3586_v45 = vpop.f32.mrf.mxu1 }
 0x6ee   :  { %v3268_v31 = vunpack.c.l.bf16 %v3266_v14  ;;  %v3671_v59 = vpack.c.bf16 %v3634_v17, %v3634_v17  ;;  %v3587_v11 = vadd.f32 %v3586_v45, %v8010_v9  ;;  %v4012_v14 = vunpack.c.l.bf16 %v3966_v34 }
 0x6ef   :  { %v4013_v37 = vmul.f32 %v4011_v10, %v4009_v46  ;;  %v7042_v52 = vpop.eup %7041  ;;  %v3992_v10 = vadd.f32 1.0, %v3990_v7  ;;  %v3541_v45 = vadd.f32 %v3540_v12, %v8008_v29 }
 0x6f0   :  { %v7044_v50 = vpop.eup %7043  ;;  %v3272_v21 = vadd.f32 %v3270_v8, %v3268_v31  ;;  %v3998_v46 = vmul.f32 %v7042_v52, %v7581_v60  ;;  %3703 = vst [vmem:[#allocation2 + $0x50] sm:$0xf] %v3671_v59  ;;  %v8101_v26 = vpack.c.bf16 %v3587_v11, %v3538_v53  ;;  %v4016_v8 = vunpack.c.l.bf16 %v3728_v54  ;;  %v3542_v31 = vpop.f32.mrf.mxu0 }
 0x6f1   :  { %v4017_v0 = vadd.f32 %v4015_v23, %v4013_v37  ;;  %v4000_v56 = vmul.f32 %v7044_v50, %v7583_v62  ;;  %v3994_v27 = vpack.c.bf16 %v3992_v10, %v3992_v10 }
 0x6f2   :  { %v6780_v33 = vpack.c.bf16 %v3272_v21, %v3271_v32  ;;  %3704 = vst [vmem:[#allocation2 + $0x54] sm:$0xff] %v8101_v26 }
 0x6f3   :  { %v4019_v19 = vpack.c.bf16 %v4017_v0, %v4017_v0  ;;  %v4002_v37 = vunpack.c.h.bf16 %v3994_v27  ;;  %v4003_v23 = vunpack.c.l.bf16 %v3994_v27  ;;  %v4001_v17 = vpack.c.bf16 %v3998_v46, %v4000_v56  ;;  %v3635_v2 = vpop.f32.mrf.mxu2 }
 0x6f4   :  { %v3928_v1 = vpop.f32.mrf.mxu3  ;;  %6781 = vst [vmem:[#allocation3 + $0x38] sm:$0xff] %v6780_v33   ;;  %v3636_v7 = vadd.f32 %v3635_v2, %v8018_v57 }
 0x6f5   :  { %v4021_v5 = vunpack.c.l.bf16 %v4019_v19  ;;  %v4010_v4 = vadd.f32 %v8088_v47, %v3928_v1  ;;  %v4027_v0 = vunpack.c.l.bf16 %v4001_v17  ;;  %v3589_v59 = vpop.f32.mrf.mxu1 }
 0x6f6   :  { %v3673_v52 = vpack.c.bf16 %v3636_v7, %v3636_v7  ;;  %v3590_v34 = vadd.f32 %v3589_v59, %v8010_v9 }
 0x6f7   :  { %7045 = vtanh.f32 %v4021_v5  ;;  %v4014_v53 = vmul.f32 %v4012_v14, %v4010_v4  ;;  %v4029_v50 = vsub.f32 1.0, %v4027_v0 }
 0x6f8   :  { %7047 = vrcp.f32 %v4002_v37  ;;  %3705 = vst [vmem:[#allocation2 + $0x5c] sm:$0xf] %v3673_v52  ;;  %v3674_v10 = vpack.c.bf16 %v3590_v34, %v3541_v45  ;;  %v3543_v37 = vadd.f32 %v3542_v31, %v8008_v29  ;;  %v3545_v2 = vpop.f32.mrf.mxu0 }
 0x6f9   :  { %7049 = vrcp.f32 %v4003_v23  ;;  %v4018_v11 = vadd.f32 %v4016_v8, %v4014_v53  ;;  %v4031_v4 = vpack.c.bf16 %v4029_v50, %v4029_v50 }
 0x6fa   :  { %3706 = vst [vmem:[#allocation2 + $0x60] sm:$0xff] %v3674_v10 }
 0x6fb   :  { %v4020_v32 = vpack.c.bf16 %v4018_v11, %v4018_v11  ;;  %v3638_v27 = vpop.f32.mrf.mxu2  ;;  %v6685_v12 = vld [vmem:[#allocation3 + $0x38] sm:$0xff]  ;;  %v4033_v45 = vunpack.c.l.bf16 %v4031_v4 }
 0x6fc   :  { %v3639_v33 = vadd.f32 %v3638_v27, %v8018_v57  ;;  %3554 = vmatmul.bf16.gmra.mxu0 %v6685_v12  ;;  %3603 = vmatmul.bf16.gmra.mxu1 %v6685_v12 }
 0x6fd   :  { %v7046_v21 = vpop.eup %7045  ;;  %v4022_v46 = vunpack.c.l.bf16 %v4020_v32  ;;  %v3591_v14 = vpop.f32.mrf.mxu1  ;;  %3652 = vmatmul.bf16.gmra.mxu2 %v6685_v12 }
 0x6fe   :  { %v7048_v19 = vpop.eup %7047  ;;  %v4025_v56 = vpack.c.bf16 %v7046_v21, %v7046_v21  ;;  %v3675_v23 = vpack.c.bf16 %v3639_v33, %v3639_v33  ;;  %v3592_v17 = vadd.f32 %v3591_v14, %v8010_v9 }
 0x6ff   :  { %v7050_v54 = vpop.eup %7049  ;;  %v4005_v1 = vmul.f32 %v7048_v19, %v7581_v60  ;;  %7051 = vtanh.f32 %v4022_v46  ;;  %v3546_v19 = vadd.f32 %v3545_v2, %v8008_v29 }
 0x700   :  { %v4007_v5 = vmul.f32 %v7050_v54, %v7583_v62  ;;  %v4035_v53 = vunpack.c.l.bf16 %v4025_v56  ;;  %3707 = vst [vmem:[#allocation2 + $0x68] sm:$0xf] %v3675_v23  ;;  %v3676_v7 = vpack.c.bf16 %v3592_v17, %v3543_v37  ;;  %v3547_v33 = vpop.f32.mrf.mxu0  ;;  %v4043_v17 = vmul.f32 0.0, %v4027_v0 }
 0x701   :  { %v3548_v2 = vadd.f32 %v3547_v33, %v8008_v29 }
 0x702   :  { %v4008_v8 = vpack.c.bf16 %v4005_v1, %v4007_v5  ;;  %3708 = vst [vmem:[#allocation2 + $0x6c] sm:$0xff] %v3676_v7  ;;  %v4037_v52 = vmul.f32 %v4035_v53, %v4033_v45 }
 0x703   :  { %v3640_v10 = vpop.f32.mrf.mxu2 }
 0x704   :  { %v4028_v59 = vunpack.c.l.bf16 %v4008_v8  ;;  %v3641_v50 = vadd.f32 %v3640_v10, %v8018_v57  ;;  %v4039_v12 = vpack.c.bf16 %v4037_v52, %v4037_v52 }
 0x705   :  { %v7052_v11 = vpop.eup %7051  ;;  %v3594_v46 = vpop.f32.mrf.mxu1 }
 0x706   :  { %v4026_v34 = vpack.c.bf16 %v7052_v11, %v7052_v11  ;;  %v4030_v32 = vsub.f32 1.0, %v4028_v59  ;;  %v3677_v27 = vpack.c.bf16 %v3641_v50, %v3641_v50  ;;  %v3595_v56 = vadd.f32 %v3594_v46, %v8010_v9 }
 0x707   :  { %v4041_v4 = vunpack.c.l.bf16 %v4039_v12  ;;  %v4044_v8 = vmul.f32 0.0, %v4028_v59 }
 0x708   :  { %v4032_v31 = vpack.c.bf16 %v4030_v32, %v4030_v32  ;;  %v4036_v21 = vunpack.c.l.bf16 %v4026_v34  ;;  %3709 = vst [vmem:[#allocation2 + $0x74] sm:$0xf] %v3677_v27  ;;  %v3678_v1 = vpack.c.bf16 %v3595_v56, %v3546_v19  ;;  %v3550_v10 = vpop.f32.mrf.mxu0 }
 0x709   :  { %v8120_v52 = vadd.f32 %v4043_v17, %v4041_v4 }
 0x70a   :  { %v4034_v54 = vunpack.c.l.bf16 %v4032_v31  ;;  %3710 = vst [vmem:[#allocation2 + $0x78] sm:$0xff] %v3678_v1 }
 0x70b   :  { %v3643_v37 = vpop.f32.mrf.mxu2 }
 0x70c   :  { %v4038_v5 = vmul.f32 %v4036_v21, %v4034_v54  ;;  %v3644_v23 = vadd.f32 %v3643_v37, %v8018_v57  ;;  %v3551_v21 = vadd.f32 %v3550_v10, %v8008_v29 }
 0x70d   :  { %v3596_v7 = vpop.f32.mrf.mxu1 }
 0x70e   :  { %v4040_v14 = vpack.c.bf16 %v4038_v5, %v4038_v5  ;;  %v3679_v45 = vpack.c.bf16 %v3644_v23, %v3644_v23  ;;  %v3597_v11 = vadd.f32 %v3596_v7, %v8010_v9 }
 0x710   :  { %v4042_v53 = vunpack.c.l.bf16 %v4040_v14  ;;  %3711 = vst [vmem:[#allocation2 + $0x80] sm:$0xf] %v3679_v45  ;;  %v3680_v32 = vpack.c.bf16 %v3597_v11, %v3548_v2  ;;  %v3552_v56 = vpop.f32.mrf.mxu0 }
 0x711   :  { %v3553_v33 = vadd.f32 %v3552_v56, %v8008_v29 }
 0x712   :  { %v8122_v34 = vadd.f32 %v4044_v8, %v4042_v53  ;;  %3712 = vst [vmem:[#allocation2 + $0x84] sm:$0xff] %v3680_v32 }
 0x713   :  { %v3645_v0 = vpop.f32.mrf.mxu2 }
 0x714   :  { %v4051_v50 = vpack.c.bf16 %v8122_v34, %v8120_v52  ;;  %v3646_v59 = vadd.f32 %v3645_v0, %v8018_v57 }
 0x715   :  { %v3599_v31 = vpop.f32.mrf.mxu1 }
 0x716   :  { %4060 = vmatmul.bf16.vlgmr.msra.gmra.mxu3 %v4051_v50  ;;  %4074 = vmatmul.bf16.vlgmr.msrb.gmra.mxu0 %v4051_v50  ;;  %v3681_v46 = vpack.c.bf16 %v3646_v59, %v3646_v59  ;;  %v3600_v19 = vadd.f32 %v3599_v31, %v8010_v9 }
 0x717   :  { %4088 = vmatmul.bf16.vlgmr.msrb.gmra.mxu1 %v4051_v50  ;;  %4406 = vmatpush.bf16.msra.mxu3 %v7892_v44 }
 0x718   :  { %4541 = vmatpush.bf16.msrb.mxu0 %v7810_v48  ;;  %4555 = vmatpush.bf16.msrb.mxu1 %v7851_v24  ;;  %3713 = vst [vmem:[#allocation2 + $0x8c] sm:$0xf] %v3681_v46  ;;  %v3682_v27 = vpack.c.bf16 %v3600_v19, %v3551_v21 }
 0x71a   :  { %3714 = vst [vmem:[#allocation2 + $0x90] sm:$0xff] %v3682_v27  ;;  %v4132_v27 = vrot.slane %v8037_v38, 4 }
 0x71b   :  { %4407 = vmatpush.bf16.msra.mxu3 %v7896_v16  ;;  %v3648_v12 = vpop.f32.mrf.mxu2 }
 0x71c   :  { %4542 = vmatpush.bf16.msrb.mxu0 %v7813_v13  ;;  %4556 = vmatpush.bf16.msrb.mxu1 %v7857_v42  ;;  %v3649_v54 = vadd.f32 %v3648_v12, %v8018_v57  ;;  %v4136_v12 = vunpack.c.l.bf16 %v4132_v27 }
 0x71d   :  { %v3601_v1 = vpop.f32.mrf.mxu1 }
 0x71e   :  { %v3683_v5 = vpack.c.bf16 %v3649_v54, %v3649_v54  ;;  %v3602_v4 = vadd.f32 %v3601_v1, %v8010_v9 }
 0x71f   :  { %4408 = vmatpush.bf16.msra.mxu3 %v7905_v28 }
 0x720   :  { %4543 = vmatpush.bf16.msrb.mxu0 %v7816_v20  ;;  %4557 = vmatpush.bf16.msrb.mxu1 %v7861_v58  ;;  %3715 = vst [vmem:[#allocation2 + $0x98] sm:$0xf] %v3683_v5  ;;  %v3684_v14 = vpack.c.bf16 %v3602_v4, %v3553_v33  ;;  %v4133_v5 = vrot.slane %v8051_v22, 4 }
 0x722   :  { %3716 = vst [vmem:[#allocation2 + $0x9c] sm:$0xff] %v3684_v14 }
 0x723   :  { %4409 = vmatpush.bf16.msra.mxu3 %v7911_v30  ;;  %v3650_v37 = vpop.f32.mrf.mxu2 }
 0x724   :  { %4544 = vmatpush.bf16.msrb.mxu0 %v7819_v41  ;;  %4558 = vmatpush.bf16.msrb.mxu1 %v7864_v18  ;;  %v3651_v23 = vadd.f32 %v3650_v37, %v8018_v57 }
 0x726   :  { %v3685_v17 = vpack.c.bf16 %v3651_v23, %v3651_v23  ;;  %v4137_v23 = vunpack.c.l.bf16 %v4133_v5 }
 0x727   :  { %4410 = vmatpush.bf16.msra.mxu3 %v7917_v35 }
 0x728   :  { %4545 = vmatpush.bf16.msrb.mxu0 %v7825_v61  ;;  %4559 = vmatpush.bf16.msrb.mxu1 %v7867_v43  ;;  %3717 = vst [vmem:[#allocation2 + $0xa4] sm:$0xf] %v3685_v17 }
 0x72b   :  { %4411 = vmatpush.bf16.msra.mxu3 %v7926_v39 }
 0x72c   :  { %4546 = vmatpush.bf16.msrb.mxu0 %v7835_v36  ;;  %4560 = vmatpush.bf16.msrb.mxu1 %v7874_v3 }
 0x72f   :  { %4412 = vmatpush.bf16.msra.mxu3 %v7932_v25 }
 0x730   :  { %4547 = vmatpush.bf16.msrb.mxu0 %v7844_v63  ;;  %4561 = vmatpush.bf16.msrb.mxu1 %v7883_v49 }
 0x733   :  { %4413 = vmatpush.bf16.msra.mxu3 %v7938_v51 }
 0x734   :  { %4548 = vmatpush.bf16.msrb.mxu0 %v7848_v15  ;;  %4562 = vmatpush.bf16.msrb.mxu1 %v7890_v40 }
 0x779   :  { %v3555_v53 = vpop.f32.mrf.mxu0  ;;  %v3604_v8 = vpop.f32.mrf.mxu1 }
 0x77a   :  { %v3556_v7 = vadd.f32 %v3555_v53, %v8008_v29  ;;  %v3605_v2 = vadd.f32 %v3604_v8, %v8010_v9 }
 0x77c   :  { %v3686_v45 = vpack.c.bf16 %v3605_v2, %v3556_v7 }
 0x77e   :  { %3718 = vst [vmem:[#allocation2 + $0xa8] sm:$0xff] %v3686_v45 }
 0x780   :  { %v3653_v11 = vpop.f32.mrf.mxu2 }
 0x781   :  { %v3654_v32 = vadd.f32 %v3653_v11, %v8018_v57  ;;  %v3557_v10 = vpop.f32.mrf.mxu0  ;;  %v3606_v50 = vpop.f32.mrf.mxu1 }
 0x782   :  { %v3558_v0 = vadd.f32 %v3557_v10, %v8008_v29  ;;  %v3607_v59 = vadd.f32 %v3606_v50, %v8010_v9  ;;  %v4094_v9 = vunpack.c.l.bf16 %v8037_v38 }
 0x783   :  { %v3687_v31 = vpack.c.bf16 %v3654_v32, %v3654_v32  ;;  %v4095_v32 = vunpack.c.l.bf16 %v8051_v22 }
 0x784   :  { %v3688_v21 = vpack.c.bf16 %v3607_v59, %v3558_v0 }
 0x785   :  { %3719 = vst [vmem:[#allocation2 + $0xb0] sm:$0xf] %v3687_v31 }
 0x786   :  { %3720 = vst [vmem:[#allocation2 + $0xb4] sm:$0xff] %v3688_v21 }
 0x788   :  { %v3655_v46 = vpop.f32.mrf.mxu2 }
 0x789   :  { %v3656_v19 = vadd.f32 %v3655_v46, %v8018_v57 }
 0x78b   :  { %v3689_v56 = vpack.c.bf16 %v3656_v19, %v3656_v19 }
 0x78d   :  { %3721 = vst [vmem:[#allocation2 + $0xbc] sm:$0xf] %v3689_v56 }
 0x793   :  { %v4075_v54 = vpop.f32.mrf.mxu0 }
 0x794   :  { %v4138_v1 = vadd.f32 %v4136_v12, %v4075_v54 }
 0x796   :  { %v4140_v33 = vpack.c.bf16 %v4138_v1, %v4138_v1 }
 0x798   :  { %v4142_v29 = vxor.u32 2147516416, %v4140_v33 }
 0x799   :  { %v4061_v4 = vpop.f32.mrf.mxu3 }
 0x79a   :  { %v4144_v14 = vunpack.c.l.bf16 %v4142_v29  ;;  %v4096_v37 = vadd.f32 %v4094_v9, %v4061_v4 }
 0x79b   :  { %v4077_v17 = vpop.f32.mrf.mxu0 }
 0x79c   :  { %v4146_v53 = vmul.f32 1.442695, %v4144_v14  ;;  %v4098_v57 = vpack.c.bf16 %v4096_v37, %v4096_v37  ;;  %v4139_v8 = vadd.f32 %v4137_v23, %v4077_v17 }
 0x79e   :  { %7053 = vpow2.f32 %v4146_v53  ;;  %v4100_v7 = vxor.u32 2147516416, %v4098_v57  ;;  %v4141_v2 = vpack.c.bf16 %v4139_v8, %v4139_v8 }
 0x7a0   :  { %v4102_v45 = vunpack.c.l.bf16 %v4100_v7  ;;  %v4143_v11 = vxor.u32 2147516416, %v4141_v2 }
 0x7a1   :  { %v4063_v10 = vpop.f32.mrf.mxu3 }
 0x7a2   :  { %v4104_v50 = vmul.f32 1.442695, %v4102_v45  ;;  %v4145_v0 = vunpack.c.l.bf16 %v4143_v11  ;;  %v4097_v59 = vadd.f32 %v4095_v32, %v4063_v10 }
 0x7a4   :  { %v7054_v38 = vpop.eup %7053  ;;  %7055 = vpow2.f32 %v4104_v50  ;;  %v4148_v31 = vmul.f32 1.442695, %v4145_v0  ;;  %v4099_v21 = vpack.c.bf16 %v4097_v59, %v4097_v59 }
 0x7a5   :  { %v4150_v46 = vpack.c.bf16 %v7054_v38, %v7054_v38 }
 0x7a6   :  { %7057 = vpow2.f32 %v4148_v31  ;;  %v4101_v19 = vxor.u32 2147516416, %v4099_v21 }
 0x7a7   :  { %v4152_v27 = vunpack.c.l.bf16 %v4150_v46  ;;  %v4089_v46 = vpop.f32.mrf.mxu1 }
 0x7a8   :  { %v4103_v56 = vunpack.c.l.bf16 %v4101_v19 }
 0x7a9   :  { %v4154_v5 = vadd.f32 1.0, %v4152_v27 }
 0x7aa   :  { %v7056_v12 = vpop.eup %7055  ;;  %v4106_v54 = vmul.f32 1.442695, %v4103_v56 }
 0x7ab   :  { %v4108_v1 = vpack.c.bf16 %v7056_v12, %v7056_v12  ;;  %v4156_v14 = vpack.c.bf16 %v4154_v5, %v4154_v5 }
 0x7ac   :  { %v7058_v33 = vpop.eup %7057  ;;  %7059 = vpow2.f32 %v4106_v54 }
 0x7ad   :  { %v4110_v22 = vunpack.c.l.bf16 %v4108_v1  ;;  %v4151_v29 = vpack.c.bf16 %v7058_v33, %v7058_v33  ;;  %v4158_v7 = vunpack.c.h.bf16 %v4156_v14  ;;  %v4159_v45 = vunpack.c.l.bf16 %v4156_v14  ;;  %v4048_v1 = vld [vmem:[#allocation2 + $0x20] sm:$0xf] }
 0x7ae   :  { %v4172_v33 = vadd.f32 %v8088_v47, %v4089_v46 }
 0x7af   :  { %v4112_v9 = vadd.f32 1.0, %v4110_v22  ;;  %v4153_v4 = vunpack.c.l.bf16 %v4151_v29 }
 0x7b1   :  { %v4114_v37 = vpack.c.bf16 %v4112_v9, %v4112_v9  ;;  %v4155_v23 = vadd.f32 1.0, %v4153_v4 }
 0x7b2   :  { %v7060_v17 = vpop.eup %7059 }
 0x7b3   :  { %v4116_v53 = vunpack.c.h.bf16 %v4114_v37  ;;  %v4117_v57 = vunpack.c.l.bf16 %v4114_v37  ;;  %v4109_v8 = vpack.c.bf16 %v7060_v17, %v7060_v17  ;;  %v4157_v2 = vpack.c.bf16 %v4155_v23, %v4155_v23 }
 0x7b4   :  { %v4178_v37 = vunpack.c.l.bf16 %v4048_v1 }
 0x7b5   :  { %7061 = vrcp.f32 %v4116_v53  ;;  %v4111_v11 = vunpack.c.l.bf16 %v4109_v8  ;;  %v4165_v10 = vunpack.c.h.bf16 %v4157_v2  ;;  %v4166_v59 = vunpack.c.l.bf16 %v4157_v2  ;;  %v4091_v2 = vpop.f32.mrf.mxu1 }
 0x7b6   :  { %7063 = vrcp.f32 %v4117_v57 }
 0x7b7   :  { %v4113_v32 = vadd.f32 1.0, %v4111_v11  ;;  %7065 = vrcp.f32 %v4158_v7 }
 0x7b8   :  { %7067 = vrcp.f32 %v4159_v45 }
 0x7b9   :  { %v4115_v50 = vpack.c.bf16 %v4113_v32, %v4113_v32  ;;  %7069 = vrcp.f32 %v4165_v10 }
 0x7bb   :  { %v7062_v0 = vpop.eup %7061  ;;  %v4123_v38 = vunpack.c.h.bf16 %v4115_v50  ;;  %v4124_v31 = vunpack.c.l.bf16 %v4115_v50  ;;  %v4050_v50 = vld [vmem:[#allocation2 + $0x2c] sm:$0xf] }
 0x7bc   :  { %v7064_v21 = vpop.eup %7063  ;;  %v4119_v19 = vmul.f32 %v7062_v0, %v7581_v60  ;;  %v4173_v0 = vadd.f32 %v8088_v47, %v4091_v2  ;;  %v4179_v46 = vunpack.c.l.bf16 %v4050_v50 }
 0x7bd   :  { %v4121_v27 = vmul.f32 %v7064_v21, %v7583_v62  ;;  %7071 = vrcp.f32 %v4123_v38  ;;  %v7066_v56 = vpop.eup %7065 }
 0x7be   :  { %7073 = vrcp.f32 %v4124_v31  ;;  %v7068_v12 = vpop.eup %7067  ;;  %v4161_v29 = vmul.f32 %v7066_v56, %v7581_v60 }
 0x7bf   :  { %v4122_v54 = vpack.c.bf16 %v4119_v19, %v4121_v27  ;;  %7075 = vrcp.f32 %v4166_v59  ;;  %v7070_v22 = vpop.eup %7069  ;;  %v4163_v9 = vmul.f32 %v7068_v12, %v7583_v62 }
 0x7c0   :  { %v4168_v32 = vmul.f32 %v7070_v22, %v7581_v60 }
 0x7c1   :  { %v4174_v5 = vunpack.c.l.bf16 %v4122_v54  ;;  %v4164_v7 = vpack.c.bf16 %v4161_v29, %v4163_v9 }
 0x7c3   :  { %v7072_v4 = vpop.eup %7071  ;;  %v4176_v14 = vmul.f32 %v4174_v5, %v4172_v33  ;;  %v4190_v31 = vunpack.c.l.bf16 %v4164_v7 }
 0x7c4   :  { %v7074_v23 = vpop.eup %7073  ;;  %v4126_v17 = vmul.f32 %v7072_v4, %v7581_v60 }
 0x7c5   :  { %v7076_v53 = vpop.eup %7075  ;;  %v4180_v57 = vadd.f32 %v4178_v37, %v4176_v14  ;;  %v4128_v8 = vmul.f32 %v7074_v23, %v7583_v62  ;;  %v4192_v56 = vsub.f32 1.0, %v4190_v31 }
 0x7c6   :  { %v4170_v10 = vmul.f32 %v7076_v53, %v7583_v62 }
 0x7c7   :  { %v4129_v45 = vpack.c.bf16 %v4126_v17, %v4128_v8  ;;  %v4182_v11 = vpack.c.bf16 %v4180_v57, %v4180_v57  ;;  %v4194_v22 = vpack.c.bf16 %v4192_v56, %v4192_v56 }
 0x7c8   :  { %v4171_v19 = vpack.c.bf16 %v4168_v32, %v4170_v10  ;;  %v4206_v32 = vmul.f32 %v4190_v31, %v8120_v52  ;;  %v4295_v52 = vrot.slane %v8070_v55, 4 }
 0x7c9   :  { %v4175_v59 = vunpack.c.l.bf16 %v4129_v45  ;;  %v4184_v38 = vunpack.c.l.bf16 %v4182_v11  ;;  %v4196_v4 = vunpack.c.l.bf16 %v4194_v22  ;;  %v4258_v22 = vunpack.c.l.bf16 %v8077_v6 }
 0x7ca   :  { %v4191_v54 = vunpack.c.l.bf16 %v4171_v19 }
 0x7cb   :  { %v4177_v21 = vmul.f32 %v4175_v59, %v4173_v0  ;;  %7077 = vtanh.f32 %v4184_v38  ;;  %v4299_v38 = vunpack.c.l.bf16 %v4295_v52 }
 0x7cc   :  { %v4193_v29 = vsub.f32 1.0, %v4191_v54  ;;  %v4207_v10 = vmul.f32 %v4191_v54, %v8122_v34  ;;  %v4257_v34 = vunpack.c.l.bf16 %v8070_v55 }
 0x7cd   :  { %v4181_v27 = vadd.f32 %v4179_v46, %v4177_v21 }
 0x7ce   :  { %v4195_v14 = vpack.c.bf16 %v4193_v29, %v4193_v29 }
 0x7cf   :  { %v4183_v12 = vpack.c.bf16 %v4181_v27, %v4181_v27 }
 0x7d0   :  { %v4197_v53 = vunpack.c.l.bf16 %v4195_v14 }
 0x7d1   :  { %v7078_v1 = vpop.eup %7077  ;;  %v4185_v33 = vunpack.c.l.bf16 %v4183_v12  ;;  %v4296_v12 = vrot.slane %v8077_v6, 4 }
 0x7d2   :  { %v4188_v5 = vpack.c.bf16 %v7078_v1, %v7078_v1 }
 0x7d3   :  { %7079 = vtanh.f32 %v4185_v33  ;;  %v4300_v29 = vunpack.c.l.bf16 %v4296_v12 }
 0x7d4   :  { %v4198_v9 = vunpack.c.l.bf16 %v4188_v5 }
 0x7d6   :  { %v4200_v37 = vmul.f32 %v4198_v9, %v4196_v4 }
 0x7d8   :  { %v4202_v8 = vpack.c.bf16 %v4200_v37, %v4200_v37 }
 0x7d9   :  { %v7080_v23 = vpop.eup %7079 }
 0x7da   :  { %v4189_v17 = vpack.c.bf16 %v7080_v23, %v7080_v23  ;;  %v4204_v45 = vunpack.c.l.bf16 %v4202_v8 }
 0x7dc   :  { %v4199_v57 = vunpack.c.l.bf16 %v4189_v17  ;;  %v8179_v50 = vadd.f32 %v4206_v32, %v4204_v45 }
 0x7de   :  { %v4201_v7 = vmul.f32 %v4199_v57, %v4197_v53 }
 0x7e0   :  { %v4203_v2 = vpack.c.bf16 %v4201_v7, %v4201_v7 }
 0x7e2   :  { %v4205_v11 = vunpack.c.l.bf16 %v4203_v2 }
 0x7e4   :  { %v8181_v0 = vadd.f32 %v4207_v10, %v4205_v11 }
 0x7e6   :  { %v4214_v59 = vpack.c.bf16 %v8181_v0, %v8179_v50 }
 0x7e8   :  { %4223 = vmatmul.bf16.vlgmr.msrb.gmra.mxu2 %v4214_v59  ;;  %4237 = vmatmul.bf16.vlgmr.msrb.gmra.mxu3 %v4214_v59 }
 0x7e9   :  { %4251 = vmatmul.bf16.vlgmr.msra.gmra.mxu0 %v4214_v59  ;;  %4569 = vmatpush.bf16.msrb.mxu2 %v7892_v44 }
 0x7ea   :  { %4704 = vmatpush.bf16.msrb.mxu3 %v7810_v48  ;;  %4718 = vmatpush.bf16.msra.mxu0 %v7851_v24 }
 0x7ed   :  { %4570 = vmatpush.bf16.msrb.mxu2 %v7896_v16 }
 0x7ee   :  { %4705 = vmatpush.bf16.msrb.mxu3 %v7813_v13  ;;  %4719 = vmatpush.bf16.msra.mxu0 %v7857_v42 }
 0x7f1   :  { %4571 = vmatpush.bf16.msrb.mxu2 %v7905_v28 }
 0x7f2   :  { %4706 = vmatpush.bf16.msrb.mxu3 %v7816_v20  ;;  %4720 = vmatpush.bf16.msra.mxu0 %v7861_v58 }
 0x7f5   :  { %4572 = vmatpush.bf16.msrb.mxu2 %v7911_v30 }
 0x7f6   :  { %4707 = vmatpush.bf16.msrb.mxu3 %v7819_v41  ;;  %4721 = vmatpush.bf16.msra.mxu0 %v7864_v18 }
 0x7f9   :  { %4573 = vmatpush.bf16.msrb.mxu2 %v7917_v35 }
 0x7fa   :  { %4708 = vmatpush.bf16.msrb.mxu3 %v7825_v61  ;;  %4722 = vmatpush.bf16.msra.mxu0 %v7867_v43 }
 0x7fd   :  { %4574 = vmatpush.bf16.msrb.mxu2 %v7926_v39 }
 0x7fe   :  { %4709 = vmatpush.bf16.msrb.mxu3 %v7835_v36  ;;  %4723 = vmatpush.bf16.msra.mxu0 %v7874_v3 }
 0x801   :  { %4575 = vmatpush.bf16.msrb.mxu2 %v7932_v25 }
 0x802   :  { %4710 = vmatpush.bf16.msrb.mxu3 %v7844_v63  ;;  %4724 = vmatpush.bf16.msra.mxu0 %v7883_v49 }
 0x805   :  { %4576 = vmatpush.bf16.msrb.mxu2 %v7938_v51 }
 0x806   :  { %4711 = vmatpush.bf16.msrb.mxu3 %v7848_v15  ;;  %4725 = vmatpush.bf16.msra.mxu0 %v7890_v40 }
 0x86b   :  { %v4224_v31 = vpop.f32.mrf.mxu2  ;;  %v4238_v21 = vpop.f32.mrf.mxu3 }
 0x86c   :  { %v4259_v46 = vadd.f32 %v4257_v34, %v4224_v31  ;;  %v4301_v19 = vadd.f32 %v4299_v38, %v4238_v21 }
 0x86e   :  { %v4261_v27 = vpack.c.bf16 %v4259_v46, %v4259_v46  ;;  %v4303_v56 = vpack.c.bf16 %v4301_v19, %v4301_v19 }
 0x870   :  { %v4263_v54 = vxor.u32 2147516416, %v4261_v27  ;;  %v4305_v1 = vxor.u32 2147516416, %v4303_v56 }
 0x872   :  { %v4265_v33 = vunpack.c.l.bf16 %v4263_v54  ;;  %v4307_v5 = vunpack.c.l.bf16 %v4305_v1 }
 0x873   :  { %v4226_v9 = vpop.f32.mrf.mxu2  ;;  %v4240_v4 = vpop.f32.mrf.mxu3 }
 0x874   :  { %v4267_v14 = vmul.f32 1.442695, %v4265_v33  ;;  %v4309_v55 = vmul.f32 1.442695, %v4307_v5  ;;  %v4260_v37 = vadd.f32 %v4258_v22, %v4226_v9  ;;  %v4302_v23 = vadd.f32 %v4300_v29, %v4240_v4 }
 0x876   :  { %7081 = vpow2.f32 %v4267_v14  ;;  %v4262_v17 = vpack.c.bf16 %v4260_v37, %v4260_v37  ;;  %v4304_v53 = vpack.c.bf16 %v4302_v23, %v4302_v23 }
 0x877   :  { %7083 = vpow2.f32 %v4309_v55 }
 0x878   :  { %v4264_v57 = vxor.u32 2147516416, %v4262_v17  ;;  %v4306_v8 = vxor.u32 2147516416, %v4304_v53 }
 0x87a   :  { %v4266_v7 = vunpack.c.l.bf16 %v4264_v57  ;;  %v4308_v2 = vunpack.c.l.bf16 %v4306_v8  ;;  %v4252_v57 = vpop.f32.mrf.mxu0 }
 0x87c   :  { %v7082_v45 = vpop.eup %7081  ;;  %v4269_v11 = vmul.f32 1.442695, %v4266_v7  ;;  %v4311_v32 = vmul.f32 1.442695, %v4308_v2 }
 0x87d   :  { %v7084_v10 = vpop.eup %7083  ;;  %v4271_v6 = vpack.c.bf16 %v7082_v45, %v7082_v45 }
 0x87e   :  { %v4313_v59 = vpack.c.bf16 %v7084_v10, %v7084_v10  ;;  %7085 = vpow2.f32 %v4269_v11 }
 0x87f   :  { %v4273_v52 = vunpack.c.l.bf16 %v4271_v6  ;;  %7087 = vpow2.f32 %v4311_v32  ;;  %v4211_v6 = vld [vmem:[#allocation2 + $0x38] sm:$0xf] }
 0x880   :  { %v4315_v34 = vunpack.c.l.bf16 %v4313_v59  ;;  %v4335_v59 = vadd.f32 %v8088_v47, %v4252_v57 }
 0x881   :  { %v4275_v38 = vadd.f32 1.0, %v4273_v52 }
 0x882   :  { %v4317_v31 = vadd.f32 1.0, %v4315_v34 }
 0x883   :  { %v4277_v21 = vpack.c.bf16 %v4275_v38, %v4275_v38 }
 0x884   :  { %v7086_v46 = vpop.eup %7085  ;;  %v4319_v19 = vpack.c.bf16 %v4317_v31, %v4317_v31 }
 0x885   :  { %v7088_v27 = vpop.eup %7087  ;;  %v4279_v56 = vunpack.c.h.bf16 %v4277_v21  ;;  %v4280_v12 = vunpack.c.l.bf16 %v4277_v21  ;;  %v4272_v54 = vpack.c.bf16 %v7086_v46, %v7086_v46  ;;  %v4341_v46 = vunpack.c.l.bf16 %v4211_v6 }
 0x886   :  { %v4321_v1 = vunpack.c.h.bf16 %v4319_v19  ;;  %v4314_v33 = vpack.c.bf16 %v7088_v27, %v7088_v27  ;;  %v4322_v5 = vunpack.c.l.bf16 %v4319_v19 }
 0x887   :  { %7089 = vrcp.f32 %v4279_v56  ;;  %v4274_v22 = vunpack.c.l.bf16 %v4272_v54 }
 0x888   :  { %7091 = vrcp.f32 %v4280_v12  ;;  %v4316_v29 = vunpack.c.l.bf16 %v4314_v33 }
 0x889   :  { %v4276_v9 = vadd.f32 1.0, %v4274_v22  ;;  %7093 = vrcp.f32 %v4321_v1 }
 0x88a   :  { %v4318_v4 = vadd.f32 1.0, %v4316_v29  ;;  %7095 = vrcp.f32 %v4322_v5  ;;  %v4254_v5 = vpop.f32.mrf.mxu0 }
 0x88b   :  { %v4278_v14 = vpack.c.bf16 %v4276_v9, %v4276_v9  ;;  %v4213_v9 = vld [vmem:[#allocation2 + $0x44] sm:$0xf] }
 0x88c   :  { %v4320_v55 = vpack.c.bf16 %v4318_v4, %v4318_v4  ;;  %v4342_v57 = vunpack.c.l.bf16 %v4213_v9 }
 0x88d   :  { %v7090_v37 = vpop.eup %7089  ;;  %v4286_v23 = vunpack.c.h.bf16 %v4278_v14  ;;  %v4287_v17 = vunpack.c.l.bf16 %v4278_v14 }
 0x88e   :  { %v7092_v53 = vpop.eup %7091  ;;  %v4282_v8 = vmul.f32 %v7090_v37, %v7581_v60  ;;  %v4328_v7 = vunpack.c.h.bf16 %v4320_v55  ;;  %v4329_v2 = vunpack.c.l.bf16 %v4320_v55  ;;  %v4336_v55 = vadd.f32 %v8088_v47, %v4254_v5 }
 0x88f   :  { %v4284_v45 = vmul.f32 %v7092_v53, %v7583_v62  ;;  %7097 = vrcp.f32 %v4286_v23  ;;  %v7094_v11 = vpop.eup %7093 }
 0x890   :  { %7099 = vrcp.f32 %v4287_v17  ;;  %v7096_v32 = vpop.eup %7095  ;;  %v4324_v34 = vmul.f32 %v7094_v11, %v7581_v60 }
 0x891   :  { %v4285_v10 = vpack.c.bf16 %v4282_v8, %v4284_v45  ;;  %7101 = vrcp.f32 %v4328_v7  ;;  %v4326_v38 = vmul.f32 %v7096_v32, %v7583_v62 }
 0x892   :  { %7103 = vrcp.f32 %v4329_v2 }
 0x893   :  { %v4337_v52 = vunpack.c.l.bf16 %v4285_v10  ;;  %v4327_v33 = vpack.c.bf16 %v4324_v34, %v4326_v38 }
 0x895   :  { %v7098_v31 = vpop.eup %7097  ;;  %v4339_v21 = vmul.f32 %v4337_v52, %v4335_v59  ;;  %v4353_v17 = vunpack.c.l.bf16 %v4327_v33 }
 0x896   :  { %v7100_v19 = vpop.eup %7099  ;;  %v4289_v27 = vmul.f32 %v7098_v31, %v7581_v60 }
 0x897   :  { %v7102_v56 = vpop.eup %7101  ;;  %v4343_v12 = vadd.f32 %v4341_v46, %v4339_v21  ;;  %v4291_v54 = vmul.f32 %v7100_v19, %v7583_v62  ;;  %v4355_v2 = vsub.f32 1.0, %v4353_v17  ;;  %v4369_v5 = vmul.f32 %v4353_v17, %v8179_v50  ;;  %v7252_v50 = vld [vmem:[#allocation2 + $0x48] sm:$0xff] }
 0x898   :  { %v7104_v1 = vpop.eup %7103  ;;  %v4331_v4 = vmul.f32 %v7102_v56, %v7581_v60 }
 0x899   :  { %v4292_v22 = vpack.c.bf16 %v4289_v27, %v4291_v54  ;;  %v4345_v29 = vpack.c.bf16 %v4343_v12, %v4343_v12  ;;  %v4333_v14 = vmul.f32 %v7104_v1, %v7583_v62  ;;  %v4357_v59 = vpack.c.bf16 %v4355_v2, %v4355_v2 }
 0x89a   :  { %v4421_v2 = vunpack.c.l.bf16 %v8101_v26 }
 0x89b   :  { %v4338_v37 = vunpack.c.l.bf16 %v4292_v22  ;;  %v4347_v23 = vunpack.c.l.bf16 %v4345_v29  ;;  %v4334_v8 = vpack.c.bf16 %v4331_v4, %v4333_v14  ;;  %v4359_v38 = vunpack.c.l.bf16 %v4357_v59 }
 0x89d   :  { %v4340_v53 = vmul.f32 %v4338_v37, %v4336_v55  ;;  %7105 = vtanh.f32 %v4347_v23  ;;  %v4354_v11 = vunpack.c.l.bf16 %v4334_v8  ;;  %v4458_v37 = vrot.slane %v7252_v50, 4 }
 0x89f   :  { %v4344_v7 = vadd.f32 %v4342_v57, %v4340_v53  ;;  %v4356_v52 = vsub.f32 1.0, %v4354_v11  ;;  %v4370_v22 = vmul.f32 %v4354_v11, %v8181_v0  ;;  %v4420_v0 = vunpack.c.l.bf16 %v7252_v50 }
 0x8a0   :  { %v4462_v53 = vunpack.c.l.bf16 %v4458_v37 }
 0x8a1   :  { %v4346_v45 = vpack.c.bf16 %v4344_v7, %v4344_v7  ;;  %v4358_v47 = vpack.c.bf16 %v4356_v52, %v4356_v52 }
 0x8a3   :  { %v7106_v32 = vpop.eup %7105  ;;  %v4348_v10 = vunpack.c.l.bf16 %v4346_v45  ;;  %v4360_v19 = vunpack.c.l.bf16 %v4358_v47 }
 0x8a4   :  { %v4351_v6 = vpack.c.bf16 %v7106_v32, %v7106_v32 }
 0x8a5   :  { %7107 = vtanh.f32 %v4348_v10 }
 0x8a6   :  { %v4361_v34 = vunpack.c.l.bf16 %v4351_v6  ;;  %v4459_v6 = vrot.slane %v8101_v26, 4 }
 0x8a8   :  { %v4363_v31 = vmul.f32 %v4361_v34, %v4359_v38  ;;  %v4463_v47 = vunpack.c.l.bf16 %v4459_v6 }
 0x8aa   :  { %v4365_v56 = vpack.c.bf16 %v4363_v31, %v4363_v31 }
 0x8ab   :  { %v7108_v21 = vpop.eup %7107 }
 0x8ac   :  { %v4352_v46 = vpack.c.bf16 %v7108_v21, %v7108_v21  ;;  %v4367_v1 = vunpack.c.l.bf16 %v4365_v56 }
 0x8ae   :  { %v4362_v27 = vunpack.c.l.bf16 %v4352_v46  ;;  %v8225_v29 = vadd.f32 %v4369_v5, %v4367_v1 }
 0x8b0   :  { %v4364_v12 = vmul.f32 %v4362_v27, %v4360_v19 }
 0x8b2   :  { %v4366_v54 = vpack.c.bf16 %v4364_v12, %v4364_v12 }
 0x8b4   :  { %v4368_v33 = vunpack.c.l.bf16 %v4366_v54 }
 0x8b6   :  { %v8227_v9 = vadd.f32 %v4370_v22, %v4368_v33 }
 0x8b8   :  { %v4377_v4 = vpack.c.bf16 %v8227_v9, %v8225_v29 }
 0x8ba   :  { %4386 = vmatmul.bf16.vlgmr.msra.gmra.mxu1 %v4377_v4  ;;  %4400 = vmatmul.bf16.vlgmr.msra.gmra.mxu2 %v4377_v4 }
 0x8bb   :  { %4414 = vmatmul.bf16.vlgmr.msra.gmra.mxu3 %v4377_v4  ;;  %4732 = vmatpush.bf16.msra.mxu1 %v7892_v44 }
 0x8bc   :  { %4867 = vmatpush.bf16.msra.mxu2 %v7810_v48  ;;  %4881 = vmatpush.bf16.msra.mxu3 %v7851_v24 }
 0x8bf   :  { %4733 = vmatpush.bf16.msra.mxu1 %v7896_v16 }
 0x8c0   :  { %4868 = vmatpush.bf16.msra.mxu2 %v7813_v13  ;;  %4882 = vmatpush.bf16.msra.mxu3 %v7857_v42 }
 0x8c3   :  { %4734 = vmatpush.bf16.msra.mxu1 %v7905_v28 }
 0x8c4   :  { %4869 = vmatpush.bf16.msra.mxu2 %v7816_v20  ;;  %4883 = vmatpush.bf16.msra.mxu3 %v7861_v58 }
 0x8c7   :  { %4735 = vmatpush.bf16.msra.mxu1 %v7911_v30 }
 0x8c8   :  { %4870 = vmatpush.bf16.msra.mxu2 %v7819_v41  ;;  %4884 = vmatpush.bf16.msra.mxu3 %v7864_v18 }
 0x8cb   :  { %4736 = vmatpush.bf16.msra.mxu1 %v7917_v35 }
 0x8cc   :  { %4871 = vmatpush.bf16.msra.mxu2 %v7825_v61  ;;  %4885 = vmatpush.bf16.msra.mxu3 %v7867_v43 }
 0x8cf   :  { %4737 = vmatpush.bf16.msra.mxu1 %v7926_v39 }
 0x8d0   :  { %4872 = vmatpush.bf16.msra.mxu2 %v7835_v36  ;;  %4886 = vmatpush.bf16.msra.mxu3 %v7874_v3 }
 0x8d3   :  { %4738 = vmatpush.bf16.msra.mxu1 %v7932_v25 }
 0x8d4   :  { %4873 = vmatpush.bf16.msra.mxu2 %v7844_v63  ;;  %4887 = vmatpush.bf16.msra.mxu3 %v7883_v49 }
 0x8d7   :  { %4739 = vmatpush.bf16.msra.mxu1 %v7938_v51 }
 0x8d8   :  { %4874 = vmatpush.bf16.msra.mxu2 %v7848_v15  ;;  %4888 = vmatpush.bf16.msra.mxu3 %v7890_v40 }
 0x937   :  { %v4387_v14 = vpop.f32.mrf.mxu1 }
 0x938   :  { %v4422_v55 = vadd.f32 %v4420_v0, %v4387_v14 }
 0x93a   :  { %v4424_v23 = vpack.c.bf16 %v4422_v55, %v4422_v55 }
 0x93c   :  { %v4426_v17 = vxor.u32 2147516416, %v4424_v23 }
 0x93d   :  { %v4401_v57 = vpop.f32.mrf.mxu2 }
 0x93e   :  { %v4428_v8 = vunpack.c.l.bf16 %v4426_v17  ;;  %v4464_v7 = vadd.f32 %v4462_v53, %v4401_v57 }
 0x93f   :  { %v4389_v45 = vpop.f32.mrf.mxu1 }
 0x940   :  { %v4430_v11 = vmul.f32 1.442695, %v4428_v8  ;;  %v4466_v32 = vpack.c.bf16 %v4464_v7, %v4464_v7  ;;  %v4423_v10 = vadd.f32 %v4421_v2, %v4389_v45 }
 0x942   :  { %7109 = vpow2.f32 %v4430_v11  ;;  %v4468_v59 = vxor.u32 2147516416, %v4466_v32  ;;  %v4425_v52 = vpack.c.bf16 %v4423_v10, %v4423_v10 }
 0x944   :  { %v4470_v34 = vunpack.c.l.bf16 %v4468_v59  ;;  %v4427_v38 = vxor.u32 2147516416, %v4425_v52 }
 0x945   :  { %v4403_v31 = vpop.f32.mrf.mxu2 }
 0x946   :  { %v4472_v21 = vmul.f32 1.442695, %v4470_v34  ;;  %v4429_v46 = vunpack.c.l.bf16 %v4427_v38  ;;  %v4465_v19 = vadd.f32 %v4463_v47, %v4403_v31  ;;  %v4415_v47 = vpop.f32.mrf.mxu3 }
 0x948   :  { %v7110_v27 = vpop.eup %7109  ;;  %7111 = vpow2.f32 %v4472_v21  ;;  %v4432_v56 = vmul.f32 1.442695, %v4429_v46  ;;  %v4467_v12 = vpack.c.bf16 %v4465_v19, %v4465_v19 }
 0x949   :  { %v4434_v54 = vpack.c.bf16 %v7110_v27, %v7110_v27 }
 0x94a   :  { %7113 = vpow2.f32 %v4432_v56  ;;  %v4469_v1 = vxor.u32 2147516416, %v4467_v12  ;;  %v4374_v56 = vld [vmem:[#allocation2 + $0x50] sm:$0xf] }
 0x94b   :  { %v4436_v33 = vunpack.c.l.bf16 %v4434_v54  ;;  %v8262_v54 = vld [vmem:[%s8393_s8] ss:$0 sm:$0xff] }
 0x94c   :  { %v4471_v5 = vunpack.c.l.bf16 %v4469_v1  ;;  %v4498_v1 = vadd.f32 %v8262_v54, %v4415_v47 }
 0x94d   :  { %v4438_v26 = vadd.f32 1.0, %v4436_v33 }
 0x94e   :  { %v7112_v22 = vpop.eup %7111  ;;  %v4474_v4 = vmul.f32 1.442695, %v4471_v5 }
 0x94f   :  { %v4440_v50 = vpack.c.bf16 %v4438_v26, %v4438_v26  ;;  %v4476_v0 = vpack.c.bf16 %v7112_v22, %v7112_v22 }
 0x950   :  { %v7114_v14 = vpop.eup %7113  ;;  %7115 = vpow2.f32 %v4474_v4 }
 0x951   :  { %v4442_v55 = vunpack.c.h.bf16 %v4440_v50  ;;  %v4443_v37 = vunpack.c.l.bf16 %v4440_v50  ;;  %v4478_v23 = vunpack.c.l.bf16 %v4476_v0  ;;  %v4435_v17 = vpack.c.bf16 %v7114_v14, %v7114_v14 }
 0x953   :  { %7117 = vrcp.f32 %v4442_v55  ;;  %v4480_v53 = vadd.f32 1.0, %v4478_v23  ;;  %v4437_v57 = vunpack.c.l.bf16 %v4435_v17  ;;  %v4504_v55 = vunpack.c.l.bf16 %v4374_v56 }
 0x954   :  { %7119 = vrcp.f32 %v4443_v37 }
 0x955   :  { %v4482_v8 = vpack.c.bf16 %v4480_v53, %v4480_v53  ;;  %v4439_v7 = vadd.f32 1.0, %v4437_v57 }
 0x956   :  { %v7116_v2 = vpop.eup %7115 }
 0x957   :  { %v4484_v45 = vunpack.c.h.bf16 %v4482_v8  ;;  %v4485_v11 = vunpack.c.l.bf16 %v4482_v8  ;;  %v4441_v32 = vpack.c.bf16 %v4439_v7, %v4439_v7  ;;  %v4477_v10 = vpack.c.bf16 %v7116_v2, %v7116_v2  ;;  %v4417_v8 = vpop.f32.mrf.mxu3 }
 0x959   :  { %v7118_v6 = vpop.eup %7117  ;;  %7121 = vrcp.f32 %v4484_v45  ;;  %v4449_v59 = vunpack.c.h.bf16 %v4441_v32  ;;  %v4450_v52 = vunpack.c.l.bf16 %v4441_v32  ;;  %v4479_v34 = vunpack.c.l.bf16 %v4477_v10  ;;  %v4376_v45 = vld [vmem:[#allocation2 + $0x5c] sm:$0xf] }
 0x95a   :  { %v7120_v38 = vpop.eup %7119  ;;  %7123 = vrcp.f32 %v4485_v11  ;;  %v4445_v31 = vmul.f32 %v7118_v6, %v7581_v60  ;;  %v4499_v10 = vadd.f32 %v8262_v54, %v4417_v8 }
 0x95b   :  { %v4447_v21 = vmul.f32 %v7120_v38, %v7583_v62  ;;  %7125 = vrcp.f32 %v4449_v59  ;;  %v4481_v46 = vadd.f32 1.0, %v4479_v34 }
 0x95c   :  { %7127 = vrcp.f32 %v4450_v52 }
 0x95d   :  { %v4448_v19 = vpack.c.bf16 %v4445_v31, %v4447_v21  ;;  %v4483_v27 = vpack.c.bf16 %v4481_v46, %v4481_v46  ;;  %v4505_v31 = vunpack.c.l.bf16 %v4376_v45 }
 0x95f   :  { %v7122_v12 = vpop.eup %7121  ;;  %v4500_v33 = vunpack.c.l.bf16 %v4448_v19  ;;  %v4491_v5 = vunpack.c.h.bf16 %v4483_v27  ;;  %v4492_v26 = vunpack.c.l.bf16 %v4483_v27 }
 0x960   :  { %v7124_v22 = vpop.eup %7123  ;;  %v4487_v4 = vmul.f32 %v7122_v12, %v7581_v60 }
 0x961   :  { %v7126_v50 = vpop.eup %7125  ;;  %v4489_v0 = vmul.f32 %v7124_v22, %v7583_v62  ;;  %v4502_v14 = vmul.f32 %v4500_v33, %v4498_v1  ;;  %7129 = vrcp.f32 %v4491_v5 }
 0x962   :  { %v7128_v37 = vpop.eup %7127  ;;  %7131 = vrcp.f32 %v4492_v26  ;;  %v4452_v23 = vmul.f32 %v7126_v50, %v7581_v60 }
 0x963   :  { %v4506_v17 = vadd.f32 %v4504_v55, %v4502_v14  ;;  %v4454_v53 = vmul.f32 %v7128_v37, %v7583_v62  ;;  %v4490_v57 = vpack.c.bf16 %v4487_v4, %v4489_v0 }
 0x965   :  { %v4508_v7 = vpack.c.bf16 %v4506_v17, %v4506_v17  ;;  %v4455_v2 = vpack.c.bf16 %v4452_v23, %v4454_v53  ;;  %v4516_v52 = vunpack.c.l.bf16 %v4490_v57 }
 0x967   :  { %v7130_v11 = vpop.eup %7129  ;;  %v4510_v32 = vunpack.c.l.bf16 %v4508_v7  ;;  %v4501_v6 = vunpack.c.l.bf16 %v4455_v2  ;;  %v4518_v19 = vsub.f32 1.0, %v4516_v52  ;;  %v4532_v7 = vmul.f32 %v4516_v52, %v8225_v29 }
 0x968   :  { %v7132_v59 = vpop.eup %7131  ;;  %v4494_v34 = vmul.f32 %v7130_v11, %v7581_v60 }
 0x969   :  { %7133 = vtanh.f32 %v4510_v32  ;;  %v4496_v38 = vmul.f32 %v7132_v59, %v7583_v62  ;;  %v4503_v47 = vmul.f32 %v4501_v6, %v4499_v10  ;;  %v4520_v5 = vpack.c.bf16 %v4518_v19, %v4518_v19 }
 0x96b   :  { %v4497_v21 = vpack.c.bf16 %v4494_v34, %v4496_v38  ;;  %v4507_v46 = vadd.f32 %v4505_v31, %v4503_v47  ;;  %v4522_v4 = vunpack.c.l.bf16 %v4520_v5 }
 0x96d   :  { %v4509_v27 = vpack.c.bf16 %v4507_v46, %v4507_v46  ;;  %v4517_v56 = vunpack.c.l.bf16 %v4497_v21 }
 0x96f   :  { %v7134_v12 = vpop.eup %7133  ;;  %v4511_v1 = vunpack.c.l.bf16 %v4509_v27  ;;  %v4519_v22 = vsub.f32 1.0, %v4517_v56  ;;  %v4533_v45 = vmul.f32 %v4517_v56, %v8227_v9 }
 0x970   :  { %v4514_v33 = vpack.c.bf16 %v7134_v12, %v7134_v12 }
 0x971   :  { %7135 = vtanh.f32 %v4511_v1  ;;  %v4521_v0 = vpack.c.bf16 %v4519_v22, %v4519_v22 }
 0x972   :  { %v4524_v26 = vunpack.c.l.bf16 %v4514_v33 }
 0x973   :  { %v4523_v23 = vunpack.c.l.bf16 %v4521_v0 }
 0x974   :  { %v4526_v50 = vmul.f32 %v4524_v26, %v4522_v4 }
 0x976   :  { %v4528_v37 = vpack.c.bf16 %v4526_v50, %v4526_v50 }
 0x977   :  { %v7136_v14 = vpop.eup %7135 }
 0x978   :  { %v4515_v55 = vpack.c.bf16 %v7136_v14, %v7136_v14  ;;  %v4530_v57 = vunpack.c.l.bf16 %v4528_v37 }
 0x97a   :  { %v4525_v17 = vunpack.c.l.bf16 %v4515_v55  ;;  %v8274_v11 = vadd.f32 %v4532_v7, %v4530_v57 }
 0x97c   :  { %v4527_v53 = vmul.f32 %v4525_v17, %v4523_v23 }
 0x97e   :  { %v4529_v8 = vpack.c.bf16 %v4527_v53, %v4527_v53 }
 0x980   :  { %v4531_v2 = vunpack.c.l.bf16 %v4529_v8 }
 0x982   :  { %v8276_v32 = vadd.f32 %v4533_v45, %v4531_v2 }
 0x984   :  { %v4540_v10 = vpack.c.bf16 %v8276_v32, %v8274_v11 }
 0x986   :  { %4549 = vmatmul.bf16.vlgmr.msrb.gmra.mxu0 %v4540_v10  ;;  %4563 = vmatmul.bf16.vlgmr.msrb.gmra.mxu1 %v4540_v10 }
 0x987   :  { %4577 = vmatmul.bf16.vlgmr.msrb.gmra.mxu2 %v4540_v10  ;;  %4895 = vmatpush.bf16.msrb.mxu0 %v7892_v44 }
 0x988   :  { %5030 = vmatpush.bf16.msrb.mxu1 %v7810_v48  ;;  %5044 = vmatpush.bf16.msrb.mxu2 %v7851_v24  ;;  %v4536_v48 = vld [vmem:[#allocation2 + $0x60] sm:$0xff]  ;;  %v4538_v24 = vld [vmem:[#allocation2 + $0x6c] sm:$0xff] }
 0x989   :  { %v4584_v6 = vunpack.c.l.bf16 %v4538_v24 }
 0x98b   :  { %4896 = vmatpush.bf16.msrb.mxu0 %v7896_v16 }
 0x98c   :  { %5031 = vmatpush.bf16.msrb.mxu1 %v7813_v13  ;;  %5045 = vmatpush.bf16.msrb.mxu2 %v7857_v42  ;;  %v4621_v13 = vrot.slane %v4536_v48, 4 }
 0x98f   :  { %4897 = vmatpush.bf16.msrb.mxu0 %v7905_v28 }
 0x990   :  { %5032 = vmatpush.bf16.msrb.mxu1 %v7816_v20  ;;  %5046 = vmatpush.bf16.msrb.mxu2 %v7861_v58  ;;  %v4583_v20 = vunpack.c.l.bf16 %v4536_v48 }
 0x993   :  { %4898 = vmatpush.bf16.msrb.mxu0 %v7911_v30 }
 0x994   :  { %5033 = vmatpush.bf16.msrb.mxu1 %v7819_v41  ;;  %5047 = vmatpush.bf16.msrb.mxu2 %v7864_v18  ;;  %v4625_v41 = vunpack.c.l.bf16 %v4621_v13 }
 0x997   :  { %4899 = vmatpush.bf16.msrb.mxu0 %v7917_v35 }
 0x998   :  { %5034 = vmatpush.bf16.msrb.mxu1 %v7825_v61  ;;  %5048 = vmatpush.bf16.msrb.mxu2 %v7867_v43 }
 0x99b   :  { %4900 = vmatpush.bf16.msrb.mxu0 %v7926_v39 }
 0x99c   :  { %5035 = vmatpush.bf16.msrb.mxu1 %v7835_v36  ;;  %5049 = vmatpush.bf16.msrb.mxu2 %v7874_v3 }
 0x99f   :  { %4901 = vmatpush.bf16.msrb.mxu0 %v7932_v25 }
 0x9a0   :  { %5036 = vmatpush.bf16.msrb.mxu1 %v7844_v63  ;;  %5050 = vmatpush.bf16.msrb.mxu2 %v7883_v49  ;;  %v4622_v63 = vrot.slane %v4538_v24, 4 }
 0x9a3   :  { %4902 = vmatpush.bf16.msrb.mxu0 %v7938_v51 }
 0x9a4   :  { %5037 = vmatpush.bf16.msrb.mxu1 %v7848_v15  ;;  %5051 = vmatpush.bf16.msrb.mxu2 %v7890_v40  ;;  %v4626_v15 = vunpack.c.l.bf16 %v4622_v63 }
 0xa03   :  { %v4550_v61 = vpop.f32.mrf.mxu0  ;;  %v4564_v36 = vpop.f32.mrf.mxu1 }
 0xa04   :  { %v4585_v42 = vadd.f32 %v4583_v20, %v4550_v61  ;;  %v4627_v58 = vadd.f32 %v4625_v41, %v4564_v36 }
 0xa06   :  { %v4587_v18 = vpack.c.bf16 %v4585_v42, %v4585_v42  ;;  %v4629_v43 = vpack.c.bf16 %v4627_v58, %v4627_v58 }
 0xa08   :  { %v4589_v3 = vxor.u32 2147516416, %v4587_v18  ;;  %v4631_v49 = vxor.u32 2147516416, %v4629_v43 }
 0xa0a   :  { %v4591_v29 = vunpack.c.l.bf16 %v4589_v3  ;;  %v4633_v9 = vunpack.c.l.bf16 %v4631_v49  ;;  %v4578_v18 = vpop.f32.mrf.mxu2 }
 0xa0b   :  { %v4552_v59 = vpop.f32.mrf.mxu0  ;;  %v4566_v40 = vpop.f32.mrf.mxu1 }
 0xa0c   :  { %v4593_v52 = vmul.f32 1.442695, %v4591_v29  ;;  %v4635_v34 = vmul.f32 1.442695, %v4633_v9  ;;  %v4586_v38 = vadd.f32 %v4584_v6, %v4552_v59  ;;  %v4628_v47 = vadd.f32 %v4626_v15, %v4566_v40  ;;  %v4537_v15 = vld [vmem:[#allocation2 + $0x68] sm:$0xf] }
 0xa0d   :  { %v4661_v59 = vadd.f32 %v8262_v54, %v4578_v18 }
 0xa0e   :  { %7137 = vpow2.f32 %v4593_v52  ;;  %v4588_v31 = vpack.c.bf16 %v4586_v38, %v4586_v38  ;;  %v4630_v21 = vpack.c.bf16 %v4628_v47, %v4628_v47 }
 0xa0f   :  { %7139 = vpow2.f32 %v4635_v34 }
 0xa10   :  { %v4590_v46 = vxor.u32 2147516416, %v4588_v31  ;;  %v4632_v19 = vxor.u32 2147516416, %v4630_v21  ;;  %v4667_v31 = vunpack.c.l.bf16 %v4537_v15 }
 0xa12   :  { %v4592_v27 = vunpack.c.l.bf16 %v4590_v46  ;;  %v4634_v56 = vunpack.c.l.bf16 %v4632_v19 }
 0xa14   :  { %v7138_v12 = vpop.eup %7137  ;;  %v4595_v1 = vmul.f32 1.442695, %v4592_v27  ;;  %v4637_v33 = vmul.f32 1.442695, %v4634_v56 }
 0xa15   :  { %v7140_v5 = vpop.eup %7139  ;;  %v4597_v26 = vpack.c.bf16 %v7138_v12, %v7138_v12 }
 0xa16   :  { %v4639_v22 = vpack.c.bf16 %v7140_v5, %v7140_v5  ;;  %7141 = vpow2.f32 %v4595_v1 }
 0xa17   :  { %v4599_v4 = vunpack.c.l.bf16 %v4597_v26  ;;  %7143 = vpow2.f32 %v4637_v33  ;;  %v4580_v33 = vpop.f32.mrf.mxu2 }
 0xa18   :  { %v4641_v50 = vunpack.c.l.bf16 %v4639_v22 }
 0xa19   :  { %v4601_v0 = vadd.f32 1.0, %v4599_v4 }
 0xa1a   :  { %v4643_v14 = vadd.f32 1.0, %v4641_v50  ;;  %v4539_v50 = vld [vmem:[#allocation2 + $0x74] sm:$0xf] }
 0xa1b   :  { %v4603_v55 = vpack.c.bf16 %v4601_v0, %v4601_v0 }
 0xa1c   :  { %v7142_v37 = vpop.eup %7141  ;;  %v4645_v23 = vpack.c.bf16 %v4643_v14, %v4643_v14  ;;  %v4662_v14 = vadd.f32 %v8262_v54, %v4580_v33 }
 0xa1d   :  { %v7144_v17 = vpop.eup %7143  ;;  %v4605_v53 = vunpack.c.h.bf16 %v4603_v55  ;;  %v4606_v57 = vunpack.c.l.bf16 %v4603_v55  ;;  %v4598_v8 = vpack.c.bf16 %v7142_v37, %v7142_v37 }
 0xa1e   :  { %v4647_v7 = vunpack.c.h.bf16 %v4645_v23  ;;  %v4640_v2 = vpack.c.bf16 %v7144_v17, %v7144_v17  ;;  %v4648_v45 = vunpack.c.l.bf16 %v4645_v23  ;;  %v4668_v17 = vunpack.c.l.bf16 %v4539_v50 }
 0xa1f   :  { %7145 = vrcp.f32 %v4605_v53  ;;  %v4600_v10 = vunpack.c.l.bf16 %v4598_v8 }
 0xa20   :  { %7147 = vrcp.f32 %v4606_v57  ;;  %v4642_v48 = vunpack.c.l.bf16 %v4640_v2 }
 0xa21   :  { %v4602_v13 = vadd.f32 1.0, %v4600_v10  ;;  %7149 = vrcp.f32 %v4647_v7 }
 0xa22   :  { %v4644_v20 = vadd.f32 1.0, %v4642_v48  ;;  %7151 = vrcp.f32 %v4648_v45 }
 0xa23   :  { %v4604_v41 = vpack.c.bf16 %v4602_v13, %v4602_v13 }
 0xa24   :  { %v4646_v61 = vpack.c.bf16 %v4644_v20, %v4644_v20 }
 0xa25   :  { %v7146_v36 = vpop.eup %7145  ;;  %v4612_v24 = vunpack.c.h.bf16 %v4604_v41  ;;  %v4613_v42 = vunpack.c.l.bf16 %v4604_v41 }
 0xa26   :  { %v7148_v58 = vpop.eup %7147  ;;  %v4608_v43 = vmul.f32 %v7146_v36, %v7581_v60  ;;  %v4654_v63 = vunpack.c.h.bf16 %v4646_v61  ;;  %v4655_v3 = vunpack.c.l.bf16 %v4646_v61 }
 0xa27   :  { %v4610_v49 = vmul.f32 %v7148_v58, %v7583_v62  ;;  %7153 = vrcp.f32 %v4612_v24  ;;  %v7150_v29 = vpop.eup %7149 }
 0xa28   :  { %7155 = vrcp.f32 %v4613_v42  ;;  %v7152_v9 = vpop.eup %7151  ;;  %v4650_v52 = vmul.f32 %v7150_v29, %v7581_v60 }
 0xa29   :  { %v4611_v6 = vpack.c.bf16 %v4608_v43, %v4610_v49  ;;  %7157 = vrcp.f32 %v4654_v63  ;;  %v4652_v34 = vmul.f32 %v7152_v9, %v7583_v62 }
 0xa2a   :  { %7159 = vrcp.f32 %v4655_v3 }
 0xa2b   :  { %v4663_v40 = vunpack.c.l.bf16 %v4611_v6  ;;  %v4653_v1 = vpack.c.bf16 %v4650_v52, %v4652_v34 }
 0xa2d   :  { %v7154_v38 = vpop.eup %7153  ;;  %v4665_v47 = vmul.f32 %v4663_v40, %v4661_v59  ;;  %v4679_v37 = vunpack.c.l.bf16 %v4653_v1 }
 0xa2e   :  { %v7156_v21 = vpop.eup %7155  ;;  %v4615_v46 = vmul.f32 %v7154_v38, %v7581_v60 }
 0xa2f   :  { %v7158_v19 = vpop.eup %7157  ;;  %v4669_v27 = vadd.f32 %v4667_v31, %v4665_v47  ;;  %v4617_v56 = vmul.f32 %v7156_v21, %v7583_v62  ;;  %v4681_v8 = vsub.f32 1.0, %v4679_v37  ;;  %v4695_v9 = vmul.f32 %v4679_v37, %v8274_v11  ;;  %v4699_v11 = vld [vmem:[#allocation2 + $0x78] sm:$0xff]  ;;  %v4701_v47 = vld [vmem:[#allocation2 + $0x84] sm:$0xff] }
 0xa30   :  { %v7160_v12 = vpop.eup %7159  ;;  %v4657_v22 = vmul.f32 %v7158_v19, %v7581_v60 }
 0xa31   :  { %v4671_v5 = vpack.c.bf16 %v4669_v27, %v4669_v27  ;;  %v4618_v26 = vpack.c.bf16 %v4615_v46, %v4617_v56  ;;  %v4659_v4 = vmul.f32 %v7160_v12, %v7583_v62  ;;  %v4683_v13 = vpack.c.bf16 %v4681_v8, %v4681_v8 }
 0xa33   :  { %v4673_v0 = vunpack.c.l.bf16 %v4671_v5  ;;  %v4664_v55 = vunpack.c.l.bf16 %v4618_v26  ;;  %v4660_v53 = vpack.c.bf16 %v4657_v22, %v4659_v4  ;;  %v4685_v61 = vunpack.c.l.bf16 %v4683_v13 }
 0xa34   :  { %v4747_v5 = vunpack.c.l.bf16 %v4701_v47 }
 0xa35   :  { %7161 = vtanh.f32 %v4673_v0  ;;  %v4666_v23 = vmul.f32 %v4664_v55, %v4662_v14  ;;  %v4680_v2 = vunpack.c.l.bf16 %v4660_v53 }
 0xa37   :  { %v4670_v57 = vadd.f32 %v4668_v17, %v4666_v23  ;;  %v4682_v41 = vsub.f32 1.0, %v4680_v2  ;;  %v4696_v15 = vmul.f32 %v4680_v2, %v8276_v32  ;;  %v4784_v32 = vrot.slane %v4699_v11, 4 }
 0xa39   :  { %v4672_v7 = vpack.c.bf16 %v4670_v57, %v4670_v57  ;;  %v4684_v24 = vpack.c.bf16 %v4682_v41, %v4682_v41  ;;  %v4788_v34 = vunpack.c.l.bf16 %v4784_v32 }
 0xa3b   :  { %v7162_v45 = vpop.eup %7161  ;;  %v4674_v10 = vunpack.c.l.bf16 %v4672_v7  ;;  %v4686_v43 = vunpack.c.l.bf16 %v4684_v24 }
 0xa3c   :  { %v4677_v48 = vpack.c.bf16 %v7162_v45, %v7162_v45 }
 0xa3d   :  { %7163 = vtanh.f32 %v4674_v10 }
 0xa3e   :  { %v4687_v20 = vunpack.c.l.bf16 %v4677_v48 }
 0xa40   :  { %v4689_v36 = vmul.f32 %v4687_v20, %v4685_v61 }
 0xa42   :  { %v4691_v18 = vpack.c.bf16 %v4689_v36, %v4689_v36 }
 0xa43   :  { %v7164_v42 = vpop.eup %7163 }
 0xa44   :  { %v4678_v58 = vpack.c.bf16 %v7164_v42, %v7164_v42  ;;  %v4693_v49 = vunpack.c.l.bf16 %v4691_v18 }
 0xa46   :  { %v4688_v63 = vunpack.c.l.bf16 %v4678_v58  ;;  %v8316_v59 = vadd.f32 %v4695_v9, %v4693_v49 }
 0xa48   :  { %v4690_v3 = vmul.f32 %v4688_v63, %v4686_v43 }
 0xa4a   :  { %v4692_v29 = vpack.c.bf16 %v4690_v3, %v4690_v3 }
 0xa4c   :  { %v4694_v6 = vunpack.c.l.bf16 %v4692_v29 }
 0xa4e   :  { %v8318_v40 = vadd.f32 %v4696_v15, %v4694_v6 }
 0xa50   :  { %v4703_v52 = vpack.c.bf16 %v8318_v40, %v8316_v59 }
 0xa52   :  { %4712 = vmatmul.bf16.vlgmr.msrb.gmra.mxu3 %v4703_v52  ;;  %4726 = vmatmul.bf16.vlgmr.msra.gmra.mxu0 %v4703_v52 }
 0xa53   :  { %4740 = vmatmul.bf16.vlgmr.msra.gmra.mxu1 %v4703_v52  ;;  %5058 = vmatpush.bf16.msrb.mxu3 %v7892_v44 }
 0xa57   :  { %5059 = vmatpush.bf16.msrb.mxu3 %v7896_v16  ;;  %v4785_v16 = vrot.slane %v4701_v47, 4 }
 0xa5b   :  { %5060 = vmatpush.bf16.msrb.mxu3 %v7905_v28  ;;  %v4746_v28 = vunpack.c.l.bf16 %v4699_v11 }
 0xa5f   :  { %5061 = vmatpush.bf16.msrb.mxu3 %v7911_v30 }
 0xa63   :  { %5062 = vmatpush.bf16.msrb.mxu3 %v7917_v35  ;;  %v4789_v35 = vunpack.c.l.bf16 %v4785_v16 }
 0xa67   :  { %5063 = vmatpush.bf16.msrb.mxu3 %v7926_v39 }
 0xa6b   :  { %5064 = vmatpush.bf16.msrb.mxu3 %v7932_v25 }
 0xa6f   :  { %5065 = vmatpush.bf16.msrb.mxu3 %v7938_v51 }
 0xacf   :  { %v4727_v38 = vpop.f32.mrf.mxu0 }
 0xad0   :  { %v4790_v44 = vadd.f32 %v4788_v34, %v4727_v38  ;;  %v4741_v38 = vpop.f32.mrf.mxu1 }
 0xad2   :  { %v4792_v31 = vpack.c.bf16 %v4790_v44, %v4790_v44 }
 0xad4   :  { %v4794_v21 = vxor.u32 2147516416, %v4792_v31 }
 0xad5   :  { %v4713_v46 = vpop.f32.mrf.mxu3 }
 0xad6   :  { %v4796_v30 = vunpack.c.l.bf16 %v4794_v21  ;;  %v4748_v19 = vadd.f32 %v4746_v28, %v4713_v46  ;;  %v4700_v28 = vld [vmem:[#allocation2 + $0x80] sm:$0xf]  ;;  %v4824_v46 = vadd.f32 %v8262_v54, %v4741_v38 }
 0xad7   :  { %v4729_v27 = vpop.f32.mrf.mxu0 }
 0xad8   :  { %v4798_v39 = vmul.f32 1.442695, %v4796_v30  ;;  %v4750_v56 = vpack.c.bf16 %v4748_v19, %v4748_v19  ;;  %v4791_v25 = vadd.f32 %v4789_v35, %v4729_v27 }
 0xada   :  { %7165 = vpow2.f32 %v4798_v39  ;;  %v4752_v51 = vxor.u32 2147516416, %v4750_v56  ;;  %v4793_v12 = vpack.c.bf16 %v4791_v25, %v4791_v25  ;;  %v4830_v25 = vunpack.c.l.bf16 %v4700_v28 }
 0xadc   :  { %v4754_v1 = vunpack.c.l.bf16 %v4752_v51  ;;  %v4795_v33 = vxor.u32 2147516416, %v4793_v12 }
 0xadd   :  { %v4715_v26 = vpop.f32.mrf.mxu3 }
 0xade   :  { %v4756_v22 = vmul.f32 1.442695, %v4754_v1  ;;  %v4797_v4 = vunpack.c.l.bf16 %v4795_v33  ;;  %v4749_v50 = vadd.f32 %v4747_v5, %v4715_v26 }
 0xae0   :  { %v7166_v0 = vpop.eup %7165  ;;  %7167 = vpow2.f32 %v4756_v22  ;;  %v4800_v14 = vmul.f32 1.442695, %v4797_v4  ;;  %v4751_v55 = vpack.c.bf16 %v4749_v50, %v4749_v50  ;;  %v4743_v22 = vpop.f32.mrf.mxu1 }
 0xae1   :  { %v4802_v37 = vpack.c.bf16 %v7166_v0, %v7166_v0 }
 0xae2   :  { %7169 = vpow2.f32 %v4800_v14  ;;  %v4753_v23 = vxor.u32 2147516416, %v4751_v55  ;;  %v4702_v55 = vld [vmem:[#allocation2 + $0x8c] sm:$0xf] }
 0xae3   :  { %v4804_v17 = vunpack.c.l.bf16 %v4802_v37  ;;  %v4825_v37 = vadd.f32 %v8262_v54, %v4743_v22 }
 0xae4   :  { %v4755_v53 = vunpack.c.l.bf16 %v4753_v23 }
 0xae5   :  { %v4806_v45 = vadd.f32 1.0, %v4804_v17 }
 0xae6   :  { %v7168_v57 = vpop.eup %7167  ;;  %v4758_v8 = vmul.f32 1.442695, %v4755_v53 }
 0xae7   :  { %v4760_v7 = vpack.c.bf16 %v7168_v57, %v7168_v57  ;;  %v4808_v41 = vpack.c.bf16 %v4806_v45, %v4806_v45 }
 0xae8   :  { %v7170_v2 = vpop.eup %7169  ;;  %7171 = vpow2.f32 %v4758_v8  ;;  %v4831_v8 = vunpack.c.l.bf16 %v4702_v55 }
 0xae9   :  { %v4762_v10 = vunpack.c.l.bf16 %v4760_v7  ;;  %v4803_v48 = vpack.c.bf16 %v7170_v2, %v7170_v2  ;;  %v4810_v43 = vunpack.c.h.bf16 %v4808_v41  ;;  %v4811_v3 = vunpack.c.l.bf16 %v4808_v41 }
 0xaeb   :  { %v4764_v13 = vadd.f32 1.0, %v4762_v10  ;;  %v4805_v20 = vunpack.c.l.bf16 %v4803_v48 }
 0xaed   :  { %v4766_v61 = vpack.c.bf16 %v4764_v13, %v4764_v13  ;;  %v4807_v36 = vadd.f32 1.0, %v4805_v20 }
 0xaee   :  { %v7172_v24 = vpop.eup %7171 }
 0xaef   :  { %v4768_v42 = vunpack.c.h.bf16 %v4766_v61  ;;  %v4769_v58 = vunpack.c.l.bf16 %v4766_v61  ;;  %v4761_v18 = vpack.c.bf16 %v7172_v24, %v7172_v24  ;;  %v4809_v63 = vpack.c.bf16 %v4807_v36, %v4807_v36 }
 0xaf1   :  { %7173 = vrcp.f32 %v4768_v42  ;;  %v4763_v49 = vunpack.c.l.bf16 %v4761_v18  ;;  %v4817_v9 = vunpack.c.h.bf16 %v4809_v63  ;;  %v4818_v52 = vunpack.c.l.bf16 %v4809_v63 }
 0xaf2   :  { %7175 = vrcp.f32 %v4769_v58 }
 0xaf3   :  { %v4765_v29 = vadd.f32 1.0, %v4763_v49  ;;  %7177 = vrcp.f32 %v4810_v43 }
 0xaf4   :  { %7179 = vrcp.f32 %v4811_v3 }
 0xaf5   :  { %v4767_v6 = vpack.c.bf16 %v4765_v29, %v4765_v29  ;;  %7181 = vrcp.f32 %v4817_v9 }
 0xaf7   :  { %v7174_v15 = vpop.eup %7173  ;;  %v4775_v11 = vunpack.c.h.bf16 %v4767_v6  ;;  %v4776_v32 = vunpack.c.l.bf16 %v4767_v6 }
 0xaf8   :  { %v7176_v34 = vpop.eup %7175  ;;  %v4771_v47 = vmul.f32 %v7174_v15, %v7581_v60 }
 0xaf9   :  { %v4773_v44 = vmul.f32 %v7176_v34, %v7583_v62  ;;  %7183 = vrcp.f32 %v4775_v11  ;;  %v7178_v31 = vpop.eup %7177 }
 0xafa   :  { %7185 = vrcp.f32 %v4776_v32  ;;  %v7180_v16 = vpop.eup %7179  ;;  %v4813_v35 = vmul.f32 %v7178_v31, %v7581_v60 }
 0xafb   :  { %v4774_v21 = vpack.c.bf16 %v4771_v47, %v4773_v44  ;;  %7187 = vrcp.f32 %v4818_v52  ;;  %v7182_v19 = vpop.eup %7181  ;;  %v4815_v27 = vmul.f32 %v7180_v16, %v7583_v62  ;;  %v4862_v44 = vld [vmem:[#allocation2 + $0x90] sm:$0xff] }
 0xafc   :  { %v4820_v0 = vmul.f32 %v7182_v19, %v7581_v60  ;;  %v4947_v31 = vrot.slane %v4862_v44, 4  ;;  %v4909_v16 = vunpack.c.l.bf16 %v4862_v44 }
 0xafd   :  { %v4826_v30 = vunpack.c.l.bf16 %v4774_v21  ;;  %v4816_v26 = vpack.c.bf16 %v4813_v35, %v4815_v27 }
 0xafe   :  { %v4951_v21 = vunpack.c.l.bf16 %v4947_v31 }
 0xaff   :  { %v7184_v39 = vpop.eup %7183  ;;  %v4828_v56 = vmul.f32 %v4826_v30, %v4824_v46  ;;  %v4842_v53 = vunpack.c.l.bf16 %v4816_v26  ;;  %v4864_v30 = vld [vmem:[#allocation2 + $0x9c] sm:$0xff] }
 0xb00   :  { %v7186_v51 = vpop.eup %7185  ;;  %v4778_v12 = vmul.f32 %v7184_v39, %v7581_v60  ;;  %v4948_v27 = vrot.slane %v4864_v30, 4 }
 0xb01   :  { %v7188_v1 = vpop.eup %7187  ;;  %v4832_v33 = vadd.f32 %v4830_v25, %v4828_v56  ;;  %v4780_v5 = vmul.f32 %v7186_v51, %v7583_v62  ;;  %v4844_v45 = vsub.f32 1.0, %v4842_v53  ;;  %v4858_v11 = vmul.f32 %v4842_v53, %v8316_v59 }
 0xb02   :  { %v4822_v14 = vmul.f32 %v7188_v1, %v7583_v62  ;;  %v4952_v1 = vunpack.c.l.bf16 %v4948_v27 }
 0xb03   :  { %v4781_v4 = vpack.c.bf16 %v4778_v12, %v4780_v5  ;;  %v4834_v50 = vpack.c.bf16 %v4832_v33, %v4832_v33  ;;  %v4846_v61 = vpack.c.bf16 %v4844_v45, %v4844_v45  ;;  %v4910_v12 = vunpack.c.l.bf16 %v4864_v30 }
 0xb04   :  { %v4823_v7 = vpack.c.bf16 %v4820_v0, %v4822_v14 }
 0xb05   :  { %v4827_v23 = vunpack.c.l.bf16 %v4781_v4  ;;  %v4836_v17 = vunpack.c.l.bf16 %v4834_v50  ;;  %v4848_v42 = vunpack.c.l.bf16 %v4846_v61 }
 0xb06   :  { %v4843_v48 = vunpack.c.l.bf16 %v4823_v7 }
 0xb07   :  { %v4829_v57 = vmul.f32 %v4827_v23, %v4825_v37  ;;  %7189 = vtanh.f32 %v4836_v17 }
 0xb08   :  { %v4845_v36 = vsub.f32 1.0, %v4843_v48  ;;  %v4859_v32 = vmul.f32 %v4843_v48, %v8318_v40 }
 0xb09   :  { %v4833_v2 = vadd.f32 %v4831_v8, %v4829_v57 }
 0xb0a   :  { %v4847_v58 = vpack.c.bf16 %v4845_v36, %v4845_v36 }
 0xb0b   :  { %v4835_v10 = vpack.c.bf16 %v4833_v2, %v4833_v2 }
 0xb0c   :  { %v4849_v3 = vunpack.c.l.bf16 %v4847_v58 }
 0xb0d   :  { %v7190_v13 = vpop.eup %7189  ;;  %v4837_v20 = vunpack.c.l.bf16 %v4835_v10 }
 0xb0e   :  { %v4840_v41 = vpack.c.bf16 %v7190_v13, %v7190_v13 }
 0xb0f   :  { %7191 = vtanh.f32 %v4837_v20 }
 0xb10   :  { %v4850_v24 = vunpack.c.l.bf16 %v4840_v41 }
 0xb12   :  { %v4852_v18 = vmul.f32 %v4850_v24, %v4848_v42 }
 0xb14   :  { %v4854_v29 = vpack.c.bf16 %v4852_v18, %v4852_v18 }
 0xb15   :  { %v7192_v43 = vpop.eup %7191 }
 0xb16   :  { %v4841_v63 = vpack.c.bf16 %v7192_v43, %v7192_v43  ;;  %v4856_v15 = vunpack.c.l.bf16 %v4854_v29 }
 0xb18   :  { %v4851_v49 = vunpack.c.l.bf16 %v4841_v63  ;;  %v8342_v34 = vadd.f32 %v4858_v11, %v4856_v15 }
 0xb1a   :  { %v4853_v9 = vmul.f32 %v4851_v49, %v4849_v3 }
 0xb1c   :  { %v4855_v6 = vpack.c.bf16 %v4853_v9, %v4853_v9 }
 0xb1e   :  { %v4857_v52 = vunpack.c.l.bf16 %v4855_v6 }
 0xb20   :  { %v8344_v38 = vadd.f32 %v4859_v32, %v4857_v52 }
 0xb22   :  { %v4866_v47 = vpack.c.bf16 %v8344_v38, %v8342_v34 }
 0xb24   :  { %4875 = vmatmul.bf16.vlgmr.msra.gmra.mxu2 %v4866_v47  ;;  %4889 = vmatmul.bf16.vlgmr.msra.gmra.mxu3 %v4866_v47 }
 0xb25   :  { %4903 = vmatmul.bf16.vlgmr.msrb.gmra.mxu0 %v4866_v47 }
 0xba2   :  { %v4904_v31 = vpop.f32.mrf.mxu0 }
 0xba7   :  { %v4876_v28 = vpop.f32.mrf.mxu2  ;;  %v4890_v46 = vpop.f32.mrf.mxu3 }
 0xba8   :  { %v4911_v59 = vadd.f32 %v4909_v16, %v4876_v28  ;;  %v4953_v19 = vadd.f32 %v4951_v21, %v4890_v46 }
 0xbaa   :  { %v4913_v40 = vpack.c.bf16 %v4911_v59, %v4911_v59  ;;  %v4955_v35 = vpack.c.bf16 %v4953_v19, %v4953_v19 }
 0xbac   :  { %v4915_v39 = vxor.u32 2147516416, %v4913_v40  ;;  %v4957_v56 = vxor.u32 2147516416, %v4955_v35  ;;  %v4863_v40 = vld [vmem:[#allocation2 + $0x98] sm:$0xf]  ;;  %v4987_v35 = vadd.f32 %v8262_v54, %v4904_v31 }
 0xbae   :  { %v4917_v25 = vunpack.c.l.bf16 %v4915_v39  ;;  %v4959_v51 = vunpack.c.l.bf16 %v4957_v56 }
 0xbaf   :  { %v4878_v33 = vpop.f32.mrf.mxu2  ;;  %v4892_v5 = vpop.f32.mrf.mxu3 }
 0xbb0   :  { %v4919_v26 = vmul.f32 1.442695, %v4917_v25  ;;  %v4961_v22 = vmul.f32 1.442695, %v4959_v51  ;;  %v4912_v4 = vadd.f32 %v4910_v12, %v4878_v33  ;;  %v4954_v50 = vadd.f32 %v4952_v1, %v4892_v5 }
 0xbb1   :  { %v4993_v12 = vunpack.c.l.bf16 %v4863_v40 }
 0xbb2   :  { %7193 = vpow2.f32 %v4919_v26  ;;  %v4914_v0 = vpack.c.bf16 %v4912_v4, %v4912_v4  ;;  %v4956_v14 = vpack.c.bf16 %v4954_v50, %v4954_v50 }
 0xbb3   :  { %7195 = vpow2.f32 %v4961_v22 }
 0xbb4   :  { %v4916_v55 = vxor.u32 2147516416, %v4914_v0  ;;  %v4958_v37 = vxor.u32 2147516416, %v4956_v14  ;;  %v4906_v0 = vpop.f32.mrf.mxu0 }
 0xbb6   :  { %v4918_v23 = vunpack.c.l.bf16 %v4916_v55  ;;  %v4960_v17 = vunpack.c.l.bf16 %v4958_v37  ;;  %v4865_v37 = vld [vmem:[#allocation2 + $0xa4] sm:$0xf] }
 0xbb8   :  { %v7194_v53 = vpop.eup %7193  ;;  %v4921_v57 = vmul.f32 1.442695, %v4918_v23  ;;  %v4963_v8 = vmul.f32 1.442695, %v4960_v17 }
 0xbb9   :  { %v7196_v7 = vpop.eup %7195  ;;  %v4923_v2 = vpack.c.bf16 %v7194_v53, %v7194_v53  ;;  %v4988_v53 = vadd.f32 %v8262_v54, %v4906_v0 }
 0xbba   :  { %v4965_v45 = vpack.c.bf16 %v7196_v7, %v7196_v7  ;;  %7197 = vpow2.f32 %v4921_v57 }
 0xbbb   :  { %v4925_v10 = vunpack.c.l.bf16 %v4923_v2  ;;  %7199 = vpow2.f32 %v4963_v8 }
 0xbbc   :  { %v4967_v48 = vunpack.c.l.bf16 %v4965_v45  ;;  %v4994_v45 = vunpack.c.l.bf16 %v4865_v37 }
 0xbbd   :  { %v4927_v13 = vadd.f32 1.0, %v4925_v10 }
 0xbbe   :  { %v4969_v20 = vadd.f32 1.0, %v4967_v48 }
 0xbbf   :  { %v4929_v41 = vpack.c.bf16 %v4927_v13, %v4927_v13 }
 0xbc0   :  { %v7198_v61 = vpop.eup %7197  ;;  %v4971_v36 = vpack.c.bf16 %v4969_v20, %v4969_v20 }
 0xbc1   :  { %v7200_v24 = vpop.eup %7199  ;;  %v4931_v42 = vunpack.c.h.bf16 %v4929_v41  ;;  %v4932_v58 = vunpack.c.l.bf16 %v4929_v41  ;;  %v4924_v18 = vpack.c.bf16 %v7198_v61, %v7198_v61 }
 0xbc2   :  { %v4973_v43 = vunpack.c.h.bf16 %v4971_v36  ;;  %v4966_v63 = vpack.c.bf16 %v7200_v24, %v7200_v24  ;;  %v4974_v3 = vunpack.c.l.bf16 %v4971_v36 }
 0xbc3   :  { %7201 = vrcp.f32 %v4931_v42  ;;  %v4926_v49 = vunpack.c.l.bf16 %v4924_v18 }
 0xbc4   :  { %7203 = vrcp.f32 %v4932_v58  ;;  %v4968_v29 = vunpack.c.l.bf16 %v4966_v63 }
 0xbc5   :  { %v4928_v9 = vadd.f32 1.0, %v4926_v49  ;;  %7205 = vrcp.f32 %v4973_v43 }
 0xbc6   :  { %v4970_v6 = vadd.f32 1.0, %v4968_v29  ;;  %7207 = vrcp.f32 %v4974_v3 }
 0xbc7   :  { %v4930_v15 = vpack.c.bf16 %v4928_v9, %v4928_v9 }
 0xbc8   :  { %v4972_v52 = vpack.c.bf16 %v4970_v6, %v4970_v6 }
 0xbc9   :  { %v7202_v11 = vpop.eup %7201  ;;  %v4938_v32 = vunpack.c.h.bf16 %v4930_v15  ;;  %v4939_v47 = vunpack.c.l.bf16 %v4930_v15 }
 0xbca   :  { %v7204_v44 = vpop.eup %7203  ;;  %v4934_v16 = vmul.f32 %v7202_v11, %v7581_v60  ;;  %v4980_v21 = vunpack.c.h.bf16 %v4972_v52  ;;  %v4981_v28 = vunpack.c.l.bf16 %v4972_v52 }
 0xbcb   :  { %v4936_v46 = vmul.f32 %v7204_v44, %v7583_v62  ;;  %7209 = vrcp.f32 %v4938_v32  ;;  %v7206_v30 = vpop.eup %7205 }
 0xbcc   :  { %7211 = vrcp.f32 %v4939_v47  ;;  %v7208_v59 = vpop.eup %7207  ;;  %v4976_v39 = vmul.f32 %v7206_v30, %v7581_v60 }
 0xbcd   :  { %v4937_v19 = vpack.c.bf16 %v4934_v16, %v4936_v46  ;;  %7213 = vrcp.f32 %v4980_v21  ;;  %v4978_v56 = vmul.f32 %v7208_v59, %v7583_v62 }
 0xbce   :  { %7215 = vrcp.f32 %v4981_v28  ;;  %v5025_v28 = vld [vmem:[#allocation2 + $0xa8] sm:$0xff] }
 0xbcf   :  { %v4989_v27 = vunpack.c.l.bf16 %v4937_v19  ;;  %v4979_v50 = vpack.c.bf16 %v4976_v39, %v4978_v56  ;;  %v5072_v46 = vunpack.c.l.bf16 %v5025_v28  ;;  %v5110_v19 = vrot.slane %v5025_v28, 4 }
 0xbd1   :  { %v7210_v25 = vpop.eup %7209  ;;  %v4991_v51 = vmul.f32 %v4989_v27, %v4987_v35  ;;  %v5005_v7 = vunpack.c.l.bf16 %v4979_v50  ;;  %v5027_v35 = vld [vmem:[#allocation2 + $0xb4] sm:$0xff]  ;;  %v5114_v27 = vunpack.c.l.bf16 %v5110_v19 }
 0xbd2   :  { %v7212_v1 = vpop.eup %7211  ;;  %v4941_v33 = vmul.f32 %v7210_v25, %v7581_v60  ;;  %v5073_v25 = vunpack.c.l.bf16 %v5027_v35 }
 0xbd3   :  { %v7214_v5 = vpop.eup %7213  ;;  %v4995_v26 = vadd.f32 %v4993_v12, %v4991_v51  ;;  %v4943_v22 = vmul.f32 %v7212_v1, %v7583_v62  ;;  %v5007_v13 = vsub.f32 1.0, %v5005_v7  ;;  %v5021_v47 = vmul.f32 %v5005_v7, %v8342_v34 }
 0xbd4   :  { %v7216_v4 = vpop.eup %7215  ;;  %v4983_v23 = vmul.f32 %v7214_v5, %v7581_v60  ;;  %v5111_v5 = vrot.slane %v5027_v35, 4 }
 0xbd5   :  { %v4944_v14 = vpack.c.bf16 %v4941_v33, %v4943_v22  ;;  %v4997_v55 = vpack.c.bf16 %v4995_v26, %v4995_v26  ;;  %v4985_v17 = vmul.f32 %v7216_v4, %v7583_v62  ;;  %v5009_v42 = vpack.c.bf16 %v5007_v13, %v5007_v13 }
 0xbd6   :  { %v5115_v0 = vunpack.c.l.bf16 %v5111_v5 }
 0xbd7   :  { %v4990_v57 = vunpack.c.l.bf16 %v4944_v14  ;;  %v4999_v8 = vunpack.c.l.bf16 %v4997_v55  ;;  %v4986_v10 = vpack.c.bf16 %v4983_v23, %v4985_v17  ;;  %v5011_v43 = vunpack.c.l.bf16 %v5009_v42  ;;  %v6741_v17 = vld [vmem:[#allocation15 + $0x38] sm:$0xff] }
 0xbd8   :  { %5257 = vmatpush.bf16.msra.mxu0 %v6741_v17 }
 0xbd9   :  { %v4992_v2 = vmul.f32 %v4990_v57, %v4988_v53  ;;  %7217 = vtanh.f32 %v4999_v8  ;;  %v5006_v41 = vunpack.c.l.bf16 %v4986_v10 }
 0xbdb   :  { %v4996_v48 = vadd.f32 %v4994_v45, %v4992_v2  ;;  %v5008_v58 = vsub.f32 1.0, %v5006_v41  ;;  %v5022_v44 = vmul.f32 %v5006_v41, %v8344_v38  ;;  %v6740_v45 = vld [vmem:[#allocation15 + $0x30] sm:$0xff] }
 0xbdc   :  { %5258 = vmatpush.bf16.msra.mxu0 %v6740_v45  ;;  %v5028_v45 = vld [vmem:[#allocation2 + $0xbc] sm:$0xf] }
 0xbdd   :  { %v4998_v20 = vpack.c.bf16 %v4996_v48, %v4996_v48  ;;  %v5010_v54 = vpack.c.bf16 %v5008_v58, %v5008_v58 }
 0xbdf   :  { %v7218_v61 = vpop.eup %7217  ;;  %v5000_v36 = vunpack.c.l.bf16 %v4998_v20  ;;  %v5012_v29 = vunpack.c.l.bf16 %v5010_v54 }
 0xbe0   :  { %v5003_v24 = vpack.c.bf16 %v7218_v61, %v7218_v61  ;;  %v6739_v61 = vld [vmem:[#allocation15 + $0x28] sm:$0xff] }
 0xbe1   :  { %7219 = vtanh.f32 %v5000_v36  ;;  %5259 = vmatpush.bf16.msra.mxu0 %v6739_v61 }
 0xbe2   :  { %v5013_v18 = vunpack.c.l.bf16 %v5003_v24 }
 0xbe4   :  { %v5015_v63 = vmul.f32 %v5013_v18, %v5011_v43 }
 0xbe6   :  { %v5017_v6 = vpack.c.bf16 %v5015_v63, %v5015_v63  ;;  %v6738_v63 = vld [vmem:[#allocation15 + $0x20] sm:$0xff] }
 0xbe7   :  { %v7220_v3 = vpop.eup %7219  ;;  %5260 = vmatpush.bf16.msra.mxu0 %v6738_v63 }
 0xbe8   :  { %v5004_v49 = vpack.c.bf16 %v7220_v3, %v7220_v3  ;;  %v5019_v11 = vunpack.c.l.bf16 %v5017_v6 }
 0xbea   :  { %v5014_v9 = vunpack.c.l.bf16 %v5004_v49  ;;  %v8360_v31 = vadd.f32 %v5021_v47, %v5019_v11 }
 0xbec   :  { %v5016_v15 = vmul.f32 %v5014_v9, %v5012_v29 }
 0xbee   :  { %v5018_v52 = vpack.c.bf16 %v5016_v15, %v5016_v15  ;;  %v6737_v15 = vld [vmem:[#allocation15 + $0x18] sm:$0xff] }
 0xbef   :  { %5261 = vmatpush.bf16.msra.mxu0 %v6737_v15 }
 0xbf0   :  { %v5020_v32 = vunpack.c.l.bf16 %v5018_v52 }
 0xbf2   :  { %v8362_v16 = vadd.f32 %v5022_v44, %v5020_v32 }
 0xbf4   :  { %v5029_v21 = vpack.c.bf16 %v8362_v16, %v8360_v31 }
 0xbf6   :  { %5038 = vmatmul.bf16.vlgmr.msrb.gmra.mxu1 %v5029_v21  ;;  %5052 = vmatmul.bf16.vlgmr.msrb.gmra.mxu2 %v5029_v21 }
 0xbf7   :  { %5066 = vmatmul.bf16.vlgmr.msrb.gmra.mxu3 %v5029_v21 }
 0xc73   :  { %v5039_v30 = vpop.f32.mrf.mxu1 }
 0xc74   :  { %v5074_v59 = vadd.f32 %v5072_v46, %v5039_v30 }
 0xc76   :  { %v5076_v40 = vpack.c.bf16 %v5074_v59, %v5074_v59 }
 0xc78   :  { %v5078_v34 = vxor.u32 2147516416, %v5076_v40  ;;  %v6736_v40 = vld [vmem:[#allocation15 + $0x10] sm:$0xff] }
 0xc79   :  { %v5053_v38 = vpop.f32.mrf.mxu2  ;;  %5262 = vmatpush.bf16.msra.mxu0 %v6736_v40 }
 0xc7a   :  { %v5080_v39 = vunpack.c.l.bf16 %v5078_v34  ;;  %v5116_v56 = vadd.f32 %v5114_v27, %v5053_v38  ;;  %v5067_v59 = vpop.f32.mrf.mxu3 }
 0xc7b   :  { %v5041_v51 = vpop.f32.mrf.mxu1 }
 0xc7c   :  { %v5082_v12 = vmul.f32 1.442695, %v5080_v39  ;;  %v5118_v1 = vpack.c.bf16 %v5116_v56, %v5116_v56  ;;  %v5075_v33 = vadd.f32 %v5073_v25, %v5041_v51  ;;  %v5026_v39 = vld [vmem:[#allocation2 + $0xb0] sm:$0xf]  ;;  %v7254_v51 = vld [vmem:[%s8393_s8] ss:$0 sm:$0xff] }
 0xc7d   :  { %v6735_v56 = vld [vmem:[#allocation15 + $0x8] sm:$0xff] }
 0xc7e   :  { %7221 = vpow2.f32 %v5082_v12  ;;  %v5120_v26 = vxor.u32 2147516416, %v5118_v1  ;;  %v5077_v22 = vpack.c.bf16 %v5075_v33, %v5075_v33  ;;  %v5150_v12 = vadd.f32 %v7254_v51, %v5067_v59  ;;  %5263 = vmatpush.bf16.msra.mxu0 %v6735_v56 }
 0xc80   :  { %v5122_v4 = vunpack.c.l.bf16 %v5120_v26  ;;  %v5079_v50 = vxor.u32 2147516416, %v5077_v22 }
 0xc81   :  { %v5055_v14 = vpop.f32.mrf.mxu2 }
 0xc82   :  { %v5124_v55 = vmul.f32 1.442695, %v5122_v4  ;;  %v5081_v37 = vunpack.c.l.bf16 %v5079_v50  ;;  %v5117_v23 = vadd.f32 %v5115_v0, %v5055_v14  ;;  %v5156_v14 = vunpack.c.l.bf16 %v5026_v39  ;;  %v6800_v39 = vld [vmem:[%s8395_s10] ss:$0 sm:$0xff] }
 0xc84   :  { %v7222_v53 = vpop.eup %7221  ;;  %7223 = vpow2.f32 %v5124_v55  ;;  %v5084_v57 = vmul.f32 1.442695, %v5081_v37  ;;  %v5119_v8 = vpack.c.bf16 %v5117_v23, %v5117_v23  ;;  %v6734_v23 = vld [vmem:[#allocation15] sm:$0xff] }
 0xc85   :  { %v5086_v7 = vpack.c.bf16 %v7222_v53, %v7222_v53  ;;  %5264 = vmatpush.bf16.msra.mxu0 %v6734_v23 }
 0xc86   :  { %7225 = vpow2.f32 %v5084_v57  ;;  %v5121_v2 = vxor.u32 2147516416, %v5119_v8  ;;  %v5069_v8 = vpop.f32.mrf.mxu3 }
 0xc87   :  { %v5088_v10 = vunpack.c.l.bf16 %v5086_v7 }
 0xc88   :  { %v5123_v48 = vunpack.c.l.bf16 %v5121_v2 }
 0xc89   :  { %v5090_v13 = vadd.f32 1.0, %v5088_v10 }
 0xc8a   :  { %v7224_v20 = vpop.eup %7223  ;;  %v5126_v41 = vmul.f32 1.442695, %v5123_v48 }
 0xc8b   :  { %v5092_v36 = vpack.c.bf16 %v5090_v13, %v5090_v13  ;;  %v5128_v24 = vpack.c.bf16 %v7224_v20, %v7224_v20  ;;  %v5151_v13 = vadd.f32 %v7254_v51, %v5069_v8 }
 0xc8c   :  { %v7226_v42 = vpop.eup %7225  ;;  %7227 = vpow2.f32 %v5126_v41 }
 0xc8d   :  { %v5094_v58 = vunpack.c.h.bf16 %v5092_v36  ;;  %v5095_v18 = vunpack.c.l.bf16 %v5092_v36  ;;  %v5130_v43 = vunpack.c.l.bf16 %v5128_v24  ;;  %v5087_v54 = vpack.c.bf16 %v7226_v42, %v7226_v42 }
 0xc8f   :  { %7229 = vrcp.f32 %v5094_v58  ;;  %v5132_v3 = vadd.f32 1.0, %v5130_v43  ;;  %v5089_v49 = vunpack.c.l.bf16 %v5087_v54  ;;  %v5157_v58 = vunpack.c.l.bf16 %v5028_v45 }
 0xc90   :  { %7231 = vrcp.f32 %v5095_v18 }
 0xc91   :  { %v5134_v29 = vpack.c.bf16 %v5132_v3, %v5132_v3  ;;  %v5091_v9 = vadd.f32 1.0, %v5089_v49 }
 0xc92   :  { %v7228_v6 = vpop.eup %7227 }
 0xc93   :  { %v5136_v52 = vunpack.c.h.bf16 %v5134_v29  ;;  %v5137_v11 = vunpack.c.l.bf16 %v5134_v29  ;;  %v5093_v32 = vpack.c.bf16 %v5091_v9, %v5091_v9  ;;  %v5129_v47 = vpack.c.bf16 %v7228_v6, %v7228_v6 }
 0xc95   :  { %v7230_v44 = vpop.eup %7229  ;;  %7233 = vrcp.f32 %v5136_v52  ;;  %v5101_v21 = vunpack.c.h.bf16 %v5093_v32  ;;  %v5102_v28 = vunpack.c.l.bf16 %v5093_v32  ;;  %v5131_v46 = vunpack.c.l.bf16 %v5129_v47 }
 0xc96   :  { %v7232_v30 = vpop.eup %7231  ;;  %7235 = vrcp.f32 %v5137_v11  ;;  %v5097_v19 = vmul.f32 %v7230_v44, %v7581_v60 }
 0xc97   :  { %v5099_v35 = vmul.f32 %v7232_v30, %v7583_v62  ;;  %7237 = vrcp.f32 %v5101_v21  ;;  %v5133_v34 = vadd.f32 1.0, %v5131_v46 }
 0xc98   :  { %7239 = vrcp.f32 %v5102_v28 }
 0xc99   :  { %v5100_v27 = vpack.c.bf16 %v5097_v19, %v5099_v35  ;;  %v5135_v38 = vpack.c.bf16 %v5133_v34, %v5133_v34 }
 0xc9b   :  { %v7234_v25 = vpop.eup %7233  ;;  %v5152_v1 = vunpack.c.l.bf16 %v5100_v27  ;;  %v5143_v33 = vunpack.c.h.bf16 %v5135_v38  ;;  %v5144_v5 = vunpack.c.l.bf16 %v5135_v38 }
 0xc9c   :  { %v7236_v26 = vpop.eup %7235  ;;  %v5139_v22 = vmul.f32 %v7234_v25, %v7581_v60 }
 0xc9d   :  { %v7238_v4 = vpop.eup %7237  ;;  %v5141_v50 = vmul.f32 %v7236_v26, %v7583_v62  ;;  %v5154_v0 = vmul.f32 %v5152_v1, %v5150_v12  ;;  %7241 = vrcp.f32 %v5143_v33 }
 0xc9e   :  { %v7240_v55 = vpop.eup %7239  ;;  %7243 = vrcp.f32 %v5144_v5  ;;  %v5104_v37 = vmul.f32 %v7238_v4, %v7581_v60 }
 0xc9f   :  { %v5158_v17 = vadd.f32 %v5156_v14, %v5154_v0  ;;  %v5106_v53 = vmul.f32 %v7240_v55, %v7583_v62  ;;  %v5142_v57 = vpack.c.bf16 %v5139_v22, %v5141_v50 }
 0xca1   :  { %v5160_v7 = vpack.c.bf16 %v5158_v17, %v5158_v17  ;;  %v5107_v2 = vpack.c.bf16 %v5104_v37, %v5106_v53  ;;  %v5168_v61 = vunpack.c.l.bf16 %v5142_v57 }
 0xca3   :  { %v7242_v10 = vpop.eup %7241  ;;  %v5162_v48 = vunpack.c.l.bf16 %v5160_v7  ;;  %v5153_v20 = vunpack.c.l.bf16 %v5107_v2  ;;  %v5170_v54 = vsub.f32 1.0, %v5168_v61  ;;  %v5184_v19 = vmul.f32 %v5168_v61, %v8360_v31 }
 0xca4   :  { %v7244_v41 = vpop.eup %7243  ;;  %v5146_v36 = vmul.f32 %v7242_v10, %v7581_v60 }
 0xca5   :  { %7245 = vtanh.f32 %v5162_v48  ;;  %v5148_v24 = vmul.f32 %v7244_v41, %v7583_v62  ;;  %v5155_v42 = vmul.f32 %v5153_v20, %v5151_v13  ;;  %v5172_v6 = vpack.c.bf16 %v5170_v54, %v5170_v54 }
 0xca7   :  { %v5149_v18 = vpack.c.bf16 %v5146_v36, %v5148_v24  ;;  %v5159_v43 = vadd.f32 %v5157_v58, %v5155_v42  ;;  %v5174_v11 = vunpack.c.l.bf16 %v5172_v6 }
 0xca9   :  { %v5161_v63 = vpack.c.bf16 %v5159_v43, %v5159_v43  ;;  %v5169_v3 = vunpack.c.l.bf16 %v5149_v18 }
 0xcab   :  { %v7246_v49 = vpop.eup %7245  ;;  %v5163_v29 = vunpack.c.l.bf16 %v5161_v63  ;;  %v5171_v52 = vsub.f32 1.0, %v5169_v3  ;;  %v5185_v35 = vmul.f32 %v5169_v3, %v8362_v16 }
 0xcac   :  { %v5166_v9 = vpack.c.bf16 %v7246_v49, %v7246_v49 }
 0xcad   :  { %7247 = vtanh.f32 %v5163_v29  ;;  %v5173_v60 = vpack.c.bf16 %v5171_v52, %v5171_v52 }
 0xcae   :  { %v5176_v15 = vunpack.c.l.bf16 %v5166_v9 }
 0xcaf   :  { %v5175_v21 = vunpack.c.l.bf16 %v5173_v60 }
 0xcb0   :  { %v5178_v32 = vmul.f32 %v5176_v15, %v5174_v11 }
 0xcb2   :  { %v5180_v62 = vpack.c.bf16 %v5178_v32, %v5178_v32 }
 0xcb3   :  { %v7248_v47 = vpop.eup %7247 }
 0xcb4   :  { %v5167_v44 = vpack.c.bf16 %v7248_v47, %v7248_v47  ;;  %v5182_v30 = vunpack.c.l.bf16 %v5180_v62 }
 0xcb6   :  { %v5177_v28 = vunpack.c.l.bf16 %v5167_v44  ;;  %v5186_v34 = vadd.f32 %v5184_v19, %v5182_v30 }
 0xcb8   :  { %v5179_v46 = vmul.f32 %v5177_v28, %v5175_v21 }
 0xcba   :  { %v5181_v59 = vpack.c.bf16 %v5179_v46, %v5179_v46 }
 0xcbc   :  { %v5183_v40 = vunpack.c.l.bf16 %v5181_v59 }
 0xcbe   :  { %v5187_v27 = vadd.f32 %v5185_v35, %v5183_v40 }
 0xcc0   :  { %v5188_v38 = vpack.c.bf16 %v5187_v27, %v5186_v34 }
 0xcc2   :  { %5265 = vmatmul.bf16.vlgmr.msra.gmra.mxu0 %v5188_v38 }
 0xd3f   :  { %v5266_v56 = vpop.f32.mrf.mxu0 }
 0xd40   :  { %v5267_v25 = vadd.f32 %v6800_v39, %v5266_v56 }
 0xd42   :  { %5271 = vst [vmem:[#allocation16] sm:$0xff] %v5267_v25 }
 0xd47   :  { %v5268_v31 = vpop.f32.mrf.mxu0 }
 0xd48   :  { %v5269_v16 = vadd.f32 %v6800_v39, %v5268_v31 }
 0xd4a   :  { %5272 = vst [vmem:[#allocation16 + $0x8] sm:$0xff] %v5269_v16 }
 0xd4b   :  { %5285 = dma.vmem_to_hbm [thread:$0]  %s5278_s23, 256, %s5280_s28, [#allocation6], %s7471_s29, %s7471_s29, %s7472_s1  }
 0xd4c   :  { %7455 = dma.done.wait [#allocation6], 256  }
 0xd4d   :  { %7456 = vsyncadd [#allocation6], 4294967040 }
 0xd4e   :  { %5290 = vsyncpa [#allocation5], 1 }
 0xd4f   :  { %5291 = vsyncpa [#allocation8], 1 }
 0xd50   :  { %5292 = vsyncpa [#allocation11], 1 }
 0xd51   :  { %5293 = vsyncpa [#allocation14], 1 }
 0xd52   :  { %5294 = vsyncpa [#allocation6], 1 }

</bundles_post_ra>
